<compile_context>
chip_gen: v6e
topology: v6e:2x2x1
jax: 0.10.0
libtpu: 0.0.40
codegen_flags: <defaults>
</compile_context>

<pallas_src>
import functools

import numpy as np
import jax
import jax.numpy as jnp
from jax import lax
from jax.experimental import pallas as pl
from jax.experimental.pallas import tpu as pltpu

_LANE = 128   # padded width of one input-image row vector (32*3 -> 128)
_HALF = 256   # padded width of one pooled feature row (pw*OC <= 256)


# ---------------------------------------------------------------------------
# Host-side weight pre-layout (done ONCE, outside the jitted forward).
# ---------------------------------------------------------------------------
def _conv_row_matmul_weight(w_oihw, w_in, in_width, pooled):
    """Per-row-tap matmul weights for a VALID stride-1 conv (PyTorch OIHW).

    Input rows are NHWC-flattened (index w*C + c, zero padded to `in_width`).
    Output columns are (ow, oc) pairs; if `pooled`, they are permuted to
    [even-ow block | odd-ow block] (each padded to _HALF) so the W-direction
    2x2 max-pool becomes max(left half, right half).
    """
    oc_n, c_n, kh, kw_n = w_oihw.shape
    ow_n = w_in - kw_n + 1
    out_cols = 2 * _HALF if pooled else ow_n * oc_n
    T = np.zeros((kh, in_width, out_cols), np.float32)
    w_np = np.asarray(w_oihw, np.float32)
    for i in range(kh):
        for ow in range(ow_n):
            if pooled:
                base = (ow // 2) * oc_n + (ow % 2) * _HALF
            else:
                base = ow * oc_n
            for kw in range(kw_n):
                wcol = ow + kw
                T[i, wcol * c_n:(wcol + 1) * c_n, base:base + oc_n] = (
                    w_np[:, :, i, kw].T)
    return T


def prepare_params(params):
    """Pre-flatten / pre-permute / pad all weights once (plain numpy)."""
    t1 = _conv_row_matmul_weight(params["conv1"], w_in=32, in_width=_LANE, pooled=True)
    t2 = _conv_row_matmul_weight(params["conv2"], w_in=15, in_width=_HALF, pooled=True)
    t3 = _conv_row_matmul_weight(params["conv3"], w_in=6, in_width=_HALF, pooled=False)

    # fc1: torch flatten index = c*16 + h*4 + w ; kernel's conv3 output row h
    # has columns w*64 + c  ->  build one (256, 512) block per spatial row h.
    fc1 = np.asarray(params["fc1"], np.float32)            # (500, 1024)
    a = fc1.reshape(500, 64, 4, 4).transpose(2, 3, 1, 0)   # (h, w, c, n)
    w1 = np.zeros((4, 256, 512), np.float32)
    w1[:, :, :500] = a.reshape(4, 256, 500)

    fc2 = np.asarray(params["fc2"], np.float32)             # (10, 500)
    w2 = np.zeros((512, 10), np.float32)
    w2[:500, :] = fc2.T

    return {
        "t1": jnp.asarray(t1), "t2": jnp.asarray(t2), "t3": jnp.asarray(t3),
        "w1": jnp.asarray(w1), "w2": jnp.asarray(w2),
    }


# ---------------------------------------------------------------------------
# Fused Pallas kernel
# ---------------------------------------------------------------------------
def _pool_select_mats(ph, oh):
    """Exact 0/1 matrices selecting even / odd rows (built from 2-D iota)."""
    r = lax.broadcasted_iota(jnp.int32, (ph, oh), 0)
    c = lax.broadcasted_iota(jnp.int32, (ph, oh), 1)
    sel_even = jnp.where(c == 2 * r, 1.0, 0.0).astype(jnp.float32)
    sel_odd = jnp.where(c == 2 * r + 1, 1.0, 0.0).astype(jnp.float32)
    return sel_even, sel_odd


def _lenet_kernel(x_ref, t1_ref, t2_ref, t3_ref, w1_ref, w2_ref, o_ref,
                  act2_ref, act3_ref, *, batch):
    def dot(a, b):
        return jnp.dot(a, b, preferred_element_type=jnp.float32)

    def conv_rows(read_row_slice, t_ref, kh, oh):
        acc = None
        for i in range(kh):
            term = dot(read_row_slice(i, oh), t_ref[i])
            acc = term if acc is None else acc + term
        return acc

    def pool_relu(y, oh, ph):
        # W-direction 2x2 pool: columns are [even-ow | odd-ow] halves.
        yw = jnp.maximum(y[:, :_HALF], y[:, _HALF:])
        # H-direction 2x2 pool: exact 0/1 selection matmuls + elementwise max.
        sel_even, sel_odd = _pool_select_mats(ph, oh)
        pooled = jnp.maximum(dot(sel_even, yw), dot(sel_odd, yw))
        return jnp.maximum(pooled, 0.0)   # relu(max) == max(relu)

    for b in range(batch):
        # ---- conv1 (3x3, 3->16) + ReLU + 2x2 maxpool ---------------------
        y = conv_rows(lambda i, oh: x_ref[b, pl.ds(i, oh), :], t1_ref, 3, 30)
        act2_ref[...] = pool_relu(y, 30, 15)                     # (15, 256)

        # ---- conv2 (4x4, 16->32) + ReLU + 2x2 maxpool --------------------
        y = conv_rows(lambda i, oh: act2_ref[pl.ds(i, oh), :], t2_ref, 4, 12)
        act3_ref[...] = pool_relu(y, 12, 6)                      # (6, 256)

        # ---- conv3 (3x3, 32->64) + ReLU ----------------------------------
        y = conv_rows(lambda i, oh: act3_ref[pl.ds(i, oh), :], t3_ref, 3, 4)
        y3 = jnp.maximum(y, 0.0)                                 # (4, 256)

        # ---- fc1 (4*4*64 -> 500, padded to 512) + ReLU -------------------
        h = None
        for r in range(4):
            term = dot(y3[r:r + 1, :], w1_ref[r])                # (1, 512)
            h = term if h is None else h + term
        h = jnp.maximum(h, 0.0)

        # ---- fc2 (500 -> 10) ---------------------------------------------
        o_ref[pl.ds(b, 1), :] = dot(h, w2_ref[...])              # (1, 10)


def _fused_forward(x_rows, t1, t2, t3, w1, w2):
    batch = x_rows.shape[0]
    kernel = functools.partial(_lenet_kernel, batch=batch)
    return pl.pallas_call(
        kernel,
        out_shape=jax.ShapeDtypeStruct((batch, 10), jnp.float32),
        grid=(1,),
        in_specs=[
            pl.BlockSpec(x_rows.shape, lambda i: (0, 0, 0)),
            pl.BlockSpec(t1.shape, lambda i: (0, 0, 0)),
            pl.BlockSpec(t2.shape, lambda i: (0, 0, 0)),
            pl.BlockSpec(t3.shape, lambda i: (0, 0, 0)),
            pl.BlockSpec(w1.shape, lambda i: (0, 0, 0)),
            pl.BlockSpec(w2.shape, lambda i: (0, 0)),
        ],
        out_specs=pl.BlockSpec((batch, 10), lambda i: (0, 0)),
        scratch_shapes=[
            pltpu.VMEM((15, _HALF), jnp.float32),   # pooled conv1 activations
            pltpu.VMEM((6, _HALF), jnp.float32),    # pooled conv2 activations
        ],
        compiler_params=pltpu.CompilerParams(
            dimension_semantics=("arbitrary",),      # no cross-TC split
            vmem_limit_bytes=32 * 1024 * 1024,
        ),
    )(x_rows, t1, t2, t3, w1, w2)


def lenet_forward(x_nchw, prep):
    b = x_nchw.shape[0]
    # NCHW -> per-row NHWC vectors (index w*C + c), zero-padded to 128 lanes.
    x_rows = jnp.transpose(x_nchw, (0, 2, 3, 1)).reshape(b, 32, 32 * 3)
    x_rows = jnp.pad(x_rows, ((0, 0), (0, 0), (0, _LANE - 32 * 3)))
    return _fused_forward(x_rows, prep["t1"], prep["t2"], prep["t3"],
                          prep["w1"], prep["w2"])


# ---------------------------------------------------------------------------
# Parameter init + pure-JAX reference (mirrors the PyTorch module exactly)
# ---------------------------------------------------------------------------
def init_params(key):
    ks = jax.random.split(key, 5)

    def init(k, shape):
        fan_in = 1
        for d in shape[1:]:
            fan_in *= d
        return (jax.random.normal(k, shape, jnp.float32) / jnp.sqrt(fan_in))

    return {
        "conv1": init(ks[0], (16, 3, 3, 3)),
        "conv2": init(ks[1], (32, 16, 4, 4)),
        "conv3": init(ks[2], (64, 32, 3, 3)),
        "fc1": init(ks[3], (500, 4 * 4 * 64)),
        "fc2": init(ks[4], (10, 500)),
    }


def ref_forward(x, params):
    def conv(x, w):
        return lax.conv_general_dilated(
            x, w, (1, 1), "VALID", dimension_numbers=("NCHW", "OIHW", "NCHW"))

    def pool(x):
        return lax.reduce_window(
            x, -jnp.inf, lax.max, (1, 1, 2, 2), (1, 1, 2, 2), "VALID")

    x = pool(jax.nn.relu(conv(x, params["conv1"])))
    x = pool(jax.nn.relu(conv(x, params["conv2"])))
    x = jax.nn.relu(conv(x, params["conv3"]))
    x = x.reshape(x.shape[0], -1)
    x = jax.nn.relu(x @ params["fc1"].T)
    x = x @ params["fc2"].T
    return x


if __name__ == "__main__":
    key = jax.random.PRNGKey(0)
    kx, kp = jax.random.split(key)
    # Spatial size is dictated by the module (fc1 expects 4*4*64 after conv3).
    x = jax.random.normal(kx, (2, 3, 32, 32), jnp.float32)
    params = init_params(kp)
    prep = prepare_params(params)      # weight pre-layout: done once

    out = jax.block_until_ready(jax.jit(lenet_forward)(x, prep))
    assert out.shape == (2, 10) and out.dtype == jnp.float32

    ref = jax.block_until_ready(jax.jit(ref_forward)(x, params))
    assert jnp.allclose(out, ref, rtol=2e-2, atol=2e-2), (
        f"mismatch: max abs err {jnp.max(jnp.abs(out - ref))}")

    print("KERNEL_OK")
</pallas_src>

<mosaic_0001>
module attributes {stable_mosaic.version = 11 : i64} {
  func.func @_lenet_kernel(%arg0: i32, %arg1: memref<2x32x128xf32, #tpu.memory_space<vmem>>, %arg2: memref<3x128x512xf32, #tpu.memory_space<vmem>>, %arg3: memref<4x256x512xf32, #tpu.memory_space<vmem>>, %arg4: memref<3x256x256xf32, #tpu.memory_space<vmem>>, %arg5: memref<4x256x512xf32, #tpu.memory_space<vmem>>, %arg6: memref<512x10xf32, #tpu.memory_space<vmem>>, %arg7: memref<2x10xf32, #tpu.memory_space<vmem>>, %arg8: memref<15x256xf32, #tpu.memory_space<vmem>>, %arg9: memref<6x256xf32, #tpu.memory_space<vmem>>) attributes {dimension_semantics = [#tpu.dimension_semantics<arbitrary>], iteration_bounds = array<i64: 1>, scalar_prefetch = 0 : i64, scratch_operands = 2 : i64, tpu.core_type = #tpu.core_type<tc>, window_params = [{pipeline_mode = #tpu.pipeline_mode<synchronous>, transform_indices = @transform_0, window_bounds = array<i64: 2, 32, 128>}, {pipeline_mode = #tpu.pipeline_mode<synchronous>, transform_indices = @transform_1, window_bounds = array<i64: 3, 128, 512>}, {pipeline_mode = #tpu.pipeline_mode<synchronous>, transform_indices = @transform_2, window_bounds = array<i64: 4, 256, 512>}, {pipeline_mode = #tpu.pipeline_mode<synchronous>, transform_indices = @transform_3, window_bounds = array<i64: 3, 256, 256>}, {pipeline_mode = #tpu.pipeline_mode<synchronous>, transform_indices = @transform_4, window_bounds = array<i64: 4, 256, 512>}, {pipeline_mode = #tpu.pipeline_mode<synchronous>, transform_indices = @transform_5, window_bounds = array<i64: 512, 10>}, {pipeline_mode = #tpu.pipeline_mode<synchronous>, transform_indices = @transform_6, window_bounds = array<i64: 2, 10>}]} {
    %c0 = arith.constant 0 : index
    %c0_0 = arith.constant 0 : index
    %c0_1 = arith.constant 0 : index
    %0 = vector.load %arg1[%c0, %c0_0, %c0_1] : memref<2x32x128xf32, #tpu.memory_space<vmem>>, vector<1x30x128xf32>
    %1 = vector.shape_cast %0 : vector<1x30x128xf32> to vector<30x128xf32>
    %c0_2 = arith.constant 0 : index
    %c0_3 = arith.constant 0 : index
    %c0_4 = arith.constant 0 : index
    %2 = vector.load %arg2[%c0_2, %c0_3, %c0_4] : memref<3x128x512xf32, #tpu.memory_space<vmem>>, vector<1x128x512xf32>
    %3 = vector.shape_cast %2 : vector<1x128x512xf32> to vector<128x512xf32>
    %cst = arith.constant dense<0.000000e+00> : vector<30x512xf32>
    %4 = tpu.matmul %1, %3, %cst {dimension_numbers = #tpu.dot_dimension_numbers<[1], [0], [0], [1], [0, 0, 1, 1], [], []>} : vector<30x128xf32>, vector<128x512xf32>, vector<30x512xf32> -> vector<30x512xf32>
    %c0_5 = arith.constant 0 : index
    %c1 = arith.constant 1 : index
    %c0_6 = arith.constant 0 : index
    %5 = vector.load %arg1[%c0_5, %c1, %c0_6] : memref<2x32x128xf32, #tpu.memory_space<vmem>>, vector<1x30x128xf32>
    %6 = vector.shape_cast %5 : vector<1x30x128xf32> to vector<30x128xf32>
    %c1_7 = arith.constant 1 : index
    %c0_8 = arith.constant 0 : index
    %c0_9 = arith.constant 0 : index
    %7 = vector.load %arg2[%c1_7, %c0_8, %c0_9] : memref<3x128x512xf32, #tpu.memory_space<vmem>>, vector<1x128x512xf32>
    %8 = vector.shape_cast %7 : vector<1x128x512xf32> to vector<128x512xf32>
    %cst_10 = arith.constant dense<0.000000e+00> : vector<30x512xf32>
    %9 = tpu.matmul %6, %8, %cst_10 {dimension_numbers = #tpu.dot_dimension_numbers<[1], [0], [0], [1], [0, 0, 1, 1], [], []>} : vector<30x128xf32>, vector<128x512xf32>, vector<30x512xf32> -> vector<30x512xf32>
    %10 = arith.addf %4, %9 : vector<30x512xf32>
    %c0_11 = arith.constant 0 : index
    %c2 = arith.constant 2 : index
    %c0_12 = arith.constant 0 : index
    %11 = vector.load %arg1[%c0_11, %c2, %c0_12] : memref<2x32x128xf32, #tpu.memory_space<vmem>>, vector<1x30x128xf32>
    %12 = vector.shape_cast %11 : vector<1x30x128xf32> to vector<30x128xf32>
    %c2_13 = arith.constant 2 : index
    %c0_14 = arith.constant 0 : index
    %c0_15 = arith.constant 0 : index
    %13 = vector.load %arg2[%c2_13, %c0_14, %c0_15] : memref<3x128x512xf32, #tpu.memory_space<vmem>>, vector<1x128x512xf32>
    %14 = vector.shape_cast %13 : vector<1x128x512xf32> to vector<128x512xf32>
    %cst_16 = arith.constant dense<0.000000e+00> : vector<30x512xf32>
    %15 = tpu.matmul %12, %14, %cst_16 {dimension_numbers = #tpu.dot_dimension_numbers<[1], [0], [0], [1], [0, 0, 1, 1], [], []>} : vector<30x128xf32>, vector<128x512xf32>, vector<30x512xf32> -> vector<30x512xf32>
    %16 = arith.addf %10, %15 : vector<30x512xf32>
    %17 = vector.extract_strided_slice %16 {offsets = [0, 0], sizes = [30, 256], strides = [1, 1]} : vector<30x512xf32> to vector<30x256xf32>
    %18 = vector.extract_strided_slice %16 {offsets = [0, 256], sizes = [30, 256], strides = [1, 1]} : vector<30x512xf32> to vector<30x256xf32>
    %19 = arith.maximumf %17, %18 : vector<30x256xf32>
    %20 = tpu.iota {dimensions = array<i32: 0>} : vector<15x30xi32>
    %21 = tpu.iota {dimensions = array<i32: 1>} : vector<15x30xi32>
    %c2_i32 = arith.constant 2 : i32
    %22 = vector.broadcast %c2_i32 : i32 to vector<15x30xi32>
    %23 = arith.muli %22, %20 : vector<15x30xi32>
    %24 = arith.cmpi eq, %21, %23 : vector<15x30xi32>
    %cst_17 = arith.constant 1.000000e+00 : f32
    %cst_18 = arith.constant 0.000000e+00 : f32
    %25 = vector.broadcast %cst_17 : f32 to vector<15x30xf32>
    %26 = vector.broadcast %cst_18 : f32 to vector<15x30xf32>
    %27 = arith.select %24, %25, %26 : vector<15x30xi1>, vector<15x30xf32>
    %c2_i32_19 = arith.constant 2 : i32
    %28 = vector.broadcast %c2_i32_19 : i32 to vector<15x30xi32>
    %29 = arith.muli %28, %20 : vector<15x30xi32>
    %c1_i32 = arith.constant 1 : i32
    %30 = vector.broadcast %c1_i32 : i32 to vector<15x30xi32>
    %31 = arith.addi %29, %30 : vector<15x30xi32>
    %32 = arith.cmpi eq, %21, %31 : vector<15x30xi32>
    %cst_20 = arith.constant 1.000000e+00 : f32
    %cst_21 = arith.constant 0.000000e+00 : f32
    %33 = vector.broadcast %cst_20 : f32 to vector<15x30xf32>
    %34 = vector.broadcast %cst_21 : f32 to vector<15x30xf32>
    %35 = arith.select %32, %33, %34 : vector<15x30xi1>, vector<15x30xf32>
    %cst_22 = arith.constant dense<0.000000e+00> : vector<15x256xf32>
    %36 = tpu.matmul %27, %19, %cst_22 {dimension_numbers = #tpu.dot_dimension_numbers<[1], [0], [0], [1], [0, 0, 1, 1], [], []>} : vector<15x30xf32>, vector<30x256xf32>, vector<15x256xf32> -> vector<15x256xf32>
    %cst_23 = arith.constant dense<0.000000e+00> : vector<15x256xf32>
    %37 = tpu.matmul %35, %19, %cst_23 {dimension_numbers = #tpu.dot_dimension_numbers<[1], [0], [0], [1], [0, 0, 1, 1], [], []>} : vector<15x30xf32>, vector<30x256xf32>, vector<15x256xf32> -> vector<15x256xf32>
    %38 = arith.maximumf %36, %37 : vector<15x256xf32>
    %cst_24 = arith.constant 0.000000e+00 : f32
    %39 = vector.broadcast %cst_24 : f32 to vector<15x256xf32>
    %40 = arith.maximumf %38, %39 : vector<15x256xf32>
    %c0_25 = arith.constant 0 : index
    %c0_26 = arith.constant 0 : index
    %41 = vector.load %arg8[%c0_25, %c0_26] : memref<15x256xf32, #tpu.memory_space<vmem>>, vector<15x256xf32>
    tpu.vector_store %arg8[%c0_25, %c0_26], %40 {strides = array<i32>} : memref<15x256xf32, #tpu.memory_space<vmem>>, vector<15x256xf32>,
    %c0_27 = arith.constant 0 : index
    %c0_28 = arith.constant 0 : index
    %42 = vector.load %arg8[%c0_27, %c0_28] : memref<15x256xf32, #tpu.memory_space<vmem>>, vector<12x256xf32>
    %c0_29 = arith.constant 0 : index
    %c0_30 = arith.constant 0 : index
    %c0_31 = arith.constant 0 : index
    %43 = vector.load %arg3[%c0_29, %c0_30, %c0_31] : memref<4x256x512xf32, #tpu.memory_space<vmem>>, vector<1x256x512xf32>
    %44 = vector.shape_cast %43 : vector<1x256x512xf32> to vector<256x512xf32>
    %cst_32 = arith.constant dense<0.000000e+00> : vector<12x512xf32>
    %45 = tpu.matmul %42, %44, %cst_32 {dimension_numbers = #tpu.dot_dimension_numbers<[1], [0], [0], [1], [0, 0, 1, 1], [], []>} : vector<12x256xf32>, vector<256x512xf32>, vector<12x512xf32> -> vector<12x512xf32>
    %c1_33 = arith.constant 1 : index
    %c0_34 = arith.constant 0 : index
    %46 = vector.load %arg8[%c1_33, %c0_34] : memref<15x256xf32, #tpu.memory_space<vmem>>, vector<12x256xf32>
    %c1_35 = arith.constant 1 : index
    %c0_36 = arith.constant 0 : index
    %c0_37 = arith.constant 0 : index
    %47 = vector.load %arg3[%c1_35, %c0_36, %c0_37] : memref<4x256x512xf32, #tpu.memory_space<vmem>>, vector<1x256x512xf32>
    %48 = vector.shape_cast %47 : vector<1x256x512xf32> to vector<256x512xf32>
    %cst_38 = arith.constant dense<0.000000e+00> : vector<12x512xf32>
    %49 = tpu.matmul %46, %48, %cst_38 {dimension_numbers = #tpu.dot_dimension_numbers<[1], [0], [0], [1], [0, 0, 1, 1], [], []>} : vector<12x256xf32>, vector<256x512xf32>, vector<12x512xf32> -> vector<12x512xf32>
    %50 = arith.addf %45, %49 : vector<12x512xf32>
    %c2_39 = arith.constant 2 : index
    %c0_40 = arith.constant 0 : index
    %51 = vector.load %arg8[%c2_39, %c0_40] : memref<15x256xf32, #tpu.memory_space<vmem>>, vector<12x256xf32>
    %c2_41 = arith.constant 2 : index
    %c0_42 = arith.constant 0 : index
    %c0_43 = arith.constant 0 : index
    %52 = vector.load %arg3[%c2_41, %c0_42, %c0_43] : memref<4x256x512xf32, #tpu.memory_space<vmem>>, vector<1x256x512xf32>
    %53 = vector.shape_cast %52 : vector<1x256x512xf32> to vector<256x512xf32>
    %cst_44 = arith.constant dense<0.000000e+00> : vector<12x512xf32>
    %54 = tpu.matmul %51, %53, %cst_44 {dimension_numbers = #tpu.dot_dimension_numbers<[1], [0], [0], [1], [0, 0, 1, 1], [], []>} : vector<12x256xf32>, vector<256x512xf32>, vector<12x512xf32> -> vector<12x512xf32>
    %55 = arith.addf %50, %54 : vector<12x512xf32>
    %c3 = arith.constant 3 : index
    %c0_45 = arith.constant 0 : index
    %56 = vector.load %arg8[%c3, %c0_45] : memref<15x256xf32, #tpu.memory_space<vmem>>, vector<12x256xf32>
    %c3_46 = arith.constant 3 : index
    %c0_47 = arith.constant 0 : index
    %c0_48 = arith.constant 0 : index
    %57 = vector.load %arg3[%c3_46, %c0_47, %c0_48] : memref<4x256x512xf32, #tpu.memory_space<vmem>>, vector<1x256x512xf32>
    %58 = vector.shape_cast %57 : vector<1x256x512xf32> to vector<256x512xf32>
    %cst_49 = arith.constant dense<0.000000e+00> : vector<12x512xf32>
    %59 = tpu.matmul %56, %58, %cst_49 {dimension_numbers = #tpu.dot_dimension_numbers<[1], [0], [0], [1], [0, 0, 1, 1], [], []>} : vector<12x256xf32>, vector<256x512xf32>, vector<12x512xf32> -> vector<12x512xf32>
    %60 = arith.addf %55, %59 : vector<12x512xf32>
    %61 = vector.extract_strided_slice %60 {offsets = [0, 0], sizes = [12, 256], strides = [1, 1]} : vector<12x512xf32> to vector<12x256xf32>
    %62 = vector.extract_strided_slice %60 {offsets = [0, 256], sizes = [12, 256], strides = [1, 1]} : vector<12x512xf32> to vector<12x256xf32>
    %63 = arith.maximumf %61, %62 : vector<12x256xf32>
    %64 = tpu.iota {dimensions = array<i32: 0>} : vector<6x12xi32>
    %65 = tpu.iota {dimensions = array<i32: 1>} : vector<6x12xi32>
    %c2_i32_50 = arith.constant 2 : i32
    %66 = vector.broadcast %c2_i32_50 : i32 to vector<6x12xi32>
    %67 = arith.muli %66, %64 : vector<6x12xi32>
    %68 = arith.cmpi eq, %65, %67 : vector<6x12xi32>
    %cst_51 = arith.constant 1.000000e+00 : f32
    %cst_52 = arith.constant 0.000000e+00 : f32
    %69 = vector.broadcast %cst_51 : f32 to vector<6x12xf32>
    %70 = vector.broadcast %cst_52 : f32 to vector<6x12xf32>
    %71 = arith.select %68, %69, %70 : vector<6x12xi1>, vector<6x12xf32>
    %c2_i32_53 = arith.constant 2 : i32
    %72 = vector.broadcast %c2_i32_53 : i32 to vector<6x12xi32>
    %73 = arith.muli %72, %64 : vector<6x12xi32>
    %c1_i32_54 = arith.constant 1 : i32
    %74 = vector.broadcast %c1_i32_54 : i32 to vector<6x12xi32>
    %75 = arith.addi %73, %74 : vector<6x12xi32>
    %76 = arith.cmpi eq, %65, %75 : vector<6x12xi32>
    %cst_55 = arith.constant 1.000000e+00 : f32
    %cst_56 = arith.constant 0.000000e+00 : f32
    %77 = vector.broadcast %cst_55 : f32 to vector<6x12xf32>
    %78 = vector.broadcast %cst_56 : f32 to vector<6x12xf32>
    %79 = arith.select %76, %77, %78 : vector<6x12xi1>, vector<6x12xf32>
    %cst_57 = arith.constant dense<0.000000e+00> : vector<6x256xf32>
    %80 = tpu.matmul %71, %63, %cst_57 {dimension_numbers = #tpu.dot_dimension_numbers<[1], [0], [0], [1], [0, 0, 1, 1], [], []>} : vector<6x12xf32>, vector<12x256xf32>, vector<6x256xf32> -> vector<6x256xf32>
    %cst_58 = arith.constant dense<0.000000e+00> : vector<6x256xf32>
    %81 = tpu.matmul %79, %63, %cst_58 {dimension_numbers = #tpu.dot_dimension_numbers<[1], [0], [0], [1], [0, 0, 1, 1], [], []>} : vector<6x12xf32>, vector<12x256xf32>, vector<6x256xf32> -> vector<6x256xf32>
    %82 = arith.maximumf %80, %81 : vector<6x256xf32>
    %cst_59 = arith.constant 0.000000e+00 : f32
    %83 = vector.broadcast %cst_59 : f32 to vector<6x256xf32>
    %84 = arith.maximumf %82, %83 : vector<6x256xf32>
    %c0_60 = arith.constant 0 : index
    %c0_61 = arith.constant 0 : index
    %85 = vector.load %arg9[%c0_60, %c0_61] : memref<6x256xf32, #tpu.memory_space<vmem>>, vector<6x256xf32>
    tpu.vector_store %arg9[%c0_60, %c0_61], %84 {strides = array<i32>} : memref<6x256xf32, #tpu.memory_space<vmem>>, vector<6x256xf32>,
    %c0_62 = arith.constant 0 : index
    %c0_63 = arith.constant 0 : index
    %86 = vector.load %arg9[%c0_62, %c0_63] : memref<6x256xf32, #tpu.memory_space<vmem>>, vector<4x256xf32>
    %c0_64 = arith.constant 0 : index
    %c0_65 = arith.constant 0 : index
    %c0_66 = arith.constant 0 : index
    %87 = vector.load %arg4[%c0_64, %c0_65, %c0_66] : memref<3x256x256xf32, #tpu.memory_space<vmem>>, vector<1x256x256xf32>
    %88 = vector.shape_cast %87 : vector<1x256x256xf32> to vector<256x256xf32>
    %cst_67 = arith.constant dense<0.000000e+00> : vector<4x256xf32>
    %89 = tpu.matmul %86, %88, %cst_67 {dimension_numbers = #tpu.dot_dimension_numbers<[1], [0], [0], [1], [0, 0, 1, 1], [], []>} : vector<4x256xf32>, vector<256x256xf32>, vector<4x256xf32> -> vector<4x256xf32>
    %c1_68 = arith.constant 1 : index
    %c0_69 = arith.constant 0 : index
    %90 = vector.load %arg9[%c1_68, %c0_69] : memref<6x256xf32, #tpu.memory_space<vmem>>, vector<4x256xf32>
    %c1_70 = arith.constant 1 : index
    %c0_71 = arith.constant 0 : index
    %c0_72 = arith.constant 0 : index
    %91 = vector.load %arg4[%c1_70, %c0_71, %c0_72] : memref<3x256x256xf32, #tpu.memory_space<vmem>>, vector<1x256x256xf32>
    %92 = vector.shape_cast %91 : vector<1x256x256xf32> to vector<256x256xf32>
    %cst_73 = arith.constant dense<0.000000e+00> : vector<4x256xf32>
    %93 = tpu.matmul %90, %92, %cst_73 {dimension_numbers = #tpu.dot_dimension_numbers<[1], [0], [0], [1], [0, 0, 1, 1], [], []>} : vector<4x256xf32>, vector<256x256xf32>, vector<4x256xf32> -> vector<4x256xf32>
    %94 = arith.addf %89, %93 : vector<4x256xf32>
    %c2_74 = arith.constant 2 : index
    %c0_75 = arith.constant 0 : index
    %95 = vector.load %arg9[%c2_74, %c0_75] : memref<6x256xf32, #tpu.memory_space<vmem>>, vector<4x256xf32>
    %c2_76 = arith.constant 2 : index
    %c0_77 = arith.constant 0 : index
    %c0_78 = arith.constant 0 : index
    %96 = vector.load %arg4[%c2_76, %c0_77, %c0_78] : memref<3x256x256xf32, #tpu.memory_space<vmem>>, vector<1x256x256xf32>
    %97 = vector.shape_cast %96 : vector<1x256x256xf32> to vector<256x256xf32>
    %cst_79 = arith.constant dense<0.000000e+00> : vector<4x256xf32>
    %98 = tpu.matmul %95, %97, %cst_79 {dimension_numbers = #tpu.dot_dimension_numbers<[1], [0], [0], [1], [0, 0, 1, 1], [], []>} : vector<4x256xf32>, vector<256x256xf32>, vector<4x256xf32> -> vector<4x256xf32>
    %99 = arith.addf %94, %98 : vector<4x256xf32>
    %cst_80 = arith.constant 0.000000e+00 : f32
    %100 = vector.broadcast %cst_80 : f32 to vector<4x256xf32>
    %101 = arith.maximumf %99, %100 : vector<4x256xf32>
    %102 = vector.extract_strided_slice %101 {offsets = [0, 0], sizes = [1, 256], strides = [1, 1]} : vector<4x256xf32> to vector<1x256xf32>
    %c0_81 = arith.constant 0 : index
    %c0_82 = arith.constant 0 : index
    %c0_83 = arith.constant 0 : index
    %103 = vector.load %arg5[%c0_81, %c0_82, %c0_83] : memref<4x256x512xf32, #tpu.memory_space<vmem>>, vector<1x256x512xf32>
    %104 = vector.shape_cast %103 : vector<1x256x512xf32> to vector<256x512xf32>
    %cst_84 = arith.constant dense<0.000000e+00> : vector<1x512xf32>
    %105 = tpu.matmul %102, %104, %cst_84 {dimension_numbers = #tpu.dot_dimension_numbers<[1], [0], [0], [1], [0, 0, 1, 1], [], []>} : vector<1x256xf32>, vector<256x512xf32>, vector<1x512xf32> -> vector<1x512xf32>
    %106 = vector.extract_strided_slice %101 {offsets = [1, 0], sizes = [1, 256], strides = [1, 1]} : vector<4x256xf32> to vector<1x256xf32>
    %c1_85 = arith.constant 1 : index
    %c0_86 = arith.constant 0 : index
    %c0_87 = arith.constant 0 : index
    %107 = vector.load %arg5[%c1_85, %c0_86, %c0_87] : memref<4x256x512xf32, #tpu.memory_space<vmem>>, vector<1x256x512xf32>
    %108 = vector.shape_cast %107 : vector<1x256x512xf32> to vector<256x512xf32>
    %cst_88 = arith.constant dense<0.000000e+00> : vector<1x512xf32>
    %109 = tpu.matmul %106, %108, %cst_88 {dimension_numbers = #tpu.dot_dimension_numbers<[1], [0], [0], [1], [0, 0, 1, 1], [], []>} : vector<1x256xf32>, vector<256x512xf32>, vector<1x512xf32> -> vector<1x512xf32>
    %110 = arith.addf %105, %109 : vector<1x512xf32>
    %111 = vector.extract_strided_slice %101 {offsets = [2, 0], sizes = [1, 256], strides = [1, 1]} : vector<4x256xf32> to vector<1x256xf32>
    %c2_89 = arith.constant 2 : index
    %c0_90 = arith.constant 0 : index
    %c0_91 = arith.constant 0 : index
    %112 = vector.load %arg5[%c2_89, %c0_90, %c0_91] : memref<4x256x512xf32, #tpu.memory_space<vmem>>, vector<1x256x512xf32>
    %113 = vector.shape_cast %112 : vector<1x256x512xf32> to vector<256x512xf32>
    %cst_92 = arith.constant dense<0.000000e+00> : vector<1x512xf32>
    %114 = tpu.matmul %111, %113, %cst_92 {dimension_numbers = #tpu.dot_dimension_numbers<[1], [0], [0], [1], [0, 0, 1, 1], [], []>} : vector<1x256xf32>, vector<256x512xf32>, vector<1x512xf32> -> vector<1x512xf32>
    %115 = arith.addf %110, %114 : vector<1x512xf32>
    %116 = vector.extract_strided_slice %101 {offsets = [3, 0], sizes = [1, 256], strides = [1, 1]} : vector<4x256xf32> to vector<1x256xf32>
    %c3_93 = arith.constant 3 : index
    %c0_94 = arith.constant 0 : index
    %c0_95 = arith.constant 0 : index
    %117 = vector.load %arg5[%c3_93, %c0_94, %c0_95] : memref<4x256x512xf32, #tpu.memory_space<vmem>>, vector<1x256x512xf32>
    %118 = vector.shape_cast %117 : vector<1x256x512xf32> to vector<256x512xf32>
    %cst_96 = arith.constant dense<0.000000e+00> : vector<1x512xf32>
    %119 = tpu.matmul %116, %118, %cst_96 {dimension_numbers = #tpu.dot_dimension_numbers<[1], [0], [0], [1], [0, 0, 1, 1], [], []>} : vector<1x256xf32>, vector<256x512xf32>, vector<1x512xf32> -> vector<1x512xf32>
    %120 = arith.addf %115, %119 : vector<1x512xf32>
    %cst_97 = arith.constant 0.000000e+00 : f32
    %121 = vector.broadcast %cst_97 : f32 to vector<1x512xf32>
    %122 = arith.maximumf %120, %121 : vector<1x512xf32>
    %c0_98 = arith.constant 0 : index
    %c0_99 = arith.constant 0 : index
    %123 = vector.load %arg6[%c0_98, %c0_99] : memref<512x10xf32, #tpu.memory_space<vmem>>, vector<512x10xf32>
    %cst_100 = arith.constant dense<0.000000e+00> : vector<1x10xf32>
    %124 = tpu.matmul %122, %123, %cst_100 {dimension_numbers = #tpu.dot_dimension_numbers<[1], [0], [0], [1], [0, 0, 1, 1], [], []>} : vector<1x512xf32>, vector<512x10xf32>, vector<1x10xf32> -> vector<1x10xf32>
    %c0_101 = arith.constant 0 : index
    %c0_102 = arith.constant 0 : index
    %125 = vector.load %arg7[%c0_101, %c0_102] : memref<2x10xf32, #tpu.memory_space<vmem>>, vector<1x10xf32>
    tpu.vector_store %arg7[%c0_101, %c0_102], %124 {strides = array<i32>} : memref<2x10xf32, #tpu.memory_space<vmem>>, vector<1x10xf32>,
    %c1_103 = arith.constant 1 : index
    %c0_104 = arith.constant 0 : index
    %c0_105 = arith.constant 0 : index
    %126 = vector.load %arg1[%c1_103, %c0_104, %c0_105] : memref<2x32x128xf32, #tpu.memory_space<vmem>>, vector<1x30x128xf32>
    %127 = vector.shape_cast %126 : vector<1x30x128xf32> to vector<30x128xf32>
    %c0_106 = arith.constant 0 : index
    %c0_107 = arith.constant 0 : index
    %c0_108 = arith.constant 0 : index
    %128 = vector.load %arg2[%c0_106, %c0_107, %c0_108] : memref<3x128x512xf32, #tpu.memory_space<vmem>>, vector<1x128x512xf32>
    %129 = vector.shape_cast %128 : vector<1x128x512xf32> to vector<128x512xf32>
    %cst_109 = arith.constant dense<0.000000e+00> : vector<30x512xf32>
    %130 = tpu.matmul %127, %129, %cst_109 {dimension_numbers = #tpu.dot_dimension_numbers<[1], [0], [0], [1], [0, 0, 1, 1], [], []>} : vector<30x128xf32>, vector<128x512xf32>, vector<30x512xf32> -> vector<30x512xf32>
    %c1_110 = arith.constant 1 : index
    %c1_111 = arith.constant 1 : index
    %c0_112 = arith.constant 0 : index
    %131 = vector.load %arg1[%c1_110, %c1_111, %c0_112] : memref<2x32x128xf32, #tpu.memory_space<vmem>>, vector<1x30x128xf32>
    %132 = vector.shape_cast %131 : vector<1x30x128xf32> to vector<30x128xf32>
    %c1_113 = arith.constant 1 : index
    %c0_114 = arith.constant 0 : index
    %c0_115 = arith.constant 0 : index
    %133 = vector.load %arg2[%c1_113, %c0_114, %c0_115] : memref<3x128x512xf32, #tpu.memory_space<vmem>>, vector<1x128x512xf32>
    %134 = vector.shape_cast %133 : vector<1x128x512xf32> to vector<128x512xf32>
    %cst_116 = arith.constant dense<0.000000e+00> : vector<30x512xf32>
    %135 = tpu.matmul %132, %134, %cst_116 {dimension_numbers = #tpu.dot_dimension_numbers<[1], [0], [0], [1], [0, 0, 1, 1], [], []>} : vector<30x128xf32>, vector<128x512xf32>, vector<30x512xf32> -> vector<30x512xf32>
    %136 = arith.addf %130, %135 : vector<30x512xf32>
    %c1_117 = arith.constant 1 : index
    %c2_118 = arith.constant 2 : index
    %c0_119 = arith.constant 0 : index
    %137 = vector.load %arg1[%c1_117, %c2_118, %c0_119] : memref<2x32x128xf32, #tpu.memory_space<vmem>>, vector<1x30x128xf32>
    %138 = vector.shape_cast %137 : vector<1x30x128xf32> to vector<30x128xf32>
    %c2_120 = arith.constant 2 : index
    %c0_121 = arith.constant 0 : index
    %c0_122 = arith.constant 0 : index
    %139 = vector.load %arg2[%c2_120, %c0_121, %c0_122] : memref<3x128x512xf32, #tpu.memory_space<vmem>>, vector<1x128x512xf32>
    %140 = vector.shape_cast %139 : vector<1x128x512xf32> to vector<128x512xf32>
    %cst_123 = arith.constant dense<0.000000e+00> : vector<30x512xf32>
    %141 = tpu.matmul %138, %140, %cst_123 {dimension_numbers = #tpu.dot_dimension_numbers<[1], [0], [0], [1], [0, 0, 1, 1], [], []>} : vector<30x128xf32>, vector<128x512xf32>, vector<30x512xf32> -> vector<30x512xf32>
    %142 = arith.addf %136, %141 : vector<30x512xf32>
    %143 = vector.extract_strided_slice %142 {offsets = [0, 0], sizes = [30, 256], strides = [1, 1]} : vector<30x512xf32> to vector<30x256xf32>
    %144 = vector.extract_strided_slice %142 {offsets = [0, 256], sizes = [30, 256], strides = [1, 1]} : vector<30x512xf32> to vector<30x256xf32>
    %145 = arith.maximumf %143, %144 : vector<30x256xf32>
    %146 = tpu.iota {dimensions = array<i32: 0>} : vector<15x30xi32>
    %147 = tpu.iota {dimensions = array<i32: 1>} : vector<15x30xi32>
    %c2_i32_124 = arith.constant 2 : i32
    %148 = vector.broadcast %c2_i32_124 : i32 to vector<15x30xi32>
    %149 = arith.muli %148, %146 : vector<15x30xi32>
    %150 = arith.cmpi eq, %147, %149 : vector<15x30xi32>
    %cst_125 = arith.constant 1.000000e+00 : f32
    %cst_126 = arith.constant 0.000000e+00 : f32
    %151 = vector.broadcast %cst_125 : f32 to vector<15x30xf32>
    %152 = vector.broadcast %cst_126 : f32 to vector<15x30xf32>
    %153 = arith.select %150, %151, %152 : vector<15x30xi1>, vector<15x30xf32>
    %c2_i32_127 = arith.constant 2 : i32
    %154 = vector.broadcast %c2_i32_127 : i32 to vector<15x30xi32>
    %155 = arith.muli %154, %146 : vector<15x30xi32>
    %c1_i32_128 = arith.constant 1 : i32
    %156 = vector.broadcast %c1_i32_128 : i32 to vector<15x30xi32>
    %157 = arith.addi %155, %156 : vector<15x30xi32>
    %158 = arith.cmpi eq, %147, %157 : vector<15x30xi32>
    %cst_129 = arith.constant 1.000000e+00 : f32
    %cst_130 = arith.constant 0.000000e+00 : f32
    %159 = vector.broadcast %cst_129 : f32 to vector<15x30xf32>
    %160 = vector.broadcast %cst_130 : f32 to vector<15x30xf32>
    %161 = arith.select %158, %159, %160 : vector<15x30xi1>, vector<15x30xf32>
    %cst_131 = arith.constant dense<0.000000e+00> : vector<15x256xf32>
    %162 = tpu.matmul %153, %145, %cst_131 {dimension_numbers = #tpu.dot_dimension_numbers<[1], [0], [0], [1], [0, 0, 1, 1], [], []>} : vector<15x30xf32>, vector<30x256xf32>, vector<15x256xf32> -> vector<15x256xf32>
    %cst_132 = arith.constant dense<0.000000e+00> : vector<15x256xf32>
    %163 = tpu.matmul %161, %145, %cst_132 {dimension_numbers = #tpu.dot_dimension_numbers<[1], [0], [0], [1], [0, 0, 1, 1], [], []>} : vector<15x30xf32>, vector<30x256xf32>, vector<15x256xf32> -> vector<15x256xf32>
    %164 = arith.maximumf %162, %163 : vector<15x256xf32>
    %cst_133 = arith.constant 0.000000e+00 : f32
    %165 = vector.broadcast %cst_133 : f32 to vector<15x256xf32>
    %166 = arith.maximumf %164, %165 : vector<15x256xf32>
    %c0_134 = arith.constant 0 : index
    %c0_135 = arith.constant 0 : index
    %167 = vector.load %arg8[%c0_134, %c0_135] : memref<15x256xf32, #tpu.memory_space<vmem>>, vector<15x256xf32>
    tpu.vector_store %arg8[%c0_134, %c0_135], %166 {strides = array<i32>} : memref<15x256xf32, #tpu.memory_space<vmem>>, vector<15x256xf32>,
    %c0_136 = arith.constant 0 : index
    %c0_137 = arith.constant 0 : index
    %168 = vector.load %arg8[%c0_136, %c0_137] : memref<15x256xf32, #tpu.memory_space<vmem>>, vector<12x256xf32>
    %c0_138 = arith.constant 0 : index
    %c0_139 = arith.constant 0 : index
    %c0_140 = arith.constant 0 : index
    %169 = vector.load %arg3[%c0_138, %c0_139, %c0_140] : memref<4x256x512xf32, #tpu.memory_space<vmem>>, vector<1x256x512xf32>
    %170 = vector.shape_cast %169 : vector<1x256x512xf32> to vector<256x512xf32>
    %cst_141 = arith.constant dense<0.000000e+00> : vector<12x512xf32>
    %171 = tpu.matmul %168, %170, %cst_141 {dimension_numbers = #tpu.dot_dimension_numbers<[1], [0], [0], [1], [0, 0, 1, 1], [], []>} : vector<12x256xf32>, vector<256x512xf32>, vector<12x512xf32> -> vector<12x512xf32>
    %c1_142 = arith.constant 1 : index
    %c0_143 = arith.constant 0 : index
    %172 = vector.load %arg8[%c1_142, %c0_143] : memref<15x256xf32, #tpu.memory_space<vmem>>, vector<12x256xf32>
    %c1_144 = arith.constant 1 : index
    %c0_145 = arith.constant 0 : index
    %c0_146 = arith.constant 0 : index
    %173 = vector.load %arg3[%c1_144, %c0_145, %c0_146] : memref<4x256x512xf32, #tpu.memory_space<vmem>>, vector<1x256x512xf32>
    %174 = vector.shape_cast %173 : vector<1x256x512xf32> to vector<256x512xf32>
    %cst_147 = arith.constant dense<0.000000e+00> : vector<12x512xf32>
    %175 = tpu.matmul %172, %174, %cst_147 {dimension_numbers = #tpu.dot_dimension_numbers<[1], [0], [0], [1], [0, 0, 1, 1], [], []>} : vector<12x256xf32>, vector<256x512xf32>, vector<12x512xf32> -> vector<12x512xf32>
    %176 = arith.addf %171, %175 : vector<12x512xf32>
    %c2_148 = arith.constant 2 : index
    %c0_149 = arith.constant 0 : index
    %177 = vector.load %arg8[%c2_148, %c0_149] : memref<15x256xf32, #tpu.memory_space<vmem>>, vector<12x256xf32>
    %c2_150 = arith.constant 2 : index
    %c0_151 = arith.constant 0 : index
    %c0_152 = arith.constant 0 : index
    %178 = vector.load %arg3[%c2_150, %c0_151, %c0_152] : memref<4x256x512xf32, #tpu.memory_space<vmem>>, vector<1x256x512xf32>
    %179 = vector.shape_cast %178 : vector<1x256x512xf32> to vector<256x512xf32>
    %cst_153 = arith.constant dense<0.000000e+00> : vector<12x512xf32>
    %180 = tpu.matmul %177, %179, %cst_153 {dimension_numbers = #tpu.dot_dimension_numbers<[1], [0], [0], [1], [0, 0, 1, 1], [], []>} : vector<12x256xf32>, vector<256x512xf32>, vector<12x512xf32> -> vector<12x512xf32>
    %181 = arith.addf %176, %180 : vector<12x512xf32>
    %c3_154 = arith.constant 3 : index
    %c0_155 = arith.constant 0 : index
    %182 = vector.load %arg8[%c3_154, %c0_155] : memref<15x256xf32, #tpu.memory_space<vmem>>, vector<12x256xf32>
    %c3_156 = arith.constant 3 : index
    %c0_157 = arith.constant 0 : index
    %c0_158 = arith.constant 0 : index
    %183 = vector.load %arg3[%c3_156, %c0_157, %c0_158] : memref<4x256x512xf32, #tpu.memory_space<vmem>>, vector<1x256x512xf32>
    %184 = vector.shape_cast %183 : vector<1x256x512xf32> to vector<256x512xf32>
    %cst_159 = arith.constant dense<0.000000e+00> : vector<12x512xf32>
    %185 = tpu.matmul %182, %184, %cst_159 {dimension_numbers = #tpu.dot_dimension_numbers<[1], [0], [0], [1], [0, 0, 1, 1], [], []>} : vector<12x256xf32>, vector<256x512xf32>, vector<12x512xf32> -> vector<12x512xf32>
    %186 = arith.addf %181, %185 : vector<12x512xf32>
    %187 = vector.extract_strided_slice %186 {offsets = [0, 0], sizes = [12, 256], strides = [1, 1]} : vector<12x512xf32> to vector<12x256xf32>
    %188 = vector.extract_strided_slice %186 {offsets = [0, 256], sizes = [12, 256], strides = [1, 1]} : vector<12x512xf32> to vector<12x256xf32>
    %189 = arith.maximumf %187, %188 : vector<12x256xf32>
    %190 = tpu.iota {dimensions = array<i32: 0>} : vector<6x12xi32>
    %191 = tpu.iota {dimensions = array<i32: 1>} : vector<6x12xi32>
    %c2_i32_160 = arith.constant 2 : i32
    %192 = vector.broadcast %c2_i32_160 : i32 to vector<6x12xi32>
    %193 = arith.muli %192, %190 : vector<6x12xi32>
    %194 = arith.cmpi eq, %191, %193 : vector<6x12xi32>
    %cst_161 = arith.constant 1.000000e+00 : f32
    %cst_162 = arith.constant 0.000000e+00 : f32
    %195 = vector.broadcast %cst_161 : f32 to vector<6x12xf32>
    %196 = vector.broadcast %cst_162 : f32 to vector<6x12xf32>
    %197 = arith.select %194, %195, %196 : vector<6x12xi1>, vector<6x12xf32>
    %c2_i32_163 = arith.constant 2 : i32
    %198 = vector.broadcast %c2_i32_163 : i32 to vector<6x12xi32>
    %199 = arith.muli %198, %190 : vector<6x12xi32>
    %c1_i32_164 = arith.constant 1 : i32
    %200 = vector.broadcast %c1_i32_164 : i32 to vector<6x12xi32>
    %201 = arith.addi %199, %200 : vector<6x12xi32>
    %202 = arith.cmpi eq, %191, %201 : vector<6x12xi32>
    %cst_165 = arith.constant 1.000000e+00 : f32
    %cst_166 = arith.constant 0.000000e+00 : f32
    %203 = vector.broadcast %cst_165 : f32 to vector<6x12xf32>
    %204 = vector.broadcast %cst_166 : f32 to vector<6x12xf32>
    %205 = arith.select %202, %203, %204 : vector<6x12xi1>, vector<6x12xf32>
    %cst_167 = arith.constant dense<0.000000e+00> : vector<6x256xf32>
    %206 = tpu.matmul %197, %189, %cst_167 {dimension_numbers = #tpu.dot_dimension_numbers<[1], [0], [0], [1], [0, 0, 1, 1], [], []>} : vector<6x12xf32>, vector<12x256xf32>, vector<6x256xf32> -> vector<6x256xf32>
    %cst_168 = arith.constant dense<0.000000e+00> : vector<6x256xf32>
    %207 = tpu.matmul %205, %189, %cst_168 {dimension_numbers = #tpu.dot_dimension_numbers<[1], [0], [0], [1], [0, 0, 1, 1], [], []>} : vector<6x12xf32>, vector<12x256xf32>, vector<6x256xf32> -> vector<6x256xf32>
    %208 = arith.maximumf %206, %207 : vector<6x256xf32>
    %cst_169 = arith.constant 0.000000e+00 : f32
    %209 = vector.broadcast %cst_169 : f32 to vector<6x256xf32>
    %210 = arith.maximumf %208, %209 : vector<6x256xf32>
    %c0_170 = arith.constant 0 : index
    %c0_171 = arith.constant 0 : index
    %211 = vector.load %arg9[%c0_170, %c0_171] : memref<6x256xf32, #tpu.memory_space<vmem>>, vector<6x256xf32>
    tpu.vector_store %arg9[%c0_170, %c0_171], %210 {strides = array<i32>} : memref<6x256xf32, #tpu.memory_space<vmem>>, vector<6x256xf32>,
    %c0_172 = arith.constant 0 : index
    %c0_173 = arith.constant 0 : index
    %212 = vector.load %arg9[%c0_172, %c0_173] : memref<6x256xf32, #tpu.memory_space<vmem>>, vector<4x256xf32>
    %c0_174 = arith.constant 0 : index
    %c0_175 = arith.constant 0 : index
    %c0_176 = arith.constant 0 : index
    %213 = vector.load %arg4[%c0_174, %c0_175, %c0_176] : memref<3x256x256xf32, #tpu.memory_space<vmem>>, vector<1x256x256xf32>
    %214 = vector.shape_cast %213 : vector<1x256x256xf32> to vector<256x256xf32>
    %cst_177 = arith.constant dense<0.000000e+00> : vector<4x256xf32>
    %215 = tpu.matmul %212, %214, %cst_177 {dimension_numbers = #tpu.dot_dimension_numbers<[1], [0], [0], [1], [0, 0, 1, 1], [], []>} : vector<4x256xf32>, vector<256x256xf32>, vector<4x256xf32> -> vector<4x256xf32>
    %c1_178 = arith.constant 1 : index
    %c0_179 = arith.constant 0 : index
    %216 = vector.load %arg9[%c1_178, %c0_179] : memref<6x256xf32, #tpu.memory_space<vmem>>, vector<4x256xf32>
    %c1_180 = arith.constant 1 : index
    %c0_181 = arith.constant 0 : index
    %c0_182 = arith.constant 0 : index
    %217 = vector.load %arg4[%c1_180, %c0_181, %c0_182] : memref<3x256x256xf32, #tpu.memory_space<vmem>>, vector<1x256x256xf32>
    %218 = vector.shape_cast %217 : vector<1x256x256xf32> to vector<256x256xf32>
    %cst_183 = arith.constant dense<0.000000e+00> : vector<4x256xf32>
    %219 = tpu.matmul %216, %218, %cst_183 {dimension_numbers = #tpu.dot_dimension_numbers<[1], [0], [0], [1], [0, 0, 1, 1], [], []>} : vector<4x256xf32>, vector<256x256xf32>, vector<4x256xf32> -> vector<4x256xf32>
    %220 = arith.addf %215, %219 : vector<4x256xf32>
    %c2_184 = arith.constant 2 : index
    %c0_185 = arith.constant 0 : index
    %221 = vector.load %arg9[%c2_184, %c0_185] : memref<6x256xf32, #tpu.memory_space<vmem>>, vector<4x256xf32>
    %c2_186 = arith.constant 2 : index
    %c0_187 = arith.constant 0 : index
    %c0_188 = arith.constant 0 : index
    %222 = vector.load %arg4[%c2_186, %c0_187, %c0_188] : memref<3x256x256xf32, #tpu.memory_space<vmem>>, vector<1x256x256xf32>
    %223 = vector.shape_cast %222 : vector<1x256x256xf32> to vector<256x256xf32>
    %cst_189 = arith.constant dense<0.000000e+00> : vector<4x256xf32>
    %224 = tpu.matmul %221, %223, %cst_189 {dimension_numbers = #tpu.dot_dimension_numbers<[1], [0], [0], [1], [0, 0, 1, 1], [], []>} : vector<4x256xf32>, vector<256x256xf32>, vector<4x256xf32> -> vector<4x256xf32>
    %225 = arith.addf %220, %224 : vector<4x256xf32>
    %cst_190 = arith.constant 0.000000e+00 : f32
    %226 = vector.broadcast %cst_190 : f32 to vector<4x256xf32>
    %227 = arith.maximumf %225, %226 : vector<4x256xf32>
    %228 = vector.extract_strided_slice %227 {offsets = [0, 0], sizes = [1, 256], strides = [1, 1]} : vector<4x256xf32> to vector<1x256xf32>
    %c0_191 = arith.constant 0 : index
    %c0_192 = arith.constant 0 : index
    %c0_193 = arith.constant 0 : index
    %229 = vector.load %arg5[%c0_191, %c0_192, %c0_193] : memref<4x256x512xf32, #tpu.memory_space<vmem>>, vector<1x256x512xf32>
    %230 = vector.shape_cast %229 : vector<1x256x512xf32> to vector<256x512xf32>
    %cst_194 = arith.constant dense<0.000000e+00> : vector<1x512xf32>
    %231 = tpu.matmul %228, %230, %cst_194 {dimension_numbers = #tpu.dot_dimension_numbers<[1], [0], [0], [1], [0, 0, 1, 1], [], []>} : vector<1x256xf32>, vector<256x512xf32>, vector<1x512xf32> -> vector<1x512xf32>
    %232 = vector.extract_strided_slice %227 {offsets = [1, 0], sizes = [1, 256], strides = [1, 1]} : vector<4x256xf32> to vector<1x256xf32>
    %c1_195 = arith.constant 1 : index
    %c0_196 = arith.constant 0 : index
    %c0_197 = arith.constant 0 : index
    %233 = vector.load %arg5[%c1_195, %c0_196, %c0_197] : memref<4x256x512xf32, #tpu.memory_space<vmem>>, vector<1x256x512xf32>
    %234 = vector.shape_cast %233 : vector<1x256x512xf32> to vector<256x512xf32>
    %cst_198 = arith.constant dense<0.000000e+00> : vector<1x512xf32>
    %235 = tpu.matmul %232, %234, %cst_198 {dimension_numbers = #tpu.dot_dimension_numbers<[1], [0], [0], [1], [0, 0, 1, 1], [], []>} : vector<1x256xf32>, vector<256x512xf32>, vector<1x512xf32> -> vector<1x512xf32>
    %236 = arith.addf %231, %235 : vector<1x512xf32>
    %237 = vector.extract_strided_slice %227 {offsets = [2, 0], sizes = [1, 256], strides = [1, 1]} : vector<4x256xf32> to vector<1x256xf32>
    %c2_199 = arith.constant 2 : index
    %c0_200 = arith.constant 0 : index
    %c0_201 = arith.constant 0 : index
    %238 = vector.load %arg5[%c2_199, %c0_200, %c0_201] : memref<4x256x512xf32, #tpu.memory_space<vmem>>, vector<1x256x512xf32>
    %239 = vector.shape_cast %238 : vector<1x256x512xf32> to vector<256x512xf32>
    %cst_202 = arith.constant dense<0.000000e+00> : vector<1x512xf32>
    %240 = tpu.matmul %237, %239, %cst_202 {dimension_numbers = #tpu.dot_dimension_numbers<[1], [0], [0], [1], [0, 0, 1, 1], [], []>} : vector<1x256xf32>, vector<256x512xf32>, vector<1x512xf32> -> vector<1x512xf32>
    %241 = arith.addf %236, %240 : vector<1x512xf32>
    %242 = vector.extract_strided_slice %227 {offsets = [3, 0], sizes = [1, 256], strides = [1, 1]} : vector<4x256xf32> to vector<1x256xf32>
    %c3_203 = arith.constant 3 : index
    %c0_204 = arith.constant 0 : index
    %c0_205 = arith.constant 0 : index
    %243 = vector.load %arg5[%c3_203, %c0_204, %c0_205] : memref<4x256x512xf32, #tpu.memory_space<vmem>>, vector<1x256x512xf32>
    %244 = vector.shape_cast %243 : vector<1x256x512xf32> to vector<256x512xf32>
    %cst_206 = arith.constant dense<0.000000e+00> : vector<1x512xf32>
    %245 = tpu.matmul %242, %244, %cst_206 {dimension_numbers = #tpu.dot_dimension_numbers<[1], [0], [0], [1], [0, 0, 1, 1], [], []>} : vector<1x256xf32>, vector<256x512xf32>, vector<1x512xf32> -> vector<1x512xf32>
    %246 = arith.addf %241, %245 : vector<1x512xf32>
    %cst_207 = arith.constant 0.000000e+00 : f32
    %247 = vector.broadcast %cst_207 : f32 to vector<1x512xf32>
    %248 = arith.maximumf %246, %247 : vector<1x512xf32>
    %c0_208 = arith.constant 0 : index
    %c0_209 = arith.constant 0 : index
    %249 = vector.load %arg6[%c0_208, %c0_209] : memref<512x10xf32, #tpu.memory_space<vmem>>, vector<512x10xf32>
    %cst_210 = arith.constant dense<0.000000e+00> : vector<1x10xf32>
    %250 = tpu.matmul %248, %249, %cst_210 {dimension_numbers = #tpu.dot_dimension_numbers<[1], [0], [0], [1], [0, 0, 1, 1], [], []>} : vector<1x512xf32>, vector<512x10xf32>, vector<1x10xf32> -> vector<1x10xf32>
    %c1_211 = arith.constant 1 : index
    %c0_212 = arith.constant 0 : index
    %251 = vector.load %arg7[%c1_211, %c0_212] : memref<2x10xf32, #tpu.memory_space<vmem>>, vector<1x10xf32>
    tpu.vector_store %arg7[%c1_211, %c0_212], %250 {strides = array<i32>} : memref<2x10xf32, #tpu.memory_space<vmem>>, vector<1x10xf32>,
    return
  }
  func.func @transform_0(%arg0: i32) -> (i32, i32, i32) {
    %c0_i32 = arith.constant 0 : i32
    %c0_i32_0 = arith.constant 0 : i32
    %c0_i32_1 = arith.constant 0 : i32
    %c0_i32_2 = arith.constant 0 : i32
    return %c0_i32, %c0_i32_0, %c0_i32_1 : i32, i32, i32
  }
  func.func @transform_1(%arg0: i32) -> (i32, i32, i32) {
    %c0_i32 = arith.constant 0 : i32
    %c0_i32_0 = arith.constant 0 : i32
    %c0_i32_1 = arith.constant 0 : i32
    %c0_i32_2 = arith.constant 0 : i32
    return %c0_i32, %c0_i32_0, %c0_i32_1 : i32, i32, i32
  }
  func.func @transform_2(%arg0: i32) -> (i32, i32, i32) {
    %c0_i32 = arith.constant 0 : i32
    %c0_i32_0 = arith.constant 0 : i32
    %c0_i32_1 = arith.constant 0 : i32
    %c0_i32_2 = arith.constant 0 : i32
    return %c0_i32, %c0_i32_0, %c0_i32_1 : i32, i32, i32
  }
  func.func @transform_3(%arg0: i32) -> (i32, i32, i32) {
    %c0_i32 = arith.constant 0 : i32
    %c0_i32_0 = arith.constant 0 : i32
    %c0_i32_1 = arith.constant 0 : i32
    %c0_i32_2 = arith.constant 0 : i32
    return %c0_i32, %c0_i32_0, %c0_i32_1 : i32, i32, i32
  }
  func.func @transform_4(%arg0: i32) -> (i32, i32, i32) {
    %c0_i32 = arith.constant 0 : i32
    %c0_i32_0 = arith.constant 0 : i32
    %c0_i32_1 = arith.constant 0 : i32
    %c0_i32_2 = arith.constant 0 : i32
    return %c0_i32, %c0_i32_0, %c0_i32_1 : i32, i32, i32
  }
  func.func @transform_5(%arg0: i32) -> (i32, i32) {
    %c0_i32 = arith.constant 0 : i32
    %c0_i32_0 = arith.constant 0 : i32
    %c0_i32_1 = arith.constant 0 : i32
    return %c0_i32, %c0_i32_0 : i32, i32
  }
  func.func @transform_6(%arg0: i32) -> (i32, i32) {
    %c0_i32 = arith.constant 0 : i32
    %c0_i32_0 = arith.constant 0 : i32
    %c0_i32_1 = arith.constant 0 : i32
    return %c0_i32, %c0_i32_0 : i32, i32
  }
}

</mosaic_0001>

<bundles_post_ra>
// kernel: lenet_forward.1
= control target key start
LH: loop header
LB: loop body
LE: loop exit
PB: predicated region body
PF: predicated region fallthrough
CT: control target
= control target key end

     0   :  { %11 = vsyncpa [#allocation5], 0  ;;  %s9325_s0 = inlined_call_operand.vmem [shape: f32[2,32,128], index: 0, kind: input, shape index: {}]   ;;  %s9326_s1 = inlined_call_operand.hbm [shape: f32[3,128,512], index: 1, kind: input, shape index: {}]   ;;  %s9327_s2 = inlined_call_operand.hbm [shape: f32[4,256,512], index: 2, kind: input, shape index: {}]   ;;  %s9328_s3 = inlined_call_operand.hbm [shape: f32[3,256,256], index: 3, kind: input, shape index: {}]   ;;  %s9329_s4 = inlined_call_operand.hbm [shape: f32[4,256,512], index: 4, kind: input, shape index: {}]   ;;  %s9330_s5 = inlined_call_operand.vmem [shape: f32[512,10], index: 5, kind: input, shape index: {}]   ;;  %s9331_s6 = inlined_call_operand.hbm [shape: f32[2,10], index: 6, kind: output, shape index: {}]  }
   0x1   :  { %12 = vsyncpa [#allocation8], 0 }
   0x2   :  { %13 = vsyncpa [#allocation11], 0 }
   0x3   :  { %14 = vsyncpa [#allocation6], 0  ;;  %s8509_s21 = smov [#allocation7]   ;;  %s8510_s23 = smov [#allocation4]  }
   0x4   :  { %s34_s22 = sshll.u32 %s8509_s21, 4  ;;  %s22_s24 = sshll.u32 %s8510_s23, 4  ;;  %s35_s22 = int_to_ptr.vmem [resolvable:$true] %s34_s22  ;;  %s23_s24 = int_to_ptr.vmem [resolvable:$true] %s22_s24 }
   0x5   :  { %s8409_s25 = scalar_lea.vmem %s35_s22, 65536  ;;  %p8414_p1 = scmp.lt.s32.totalorder %s35_s22, %s35_s22 }
   0x6   :  { %p8410_p0 = scmp.ne.s32.totalorder %s35_s22, %s8409_s25  ;;  %p8415_p2 = scmp.lt.s32.totalorder %s8409_s25, %s8409_s25 }
   0x8   :  { %p8416_p3 = por %p8415_p2, %p8414_p1 }
   0xa   :  { %p8417_p4 = pnand %p8416_p3, %p8410_p0 }
   0xc   :  { %8420 = shalt.err (!%p8417_p4)
}
   0xd   :  { %s8511_s26 = smov 512   ;;  %s8512_s27 = smov 32  }
   0xe   :  { %40 = dma.hbm_to_vmem [thread:$0]  %s9327_s2, 65536, %s35_s22, [#allocation8], %s8511_s26, %s8511_s26, %s8512_s27  }
   0xf   :  { %s8429_s30 = scalar_lea.vmem %s23_s24, 24576  ;;  %p8434_p6 = scmp.lt.s32.totalorder %s23_s24, %s23_s24 }
  0x10   :  { %p8430_p5 = scmp.ne.s32.totalorder %s23_s24, %s8429_s30  ;;  %p8435_p7 = scmp.lt.s32.totalorder %s8429_s30, %s8429_s30 }
  0x12   :  { %p8436_p8 = por %p8435_p7, %p8434_p6 }
  0x14   :  { %p8437_p9 = pnand %p8436_p8, %p8430_p5 }
  0x16   :  { %8440 = shalt.err (!%p8437_p9)
}
  0x17   :  { %28 = dma.hbm_to_vmem [thread:$0]  %s9326_s1, 24576, %s23_s24, [#allocation5], %s8511_s26, %s8511_s26, %s8512_s27  }
  0x18   :  { %s8513_s9 = smov [#allocation9]  }
  0x19   :  { %s46_s10 = sshll.u32 %s8513_s9, 4  ;;  %s47_s10 = int_to_ptr.vmem [resolvable:$true] %s46_s10 }
  0x1a   :  { %s8449_s11 = scalar_lea.vmem %s47_s10, 24576  ;;  %p8454_p11 = scmp.lt.s32.totalorder %s47_s10, %s47_s10 }
  0x1b   :  { %p8450_p10 = scmp.ne.s32.totalorder %s47_s10, %s8449_s11  ;;  %p8455_p12 = scmp.lt.s32.totalorder %s8449_s11, %s8449_s11 }
  0x1d   :  { %p8456_p13 = por %p8455_p12, %p8454_p11 }
  0x1f   :  { %p8457_p0 = pnand %p8456_p13, %p8450_p10 }
  0x21   :  { %8460 = shalt.err (!%p8457_p0)
}
  0x22   :  { %s8514_s2 = smov 256   ;;  %s8515_s12 = smov 16  }
  0x23   :  { %52 = dma.hbm_to_vmem [thread:$0]  %s9328_s3, 24576, %s47_s10, [#allocation8], %s8514_s2, %s8514_s2, %s8515_s12  }
  0x24   :  { %s8516_s15 = smov [#allocation10]  }
  0x25   :  { %s58_s16 = sshll.u32 %s8516_s15, 4  ;;  %s59_s16 = int_to_ptr.vmem [resolvable:$true] %s58_s16 }
  0x26   :  { %s8469_s1 = scalar_lea.vmem %s59_s16, 65536  ;;  %p8474_p2 = scmp.lt.s32.totalorder %s59_s16, %s59_s16 }
  0x27   :  { %p8470_p1 = scmp.ne.s32.totalorder %s59_s16, %s8469_s1  ;;  %p8475_p3 = scmp.lt.s32.totalorder %s8469_s1, %s8469_s1 }
  0x29   :  { %p8476_p4 = por %p8475_p3, %p8474_p2 }
  0x2b   :  { %p8477_p5 = pnand %p8476_p4, %p8470_p1 }
  0x2d   :  { %8480 = shalt.err (!%p8477_p5)
}
  0x2e   :  { %64 = dma.hbm_to_vmem [thread:$0]  %s9329_s4, 65536, %s59_s16, [#allocation11], %s8511_s26, %s8511_s26, %s8512_s27  }
  0x2f   :  { %8501 = dma.done.wait [#allocation5], 24576  }
  0x30   :  { %8502 = vsyncadd [#allocation5], 4294942720 }
  0x31   :  { %8503 = dma.done.wait [#allocation8], 90112  }
  0x32   :  { %8504 = vsyncadd [#allocation8], 4294877184 }
  0x33   :  { %8505 = dma.done.wait [#allocation11], 65536  }
  0x34   :  { %8506 = vsyncadd [#allocation11], 4294901760  ;;  %v9332_v0 = vmov 0.0   ;;  %v213_v1 = vld [vmem:[#allocation4 + $0x3e8] sm:$0xff]  ;;  %v215_v2 = vld [vmem:[#allocation4 + $0x3f8] sm:$0xff]  ;;  %vm867_vm0 = vcmask 1045504  }
  0x35   :  { %280 = vmatprep.mubr.f32.mxu0 %v9332_v0  ;;  %369 = vmatprep.mubr.f32.mxu1 %v9332_v0  ;;  %v212_v3 = vld [vmem:[#allocation4 + $0x3e0] sm:$0xff]  ;;  %v214_v4 = vld [vmem:[#allocation4 + $0x3f0] sm:$0xff]  ;;  %v209_v5 = vld [vmem:[#allocation4 + $0x3c8] sm:$0xff]  ;;  %vm860_vm3 = vcmask 244736   ;;  %vm1315_vm6 = vcmask 1046528   ;;  %vm2080_vm7 = vcmask 1044480  }
  0x36   :  { %216 = vmatprep.subr.mxu0 %v213_v1  ;;  %305 = vmatprep.subr.mxu1 %v215_v2  ;;  %v211_v6 = vld [vmem:[#allocation4 + $0x3d8] sm:$0xff]  ;;  %v208_v7 = vld [vmem:[#allocation4 + $0x3c0] sm:$0xff]  ;;  %v210_v8 = vld [vmem:[#allocation4 + $0x3d0] sm:$0xff]  ;;  %vm2260_vm8 = vcmask 1043456   ;;  %vm2257_vm9 = vcmask 97280   ;;  %vm4159_vm10 = vcmask 73728  }
  0x37   :  { %217 = vmatpush1.msra.mxu0 %v212_v3  ;;  %306 = vmatpush1.msra.mxu1 %v214_v4  ;;  %v205_v9 = vld [vmem:[#allocation4 + $0x3a8] sm:$0xff]  ;;  %v207_v10 = vld [vmem:[#allocation4 + $0x3b8] sm:$0xff]  ;;  %v204_v11 = vld [vmem:[#allocation4 + $0x3a0] sm:$0xff]  ;;  %s8518_s10 = smov [#allocation12]  }
  0x38   :  { %218 = vmatprep.subr.mxu0 %v209_v5  ;;  %307 = vmatprep.subr.mxu1 %v211_v6  ;;  %v206_v12 = vld [vmem:[#allocation4 + $0x3b0] sm:$0xff]  ;;  %v201_v13 = vld [vmem:[#allocation4 + $0x388] sm:$0xff]  ;;  %v203_v14 = vld [vmem:[#allocation4 + $0x398] sm:$0xff]  ;;  %s8200_s11 = sshll.u32 %s8518_s10, 4  ;;  %s8201_s11 = int_to_ptr.vmem [resolvable:$true] %s8200_s11 }
  0x39   :  { %219 = vmatpush1.msra.mxu0 %v208_v7  ;;  %308 = vmatpush1.msra.mxu1 %v210_v8  ;;  %v200_v15 = vld [vmem:[#allocation4 + $0x380] sm:$0xff]  ;;  %v202_v16 = vld [vmem:[#allocation4 + $0x390] sm:$0xff]  ;;  %v197_v17 = vld [vmem:[#allocation4 + $0x368] sm:$0xff]  ;;  %s8481_s2 = scalar_lea.vmem %s8201_s11, 32  ;;  %p8486_p7 = scmp.lt.s32.totalorder %s8201_s11, %s8201_s11 }
  0x3a   :  { %220 = vmatprep.subr.mxu0 %v205_v9  ;;  %309 = vmatprep.subr.mxu1 %v207_v10  ;;  %v199_v18 = vld [vmem:[#allocation4 + $0x378] sm:$0xff]  ;;  %v196_v19 = vld [vmem:[#allocation4 + $0x360] sm:$0xff]  ;;  %v198_v20 = vld [vmem:[#allocation4 + $0x370] sm:$0xff]  ;;  %p8482_p6 = scmp.ne.s32.totalorder %s8201_s11, %s8481_s2  ;;  %p8487_p8 = scmp.lt.s32.totalorder %s8481_s2, %s8481_s2 }
  0x3b   :  { %221 = vmatpush1.msra.mxu0 %v204_v11  ;;  %310 = vmatpush1.msra.mxu1 %v206_v12  ;;  %v193_v21 = vld [vmem:[#allocation4 + $0x348] sm:$0xff]  ;;  %v195_v22 = vld [vmem:[#allocation4 + $0x358] sm:$0xff]  ;;  %v192_v23 = vld [vmem:[#allocation4 + $0x340] sm:$0xff] }
  0x3c   :  { %222 = vmatprep.subr.mxu0 %v201_v13  ;;  %311 = vmatprep.subr.mxu1 %v203_v14  ;;  %v194_v24 = vld [vmem:[#allocation4 + $0x350] sm:$0xff]  ;;  %v189_v25 = vld [vmem:[#allocation4 + $0x328] sm:$0xff]  ;;  %v191_v26 = vld [vmem:[#allocation4 + $0x338] sm:$0xff]  ;;  %p8488_p9 = por %p8487_p8, %p8486_p7 }
  0x3d   :  { %223 = vmatpush1.msra.mxu0 %v200_v15  ;;  %312 = vmatpush1.msra.mxu1 %v202_v16  ;;  %v188_v27 = vld [vmem:[#allocation4 + $0x320] sm:$0xff]  ;;  %v190_v28 = vld [vmem:[#allocation4 + $0x330] sm:$0xff]  ;;  %v185_v29 = vld [vmem:[#allocation4 + $0x308] sm:$0xff] }
  0x3e   :  { %224 = vmatprep.subr.mxu0 %v197_v17  ;;  %313 = vmatprep.subr.mxu1 %v199_v18  ;;  %v187_v30 = vld [vmem:[#allocation4 + $0x318] sm:$0xff]  ;;  %v184_v31 = vld [vmem:[#allocation4 + $0x300] sm:$0xff]  ;;  %v186_v32 = vld [vmem:[#allocation4 + $0x310] sm:$0xff]  ;;  %p8489_p10 = pnand %p8488_p9, %p8482_p6 }
  0x3f   :  { %225 = vmatpush1.msra.mxu0 %v196_v19  ;;  %314 = vmatpush1.msra.mxu1 %v198_v20  ;;  %v181_v33 = vld [vmem:[#allocation4 + $0x2e8] sm:$0xff]  ;;  %v183_v34 = vld [vmem:[#allocation4 + $0x2f8] sm:$0xff]  ;;  %v180_v35 = vld [vmem:[#allocation4 + $0x2e0] sm:$0xff] }
  0x40   :  { %226 = vmatprep.subr.mxu0 %v193_v21  ;;  %315 = vmatprep.subr.mxu1 %v195_v22  ;;  %v182_v36 = vld [vmem:[#allocation4 + $0x2f0] sm:$0xff]  ;;  %v177_v37 = vld [vmem:[#allocation4 + $0x2c8] sm:$0xff]  ;;  %v179_v38 = vld [vmem:[#allocation4 + $0x2d8] sm:$0xff] }
  0x41   :  { %227 = vmatpush1.msra.mxu0 %v192_v23  ;;  %316 = vmatpush1.msra.mxu1 %v194_v24  ;;  %v176_v39 = vld [vmem:[#allocation4 + $0x2c0] sm:$0xff]  ;;  %v178_v40 = vld [vmem:[#allocation4 + $0x2d0] sm:$0xff]  ;;  %v173_v41 = vld [vmem:[#allocation4 + $0x2a8] sm:$0xff] }
  0x42   :  { %228 = vmatprep.subr.mxu0 %v189_v25  ;;  %317 = vmatprep.subr.mxu1 %v191_v26  ;;  %v175_v42 = vld [vmem:[#allocation4 + $0x2b8] sm:$0xff]  ;;  %v172_v43 = vld [vmem:[#allocation4 + $0x2a0] sm:$0xff]  ;;  %v174_v44 = vld [vmem:[#allocation4 + $0x2b0] sm:$0xff] }
  0x43   :  { %229 = vmatpush1.msra.mxu0 %v188_v27  ;;  %318 = vmatpush1.msra.mxu1 %v190_v28  ;;  %v169_v45 = vld [vmem:[#allocation4 + $0x288] sm:$0xff]  ;;  %v171_v46 = vld [vmem:[#allocation4 + $0x298] sm:$0xff]  ;;  %v168_v47 = vld [vmem:[#allocation4 + $0x280] sm:$0xff] }
  0x44   :  { %230 = vmatprep.subr.mxu0 %v185_v29  ;;  %319 = vmatprep.subr.mxu1 %v187_v30  ;;  %v170_v48 = vld [vmem:[#allocation4 + $0x290] sm:$0xff]  ;;  %v165_v49 = vld [vmem:[#allocation4 + $0x268] sm:$0xff]  ;;  %v167_v50 = vld [vmem:[#allocation4 + $0x278] sm:$0xff] }
  0x45   :  { %231 = vmatpush1.msra.mxu0 %v184_v31  ;;  %320 = vmatpush1.msra.mxu1 %v186_v32  ;;  %v164_v51 = vld [vmem:[#allocation4 + $0x260] sm:$0xff]  ;;  %v166_v52 = vld [vmem:[#allocation4 + $0x270] sm:$0xff]  ;;  %v161_v53 = vld [vmem:[#allocation4 + $0x248] sm:$0xff] }
  0x46   :  { %232 = vmatprep.subr.mxu0 %v181_v33  ;;  %321 = vmatprep.subr.mxu1 %v183_v34  ;;  %v163_v54 = vld [vmem:[#allocation4 + $0x258] sm:$0xff]  ;;  %v160_v55 = vld [vmem:[#allocation4 + $0x240] sm:$0xff]  ;;  %v162_v56 = vld [vmem:[#allocation4 + $0x250] sm:$0xff] }
  0x47   :  { %233 = vmatpush1.msra.mxu0 %v180_v35  ;;  %322 = vmatpush1.msra.mxu1 %v182_v36  ;;  %v157_v57 = vld [vmem:[#allocation4 + $0x228] sm:$0xff]  ;;  %v159_v58 = vld [vmem:[#allocation4 + $0x238] sm:$0xff]  ;;  %v156_v59 = vld [vmem:[#allocation4 + $0x220] sm:$0xff] }
  0x48   :  { %234 = vmatprep.subr.mxu0 %v177_v37  ;;  %323 = vmatprep.subr.mxu1 %v179_v38  ;;  %v158_v60 = vld [vmem:[#allocation4 + $0x230] sm:$0xff]  ;;  %v153_v61 = vld [vmem:[#allocation4 + $0x208] sm:$0xff]  ;;  %v155_v62 = vld [vmem:[#allocation4 + $0x218] sm:$0xff] }
  0x49   :  { %235 = vmatpush1.msra.mxu0 %v176_v39  ;;  %324 = vmatpush1.msra.mxu1 %v178_v40  ;;  %v152_v63 = vld [vmem:[#allocation4 + $0x200] sm:$0xff]  ;;  %v154_v1 = vld [vmem:[#allocation4 + $0x210] sm:$0xff]  ;;  %v144_v3 = vld [vmem:[#allocation4 + $0x1e8] sm:$0xff] }
  0x4a   :  { %236 = vmatprep.subr.mxu0 %v173_v41  ;;  %325 = vmatprep.subr.mxu1 %v175_v42  ;;  %v147_v2 = vld [vmem:[%s9325_s0 + $0x1] sm:$0xff]  ;;  %v143_v5 = vld [vmem:[#allocation4 + $0x1e0] sm:$0xff]  ;;  %v140_v7 = vld [vmem:[#allocation4 + $0x1c8] sm:$0xff] }
  0x4b   :  { %237 = vmatpush1.msra.mxu0 %v172_v43  ;;  %326 = vmatpush1.msra.mxu1 %v174_v44  ;;  %v146_v4 = vld [vmem:[#allocation4 + $0x1f8] sm:$0xff]  ;;  %v145_v6 = vld [vmem:[#allocation4 + $0x1f0] sm:$0xff]  ;;  %v139_v9 = vld [vmem:[#allocation4 + $0x1c0] sm:$0xff] }
  0x4c   :  { %238 = vmatprep.subr.mxu0 %v169_v45  ;;  %327 = vmatprep.subr.mxu1 %v171_v46  ;;  %v142_v8 = vld [vmem:[#allocation4 + $0x1d8] sm:$0xff]  ;;  %v141_v10 = vld [vmem:[#allocation4 + $0x1d0] sm:$0xff]  ;;  %v136_v11 = vld [vmem:[#allocation4 + $0x1a8] sm:$0xff] }
  0x4d   :  { %239 = vmatpush1.msra.mxu0 %v168_v47  ;;  %328 = vmatpush1.msra.mxu1 %v170_v48  ;;  %v138_v12 = vld [vmem:[#allocation4 + $0x1b8] sm:$0xff]  ;;  %v135_v13 = vld [vmem:[#allocation4 + $0x1a0] sm:$0xff]  ;;  %v137_v14 = vld [vmem:[#allocation4 + $0x1b0] sm:$0xff] }
  0x4e   :  { %240 = vmatprep.subr.mxu0 %v165_v49  ;;  %329 = vmatprep.subr.mxu1 %v167_v50  ;;  %v132_v15 = vld [vmem:[#allocation4 + $0x188] sm:$0xff]  ;;  %v134_v16 = vld [vmem:[#allocation4 + $0x198] sm:$0xff]  ;;  %v131_v17 = vld [vmem:[#allocation4 + $0x180] sm:$0xff] }
  0x4f   :  { %241 = vmatpush1.msra.mxu0 %v164_v51  ;;  %330 = vmatpush1.msra.mxu1 %v166_v52  ;;  %v133_v18 = vld [vmem:[#allocation4 + $0x190] sm:$0xff]  ;;  %v128_v19 = vld [vmem:[#allocation4 + $0x168] sm:$0xff]  ;;  %v130_v20 = vld [vmem:[#allocation4 + $0x178] sm:$0xff] }
  0x50   :  { %242 = vmatprep.subr.mxu0 %v161_v53  ;;  %331 = vmatprep.subr.mxu1 %v163_v54  ;;  %v127_v21 = vld [vmem:[#allocation4 + $0x160] sm:$0xff]  ;;  %v129_v22 = vld [vmem:[#allocation4 + $0x170] sm:$0xff]  ;;  %v124_v23 = vld [vmem:[#allocation4 + $0x148] sm:$0xff] }
  0x51   :  { %243 = vmatpush1.msra.mxu0 %v160_v55  ;;  %332 = vmatpush1.msra.mxu1 %v162_v56  ;;  %v126_v24 = vld [vmem:[#allocation4 + $0x158] sm:$0xff]  ;;  %v123_v25 = vld [vmem:[#allocation4 + $0x140] sm:$0xff]  ;;  %v125_v26 = vld [vmem:[#allocation4 + $0x150] sm:$0xff] }
  0x52   :  { %244 = vmatprep.subr.mxu0 %v157_v57  ;;  %333 = vmatprep.subr.mxu1 %v159_v58  ;;  %v120_v27 = vld [vmem:[#allocation4 + $0x128] sm:$0xff]  ;;  %v122_v28 = vld [vmem:[#allocation4 + $0x138] sm:$0xff]  ;;  %v119_v29 = vld [vmem:[#allocation4 + $0x120] sm:$0xff] }
  0x53   :  { %245 = vmatpush1.msra.mxu0 %v156_v59  ;;  %334 = vmatpush1.msra.mxu1 %v158_v60  ;;  %v121_v30 = vld [vmem:[#allocation4 + $0x130] sm:$0xff]  ;;  %v116_v31 = vld [vmem:[#allocation4 + $0x108] sm:$0xff]  ;;  %v118_v32 = vld [vmem:[#allocation4 + $0x118] sm:$0xff] }
  0x54   :  { %246 = vmatprep.subr.mxu0 %v153_v61  ;;  %335 = vmatprep.subr.mxu1 %v155_v62  ;;  %v115_v33 = vld [vmem:[#allocation4 + $0x100] sm:$0xff]  ;;  %v117_v34 = vld [vmem:[#allocation4 + $0x110] sm:$0xff]  ;;  %v112_v35 = vld [vmem:[#allocation4 + $0xe8] sm:$0xff] }
  0x55   :  { %247 = vmatpush1.msra.mxu0 %v152_v63  ;;  %336 = vmatpush1.msra.mxu1 %v154_v1  ;;  %v114_v36 = vld [vmem:[#allocation4 + $0xf8] sm:$0xff]  ;;  %v111_v37 = vld [vmem:[#allocation4 + $0xe0] sm:$0xff]  ;;  %v113_v38 = vld [vmem:[#allocation4 + $0xf0] sm:$0xff] }
  0x56   :  { %281 = vmatmul.mubr.f32.vlgmr.msra.gmra.mxu0 %v147_v2  ;;  %370 = vmatmul.mubr.f32.vlgmr.msra.gmra.mxu1 %v147_v2  ;;  %v108_v39 = vld [vmem:[#allocation4 + $0xc8] sm:$0xff]  ;;  %v110_v40 = vld [vmem:[#allocation4 + $0xd8] sm:$0xff]  ;;  %v107_v42 = vld [vmem:[#allocation4 + $0xc0] sm:$0xff] }
  0x57   :  { %394 = vmatprep.subr.mxu0 %v144_v3  ;;  %483 = vmatprep.subr.mxu1 %v146_v4  ;;  %v148_v41 = vld [vmem:[%s9325_s0 + $0x9] sm:$0xff]  ;;  %v109_v43 = vld [vmem:[#allocation4 + $0xd0] sm:$0xff]  ;;  %v104_v44 = vld [vmem:[#allocation4 + $0xa8] sm:$0xff] }
  0x58   :  { %395 = vmatpush1.msra.mxu0 %v143_v5  ;;  %484 = vmatpush1.msra.mxu1 %v145_v6  ;;  %v106_v45 = vld [vmem:[#allocation4 + $0xb8] sm:$0xff]  ;;  %v103_v46 = vld [vmem:[#allocation4 + $0xa0] sm:$0xff]  ;;  %v105_v47 = vld [vmem:[#allocation4 + $0xb0] sm:$0xff] }
  0x59   :  { %396 = vmatprep.subr.mxu0 %v140_v7  ;;  %485 = vmatprep.subr.mxu1 %v142_v8  ;;  %v100_v48 = vld [vmem:[#allocation4 + $0x88] sm:$0xff]  ;;  %v102_v49 = vld [vmem:[#allocation4 + $0x98] sm:$0xff]  ;;  %v99_v51 = vld [vmem:[#allocation4 + $0x80] sm:$0xff] }
  0x5a   :  { %397 = vmatpush1.msra.mxu0 %v139_v9  ;;  %486 = vmatpush1.msra.mxu1 %v141_v10  ;;  %v149_v50 = vld [vmem:[%s9325_s0 + $0x11] sm:$0xff]  ;;  %v101_v52 = vld [vmem:[#allocation4 + $0x90] sm:$0xff]  ;;  %v98_v54 = vld [vmem:[#allocation4 + $0x78] sm:$0xff] }
  0x5b   :  { %398 = vmatprep.subr.mxu0 %v136_v11  ;;  %487 = vmatprep.subr.mxu1 %v138_v12  ;;  %v96_v53 = vld [vmem:[#allocation4 + $0x68] sm:$0xff]  ;;  %v95_v55 = vld [vmem:[#allocation4 + $0x60] sm:$0xff]  ;;  %v97_v56 = vld [vmem:[#allocation4 + $0x70] sm:$0xff] }
  0x5c   :  { %399 = vmatpush1.msra.mxu0 %v135_v13  ;;  %488 = vmatpush1.msra.mxu1 %v137_v14  ;;  %v92_v57 = vld [vmem:[#allocation4 + $0x48] sm:$0xff]  ;;  %v94_v58 = vld [vmem:[#allocation4 + $0x58] sm:$0xff]  ;;  %v91_v60 = vld [vmem:[#allocation4 + $0x40] sm:$0xff] }
  0x5d   :  { %400 = vmatprep.subr.mxu0 %v132_v15  ;;  %489 = vmatprep.subr.mxu1 %v134_v16  ;;  %v150_v59 = vld [vmem:[%s9325_s0 + $0x19] sm:$0x3f]  ;;  %v93_v61 = vld [vmem:[#allocation4 + $0x50] sm:$0xff]  ;;  %v90_v63 = vld [vmem:[#allocation4 + $0x38] sm:$0xff] }
  0x5e   :  { %401 = vmatpush1.msra.mxu0 %v131_v17  ;;  %490 = vmatpush1.msra.mxu1 %v133_v18  ;;  %v88_v62 = vld [vmem:[#allocation4 + $0x28] sm:$0xff]  ;;  %v87_v1 = vld [vmem:[#allocation4 + $0x20] sm:$0xff]  ;;  %v89_v2 = vld [vmem:[#allocation4 + $0x30] sm:$0xff] }
  0x5f   :  { %402 = vmatprep.subr.mxu0 %v128_v19  ;;  %491 = vmatprep.subr.mxu1 %v130_v20  ;;  %v84_v3 = vld [vmem:[#allocation4 + $0x8] sm:$0xff]  ;;  %v86_v4 = vld [vmem:[#allocation4 + $0x18] sm:$0xff]  ;;  %v83_v5 = vld [vmem:[#allocation4] sm:$0xff] }
  0x60   :  { %403 = vmatpush1.msra.mxu0 %v127_v21  ;;  %492 = vmatpush1.msra.mxu1 %v129_v22  ;;  %v85_v6 = vld [vmem:[#allocation4 + $0x10] sm:$0xff]  ;;  %v638_v8 = vld [vmem:[#allocation4 + $0x5e8] sm:$0xff]  ;;  %v640_v9 = vld [vmem:[#allocation4 + $0x5f8] sm:$0xff] }
  0x61   :  { %404 = vmatprep.subr.mxu0 %v124_v23  ;;  %493 = vmatprep.subr.mxu1 %v126_v24  ;;  %v79_v7 = vld [vmem:[%s9325_s0] sm:$0xff]  ;;  %v637_v10 = vld [vmem:[#allocation4 + $0x5e0] sm:$0xff]  ;;  %v634_v12 = vld [vmem:[#allocation4 + $0x5c8] sm:$0xff] }
  0x62   :  { %405 = vmatpush1.msra.mxu0 %v123_v25  ;;  %494 = vmatpush1.msra.mxu1 %v125_v26  ;;  %v639_v11 = vld [vmem:[#allocation4 + $0x5f0] sm:$0xff]  ;;  %v636_v13 = vld [vmem:[#allocation4 + $0x5d8] sm:$0xff]  ;;  %v633_v14 = vld [vmem:[#allocation4 + $0x5c0] sm:$0xff] }
  0x63   :  { %406 = vmatprep.subr.mxu0 %v120_v27  ;;  %495 = vmatprep.subr.mxu1 %v122_v28  ;;  %v635_v15 = vld [vmem:[#allocation4 + $0x5d0] sm:$0xff]  ;;  %v80_v16 = vld [vmem:[%s9325_s0 + $0x8] sm:$0xff]  ;;  %v630_v17 = vld [vmem:[#allocation4 + $0x5a8] sm:$0xff] }
  0x64   :  { %407 = vmatpush1.msra.mxu0 %v119_v29  ;;  %496 = vmatpush1.msra.mxu1 %v121_v30  ;;  %v632_v18 = vld [vmem:[#allocation4 + $0x5b8] sm:$0xff]  ;;  %v629_v19 = vld [vmem:[#allocation4 + $0x5a0] sm:$0xff]  ;;  %v631_v20 = vld [vmem:[#allocation4 + $0x5b0] sm:$0xff] }
  0x65   :  { %408 = vmatprep.subr.mxu0 %v116_v31  ;;  %497 = vmatprep.subr.mxu1 %v118_v32  ;;  %v626_v21 = vld [vmem:[#allocation4 + $0x588] sm:$0xff]  ;;  %v628_v22 = vld [vmem:[#allocation4 + $0x598] sm:$0xff]  ;;  %v625_v23 = vld [vmem:[#allocation4 + $0x580] sm:$0xff] }
  0x66   :  { %409 = vmatpush1.msra.mxu0 %v115_v33  ;;  %498 = vmatpush1.msra.mxu1 %v117_v34  ;;  %v627_v24 = vld [vmem:[#allocation4 + $0x590] sm:$0xff]  ;;  %v81_v25 = vld [vmem:[%s9325_s0 + $0x10] sm:$0xff]  ;;  %v622_v26 = vld [vmem:[#allocation4 + $0x568] sm:$0xff] }
  0x67   :  { %410 = vmatprep.subr.mxu0 %v112_v35  ;;  %499 = vmatprep.subr.mxu1 %v114_v36  ;;  %v624_v27 = vld [vmem:[#allocation4 + $0x578] sm:$0xff]  ;;  %v621_v28 = vld [vmem:[#allocation4 + $0x560] sm:$0xff]  ;;  %v623_v29 = vld [vmem:[#allocation4 + $0x570] sm:$0xff] }
  0x68   :  { %411 = vmatpush1.msra.mxu0 %v111_v37  ;;  %500 = vmatpush1.msra.mxu1 %v113_v38  ;;  %v618_v30 = vld [vmem:[#allocation4 + $0x548] sm:$0xff]  ;;  %v620_v31 = vld [vmem:[#allocation4 + $0x558] sm:$0xff]  ;;  %v617_v32 = vld [vmem:[#allocation4 + $0x540] sm:$0xff] }
  0x69   :  { %286 = vmatprep.mubr.f32.mxu0 %v9332_v0  ;;  %375 = vmatprep.mubr.f32.mxu1 %v9332_v0  ;;  %v619_v33 = vld [vmem:[#allocation4 + $0x550] sm:$0xff]  ;;  %v82_v34 = vld [vmem:[%s9325_s0 + $0x18] sm:$0x3f]  ;;  %v616_v36 = vld [vmem:[#allocation4 + $0x538] sm:$0xff] }
  0x6a   :  { %412 = vmatprep.subr.mxu0 %v108_v39  ;;  %501 = vmatprep.subr.mxu1 %v110_v40  ;;  %v614_v35 = vld [vmem:[#allocation4 + $0x528] sm:$0xff]  ;;  %v613_v37 = vld [vmem:[#allocation4 + $0x520] sm:$0xff]  ;;  %v615_v38 = vld [vmem:[#allocation4 + $0x530] sm:$0xff] }
  0x6b   :  { %287 = vmatmul.mubr.f32.gmra.mxu0 %v148_v41  ;;  %376 = vmatmul.mubr.f32.gmra.mxu1 %v148_v41  ;;  %v610_v39 = vld [vmem:[#allocation4 + $0x508] sm:$0xff]  ;;  %v612_v40 = vld [vmem:[#allocation4 + $0x518] sm:$0xff]  ;;  %v609_v41 = vld [vmem:[#allocation4 + $0x500] sm:$0xff] }
  0x6c   :  { %413 = vmatpush1.msra.mxu0 %v107_v42  ;;  %502 = vmatpush1.msra.mxu1 %v109_v43  ;;  %v611_v42 = vld [vmem:[#allocation4 + $0x510] sm:$0xff]  ;;  %v606_v43 = vld [vmem:[#allocation4 + $0x4e8] sm:$0xff] }
  0x6d   :  { %414 = vmatprep.subr.mxu0 %v104_v44  ;;  %503 = vmatprep.subr.mxu1 %v106_v45  ;;  %v608_v44 = vld [vmem:[#allocation4 + $0x4f8] sm:$0xff]  ;;  %v605_v45 = vld [vmem:[#allocation4 + $0x4e0] sm:$0xff] }
  0x6e   :  { %415 = vmatpush1.msra.mxu0 %v103_v46  ;;  %504 = vmatpush1.msra.mxu1 %v105_v47  ;;  %v607_v46 = vld [vmem:[#allocation4 + $0x4f0] sm:$0xff]  ;;  %v602_v47 = vld [vmem:[#allocation4 + $0x4c8] sm:$0xff] }
  0x6f   :  { %292 = vmatprep.mubr.f32.mxu0 %v9332_v0  ;;  %381 = vmatprep.mubr.f32.mxu1 %v9332_v0 }
  0x70   :  { %416 = vmatprep.subr.mxu0 %v100_v48  ;;  %505 = vmatprep.subr.mxu1 %v102_v49  ;;  %v604_v48 = vld [vmem:[#allocation4 + $0x4d8] sm:$0xff]  ;;  %v601_v49 = vld [vmem:[#allocation4 + $0x4c0] sm:$0xff] }
  0x71   :  { %293 = vmatmul.mubr.f32.gmra.mxu0 %v149_v50  ;;  %382 = vmatmul.mubr.f32.gmra.mxu1 %v149_v50  ;;  %v603_v50 = vld [vmem:[#allocation4 + $0x4d0] sm:$0xff] }
  0x72   :  { %417 = vmatpush1.msra.mxu0 %v99_v51  ;;  %506 = vmatpush1.msra.mxu1 %v101_v52  ;;  %v598_v51 = vld [vmem:[#allocation4 + $0x4a8] sm:$0xff]  ;;  %v600_v52 = vld [vmem:[#allocation4 + $0x4b8] sm:$0xff] }
  0x73   :  { %418 = vmatprep.subr.mxu0 %v96_v53  ;;  %507 = vmatprep.subr.mxu1 %v98_v54  ;;  %v597_v53 = vld [vmem:[#allocation4 + $0x4a0] sm:$0xff]  ;;  %v599_v54 = vld [vmem:[#allocation4 + $0x4b0] sm:$0xff] }
  0x74   :  { %419 = vmatpush1.msra.mxu0 %v95_v55  ;;  %508 = vmatpush1.msra.mxu1 %v97_v56  ;;  %v594_v55 = vld [vmem:[#allocation4 + $0x488] sm:$0xff]  ;;  %v596_v56 = vld [vmem:[#allocation4 + $0x498] sm:$0xff] }
  0x75   :  { %298 = vmatprep.mubr.f32.mxu0 %v9332_v0  ;;  %387 = vmatprep.mubr.f32.mxu1 %v9332_v0 }
  0x76   :  { %420 = vmatprep.subr.mxu0 %v92_v57  ;;  %509 = vmatprep.subr.mxu1 %v94_v58  ;;  %v593_v57 = vld [vmem:[#allocation4 + $0x480] sm:$0xff]  ;;  %v595_v58 = vld [vmem:[#allocation4 + $0x490] sm:$0xff] }
  0x77   :  { %299 = vmatmul.mubr.f32.gmra.mxu0 %v150_v59  ;;  %388 = vmatmul.mubr.f32.gmra.mxu1 %v150_v59  ;;  %v590_v59 = vld [vmem:[#allocation4 + $0x468] sm:$0xff] }
  0x78   :  { %421 = vmatpush1.msra.mxu0 %v91_v60  ;;  %510 = vmatpush1.msra.mxu1 %v93_v61  ;;  %v592_v60 = vld [vmem:[#allocation4 + $0x478] sm:$0xff]  ;;  %v589_v61 = vld [vmem:[#allocation4 + $0x460] sm:$0xff] }
  0x79   :  { %422 = vmatprep.subr.mxu0 %v88_v62  ;;  %511 = vmatprep.subr.mxu1 %v90_v63  ;;  %v591_v62 = vld [vmem:[#allocation4 + $0x470] sm:$0xff]  ;;  %v586_v63 = vld [vmem:[#allocation4 + $0x448] sm:$0xff] }
  0x7a   :  { %423 = vmatpush1.msra.mxu0 %v87_v1  ;;  %512 = vmatpush1.msra.mxu1 %v89_v2  ;;  %v588_v1 = vld [vmem:[#allocation4 + $0x458] sm:$0xff]  ;;  %v585_v2 = vld [vmem:[#allocation4 + $0x440] sm:$0xff] }
  0x7b   :  { %424 = vmatprep.subr.mxu0 %v84_v3  ;;  %513 = vmatprep.subr.mxu1 %v86_v4  ;;  %v587_v3 = vld [vmem:[#allocation4 + $0x450] sm:$0xff]  ;;  %v582_v4 = vld [vmem:[#allocation4 + $0x428] sm:$0xff] }
  0x7c   :  { %425 = vmatpush1.msra.mxu0 %v83_v5  ;;  %458 = vmatprep.mubr.f32.mxu0 %v9332_v0  ;;  %v584_v5 = vld [vmem:[#allocation4 + $0x438] sm:$0xff] }
  0x7d   :  { %514 = vmatpush1.msra.mxu1 %v85_v6  ;;  %547 = vmatprep.mubr.f32.mxu1 %v9332_v0  ;;  %v581_v6 = vld [vmem:[#allocation4 + $0x420] sm:$0xff] }
  0x7e   :  { %459 = vmatmul.mubr.f32.vlgmr.msra.gmra.mxu0 %v79_v7  ;;  %548 = vmatmul.mubr.f32.vlgmr.msra.gmra.mxu1 %v79_v7  ;;  %v583_v7 = vld [vmem:[#allocation4 + $0x430] sm:$0xff] }
  0x7f   :  { %641 = vmatprep.subr.mxu0 %v638_v8  ;;  %730 = vmatprep.subr.mxu1 %v640_v9  ;;  %v578_v8 = vld [vmem:[#allocation4 + $0x408] sm:$0xff]  ;;  %v580_v9 = vld [vmem:[#allocation4 + $0x418] sm:$0xff] }
  0x80   :  { %642 = vmatpush1.msra.mxu0 %v637_v10  ;;  %731 = vmatpush1.msra.mxu1 %v639_v11  ;;  %v577_v10 = vld [vmem:[#allocation4 + $0x400] sm:$0xff]  ;;  %v579_v11 = vld [vmem:[#allocation4 + $0x410] sm:$0xff] }
  0x81   :  { %643 = vmatprep.subr.mxu0 %v634_v12  ;;  %732 = vmatprep.subr.mxu1 %v636_v13  ;;  %v572_v12 = vld [vmem:[%s9325_s0 + $0x2] sm:$0xff]  ;;  %v573_v13 = vld [vmem:[%s9325_s0 + $0xa] sm:$0xff] }
  0x82   :  { %464 = vmatprep.mubr.f32.mxu0 %v9332_v0  ;;  %553 = vmatprep.mubr.f32.mxu1 %v9332_v0 }
  0x83   :  { %644 = vmatpush1.msra.mxu0 %v633_v14  ;;  %733 = vmatpush1.msra.mxu1 %v635_v15  ;;  %v574_v14 = vld [vmem:[%s9325_s0 + $0x12] sm:$0xff]  ;;  %v575_v15 = vld [vmem:[%s9325_s0 + $0x1a] sm:$0x3f] }
  0x84   :  { %465 = vmatmul.mubr.f32.gmra.mxu0 %v80_v16  ;;  %554 = vmatmul.mubr.f32.gmra.mxu1 %v80_v16 }
  0x85   :  { %645 = vmatprep.subr.mxu0 %v630_v17  ;;  %734 = vmatprep.subr.mxu1 %v632_v18 }
  0x86   :  { %646 = vmatpush1.msra.mxu0 %v629_v19  ;;  %735 = vmatpush1.msra.mxu1 %v631_v20 }
  0x87   :  { %647 = vmatprep.subr.mxu0 %v626_v21  ;;  %736 = vmatprep.subr.mxu1 %v628_v22 }
  0x88   :  { %470 = vmatprep.mubr.f32.mxu0 %v9332_v0  ;;  %559 = vmatprep.mubr.f32.mxu1 %v9332_v0 }
  0x89   :  { %648 = vmatpush1.msra.mxu0 %v625_v23  ;;  %737 = vmatpush1.msra.mxu1 %v627_v24 }
  0x8a   :  { %471 = vmatmul.mubr.f32.gmra.mxu0 %v81_v25  ;;  %560 = vmatmul.mubr.f32.gmra.mxu1 %v81_v25 }
  0x8b   :  { %649 = vmatprep.subr.mxu0 %v622_v26  ;;  %738 = vmatprep.subr.mxu1 %v624_v27 }
  0x8c   :  { %650 = vmatpush1.msra.mxu0 %v621_v28  ;;  %739 = vmatpush1.msra.mxu1 %v623_v29 }
  0x8d   :  { %651 = vmatprep.subr.mxu0 %v618_v30  ;;  %740 = vmatprep.subr.mxu1 %v620_v31 }
  0x8e   :  { %476 = vmatprep.mubr.f32.mxu0 %v9332_v0  ;;  %565 = vmatprep.mubr.f32.mxu1 %v9332_v0 }
  0x8f   :  { %652 = vmatpush1.msra.mxu0 %v617_v32  ;;  %741 = vmatpush1.msra.mxu1 %v619_v33 }
  0x90   :  { %477 = vmatmul.mubr.f32.gmra.mxu0 %v82_v34  ;;  %566 = vmatmul.mubr.f32.gmra.mxu1 %v82_v34 }
  0x91   :  { %653 = vmatprep.subr.mxu0 %v614_v35  ;;  %742 = vmatprep.subr.mxu1 %v616_v36 }
  0x92   :  { %654 = vmatpush1.msra.mxu0 %v613_v37  ;;  %743 = vmatpush1.msra.mxu1 %v615_v38 }
  0x93   :  { %655 = vmatprep.subr.mxu0 %v610_v39  ;;  %744 = vmatprep.subr.mxu1 %v612_v40 }
  0x94   :  { %656 = vmatpush1.msra.mxu0 %v609_v41  ;;  %745 = vmatpush1.msra.mxu1 %v611_v42 }
  0x95   :  { %657 = vmatprep.subr.mxu0 %v606_v43  ;;  %746 = vmatprep.subr.mxu1 %v608_v44 }
  0x96   :  { %658 = vmatpush1.msra.mxu0 %v605_v45  ;;  %747 = vmatpush1.msra.mxu1 %v607_v46 }
  0x97   :  { %659 = vmatprep.subr.mxu0 %v602_v47  ;;  %748 = vmatprep.subr.mxu1 %v604_v48  ;;  %v843_v48 = vlaneseq }
  0x98   :  { %660 = vmatpush1.msra.mxu0 %v601_v49  ;;  %749 = vmatpush1.msra.mxu1 %v603_v50 }
  0x99   :  { %661 = vmatprep.subr.mxu0 %v598_v51  ;;  %750 = vmatprep.subr.mxu1 %v600_v52 }
  0x9a   :  { %662 = vmatpush1.msra.mxu0 %v597_v53  ;;  %751 = vmatpush1.msra.mxu1 %v599_v54  ;;  %v8647_v53 = vshrl.u32 %v843_v48, 7 }
  0x9b   :  { %663 = vmatprep.subr.mxu0 %v594_v55  ;;  %752 = vmatprep.subr.mxu1 %v596_v56 }
  0x9c   :  { %664 = vmatpush1.msra.mxu0 %v593_v57  ;;  %753 = vmatpush1.msra.mxu1 %v595_v58  ;;  %v848_v58 = vmul.u32 2, %v8647_v53 }
  0x9d   :  { %665 = vmatprep.subr.mxu0 %v590_v59  ;;  %754 = vmatprep.subr.mxu1 %v592_v60  ;;  %v8651_v59 = vadd.s32 8, %v8647_v53 }
  0x9e   :  { %666 = vmatpush1.msra.mxu0 %v589_v61  ;;  %755 = vmatpush1.msra.mxu1 %v591_v62 }
  0x9f   :  { %667 = vmatprep.subr.mxu0 %v586_v63  ;;  %756 = vmatprep.subr.mxu1 %v588_v1  ;;  %v8653_v1 = vand.u32 127, %v843_v48 }
  0xa0   :  { %668 = vmatpush1.msra.mxu0 %v585_v2  ;;  %757 = vmatpush1.msra.mxu1 %v587_v3 }
  0xa1   :  { %669 = vmatprep.subr.mxu0 %v582_v4  ;;  %758 = vmatprep.subr.mxu1 %v584_v5  ;;  %9343 = vst [vmem:[#allocation18_spill] sm:$0xff] %v8653_v1  ;;  %v854_v4 = vadd.s32 1, %v848_v58 }
  0xa2   :  { %670 = vmatpush1.msra.mxu0 %v581_v6  ;;  %759 = vmatpush1.msra.mxu1 %v583_v7 }
  0xa3   :  { %671 = vmatprep.subr.mxu0 %v578_v8  ;;  %760 = vmatprep.subr.mxu1 %v580_v9 }
  0xa4   :  { %672 = vmatpush1.msra.mxu0 %v577_v10  ;;  %705 = vmatprep.mubr.f32.mxu0 %v9332_v0 }
  0xa5   :  { %761 = vmatpush1.msra.mxu1 %v579_v11  ;;  %794 = vmatprep.mubr.f32.mxu1 %v9332_v0 }
  0xa6   :  { %706 = vmatmul.mubr.f32.vlgmr.msra.gmra.mxu0 %v572_v12  ;;  %795 = vmatmul.mubr.f32.vlgmr.msra.gmra.mxu1 %v572_v12 }
  0xa7   :  { %711 = vmatprep.mubr.f32.mxu0 %v9332_v0  ;;  %800 = vmatprep.mubr.f32.mxu1 %v9332_v0 }
  0xaa   :  { %712 = vmatmul.mubr.f32.gmra.mxu0 %v573_v13  ;;  %801 = vmatmul.mubr.f32.gmra.mxu1 %v573_v13 }
  0xab   :  { %717 = vmatprep.mubr.f32.mxu0 %v9332_v0  ;;  %806 = vmatprep.mubr.f32.mxu1 %v9332_v0 }
  0xae   :  { %718 = vmatmul.mubr.f32.gmra.mxu0 %v574_v14  ;;  %807 = vmatmul.mubr.f32.gmra.mxu1 %v574_v14 }
  0xaf   :  { %723 = vmatprep.mubr.f32.mxu0 %v9332_v0  ;;  %812 = vmatprep.mubr.f32.mxu1 %v9332_v0 }
  0xb2   :  { %724 = vmatmul.mubr.f32.gmra.mxu0 %v575_v15  ;;  %813 = vmatmul.mubr.f32.gmra.mxu1 %v575_v15 }
  0xb3   :  { %938 = vmatprep.mubr.f32.mxu0 %v9332_v0  ;;  %1021 = vmatprep.mubr.f32.mxu1 %v9332_v0 }
 0x116   :  { %v282_v16 = vpop.f32.mrf.mxu0  ;;  %v8637_v17 = vpop.f32.mrf.mxu1 }
 0x118   :  { %v284_v18 = vpop.f32.mrf.mxu0  ;;  %v8639_v19 = vpop.f32.mrf.mxu1 }
 0x12b   :  { %v8641_v20 = vpop.f32.mrf.mxu0  ;;  %v8643_v21 = vpop.f32.mrf.mxu1 }
 0x12d   :  { %v290_v22 = vpop.f32.mrf.mxu0  ;;  %v379_v23 = vpop.f32.mrf.mxu1 }
 0x131   :  { %v294_v24 = vpop.f32.mrf.mxu0  ;;  %v383_v25 = vpop.f32.mrf.mxu1 }
 0x133   :  { %v296_v26 = vpop.f32.mrf.mxu0  ;;  %v385_v27 = vpop.f32.mrf.mxu1 }
 0x137   :  { %v300_v28 = vpop.f32.mrf.mxu0  ;;  %v389_v29 = vpop.f32.mrf.mxu1 }
 0x139   :  { %v302_v30 = vpop.f32.mrf.mxu0  ;;  %v391_v31 = vpop.f32.mrf.mxu1 }
 0x13e   :  { %v460_v32 = vpop.f32.mrf.mxu0  ;;  %v8645_v33 = vpop.f32.mrf.mxu1 }
 0x13f   :  { %9342 = vst [vmem:[#allocation17_spill] sm:$0xff] %v8645_v33  ;;  %v461_v2 = vadd.f32 %v460_v32, %v282_v16 }
 0x140   :  { %v462_v34 = vpop.f32.mrf.mxu0  ;;  %v551_v35 = vpop.f32.mrf.mxu1 }
 0x141   :  { %v463_v3 = vadd.f32 %v462_v34, %v284_v18 }
 0x144   :  { %v466_v36 = vpop.f32.mrf.mxu0  ;;  %v555_v37 = vpop.f32.mrf.mxu1 }
 0x146   :  { %v468_v38 = vpop.f32.mrf.mxu0  ;;  %v557_v39 = vpop.f32.mrf.mxu1 }
 0x147   :  { %v469_v6 = vadd.f32 %v468_v38, %v290_v22  ;;  %v558_v7 = vadd.f32 %v557_v39, %v379_v23  ;;  %v467_v22 = vadd.f32 %v466_v36, %v8641_v20  ;;  %v556_v23 = vadd.f32 %v555_v37, %v8643_v21 }
 0x14a   :  { %v472_v40 = vpop.f32.mrf.mxu0  ;;  %v561_v41 = vpop.f32.mrf.mxu1 }
 0x14b   :  { %v473_v53 = vadd.f32 %v472_v40, %v294_v24  ;;  %v562_v0 = vadd.f32 %v561_v41, %v383_v25  ;;  %v9344_v25 = vld [vmem:[#allocation17_spill] sm:$0xff] }
 0x14c   :  { %v474_v42 = vpop.f32.mrf.mxu0  ;;  %v563_v43 = vpop.f32.mrf.mxu1 }
 0x14d   :  { %v475_v12 = vadd.f32 %v474_v42, %v296_v26  ;;  %v564_v13 = vadd.f32 %v563_v43, %v385_v27  ;;  %v552_v26 = vadd.f32 %v551_v35, %v8639_v19 }
 0x150   :  { %v478_v44 = vpop.f32.mrf.mxu0  ;;  %v567_v45 = vpop.f32.mrf.mxu1 }
 0x151   :  { %v479_v8 = vadd.f32 %v478_v44, %v300_v28  ;;  %v568_v9 = vadd.f32 %v567_v45, %v389_v29  ;;  %v9347_v45 = vmov 0.0  }
 0x152   :  { %v480_v46 = vpop.f32.mrf.mxu0  ;;  %v569_v47 = vpop.f32.mrf.mxu1 }
 0x153   :  { %v481_v14 = vadd.f32 %v480_v46, %v302_v30  ;;  %v570_v15 = vadd.f32 %v569_v47, %v391_v31  ;;  %v550_v31 = vadd.f32 %v9344_v25, %v8637_v17  ;;  %v9345_v17 = vld [vmem:[#allocation18_spill] sm:$0xff] }
 0x154   :  { %vm850_vm1 = vcmp.eq.s32.totalorder %v9345_v17, %v848_v58  ;;  %vm856_vm2 = vcmp.eq.s32.totalorder %v9345_v17, %v854_v4  ;;  %v1242_v58 = vld [vmem:[#allocation7 + $0x5d8] sm:$0xff]  ;;  %v1231_v4 = vld [vmem:[#allocation7 + $0x580] sm:$0xff]  ;;  %v1204_v25 = vld [vmem:[#allocation7 + $0x4a8] sm:$0xff] }
 0x155   :  { %v8670_v46 = vsel %vm850_vm1, 1.0, %v9347_v45  ;;  %v8673_v47 = vsel %vm856_vm2, 1.0, %v9347_v45 }
 0x156   :  { %9348 = vst [vmem:[#allocation17_spill] sm:$0xff] %v8670_v46  ;;  %9349 = vst [vmem:[#allocation18_spill] sm:$0xff] %v8673_v47 }
 0x166   :  { %v707_v49 = vpop.f32.mrf.mxu0  ;;  %v796_v50 = vpop.f32.mrf.mxu1 }
 0x167   :  { %v819_v20 = vadd.f32 %v707_v49, %v461_v2  ;;  %v1232_v2 = vld [vmem:[#allocation7 + $0x588] sm:$0xff] }
 0x168   :  { %v709_v51 = vpop.f32.mrf.mxu0  ;;  %v798_v52 = vpop.f32.mrf.mxu1 }
 0x169   :  { %v820_v41 = vadd.f32 %v709_v51, %v463_v3  ;;  %v822_v42 = vadd.f32 %v798_v52, %v552_v26  ;;  %v1246_v51 = vld [vmem:[#allocation7 + $0x5f8] sm:$0xff]  ;;  %v1243_v52 = vld [vmem:[#allocation7 + $0x5e0] sm:$0xff]  ;;  %v1208_v26 = vld [vmem:[#allocation7 + $0x4c8] sm:$0xff] }
 0x16a   :  { %v713_v54 = vpop.f32.mrf.mxu0  ;;  %v802_v55 = vpop.f32.mrf.mxu1  ;;  %v1234_v3 = vld [vmem:[#allocation7 + $0x598] sm:$0xff] }
 0x16b   :  { %v823_v38 = vadd.f32 %v713_v54, %v467_v22  ;;  %v825_v39 = vadd.f32 %v802_v55, %v556_v23  ;;  %v836_v37 = vmax.f32 %v820_v41, %v822_v42  ;;  %v1245_v54 = vld [vmem:[#allocation7 + $0x5f0] sm:$0xff]  ;;  %v1212_v22 = vld [vmem:[#allocation7 + $0x4e8] sm:$0xff]  ;;  %v1214_v23 = vld [vmem:[#allocation7 + $0x4f8] sm:$0xff] }
 0x16c   :  { %v715_v56 = vpop.f32.mrf.mxu0  ;;  %v804_v57 = vpop.f32.mrf.mxu1  ;;  %v1202_v41 = vld [vmem:[#allocation7 + $0x498] sm:$0xff]  ;;  %v1199_v42 = vld [vmem:[#allocation7 + $0x480] sm:$0xff] }
 0x16d   :  { %v824_v27 = vadd.f32 %v715_v56, %v469_v6  ;;  %v826_v30 = vadd.f32 %v804_v57, %v558_v7  ;;  %v837_v36 = vmax.f32 %v823_v38, %v825_v39  ;;  %v1240_v57 = vld [vmem:[#allocation7 + $0x5c8] sm:$0xff]  ;;  %v1230_v7 = vld [vmem:[#allocation7 + $0x578] sm:$0xff]  ;;  %v1203_v38 = vld [vmem:[#allocation7 + $0x4a0] sm:$0xff] }
 0x16e   :  { %v719_v60 = vpop.f32.mrf.mxu0  ;;  %v808_v61 = vpop.f32.mrf.mxu1  ;;  %v1228_v6 = vld [vmem:[#allocation7 + $0x568] sm:$0xff]  ;;  %v1205_v39 = vld [vmem:[#allocation7 + $0x4b0] sm:$0xff] }
 0x16f   :  { %v827_v28 = vadd.f32 %v719_v60, %v473_v53  ;;  %v829_v29 = vadd.f32 %v808_v61, %v562_v0  ;;  %v821_v0 = vadd.f32 %v796_v50, %v550_v31  ;;  %v838_v19 = vmax.f32 %v824_v27, %v826_v30  ;;  %v1244_v50 = vld [vmem:[#allocation7 + $0x5e8] sm:$0xff]  ;;  %v1241_v60 = vld [vmem:[#allocation7 + $0x5d0] sm:$0xff]  ;;  %v1219_v53 = vld [vmem:[#allocation7 + $0x520] sm:$0xff] }
 0x170   :  { %v721_v62 = vpop.f32.mrf.mxu0  ;;  %v810_v63 = vpop.f32.mrf.mxu1  ;;  %v1236_v61 = vld [vmem:[#allocation7 + $0x5a8] sm:$0xff]  ;;  %v1210_v27 = vld [vmem:[#allocation7 + $0x4d8] sm:$0xff]  ;;  %v1207_v30 = vld [vmem:[#allocation7 + $0x4c0] sm:$0xff] }
 0x171   :  { %v828_v18 = vadd.f32 %v721_v62, %v475_v12  ;;  %v830_v32 = vadd.f32 %v810_v63, %v564_v13  ;;  %v839_v21 = vmax.f32 %v827_v28, %v829_v29  ;;  %v835_v44 = vmax.f32 %v819_v20, %v821_v0  ;;  %v1238_v62 = vld [vmem:[#allocation7 + $0x5b8] sm:$0xff]  ;;  %v1235_v63 = vld [vmem:[#allocation7 + $0x5a0] sm:$0xff]  ;;  %v1225_v13 = vld [vmem:[#allocation7 + $0x550] sm:$0xff] }
 0x172   :  { %v725_v10 = vpop.f32.mrf.mxu0  ;;  %v814_v11 = vpop.f32.mrf.mxu1  ;;  %v1223_v12 = vld [vmem:[#allocation7 + $0x540] sm:$0xff]  ;;  %v1213_v29 = vld [vmem:[#allocation7 + $0x4f0] sm:$0xff]  ;;  %v1206_v31 = vld [vmem:[#allocation7 + $0x4b8] sm:$0xff] }
 0x173   :  { %v831_v33 = vadd.f32 %v725_v10, %v479_v8  ;;  %v833_v48 = vadd.f32 %v814_v11, %v568_v9  ;;  %v840_v43 = vmax.f32 %v828_v18, %v830_v32  ;;  %v1227_v8 = vld [vmem:[#allocation7 + $0x560] sm:$0xff]  ;;  %v1229_v9 = vld [vmem:[#allocation7 + $0x570] sm:$0xff]  ;;  %v1224_v10 = vld [vmem:[#allocation7 + $0x548] sm:$0xff] }
 0x174   :  { %v727_v1 = vpop.f32.mrf.mxu0  ;;  %v816_v16 = vpop.f32.mrf.mxu1  ;;  %v1226_v11 = vld [vmem:[#allocation7 + $0x558] sm:$0xff]  ;;  %v1215_v32 = vld [vmem:[#allocation7 + $0x500] sm:$0xff]  ;;  %v1196_v20 = vld [vmem:[#allocation7 + $0x468] sm:$0xff] }
 0x175   :  { %v832_v34 = vadd.f32 %v727_v1, %v481_v14  ;;  %v834_v5 = vadd.f32 %v816_v16, %v570_v15  ;;  %v841_v40 = vmax.f32 %v831_v33, %v833_v48  ;;  %v9346_v33 = vmul.u32 2, %v8651_v59  ;;  %v1239_v59 = vld [vmem:[#allocation7 + $0x5c0] sm:$0xff]  ;;  %v1237_v1 = vld [vmem:[#allocation7 + $0x5b0] sm:$0xff]  ;;  %v1220_v14 = vld [vmem:[#allocation7 + $0x528] sm:$0xff] }
 0x176   :  { %v1222_v15 = vld [vmem:[#allocation7 + $0x538] sm:$0xff]  ;;  %v1221_v48 = vld [vmem:[#allocation7 + $0x530] sm:$0xff]  ;;  %v1216_v16 = vld [vmem:[#allocation7 + $0x508] sm:$0xff] }
 0x177   :  { %v842_v24 = vmax.f32 %v832_v34, %v834_v5  ;;  %v855_v35 = vadd.s32 1, %v9346_v33  ;;  %v9350_v49 = vmov %v9346_v33  ;;  %v1233_v5 = vld [vmem:[#allocation7 + $0x590] sm:$0xff]  ;;  %v1218_v18 = vld [vmem:[#allocation7 + $0x518] sm:$0xff]  ;;  %v1211_v28 = vld [vmem:[#allocation7 + $0x4e0] sm:$0xff] }
 0x178   :  { %vm851_vm4 = vcmp.eq.s32.totalorder %v9345_v17, %v9350_v49  ;;  %v1217_v34 = vld [vmem:[#allocation7 + $0x510] sm:$0xff]  ;;  %v1198_v0 = vld [vmem:[#allocation7 + $0x478] sm:$0xff]  ;;  %v1187_v49 = vld [vmem:[#allocation7 + $0x420] sm:$0xff] }
 0x179   :  { %8211 = vmatprep.subr.msk.mxu0 %vm867_vm0, %v842_v24  ;;  %8215 = vmatprep.subr.msk.mxu1 %vm867_vm0, %v842_v24  ;;  %vm857_vm5 = vcmp.eq.s32.totalorder %v9345_v17, %v855_v35  ;;  %v8686_v55 = vsel %vm851_vm4, 1.0, %v9347_v45  ;;  %v1209_v24 = vld [vmem:[#allocation7 + $0x4d0] sm:$0xff]  ;;  %v1192_v17 = vld [vmem:[#allocation7 + $0x448] sm:$0xff]  ;;  %v1194_v33 = vld [vmem:[#allocation7 + $0x458] sm:$0xff] }
 0x17a   :  { %8212 = vmatpush1.msk.msra.mxu0 %vm867_vm0, %v841_v40  ;;  %8216 = vmatpush1.msk.msra.mxu1 %vm867_vm0, %v841_v40  ;;  %9351 = vst [vmem:[#allocation19_spill] sm:$0xff] %v8686_v55  ;;  %v8689_v56 = vsel %vm857_vm5, 1.0, %v9347_v45  ;;  %v1200_v40 = vld [vmem:[#allocation7 + $0x488] sm:$0xff]  ;;  %v1191_v35 = vld [vmem:[#allocation7 + $0x440] sm:$0xff] }
 0x17b   :  { %900 = vmatprep.subr.mxu0 %v840_v43  ;;  %983 = vmatprep.subr.mxu1 %v840_v43  ;;  %9352 = vst [vmem:[#allocation20_spill] sm:$0xff] %v8689_v56  ;;  %v1201_v43 = vld [vmem:[#allocation7 + $0x490] sm:$0xff] }
 0x17c   :  { %901 = vmatpush1.msra.mxu0 %v839_v21  ;;  %984 = vmatpush1.msra.mxu1 %v839_v21  ;;  %v1195_v21 = vld [vmem:[#allocation7 + $0x460] sm:$0xff] }
 0x17d   :  { %902 = vmatprep.subr.mxu0 %v838_v19  ;;  %985 = vmatprep.subr.mxu1 %v838_v19  ;;  %v1197_v19 = vld [vmem:[#allocation7 + $0x470] sm:$0xff] }
 0x17e   :  { %903 = vmatpush1.msra.mxu0 %v837_v36  ;;  %986 = vmatpush1.msra.mxu1 %v837_v36  ;;  %v1193_v36 = vld [vmem:[#allocation7 + $0x450] sm:$0xff] }
 0x17f   :  { %904 = vmatprep.subr.mxu0 %v836_v37  ;;  %987 = vmatprep.subr.mxu1 %v836_v37  ;;  %v1188_v37 = vld [vmem:[#allocation7 + $0x428] sm:$0xff] }
 0x180   :  { %905 = vmatpush1.msra.mxu0 %v835_v44  ;;  %988 = vmatpush1.msra.mxu1 %v835_v44  ;;  %v1190_v44 = vld [vmem:[#allocation7 + $0x438] sm:$0xff] }
 0x181   :  { %8213 = vmatmul.mubr.msk.f32.vlgmr.msra.gmra.mxu0 %vm860_vm3, %v8670_v46  ;;  %8217 = vmatmul.mubr.msk.f32.vlgmr.msra.gmra.mxu1 %vm860_vm3, %v8673_v47 }
 0x182   :  { %944 = vmatprep.mubr.f32.mxu0 %v9347_v45  ;;  %1027 = vmatprep.mubr.f32.mxu1 %v9347_v45 }
 0x183   :  { %1326 = vmatprep.subr.mxu0 %v1244_v50  ;;  %1403 = vmatprep.subr.mxu1 %v1246_v51  ;;  %v1189_v50 = vld [vmem:[#allocation7 + $0x430] sm:$0xff]  ;;  %v1184_v51 = vld [vmem:[#allocation7 + $0x408] sm:$0xff] }
 0x184   :  { %1327 = vmatpush1.msra.mxu0 %v1243_v52  ;;  %1404 = vmatpush1.msra.mxu1 %v1245_v54  ;;  %v1186_v52 = vld [vmem:[#allocation7 + $0x418] sm:$0xff]  ;;  %v1183_v54 = vld [vmem:[#allocation7 + $0x400] sm:$0xff] }
 0x185   :  { %8214 = vmatmul.mubr.msk.f32.gmra.mxu0 %vm860_vm3, %v8686_v55  ;;  %8218 = vmatmul.mubr.msk.f32.gmra.mxu1 %vm860_vm3, %v8689_v56 }
 0x186   :  { %1328 = vmatprep.subr.mxu0 %v1240_v57  ;;  %1405 = vmatprep.subr.mxu1 %v1242_v58  ;;  %v1185_v57 = vld [vmem:[#allocation7 + $0x410] sm:$0xff]  ;;  %v1308_v58 = vld [vmem:[#allocation7 + $0x7e8] sm:$0xff] }
 0x187   :  { %1329 = vmatpush1.msra.mxu0 %v1239_v59  ;;  %1406 = vmatpush1.msra.mxu1 %v1241_v60  ;;  %v1310_v59 = vld [vmem:[#allocation7 + $0x7f8] sm:$0xff]  ;;  %v1307_v60 = vld [vmem:[#allocation7 + $0x7e0] sm:$0xff] }
 0x188   :  { %1330 = vmatprep.subr.mxu0 %v1236_v61  ;;  %1407 = vmatprep.subr.mxu1 %v1238_v62  ;;  %v1309_v61 = vld [vmem:[#allocation7 + $0x7f0] sm:$0xff]  ;;  %v1304_v62 = vld [vmem:[#allocation7 + $0x7c8] sm:$0xff] }
 0x189   :  { %1331 = vmatpush1.msra.mxu0 %v1235_v63  ;;  %1408 = vmatpush1.msra.mxu1 %v1237_v1  ;;  %v1306_v63 = vld [vmem:[#allocation7 + $0x7d8] sm:$0xff]  ;;  %v1303_v1 = vld [vmem:[#allocation7 + $0x7c0] sm:$0xff] }
 0x18a   :  { %1332 = vmatprep.subr.mxu0 %v1232_v2  ;;  %1409 = vmatprep.subr.mxu1 %v1234_v3  ;;  %v1305_v2 = vld [vmem:[#allocation7 + $0x7d0] sm:$0xff]  ;;  %v1300_v3 = vld [vmem:[#allocation7 + $0x7a8] sm:$0xff] }
 0x18b   :  { %1333 = vmatpush1.msra.mxu0 %v1231_v4  ;;  %1410 = vmatpush1.msra.mxu1 %v1233_v5  ;;  %v1302_v4 = vld [vmem:[#allocation7 + $0x7b8] sm:$0xff]  ;;  %v1299_v5 = vld [vmem:[#allocation7 + $0x7a0] sm:$0xff] }
 0x18c   :  { %1334 = vmatprep.subr.mxu0 %v1228_v6  ;;  %1411 = vmatprep.subr.mxu1 %v1230_v7  ;;  %v1301_v6 = vld [vmem:[#allocation7 + $0x7b0] sm:$0xff]  ;;  %v1296_v7 = vld [vmem:[#allocation7 + $0x788] sm:$0xff] }
 0x18d   :  { %1335 = vmatpush1.msra.mxu0 %v1227_v8  ;;  %1412 = vmatpush1.msra.mxu1 %v1229_v9  ;;  %v1298_v8 = vld [vmem:[#allocation7 + $0x798] sm:$0xff]  ;;  %v1295_v9 = vld [vmem:[#allocation7 + $0x780] sm:$0xff] }
 0x18e   :  { %1336 = vmatprep.subr.mxu0 %v1224_v10  ;;  %1413 = vmatprep.subr.mxu1 %v1226_v11  ;;  %v1297_v10 = vld [vmem:[#allocation7 + $0x790] sm:$0xff]  ;;  %v1292_v11 = vld [vmem:[#allocation7 + $0x768] sm:$0xff] }
 0x18f   :  { %1337 = vmatpush1.msra.mxu0 %v1223_v12  ;;  %1414 = vmatpush1.msra.mxu1 %v1225_v13  ;;  %v1294_v12 = vld [vmem:[#allocation7 + $0x778] sm:$0xff]  ;;  %v1291_v13 = vld [vmem:[#allocation7 + $0x760] sm:$0xff] }
 0x190   :  { %1338 = vmatprep.subr.mxu0 %v1220_v14  ;;  %1415 = vmatprep.subr.mxu1 %v1222_v15  ;;  %v1293_v14 = vld [vmem:[#allocation7 + $0x770] sm:$0xff]  ;;  %v1288_v15 = vld [vmem:[#allocation7 + $0x748] sm:$0xff] }
 0x191   :  { %1339 = vmatpush1.msra.mxu0 %v1219_v53  ;;  %1416 = vmatpush1.msra.mxu1 %v1221_v48  ;;  %v1290_v53 = vld [vmem:[#allocation7 + $0x758] sm:$0xff]  ;;  %v1287_v48 = vld [vmem:[#allocation7 + $0x740] sm:$0xff] }
 0x192   :  { %1340 = vmatprep.subr.mxu0 %v1216_v16  ;;  %1417 = vmatprep.subr.mxu1 %v1218_v18  ;;  %v1289_v16 = vld [vmem:[#allocation7 + $0x750] sm:$0xff]  ;;  %v1284_v18 = vld [vmem:[#allocation7 + $0x728] sm:$0xff] }
 0x193   :  { %1341 = vmatpush1.msra.mxu0 %v1215_v32  ;;  %1418 = vmatpush1.msra.mxu1 %v1217_v34  ;;  %v1286_v32 = vld [vmem:[#allocation7 + $0x738] sm:$0xff]  ;;  %v1283_v34 = vld [vmem:[#allocation7 + $0x720] sm:$0xff] }
 0x194   :  { %1342 = vmatprep.subr.mxu0 %v1212_v22  ;;  %1419 = vmatprep.subr.mxu1 %v1214_v23  ;;  %v1285_v22 = vld [vmem:[#allocation7 + $0x730] sm:$0xff]  ;;  %v1280_v23 = vld [vmem:[#allocation7 + $0x708] sm:$0xff] }
 0x195   :  { %1343 = vmatpush1.msra.mxu0 %v1211_v28  ;;  %1420 = vmatpush1.msra.mxu1 %v1213_v29  ;;  %v1282_v28 = vld [vmem:[#allocation7 + $0x718] sm:$0xff]  ;;  %v1279_v29 = vld [vmem:[#allocation7 + $0x700] sm:$0xff] }
 0x196   :  { %1344 = vmatprep.subr.mxu0 %v1208_v26  ;;  %1421 = vmatprep.subr.mxu1 %v1210_v27  ;;  %v1281_v26 = vld [vmem:[#allocation7 + $0x710] sm:$0xff]  ;;  %v1276_v27 = vld [vmem:[#allocation7 + $0x6e8] sm:$0xff] }
 0x197   :  { %1345 = vmatpush1.msra.mxu0 %v1207_v30  ;;  %1422 = vmatpush1.msra.mxu1 %v1209_v24  ;;  %v1278_v30 = vld [vmem:[#allocation7 + $0x6f8] sm:$0xff]  ;;  %v1275_v24 = vld [vmem:[#allocation7 + $0x6e0] sm:$0xff] }
 0x198   :  { %1346 = vmatprep.subr.mxu0 %v1204_v25  ;;  %1423 = vmatprep.subr.mxu1 %v1206_v31  ;;  %v1277_v25 = vld [vmem:[#allocation7 + $0x6f0] sm:$0xff]  ;;  %v1272_v31 = vld [vmem:[#allocation7 + $0x6c8] sm:$0xff] }
 0x199   :  { %1347 = vmatpush1.msra.mxu0 %v1203_v38  ;;  %1424 = vmatpush1.msra.mxu1 %v1205_v39  ;;  %v1274_v38 = vld [vmem:[#allocation7 + $0x6d8] sm:$0xff]  ;;  %v1271_v39 = vld [vmem:[#allocation7 + $0x6c0] sm:$0xff] }
 0x19a   :  { %1348 = vmatprep.subr.mxu0 %v1200_v40  ;;  %1425 = vmatprep.subr.mxu1 %v1202_v41  ;;  %v1273_v40 = vld [vmem:[#allocation7 + $0x6d0] sm:$0xff]  ;;  %v1268_v41 = vld [vmem:[#allocation7 + $0x6a8] sm:$0xff] }
 0x19b   :  { %1349 = vmatpush1.msra.mxu0 %v1199_v42  ;;  %1426 = vmatpush1.msra.mxu1 %v1201_v43  ;;  %v1270_v42 = vld [vmem:[#allocation7 + $0x6b8] sm:$0xff]  ;;  %v1267_v43 = vld [vmem:[#allocation7 + $0x6a0] sm:$0xff] }
 0x19c   :  { %1350 = vmatprep.subr.mxu0 %v1196_v20  ;;  %1427 = vmatprep.subr.mxu1 %v1198_v0  ;;  %v1269_v20 = vld [vmem:[#allocation7 + $0x6b0] sm:$0xff]  ;;  %v1264_v0 = vld [vmem:[#allocation7 + $0x688] sm:$0xff] }
 0x19d   :  { %1351 = vmatpush1.msra.mxu0 %v1195_v21  ;;  %1428 = vmatpush1.msra.mxu1 %v1197_v19  ;;  %v1266_v21 = vld [vmem:[#allocation7 + $0x698] sm:$0xff]  ;;  %v1263_v19 = vld [vmem:[#allocation7 + $0x680] sm:$0xff] }
 0x19e   :  { %1352 = vmatprep.subr.mxu0 %v1192_v17  ;;  %1429 = vmatprep.subr.mxu1 %v1194_v33  ;;  %v1265_v17 = vld [vmem:[#allocation7 + $0x690] sm:$0xff]  ;;  %v1260_v33 = vld [vmem:[#allocation7 + $0x668] sm:$0xff] }
 0x19f   :  { %1353 = vmatpush1.msra.mxu0 %v1191_v35  ;;  %1430 = vmatpush1.msra.mxu1 %v1193_v36  ;;  %v1262_v35 = vld [vmem:[#allocation7 + $0x678] sm:$0xff]  ;;  %v1259_v36 = vld [vmem:[#allocation7 + $0x660] sm:$0xff] }
 0x1a0   :  { %1354 = vmatprep.subr.mxu0 %v1188_v37  ;;  %1431 = vmatprep.subr.mxu1 %v1190_v44  ;;  %v1261_v37 = vld [vmem:[#allocation7 + $0x670] sm:$0xff]  ;;  %v1256_v44 = vld [vmem:[#allocation7 + $0x648] sm:$0xff] }
 0x1a1   :  { %1355 = vmatpush1.msra.mxu0 %v1187_v49  ;;  %1432 = vmatpush1.msra.mxu1 %v1189_v50  ;;  %v1258_v49 = vld [vmem:[#allocation7 + $0x658] sm:$0xff]  ;;  %v1255_v50 = vld [vmem:[#allocation7 + $0x640] sm:$0xff] }
 0x1a2   :  { %1356 = vmatprep.subr.mxu0 %v1184_v51  ;;  %1433 = vmatprep.subr.mxu1 %v1186_v52  ;;  %v1257_v51 = vld [vmem:[#allocation7 + $0x650] sm:$0xff]  ;;  %v1252_v52 = vld [vmem:[#allocation7 + $0x628] sm:$0xff] }
 0x1a3   :  { %1357 = vmatpush1.msra.mxu0 %v1183_v54  ;;  %1434 = vmatpush1.msra.mxu1 %v1185_v57  ;;  %v1254_v54 = vld [vmem:[#allocation7 + $0x638] sm:$0xff]  ;;  %v1251_v57 = vld [vmem:[#allocation7 + $0x620] sm:$0xff] }
 0x1a4   :  { %1358 = vmatprep.subr.mxu0 %v1308_v58  ;;  %1435 = vmatprep.subr.mxu1 %v1310_v59  ;;  %v1253_v58 = vld [vmem:[#allocation7 + $0x630] sm:$0xff]  ;;  %v1248_v59 = vld [vmem:[#allocation7 + $0x608] sm:$0xff] }
 0x1a5   :  { %1359 = vmatpush2.msra.mxu0 %v1307_v60  ;;  %1436 = vmatpush2.msra.mxu1 %v1309_v61  ;;  %v1250_v60 = vld [vmem:[#allocation7 + $0x618] sm:$0xff]  ;;  %v1247_v61 = vld [vmem:[#allocation7 + $0x600] sm:$0xff] }
 0x1a6   :  { %1360 = vmatprep.subr.mxu0 %v1304_v62  ;;  %1437 = vmatprep.subr.mxu1 %v1306_v63  ;;  %v1249_v62 = vld [vmem:[#allocation7 + $0x610] sm:$0xff]  ;;  %v1111_v63 = vld [vmem:[#allocation7 + $0x1e8] sm:$0xff] }
 0x1a7   :  { %1361 = vmatpush2.msra.mxu0 %v1303_v1  ;;  %1438 = vmatpush2.msra.mxu1 %v1305_v2  ;;  %v1113_v1 = vld [vmem:[#allocation7 + $0x1f8] sm:$0xff] }
 0x1a8   :  { %1362 = vmatprep.subr.mxu0 %v1300_v3  ;;  %1439 = vmatprep.subr.mxu1 %v1302_v4 }
 0x1a9   :  { %1363 = vmatpush2.msra.mxu0 %v1299_v5  ;;  %1440 = vmatpush2.msra.mxu1 %v1301_v6 }
 0x1aa   :  { %1364 = vmatprep.subr.mxu0 %v1296_v7  ;;  %1441 = vmatprep.subr.mxu1 %v1298_v8 }
 0x1ab   :  { %1365 = vmatpush2.msra.mxu0 %v1295_v9  ;;  %1442 = vmatpush2.msra.mxu1 %v1297_v10 }
 0x1ac   :  { %1366 = vmatprep.subr.mxu0 %v1292_v11  ;;  %1443 = vmatprep.subr.mxu1 %v1294_v12 }
 0x1ad   :  { %1367 = vmatpush2.msra.mxu0 %v1291_v13  ;;  %1444 = vmatpush2.msra.mxu1 %v1293_v14 }
 0x1ae   :  { %1368 = vmatprep.subr.mxu0 %v1288_v15  ;;  %1445 = vmatprep.subr.mxu1 %v1290_v53 }
 0x1af   :  { %1369 = vmatpush2.msra.mxu0 %v1287_v48  ;;  %1446 = vmatpush2.msra.mxu1 %v1289_v16 }
 0x1b0   :  { %1370 = vmatprep.subr.mxu0 %v1284_v18  ;;  %1447 = vmatprep.subr.mxu1 %v1286_v32 }
 0x1b1   :  { %1371 = vmatpush2.msra.mxu0 %v1283_v34  ;;  %1448 = vmatpush2.msra.mxu1 %v1285_v22 }
 0x1b2   :  { %1372 = vmatprep.subr.mxu0 %v1280_v23  ;;  %1449 = vmatprep.subr.mxu1 %v1282_v28 }
 0x1b3   :  { %1373 = vmatpush2.msra.mxu0 %v1279_v29  ;;  %1450 = vmatpush2.msra.mxu1 %v1281_v26 }
 0x1b4   :  { %1374 = vmatprep.subr.mxu0 %v1276_v27  ;;  %1451 = vmatprep.subr.mxu1 %v1278_v30  ;;  %v1110_v27 = vld [vmem:[#allocation7 + $0x1e0] sm:$0xff]  ;;  %v1112_v30 = vld [vmem:[#allocation7 + $0x1f0] sm:$0xff] }
 0x1b5   :  { %1375 = vmatpush2.msra.mxu0 %v1275_v24  ;;  %1452 = vmatpush2.msra.mxu1 %v1277_v25  ;;  %v1107_v25 = vld [vmem:[#allocation7 + $0x1c8] sm:$0xff] }
 0x1b6   :  { %1376 = vmatprep.subr.mxu0 %v1272_v31  ;;  %1453 = vmatprep.subr.mxu1 %v1274_v38  ;;  %v1109_v31 = vld [vmem:[#allocation7 + $0x1d8] sm:$0xff]  ;;  %v1106_v38 = vld [vmem:[#allocation7 + $0x1c0] sm:$0xff] }
 0x1b7   :  { %1377 = vmatpush2.msra.mxu0 %v1271_v39  ;;  %1454 = vmatpush2.msra.mxu1 %v1273_v40  ;;  %v1108_v39 = vld [vmem:[#allocation7 + $0x1d0] sm:$0xff]  ;;  %v1103_v40 = vld [vmem:[#allocation7 + $0x1a8] sm:$0xff] }
 0x1b8   :  { %1378 = vmatprep.subr.mxu0 %v1268_v41  ;;  %1455 = vmatprep.subr.mxu1 %v1270_v42  ;;  %v1105_v41 = vld [vmem:[#allocation7 + $0x1b8] sm:$0xff]  ;;  %v1102_v42 = vld [vmem:[#allocation7 + $0x1a0] sm:$0xff] }
 0x1b9   :  { %1379 = vmatpush2.msra.mxu0 %v1267_v43  ;;  %1456 = vmatpush2.msra.mxu1 %v1269_v20  ;;  %v1104_v43 = vld [vmem:[#allocation7 + $0x1b0] sm:$0xff]  ;;  %v1099_v20 = vld [vmem:[#allocation7 + $0x188] sm:$0xff] }
 0x1ba   :  { %1380 = vmatprep.subr.mxu0 %v1264_v0  ;;  %1457 = vmatprep.subr.mxu1 %v1266_v21  ;;  %v1101_v0 = vld [vmem:[#allocation7 + $0x198] sm:$0xff]  ;;  %v1098_v21 = vld [vmem:[#allocation7 + $0x180] sm:$0xff] }
 0x1bb   :  { %1381 = vmatpush2.msra.mxu0 %v1263_v19  ;;  %1458 = vmatpush2.msra.mxu1 %v1265_v17  ;;  %v1100_v19 = vld [vmem:[#allocation7 + $0x190] sm:$0xff]  ;;  %v1095_v17 = vld [vmem:[#allocation7 + $0x168] sm:$0xff] }
 0x1bc   :  { %1382 = vmatprep.subr.mxu0 %v1260_v33  ;;  %1459 = vmatprep.subr.mxu1 %v1262_v35  ;;  %v1097_v33 = vld [vmem:[#allocation7 + $0x178] sm:$0xff]  ;;  %v1094_v35 = vld [vmem:[#allocation7 + $0x160] sm:$0xff] }
 0x1bd   :  { %1383 = vmatpush2.msra.mxu0 %v1259_v36  ;;  %1460 = vmatpush2.msra.mxu1 %v1261_v37  ;;  %v1096_v36 = vld [vmem:[#allocation7 + $0x170] sm:$0xff]  ;;  %v1091_v37 = vld [vmem:[#allocation7 + $0x148] sm:$0xff] }
 0x1be   :  { %1384 = vmatprep.subr.mxu0 %v1256_v44  ;;  %1461 = vmatprep.subr.mxu1 %v1258_v49  ;;  %v1093_v44 = vld [vmem:[#allocation7 + $0x158] sm:$0xff]  ;;  %v1090_v49 = vld [vmem:[#allocation7 + $0x140] sm:$0xff] }
 0x1bf   :  { %1385 = vmatpush2.msra.mxu0 %v1255_v50  ;;  %1462 = vmatpush2.msra.mxu1 %v1257_v51  ;;  %v1092_v50 = vld [vmem:[#allocation7 + $0x150] sm:$0xff]  ;;  %v1087_v51 = vld [vmem:[#allocation7 + $0x128] sm:$0xff] }
 0x1c0   :  { %1386 = vmatprep.subr.mxu0 %v1252_v52  ;;  %1463 = vmatprep.subr.mxu1 %v1254_v54  ;;  %v1089_v52 = vld [vmem:[#allocation7 + $0x138] sm:$0xff]  ;;  %v1086_v54 = vld [vmem:[#allocation7 + $0x120] sm:$0xff] }
 0x1c1   :  { %1387 = vmatpush2.msra.mxu0 %v1251_v57  ;;  %1464 = vmatpush2.msra.mxu1 %v1253_v58  ;;  %v1088_v57 = vld [vmem:[#allocation7 + $0x130] sm:$0xff]  ;;  %v1083_v58 = vld [vmem:[#allocation7 + $0x108] sm:$0xff] }
 0x1c2   :  { %1388 = vmatprep.subr.mxu0 %v1248_v59  ;;  %1465 = vmatprep.subr.mxu1 %v1250_v60  ;;  %v1085_v59 = vld [vmem:[#allocation7 + $0x118] sm:$0xff]  ;;  %v1082_v60 = vld [vmem:[#allocation7 + $0x100] sm:$0xff] }
 0x1c3   :  { %1389 = vmatpush2.msra.mxu0 %v1247_v61  ;;  %1466 = vmatpush2.msra.mxu1 %v1249_v62  ;;  %v1084_v61 = vld [vmem:[#allocation7 + $0x110] sm:$0xff]  ;;  %v1079_v62 = vld [vmem:[#allocation7 + $0xe8] sm:$0xff] }
 0x1c4   :  { %1480 = vmatprep.subr.mxu0 %v1111_v63  ;;  %1557 = vmatprep.subr.mxu1 %v1113_v1  ;;  %v1081_v63 = vld [vmem:[#allocation7 + $0xf8] sm:$0xff]  ;;  %v1078_v1 = vld [vmem:[#allocation7 + $0xe0] sm:$0xff] }
 0x241   :  { %v940_v2 = vpop.f32.mrf.mxu0  ;;  %v1023_v3 = vpop.f32.mrf.mxu1 }
 0x242   :  { %v1034_v4 = vmax.f32 %v940_v2, %v1023_v3  ;;  %v1080_v2 = vld [vmem:[#allocation7 + $0xf0] sm:$0xff]  ;;  %v1075_v3 = vld [vmem:[#allocation7 + $0xc8] sm:$0xff] }
 0x243   :  { %v942_v5 = vpop.f32.mrf.mxu0  ;;  %v1025_v6 = vpop.f32.mrf.mxu1 }
 0x244   :  { %v8695_v7 = vmax.f32 %v1034_v4, 0.0  ;;  %v1035_v8 = vmax.f32 %v942_v5, %v1025_v6  ;;  %v1077_v4 = vld [vmem:[#allocation7 + $0xd8] sm:$0xff]  ;;  %v1074_v5 = vld [vmem:[#allocation7 + $0xc0] sm:$0xff]  ;;  %v1076_v6 = vld [vmem:[#allocation7 + $0xd0] sm:$0xff] }
 0x245   :  { %v946_v9 = vpop.f32.mrf.mxu0  ;;  %v1029_v10 = vpop.f32.mrf.mxu1 }
 0x246   :  { %1042 = vst [vmem:[#allocation2 + $0x10] sm:$0xff] %v8695_v7  ;;  %v1039_v11 = vmax.f32 %v1035_v8, 0.0  ;;  %v1036_v12 = vmax.f32 %v946_v9, %v1029_v10  ;;  %v1071_v8 = vld [vmem:[#allocation7 + $0xa8] sm:$0xff]  ;;  %v1073_v9 = vld [vmem:[#allocation7 + $0xb8] sm:$0xff]  ;;  %v1070_v10 = vld [vmem:[#allocation7 + $0xa0] sm:$0xff] }
 0x247   :  { %v948_v13 = vpop.f32.mrf.mxu0  ;;  %v1031_v14 = vpop.f32.mrf.mxu1 }
 0x248   :  { %1043 = vst [vmem:[#allocation2] sm:$0xff] %v1039_v11  ;;  %v1040_v15 = vmax.f32 %v1036_v12, 0.0  ;;  %v1037_v53 = vmax.f32 %v948_v13, %v1031_v14  ;;  %v1067_v12 = vld [vmem:[#allocation7 + $0x88] sm:$0xff]  ;;  %v1069_v13 = vld [vmem:[#allocation7 + $0x98] sm:$0xff]  ;;  %v1066_v14 = vld [vmem:[#allocation7 + $0x80] sm:$0xff] }
 0x24a   :  { %1044 = vst [vmem:[#allocation2 + $0x18] sm:$0x7f] %v1040_v15  ;;  %v1041_v48 = vmax.f32 %v1037_v53, 0.0  ;;  %v1068_v15 = vld [vmem:[#allocation7 + $0x90] sm:$0xff]  ;;  %v1063_v53 = vld [vmem:[#allocation7 + $0x68] sm:$0xff] }
 0x24c   :  { %1045 = vst [vmem:[#allocation2 + $0x8] sm:$0x7f] %v1041_v48  ;;  %v1065_v48 = vld [vmem:[#allocation7 + $0x78] sm:$0xff] }
 0x24d   :  { %v1178_v32 = vld [vmem:[#allocation2 + $0x10] sm:$0xfe] }
 0x24e   :  { %v1316_v29 = vrot.slane %v1178_v32, 1  ;;  %v1059_v32 = vld [vmem:[#allocation7 + $0x48] sm:$0xff] }
 0x24f   :  { %v1179_v16 = vld [vmem:[#allocation2] sm:$0xfe] }
 0x250   :  { %v1319_v23 = vrot.slane %v1179_v16, 1  ;;  %v1062_v16 = vld [vmem:[#allocation7 + $0x60] sm:$0xff] }
 0x251   :  { %v1180_v18 = vld [vmem:[#allocation2 + $0x18] sm:$0x1f] }
 0x252   :  { %v1317_v22 = vrot.slane %v1180_v18, 1  ;;  %v1064_v18 = vld [vmem:[#allocation7 + $0x70] sm:$0xff] }
 0x253   :  { %v1181_v34 = vld [vmem:[#allocation2 + $0x8] sm:$0x1f] }
 0x254   :  { %v1320_v28 = vrot.slane %v1181_v34, 1  ;;  %v1318_v24 = vsel %vm1315_vm6, %v1316_v29, %v1317_v22  ;;  %v1061_v34 = vld [vmem:[#allocation7 + $0x58] sm:$0xff] }
 0x255   :  { %v1057_v29 = vld [vmem:[#allocation7 + $0x38] sm:$0xff] }
 0x256   :  { %v1321_v26 = vsel %vm1315_vm6, %v1319_v23, %v1320_v28  ;;  %v1060_v23 = vld [vmem:[#allocation7 + $0x50] sm:$0xff] }
 0x257   :  { %1390 = vmatprep.mubr.f32.mxu0 %v1321_v26  ;;  %1467 = vmatprep.mubr.f32.mxu1 %v1321_v26  ;;  %v1054_v26 = vld [vmem:[#allocation7 + $0x20] sm:$0xff] }
 0x258   :  { %1391 = vmatmul.mubr.f32.vlgmr.msra.gmra.mxu0 %v1318_v24  ;;  %1468 = vmatmul.mubr.f32.vlgmr.msra.gmra.mxu1 %v1318_v24  ;;  %v1053_v24 = vld [vmem:[#allocation7 + $0x18] sm:$0xff] }
 0x259   :  { %1481 = vmatpush1.msra.mxu0 %v1110_v27  ;;  %1558 = vmatpush1.msra.mxu1 %v1112_v30  ;;  %v1056_v27 = vld [vmem:[#allocation7 + $0x30] sm:$0xff]  ;;  %v1051_v30 = vld [vmem:[#allocation7 + $0x8] sm:$0xff] }
 0x25a   :  { %1396 = vmatprep.mubr.f32.mxu0 %v1320_v28  ;;  %1473 = vmatprep.mubr.f32.mxu1 %v1320_v28  ;;  %v1055_v28 = vld [vmem:[#allocation7 + $0x28] sm:$0xff] }
 0x25b   :  { %1482 = vmatprep.subr.mxu0 %v1107_v25  ;;  %1559 = vmatprep.subr.mxu1 %v1109_v31  ;;  %v1050_v25 = vld [vmem:[#allocation7] sm:$0xff]  ;;  %v1052_v31 = vld [vmem:[#allocation7 + $0x10] sm:$0xff] }
 0x25c   :  { %1483 = vmatpush1.msra.mxu0 %v1106_v38  ;;  %1560 = vmatpush1.msra.mxu1 %v1108_v39  ;;  %v1175_v38 = vld [vmem:[#allocation7 + $0x3e8] sm:$0xff]  ;;  %v1177_v39 = vld [vmem:[#allocation7 + $0x3f8] sm:$0xff] }
 0x25d   :  { %1484 = vmatprep.subr.mxu0 %v1103_v40  ;;  %1561 = vmatprep.subr.mxu1 %v1105_v41  ;;  %v1174_v40 = vld [vmem:[#allocation7 + $0x3e0] sm:$0xff]  ;;  %v1176_v41 = vld [vmem:[#allocation7 + $0x3f0] sm:$0xff] }
 0x25e   :  { %1397 = vmatmul.mubr.f32.gmra.mxu0 %v1317_v22  ;;  %1474 = vmatmul.mubr.f32.gmra.mxu1 %v1317_v22  ;;  %v1058_v22 = vld [vmem:[#allocation7 + $0x40] sm:$0xff] }
 0x25f   :  { %1485 = vmatpush1.msra.mxu0 %v1102_v42  ;;  %1562 = vmatpush1.msra.mxu1 %v1104_v43  ;;  %v1171_v42 = vld [vmem:[#allocation7 + $0x3c8] sm:$0xff]  ;;  %v1173_v43 = vld [vmem:[#allocation7 + $0x3d8] sm:$0xff] }
 0x260   :  { %1486 = vmatprep.subr.mxu0 %v1099_v20  ;;  %1544 = vmatprep.mubr.f32.mxu0 %v1039_v11  ;;  %v1170_v20 = vld [vmem:[#allocation7 + $0x3c0] sm:$0xff] }
 0x261   :  { %1563 = vmatprep.subr.mxu1 %v1101_v0  ;;  %1621 = vmatprep.mubr.f32.mxu1 %v1039_v11  ;;  %v1072_v11 = vld [vmem:[#allocation7 + $0xb0] sm:$0xff] }
 0x262   :  { %1487 = vmatpush1.msra.mxu0 %v1098_v21  ;;  %1564 = vmatpush1.msra.mxu1 %v1100_v19  ;;  %v1172_v0 = vld [vmem:[#allocation7 + $0x3d0] sm:$0xff]  ;;  %v1167_v21 = vld [vmem:[#allocation7 + $0x3a8] sm:$0xff]  ;;  %v1169_v19 = vld [vmem:[#allocation7 + $0x3b8] sm:$0xff] }
 0x263   :  { %1488 = vmatprep.subr.mxu0 %v1095_v17  ;;  %1565 = vmatprep.subr.mxu1 %v1097_v33  ;;  %v1166_v17 = vld [vmem:[#allocation7 + $0x3a0] sm:$0xff]  ;;  %v1168_v33 = vld [vmem:[#allocation7 + $0x3b0] sm:$0xff] }
 0x264   :  { %1489 = vmatpush1.msra.mxu0 %v1094_v35  ;;  %1566 = vmatpush1.msra.mxu1 %v1096_v36  ;;  %v1163_v35 = vld [vmem:[#allocation7 + $0x388] sm:$0xff]  ;;  %v1165_v36 = vld [vmem:[#allocation7 + $0x398] sm:$0xff] }
 0x265   :  { %1490 = vmatprep.subr.mxu0 %v1091_v37  ;;  %1567 = vmatprep.subr.mxu1 %v1093_v44  ;;  %v1162_v37 = vld [vmem:[#allocation7 + $0x380] sm:$0xff]  ;;  %v1164_v44 = vld [vmem:[#allocation7 + $0x390] sm:$0xff] }
 0x266   :  { %1491 = vmatpush1.msra.mxu0 %v1090_v49  ;;  %1568 = vmatpush1.msra.mxu1 %v1092_v50  ;;  %v1159_v49 = vld [vmem:[#allocation7 + $0x368] sm:$0xff]  ;;  %v1161_v50 = vld [vmem:[#allocation7 + $0x378] sm:$0xff] }
 0x267   :  { %1492 = vmatprep.subr.mxu0 %v1087_v51  ;;  %1569 = vmatprep.subr.mxu1 %v1089_v52  ;;  %v1158_v51 = vld [vmem:[#allocation7 + $0x360] sm:$0xff]  ;;  %v1160_v52 = vld [vmem:[#allocation7 + $0x370] sm:$0xff] }
 0x268   :  { %1493 = vmatpush1.msra.mxu0 %v1086_v54  ;;  %1570 = vmatpush1.msra.mxu1 %v1088_v57  ;;  %v1155_v54 = vld [vmem:[#allocation7 + $0x348] sm:$0xff]  ;;  %v1157_v57 = vld [vmem:[#allocation7 + $0x358] sm:$0xff] }
 0x269   :  { %1494 = vmatprep.subr.mxu0 %v1083_v58  ;;  %1571 = vmatprep.subr.mxu1 %v1085_v59  ;;  %v1154_v58 = vld [vmem:[#allocation7 + $0x340] sm:$0xff]  ;;  %v1156_v59 = vld [vmem:[#allocation7 + $0x350] sm:$0xff] }
 0x26a   :  { %1495 = vmatpush1.msra.mxu0 %v1082_v60  ;;  %1572 = vmatpush1.msra.mxu1 %v1084_v61  ;;  %v1151_v60 = vld [vmem:[#allocation7 + $0x328] sm:$0xff]  ;;  %v1153_v61 = vld [vmem:[#allocation7 + $0x338] sm:$0xff] }
 0x26b   :  { %1496 = vmatprep.subr.mxu0 %v1079_v62  ;;  %1573 = vmatprep.subr.mxu1 %v1081_v63  ;;  %v1150_v62 = vld [vmem:[#allocation7 + $0x320] sm:$0xff]  ;;  %v1152_v63 = vld [vmem:[#allocation7 + $0x330] sm:$0xff] }
 0x26c   :  { %1497 = vmatpush1.msra.mxu0 %v1078_v1  ;;  %1574 = vmatpush1.msra.mxu1 %v1080_v2  ;;  %v1147_v1 = vld [vmem:[#allocation7 + $0x308] sm:$0xff]  ;;  %v1149_v2 = vld [vmem:[#allocation7 + $0x318] sm:$0xff] }
 0x26d   :  { %1498 = vmatprep.subr.mxu0 %v1075_v3  ;;  %1575 = vmatprep.subr.mxu1 %v1077_v4  ;;  %v1146_v3 = vld [vmem:[#allocation7 + $0x300] sm:$0xff]  ;;  %v1148_v4 = vld [vmem:[#allocation7 + $0x310] sm:$0xff] }
 0x26e   :  { %1499 = vmatpush1.msra.mxu0 %v1074_v5  ;;  %1576 = vmatpush1.msra.mxu1 %v1076_v6  ;;  %v1143_v5 = vld [vmem:[#allocation7 + $0x2e8] sm:$0xff]  ;;  %v1145_v6 = vld [vmem:[#allocation7 + $0x2f8] sm:$0xff] }
 0x26f   :  { %1500 = vmatprep.subr.mxu0 %v1071_v8  ;;  %1577 = vmatprep.subr.mxu1 %v1073_v9  ;;  %v1142_v8 = vld [vmem:[#allocation7 + $0x2e0] sm:$0xff]  ;;  %v1144_v9 = vld [vmem:[#allocation7 + $0x2f0] sm:$0xff] }
 0x270   :  { %1501 = vmatpush1.msra.mxu0 %v1070_v10  ;;  %1578 = vmatpush1.msra.mxu1 %v1072_v11  ;;  %v1139_v10 = vld [vmem:[#allocation7 + $0x2c8] sm:$0xff]  ;;  %v1141_v11 = vld [vmem:[#allocation7 + $0x2d8] sm:$0xff] }
 0x271   :  { %1502 = vmatprep.subr.mxu0 %v1067_v12  ;;  %1579 = vmatprep.subr.mxu1 %v1069_v13  ;;  %v1138_v12 = vld [vmem:[#allocation7 + $0x2c0] sm:$0xff]  ;;  %v1140_v13 = vld [vmem:[#allocation7 + $0x2d0] sm:$0xff] }
 0x272   :  { %1503 = vmatpush1.msra.mxu0 %v1066_v14  ;;  %1580 = vmatpush1.msra.mxu1 %v1068_v15  ;;  %v1135_v14 = vld [vmem:[#allocation7 + $0x2a8] sm:$0xff]  ;;  %v1137_v15 = vld [vmem:[#allocation7 + $0x2b8] sm:$0xff] }
 0x273   :  { %1504 = vmatprep.subr.mxu0 %v1063_v53  ;;  %1581 = vmatprep.subr.mxu1 %v1065_v48  ;;  %v1134_v53 = vld [vmem:[#allocation7 + $0x2a0] sm:$0xff]  ;;  %v1136_v48 = vld [vmem:[#allocation7 + $0x2b0] sm:$0xff] }
 0x274   :  { %1505 = vmatpush1.msra.mxu0 %v1062_v16  ;;  %1582 = vmatpush1.msra.mxu1 %v1064_v18  ;;  %v1131_v16 = vld [vmem:[#allocation7 + $0x288] sm:$0xff]  ;;  %v1133_v18 = vld [vmem:[#allocation7 + $0x298] sm:$0xff] }
 0x275   :  { %1506 = vmatprep.subr.mxu0 %v1059_v32  ;;  %1583 = vmatprep.subr.mxu1 %v1061_v34  ;;  %v1130_v32 = vld [vmem:[#allocation7 + $0x280] sm:$0xff]  ;;  %v1132_v34 = vld [vmem:[#allocation7 + $0x290] sm:$0xff] }
 0x276   :  { %1507 = vmatpush1.msra.mxu0 %v1058_v22  ;;  %1584 = vmatpush1.msra.mxu1 %v1060_v23  ;;  %v1127_v22 = vld [vmem:[#allocation7 + $0x268] sm:$0xff]  ;;  %v1129_v23 = vld [vmem:[#allocation7 + $0x278] sm:$0xff] }
 0x277   :  { %1508 = vmatprep.subr.mxu0 %v1055_v28  ;;  %1585 = vmatprep.subr.mxu1 %v1057_v29  ;;  %v1126_v28 = vld [vmem:[#allocation7 + $0x260] sm:$0xff]  ;;  %v1128_v29 = vld [vmem:[#allocation7 + $0x270] sm:$0xff] }
 0x278   :  { %1509 = vmatpush1.msra.mxu0 %v1054_v26  ;;  %1586 = vmatpush1.msra.mxu1 %v1056_v27  ;;  %v1123_v26 = vld [vmem:[#allocation7 + $0x248] sm:$0xff]  ;;  %v1125_v27 = vld [vmem:[#allocation7 + $0x258] sm:$0xff] }
 0x279   :  { %1510 = vmatprep.subr.mxu0 %v1051_v30  ;;  %1587 = vmatprep.subr.mxu1 %v1053_v24  ;;  %v1122_v30 = vld [vmem:[#allocation7 + $0x240] sm:$0xff]  ;;  %v1124_v24 = vld [vmem:[#allocation7 + $0x250] sm:$0xff] }
 0x27a   :  { %1511 = vmatpush1.msra.mxu0 %v1050_v25  ;;  %1588 = vmatpush1.msra.mxu1 %v1052_v31  ;;  %v1119_v25 = vld [vmem:[#allocation7 + $0x228] sm:$0xff]  ;;  %v1121_v31 = vld [vmem:[#allocation7 + $0x238] sm:$0xff] }
 0x27b   :  { %1512 = vmatprep.subr.mxu0 %v1175_v38  ;;  %1589 = vmatprep.subr.mxu1 %v1177_v39  ;;  %v1118_v38 = vld [vmem:[#allocation7 + $0x220] sm:$0xff]  ;;  %v1120_v39 = vld [vmem:[#allocation7 + $0x230] sm:$0xff] }
 0x27c   :  { %1513 = vmatpush2.msra.mxu0 %v1174_v40  ;;  %1590 = vmatpush2.msra.mxu1 %v1176_v41  ;;  %v1115_v40 = vld [vmem:[#allocation7 + $0x208] sm:$0xff]  ;;  %v1117_v41 = vld [vmem:[#allocation7 + $0x218] sm:$0xff] }
 0x27d   :  { %1514 = vmatprep.subr.mxu0 %v1171_v42  ;;  %1591 = vmatprep.subr.mxu1 %v1173_v43  ;;  %v1114_v42 = vld [vmem:[#allocation7 + $0x200] sm:$0xff]  ;;  %v1116_v43 = vld [vmem:[#allocation7 + $0x210] sm:$0xff] }
 0x27e   :  { %1515 = vmatpush2.msra.mxu0 %v1170_v20  ;;  %1592 = vmatpush2.msra.mxu1 %v1172_v0  ;;  %v1700_v20 = vld [vmem:[#allocation7 + $0x9e8] sm:$0xff]  ;;  %v1702_v0 = vld [vmem:[#allocation7 + $0x9f8] sm:$0xff] }
 0x27f   :  { %1516 = vmatprep.subr.mxu0 %v1167_v21  ;;  %1593 = vmatprep.subr.mxu1 %v1169_v19  ;;  %v1699_v21 = vld [vmem:[#allocation7 + $0x9e0] sm:$0xff]  ;;  %v1701_v19 = vld [vmem:[#allocation7 + $0x9f0] sm:$0xff] }
 0x280   :  { %1517 = vmatpush2.msra.mxu0 %v1166_v17  ;;  %1594 = vmatpush2.msra.mxu1 %v1168_v33  ;;  %v1637_v17 = vld [vmem:[#allocation2 + $0x8] sm:$0x3f] }
 0x281   :  { %1518 = vmatprep.subr.mxu0 %v1163_v35  ;;  %1595 = vmatprep.subr.mxu1 %v1165_v36  ;;  %v1049_v33 = vld [vmem:[#allocation2 + $0x8] sm:$0xf]  ;;  %v1696_v35 = vld [vmem:[#allocation7 + $0x9c8] sm:$0xff] }
 0x282   :  { %1519 = vmatpush2.msra.mxu0 %v1162_v37  ;;  %1596 = vmatpush2.msra.mxu1 %v1164_v44  ;;  %v1698_v36 = vld [vmem:[#allocation7 + $0x9d8] sm:$0xff]  ;;  %v1695_v37 = vld [vmem:[#allocation7 + $0x9c0] sm:$0xff]  ;;  %v1697_v44 = vld [vmem:[#allocation7 + $0x9d0] sm:$0xff] }
 0x283   :  { %1520 = vmatprep.subr.mxu0 %v1159_v49  ;;  %1597 = vmatprep.subr.mxu1 %v1161_v50  ;;  %v1635_v49 = vld [vmem:[#allocation2] sm:$0xfc]  ;;  %v8702_v50 = vrot.slane %v1637_v17, 2  ;;  %v1644_v17 = vld [vmem:[#allocation7 + $0x828] sm:$0xff] }
 0x284   :  { %1521 = vmatpush2.msra.mxu0 %v1158_v51  ;;  %1598 = vmatpush2.msra.mxu1 %v1160_v52  ;;  %v1694_v51 = vld [vmem:[#allocation7 + $0x9b8] sm:$0xff]  ;;  %v1048_v52 = vld [vmem:[#allocation2 + $0x18] sm:$0xf] }
 0x285   :  { %1522 = vmatprep.subr.mxu0 %v1155_v54  ;;  %1599 = vmatprep.subr.mxu1 %v1157_v57  ;;  %v1691_v54 = vld [vmem:[#allocation7 + $0x9a0] sm:$0xff]  ;;  %v1774_v57 = vrot.slane %v1635_v49, 2 }
 0x286   :  { %1523 = vmatpush2.msra.mxu0 %v1154_v58  ;;  %1600 = vmatpush2.msra.mxu1 %v1156_v59  ;;  %v1693_v58 = vld [vmem:[#allocation7 + $0x9b0] sm:$0xff]  ;;  %v1639_v49 = vld [vmem:[#allocation7 + $0x800] sm:$0xff] }
 0x287   :  { %1524 = vmatprep.subr.mxu0 %v1151_v60  ;;  %1601 = vmatprep.subr.mxu1 %v1153_v61  ;;  %v1776_v59 = vsel %vm867_vm0, %v1774_v57, %v8702_v50  ;;  %v1688_v60 = vld [vmem:[#allocation7 + $0x988] sm:$0xff]  ;;  %v1690_v61 = vld [vmem:[#allocation7 + $0x998] sm:$0xff]  ;;  %v1765_v57 = vld [vmem:[#allocation7 + $0xbf0] sm:$0xff] }
 0x288   :  { %1525 = vmatpush2.msra.mxu0 %v1150_v62  ;;  %1602 = vmatpush2.msra.mxu1 %v1152_v63  ;;  %v1687_v62 = vld [vmem:[#allocation7 + $0x980] sm:$0xff]  ;;  %v1689_v63 = vld [vmem:[#allocation7 + $0x990] sm:$0xff] }
 0x289   :  { %1526 = vmatprep.subr.mxu0 %v1147_v1  ;;  %1603 = vmatprep.subr.mxu1 %v1149_v2  ;;  %v1684_v1 = vld [vmem:[#allocation7 + $0x968] sm:$0xff]  ;;  %v1686_v2 = vld [vmem:[#allocation7 + $0x978] sm:$0xff] }
 0x28a   :  { %1527 = vmatpush2.msra.mxu0 %v1146_v3  ;;  %1604 = vmatpush2.msra.mxu1 %v1148_v4  ;;  %v1683_v3 = vld [vmem:[#allocation7 + $0x960] sm:$0xff]  ;;  %v1685_v4 = vld [vmem:[#allocation7 + $0x970] sm:$0xff] }
 0x28b   :  { %1528 = vmatprep.subr.mxu0 %v1143_v5  ;;  %1605 = vmatprep.subr.mxu1 %v1145_v6  ;;  %v1680_v5 = vld [vmem:[#allocation7 + $0x948] sm:$0xff]  ;;  %v1682_v6 = vld [vmem:[#allocation7 + $0x958] sm:$0xff] }
 0x28c   :  { %1529 = vmatpush2.msra.mxu0 %v1142_v8  ;;  %1606 = vmatpush2.msra.mxu1 %v1144_v9  ;;  %v1679_v8 = vld [vmem:[#allocation7 + $0x940] sm:$0xff]  ;;  %v1681_v9 = vld [vmem:[#allocation7 + $0x950] sm:$0xff] }
 0x28d   :  { %1530 = vmatprep.subr.mxu0 %v1139_v10  ;;  %1607 = vmatprep.subr.mxu1 %v1141_v11  ;;  %v1676_v10 = vld [vmem:[#allocation7 + $0x928] sm:$0xff]  ;;  %v1678_v11 = vld [vmem:[#allocation7 + $0x938] sm:$0xff] }
 0x28e   :  { %1531 = vmatpush2.msra.mxu0 %v1138_v12  ;;  %1608 = vmatpush2.msra.mxu1 %v1140_v13  ;;  %v1675_v12 = vld [vmem:[#allocation7 + $0x920] sm:$0xff]  ;;  %v1677_v13 = vld [vmem:[#allocation7 + $0x930] sm:$0xff] }
 0x28f   :  { %1532 = vmatprep.subr.mxu0 %v1135_v14  ;;  %1609 = vmatprep.subr.mxu1 %v1137_v15  ;;  %v1672_v14 = vld [vmem:[#allocation7 + $0x908] sm:$0xff]  ;;  %v1674_v15 = vld [vmem:[#allocation7 + $0x918] sm:$0xff] }
 0x290   :  { %1533 = vmatpush2.msra.mxu0 %v1134_v53  ;;  %1610 = vmatpush2.msra.mxu1 %v1136_v48  ;;  %v1671_v53 = vld [vmem:[#allocation7 + $0x900] sm:$0xff]  ;;  %v1673_v48 = vld [vmem:[#allocation7 + $0x910] sm:$0xff] }
 0x291   :  { %1534 = vmatprep.subr.mxu0 %v1131_v16  ;;  %1611 = vmatprep.subr.mxu1 %v1133_v18  ;;  %v1668_v16 = vld [vmem:[#allocation7 + $0x8e8] sm:$0xff]  ;;  %v1670_v18 = vld [vmem:[#allocation7 + $0x8f8] sm:$0xff] }
 0x292   :  { %1535 = vmatpush2.msra.mxu0 %v1130_v32  ;;  %1612 = vmatpush2.msra.mxu1 %v1132_v34  ;;  %v1667_v32 = vld [vmem:[#allocation7 + $0x8e0] sm:$0xff]  ;;  %v1669_v34 = vld [vmem:[#allocation7 + $0x8f0] sm:$0xff] }
 0x293   :  { %1536 = vmatprep.subr.mxu0 %v1127_v22  ;;  %1613 = vmatprep.subr.mxu1 %v1129_v23  ;;  %v1664_v22 = vld [vmem:[#allocation7 + $0x8c8] sm:$0xff]  ;;  %v1666_v23 = vld [vmem:[#allocation7 + $0x8d8] sm:$0xff] }
 0x294   :  { %1537 = vmatpush2.msra.mxu0 %v1126_v28  ;;  %1614 = vmatpush2.msra.mxu1 %v1128_v29  ;;  %v1663_v28 = vld [vmem:[#allocation7 + $0x8c0] sm:$0xff]  ;;  %v1665_v29 = vld [vmem:[#allocation7 + $0x8d0] sm:$0xff] }
 0x295   :  { %1538 = vmatprep.subr.mxu0 %v1123_v26  ;;  %1615 = vmatprep.subr.mxu1 %v1125_v27  ;;  %v1660_v26 = vld [vmem:[#allocation7 + $0x8a8] sm:$0xff]  ;;  %v1662_v27 = vld [vmem:[#allocation7 + $0x8b8] sm:$0xff] }
 0x296   :  { %1539 = vmatpush2.msra.mxu0 %v1122_v30  ;;  %1616 = vmatpush2.msra.mxu1 %v1124_v24  ;;  %v1659_v30 = vld [vmem:[#allocation7 + $0x8a0] sm:$0xff]  ;;  %v1661_v24 = vld [vmem:[#allocation7 + $0x8b0] sm:$0xff] }
 0x297   :  { %1540 = vmatprep.subr.mxu0 %v1119_v25  ;;  %1617 = vmatprep.subr.mxu1 %v1121_v31  ;;  %v1656_v25 = vld [vmem:[#allocation7 + $0x888] sm:$0xff]  ;;  %v1658_v31 = vld [vmem:[#allocation7 + $0x898] sm:$0xff] }
 0x298   :  { %1541 = vmatpush2.msra.mxu0 %v1118_v38  ;;  %1618 = vmatpush2.msra.mxu1 %v1120_v39  ;;  %v1655_v38 = vld [vmem:[#allocation7 + $0x880] sm:$0xff]  ;;  %v1657_v39 = vld [vmem:[#allocation7 + $0x890] sm:$0xff] }
 0x299   :  { %1542 = vmatprep.subr.mxu0 %v1115_v40  ;;  %1619 = vmatprep.subr.mxu1 %v1117_v41  ;;  %v1652_v40 = vld [vmem:[#allocation7 + $0x868] sm:$0xff]  ;;  %v1654_v41 = vld [vmem:[#allocation7 + $0x878] sm:$0xff] }
 0x29a   :  { %1543 = vmatpush2.msra.mxu0 %v1114_v42  ;;  %1620 = vmatpush2.msra.mxu1 %v1116_v43  ;;  %v1651_v42 = vld [vmem:[#allocation7 + $0x860] sm:$0xff]  ;;  %v1653_v43 = vld [vmem:[#allocation7 + $0x870] sm:$0xff] }
 0x29b   :  { %1545 = vmatmul.mubr.f32.vlgmr.msra.gmra.mxu0 %v8695_v7  ;;  %1622 = vmatmul.mubr.f32.vlgmr.msra.gmra.mxu1 %v8695_v7  ;;  %v1692_v7 = vld [vmem:[#allocation7 + $0x9a8] sm:$0xff] }
 0x29c   :  { %1781 = vmatprep.subr.mxu0 %v1700_v20  ;;  %1858 = vmatprep.subr.mxu1 %v1702_v0  ;;  %v1648_v20 = vld [vmem:[#allocation7 + $0x848] sm:$0xff]  ;;  %v1650_v0 = vld [vmem:[#allocation7 + $0x858] sm:$0xff] }
 0x29d   :  { %1550 = vmatprep.mubr.f32.mxu0 %v1049_v33  ;;  %1627 = vmatprep.mubr.f32.mxu1 %v1049_v33  ;;  %v1646_v33 = vld [vmem:[#allocation7 + $0x838] sm:$0xff] }
 0x29e   :  { %1782 = vmatpush1.msra.mxu0 %v1699_v21  ;;  %1859 = vmatpush1.msra.mxu1 %v1701_v19  ;;  %v1647_v21 = vld [vmem:[#allocation7 + $0x840] sm:$0xff]  ;;  %v1649_v19 = vld [vmem:[#allocation7 + $0x850] sm:$0xff] }
 0x29f   :  { %1783 = vmatprep.subr.mxu0 %v1696_v35  ;;  %1860 = vmatprep.subr.mxu1 %v1698_v36  ;;  %v1643_v35 = vld [vmem:[#allocation7 + $0x820] sm:$0xff]  ;;  %v1645_v36 = vld [vmem:[#allocation7 + $0x830] sm:$0xff] }
 0x2a0   :  { %1784 = vmatpush1.msra.mxu0 %v1695_v37  ;;  %1861 = vmatpush1.msra.mxu1 %v1697_v44  ;;  %v1640_v37 = vld [vmem:[#allocation7 + $0x808] sm:$0xff]  ;;  %v1642_v44 = vld [vmem:[#allocation7 + $0x818] sm:$0xff] }
 0x2a1   :  { %1551 = vmatmul.mubr.f32.gmra.mxu0 %v1048_v52  ;;  %1628 = vmatmul.mubr.f32.gmra.mxu1 %v1048_v52  ;;  %v1766_v52 = vld [vmem:[#allocation7 + $0xbf8] sm:$0xff] }
 0x2a2   :  { %1785 = vmatprep.subr.mxu0 %v1692_v7  ;;  %1862 = vmatprep.subr.mxu1 %v1694_v51  ;;  %v1641_v7 = vld [vmem:[#allocation7 + $0x810] sm:$0xff]  ;;  %v1764_v51 = vld [vmem:[#allocation7 + $0xbe8] sm:$0xff] }
 0x2a3   :  { %1786 = vmatpush1.msra.mxu0 %v1691_v54  ;;  %1845 = vmatprep.mubr.f32.mxu0 %v1776_v59  ;;  %v1763_v54 = vld [vmem:[#allocation7 + $0xbe0] sm:$0xff] }
 0x2a4   :  { %1863 = vmatpush1.msra.mxu1 %v1693_v58  ;;  %1922 = vmatprep.mubr.f32.mxu1 %v1776_v59  ;;  %v1760_v58 = vld [vmem:[#allocation7 + $0xbc8] sm:$0xff]  ;;  %v1762_v59 = vld [vmem:[#allocation7 + $0xbd8] sm:$0xff] }
 0x2a5   :  { %1787 = vmatprep.subr.mxu0 %v1688_v60  ;;  %1864 = vmatprep.subr.mxu1 %v1690_v61  ;;  %v1759_v60 = vld [vmem:[#allocation7 + $0xbc0] sm:$0xff]  ;;  %v1761_v61 = vld [vmem:[#allocation7 + $0xbd0] sm:$0xff] }
 0x2a6   :  { %1788 = vmatpush1.msra.mxu0 %v1687_v62  ;;  %1865 = vmatpush1.msra.mxu1 %v1689_v63  ;;  %v1756_v62 = vld [vmem:[#allocation7 + $0xba8] sm:$0xff]  ;;  %v1758_v63 = vld [vmem:[#allocation7 + $0xbb8] sm:$0xff] }
 0x2a7   :  { %1789 = vmatprep.subr.mxu0 %v1684_v1  ;;  %1866 = vmatprep.subr.mxu1 %v1686_v2  ;;  %v1755_v1 = vld [vmem:[#allocation7 + $0xba0] sm:$0xff]  ;;  %v1757_v2 = vld [vmem:[#allocation7 + $0xbb0] sm:$0xff] }
 0x2a8   :  { %1790 = vmatpush1.msra.mxu0 %v1683_v3  ;;  %1867 = vmatpush1.msra.mxu1 %v1685_v4  ;;  %v1752_v3 = vld [vmem:[#allocation7 + $0xb88] sm:$0xff]  ;;  %v1754_v4 = vld [vmem:[#allocation7 + $0xb98] sm:$0xff] }
 0x2a9   :  { %1791 = vmatprep.subr.mxu0 %v1680_v5  ;;  %1868 = vmatprep.subr.mxu1 %v1682_v6  ;;  %v1751_v5 = vld [vmem:[#allocation7 + $0xb80] sm:$0xff]  ;;  %v1753_v6 = vld [vmem:[#allocation7 + $0xb90] sm:$0xff] }
 0x2aa   :  { %1792 = vmatpush1.msra.mxu0 %v1679_v8  ;;  %1869 = vmatpush1.msra.mxu1 %v1681_v9  ;;  %v1748_v8 = vld [vmem:[#allocation7 + $0xb68] sm:$0xff]  ;;  %v1750_v9 = vld [vmem:[#allocation7 + $0xb78] sm:$0xff] }
 0x2ab   :  { %1793 = vmatprep.subr.mxu0 %v1676_v10  ;;  %1870 = vmatprep.subr.mxu1 %v1678_v11  ;;  %v1747_v10 = vld [vmem:[#allocation7 + $0xb60] sm:$0xff]  ;;  %v1749_v11 = vld [vmem:[#allocation7 + $0xb70] sm:$0xff] }
 0x2ac   :  { %1794 = vmatpush1.msra.mxu0 %v1675_v12  ;;  %1871 = vmatpush1.msra.mxu1 %v1677_v13  ;;  %v1744_v12 = vld [vmem:[#allocation7 + $0xb48] sm:$0xff]  ;;  %v1746_v13 = vld [vmem:[#allocation7 + $0xb58] sm:$0xff] }
 0x2ad   :  { %1795 = vmatprep.subr.mxu0 %v1672_v14  ;;  %1872 = vmatprep.subr.mxu1 %v1674_v15  ;;  %v1743_v14 = vld [vmem:[#allocation7 + $0xb40] sm:$0xff]  ;;  %v1745_v15 = vld [vmem:[#allocation7 + $0xb50] sm:$0xff] }
 0x2ae   :  { %1796 = vmatpush1.msra.mxu0 %v1671_v53  ;;  %1873 = vmatpush1.msra.mxu1 %v1673_v48  ;;  %v1740_v53 = vld [vmem:[#allocation7 + $0xb28] sm:$0xff]  ;;  %v1742_v48 = vld [vmem:[#allocation7 + $0xb38] sm:$0xff] }
 0x2af   :  { %1797 = vmatprep.subr.mxu0 %v1668_v16  ;;  %1874 = vmatprep.subr.mxu1 %v1670_v18  ;;  %v1739_v16 = vld [vmem:[#allocation7 + $0xb20] sm:$0xff]  ;;  %v1741_v18 = vld [vmem:[#allocation7 + $0xb30] sm:$0xff] }
 0x2b0   :  { %1798 = vmatpush1.msra.mxu0 %v1667_v32  ;;  %1875 = vmatpush1.msra.mxu1 %v1669_v34  ;;  %v1736_v32 = vld [vmem:[#allocation7 + $0xb08] sm:$0xff]  ;;  %v1738_v34 = vld [vmem:[#allocation7 + $0xb18] sm:$0xff] }
 0x2b1   :  { %1799 = vmatprep.subr.mxu0 %v1664_v22  ;;  %1876 = vmatprep.subr.mxu1 %v1666_v23  ;;  %v1735_v22 = vld [vmem:[#allocation7 + $0xb00] sm:$0xff]  ;;  %v1737_v23 = vld [vmem:[#allocation7 + $0xb10] sm:$0xff] }
 0x2b2   :  { %1800 = vmatpush1.msra.mxu0 %v1663_v28  ;;  %1877 = vmatpush1.msra.mxu1 %v1665_v29  ;;  %v1732_v28 = vld [vmem:[#allocation7 + $0xae8] sm:$0xff]  ;;  %v1734_v29 = vld [vmem:[#allocation7 + $0xaf8] sm:$0xff] }
 0x2b3   :  { %1801 = vmatprep.subr.mxu0 %v1660_v26  ;;  %1878 = vmatprep.subr.mxu1 %v1662_v27  ;;  %v1731_v26 = vld [vmem:[#allocation7 + $0xae0] sm:$0xff]  ;;  %v1733_v27 = vld [vmem:[#allocation7 + $0xaf0] sm:$0xff] }
 0x2b4   :  { %1802 = vmatpush1.msra.mxu0 %v1659_v30  ;;  %1879 = vmatpush1.msra.mxu1 %v1661_v24  ;;  %v1728_v30 = vld [vmem:[#allocation7 + $0xac8] sm:$0xff]  ;;  %v1730_v24 = vld [vmem:[#allocation7 + $0xad8] sm:$0xff] }
 0x2b5   :  { %1803 = vmatprep.subr.mxu0 %v1656_v25  ;;  %1880 = vmatprep.subr.mxu1 %v1658_v31  ;;  %v1727_v25 = vld [vmem:[#allocation7 + $0xac0] sm:$0xff]  ;;  %v1729_v31 = vld [vmem:[#allocation7 + $0xad0] sm:$0xff] }
 0x2b6   :  { %1804 = vmatpush1.msra.mxu0 %v1655_v38  ;;  %1881 = vmatpush1.msra.mxu1 %v1657_v39  ;;  %v1724_v38 = vld [vmem:[#allocation7 + $0xaa8] sm:$0xff]  ;;  %v1726_v39 = vld [vmem:[#allocation7 + $0xab8] sm:$0xff] }
 0x2b7   :  { %1805 = vmatprep.subr.mxu0 %v1652_v40  ;;  %1882 = vmatprep.subr.mxu1 %v1654_v41  ;;  %v1723_v40 = vld [vmem:[#allocation7 + $0xaa0] sm:$0xff]  ;;  %v1725_v41 = vld [vmem:[#allocation7 + $0xab0] sm:$0xff] }
 0x2b8   :  { %1806 = vmatpush1.msra.mxu0 %v1651_v42  ;;  %1883 = vmatpush1.msra.mxu1 %v1653_v43  ;;  %v1720_v42 = vld [vmem:[#allocation7 + $0xa88] sm:$0xff]  ;;  %v1722_v43 = vld [vmem:[#allocation7 + $0xa98] sm:$0xff] }
 0x2b9   :  { %1807 = vmatprep.subr.mxu0 %v1648_v20  ;;  %1884 = vmatprep.subr.mxu1 %v1650_v0  ;;  %v1719_v20 = vld [vmem:[#allocation7 + $0xa80] sm:$0xff]  ;;  %v1721_v0 = vld [vmem:[#allocation7 + $0xa90] sm:$0xff] }
 0x2ba   :  { %1808 = vmatpush1.msra.mxu0 %v1647_v21  ;;  %1885 = vmatpush1.msra.mxu1 %v1649_v19  ;;  %v1716_v21 = vld [vmem:[#allocation7 + $0xa68] sm:$0xff]  ;;  %v1718_v19 = vld [vmem:[#allocation7 + $0xa78] sm:$0xff] }
 0x2bb   :  { %1809 = vmatprep.subr.mxu0 %v1644_v17  ;;  %1886 = vmatprep.subr.mxu1 %v1646_v33  ;;  %v1715_v17 = vld [vmem:[#allocation7 + $0xa60] sm:$0xff]  ;;  %v1717_v33 = vld [vmem:[#allocation7 + $0xa70] sm:$0xff] }
 0x2bc   :  { %1810 = vmatpush1.msra.mxu0 %v1643_v35  ;;  %1887 = vmatpush1.msra.mxu1 %v1645_v36  ;;  %v1712_v35 = vld [vmem:[#allocation7 + $0xa48] sm:$0xff]  ;;  %v1714_v36 = vld [vmem:[#allocation7 + $0xa58] sm:$0xff] }
 0x2bd   :  { %1811 = vmatprep.subr.mxu0 %v1640_v37  ;;  %1888 = vmatprep.subr.mxu1 %v1642_v44  ;;  %v1711_v37 = vld [vmem:[#allocation7 + $0xa40] sm:$0xff]  ;;  %v1713_v44 = vld [vmem:[#allocation7 + $0xa50] sm:$0xff] }
 0x2be   :  { %1812 = vmatpush1.msra.mxu0 %v1639_v49  ;;  %1889 = vmatpush1.msra.mxu1 %v1641_v7  ;;  %v1636_v49 = vld [vmem:[#allocation2 + $0x18] sm:$0x3f] }
 0x2bf   :  { %1813 = vmatprep.subr.mxu0 %v1764_v51  ;;  %1890 = vmatprep.subr.mxu1 %v1766_v52  ;;  %v1708_v7 = vld [vmem:[#allocation7 + $0xa28] sm:$0xff]  ;;  %v1710_v51 = vld [vmem:[#allocation7 + $0xa38] sm:$0xff]  ;;  %v1707_v52 = vld [vmem:[#allocation7 + $0xa20] sm:$0xff] }
 0x2c0   :  { %1814 = vmatpush2.msra.mxu0 %v1763_v54  ;;  %1891 = vmatpush2.msra.mxu1 %v1765_v57  ;;  %v1709_v54 = vld [vmem:[#allocation7 + $0xa30] sm:$0xff]  ;;  %v1634_v57 = vld [vmem:[#allocation2 + $0x10] sm:$0xfc] }
 0x2c1   :  { %1815 = vmatprep.subr.mxu0 %v1760_v58  ;;  %1892 = vmatprep.subr.mxu1 %v1762_v59  ;;  %v1704_v58 = vld [vmem:[#allocation7 + $0xa08] sm:$0xff]  ;;  %v1706_v59 = vld [vmem:[#allocation7 + $0xa18] sm:$0xff] }
 0x2c2   :  { %1816 = vmatpush2.msra.mxu0 %v1759_v60  ;;  %1893 = vmatpush2.msra.mxu1 %v1761_v61  ;;  %v1772_v60 = vrot.slane %v1636_v49, 2  ;;  %v1703_v61 = vld [vmem:[#allocation7 + $0xa00] sm:$0xff]  ;;  %v1971_v49 = vld [vmem:[#allocation7 + $0xcb8] sm:$0xff] }
 0x2c3   :  { %1817 = vmatprep.subr.mxu0 %v1756_v62  ;;  %1894 = vmatprep.subr.mxu1 %v1758_v63  ;;  %v1705_v62 = vld [vmem:[#allocation7 + $0xa10] sm:$0xff]  ;;  %v1771_v63 = vrot.slane %v1634_v57, 2  ;;  %v1964_v57 = vld [vmem:[#allocation7 + $0xc80] sm:$0xff] }
 0x2c4   :  { %1818 = vmatpush2.msra.mxu0 %v1755_v1  ;;  %1895 = vmatpush2.msra.mxu1 %v1757_v2  ;;  %v2009_v1 = vld [vmem:[#allocation7 + $0xde8] sm:$0xff]  ;;  %v2011_v2 = vld [vmem:[#allocation7 + $0xdf8] sm:$0xff] }
 0x2c5   :  { %1819 = vmatprep.subr.mxu0 %v1752_v3  ;;  %1896 = vmatprep.subr.mxu1 %v1754_v4  ;;  %v1773_v3 = vsel %vm867_vm0, %v1771_v63, %v1772_v60  ;;  %v2008_v4 = vld [vmem:[#allocation7 + $0xde0] sm:$0xff]  ;;  %v1957_v63 = vld [vmem:[#allocation7 + $0xc48] sm:$0xff] }
 0x2c6   :  { %1820 = vmatpush2.msra.mxu0 %v1751_v5  ;;  %1897 = vmatpush2.msra.mxu1 %v1753_v6  ;;  %v2010_v5 = vld [vmem:[#allocation7 + $0xdf0] sm:$0xff]  ;;  %v1946_v6 = vld [vmem:[#allocation2 + $0x8] sm:$0x7f] }
 0x2c7   :  { %1821 = vmatprep.subr.mxu0 %v1748_v8  ;;  %1898 = vmatprep.subr.mxu1 %v1750_v9  ;;  %v2005_v8 = vld [vmem:[#allocation7 + $0xdc8] sm:$0xff]  ;;  %v2007_v9 = vld [vmem:[#allocation7 + $0xdd8] sm:$0xff] }
 0x2c8   :  { %1822 = vmatpush2.msra.mxu0 %v1747_v10  ;;  %1899 = vmatpush2.msra.mxu1 %v1749_v11  ;;  %v2004_v10 = vld [vmem:[#allocation7 + $0xdc0] sm:$0xff]  ;;  %v2006_v11 = vld [vmem:[#allocation7 + $0xdd0] sm:$0xff] }
 0x2c9   :  { %1823 = vmatprep.subr.mxu0 %v1744_v12  ;;  %1900 = vmatprep.subr.mxu1 %v1746_v13  ;;  %v1944_v12 = vld [vmem:[#allocation2] sm:$0xf8]  ;;  %v8709_v13 = vrot.slane %v1946_v6, 3  ;;  %v1952_v6 = vld [vmem:[#allocation7 + $0xc20] sm:$0xff] }
 0x2ca   :  { %1824 = vmatpush2.msra.mxu0 %v1743_v14  ;;  %1901 = vmatpush2.msra.mxu1 %v1745_v15  ;;  %v2001_v14 = vld [vmem:[#allocation7 + $0xda8] sm:$0xff]  ;;  %v2003_v15 = vld [vmem:[#allocation7 + $0xdb8] sm:$0xff] }
 0x2cb   :  { %1825 = vmatprep.subr.mxu0 %v1740_v53  ;;  %1902 = vmatprep.subr.mxu1 %v1742_v48  ;;  %v2000_v53 = vld [vmem:[#allocation7 + $0xda0] sm:$0xff]  ;;  %v2084_v48 = vrot.slane %v1944_v12, 3  ;;  %v1950_v12 = vld [vmem:[#allocation7 + $0xc10] sm:$0xff] }
 0x2cc   :  { %1826 = vmatpush2.msra.mxu0 %v1739_v16  ;;  %1903 = vmatpush2.msra.mxu1 %v1741_v18  ;;  %v2002_v16 = vld [vmem:[#allocation7 + $0xdb0] sm:$0xff]  ;;  %v1997_v18 = vld [vmem:[#allocation7 + $0xd88] sm:$0xff] }
 0x2cd   :  { %1827 = vmatprep.subr.mxu0 %v1736_v32  ;;  %1904 = vmatprep.subr.mxu1 %v1738_v34  ;;  %v1999_v32 = vld [vmem:[#allocation7 + $0xd98] sm:$0xff]  ;;  %v1996_v34 = vld [vmem:[#allocation7 + $0xd80] sm:$0xff] }
 0x2ce   :  { %1828 = vmatpush2.msra.mxu0 %v1735_v22  ;;  %1905 = vmatpush2.msra.mxu1 %v1737_v23  ;;  %v1998_v22 = vld [vmem:[#allocation7 + $0xd90] sm:$0xff]  ;;  %v1993_v23 = vld [vmem:[#allocation7 + $0xd68] sm:$0xff] }
 0x2cf   :  { %1829 = vmatprep.subr.mxu0 %v1732_v28  ;;  %1906 = vmatprep.subr.mxu1 %v1734_v29  ;;  %v1995_v28 = vld [vmem:[#allocation7 + $0xd78] sm:$0xff]  ;;  %v1992_v29 = vld [vmem:[#allocation7 + $0xd60] sm:$0xff] }
 0x2d0   :  { %1830 = vmatpush2.msra.mxu0 %v1731_v26  ;;  %1907 = vmatpush2.msra.mxu1 %v1733_v27  ;;  %v1994_v26 = vld [vmem:[#allocation7 + $0xd70] sm:$0xff]  ;;  %v1989_v27 = vld [vmem:[#allocation7 + $0xd48] sm:$0xff] }
 0x2d1   :  { %1831 = vmatprep.subr.mxu0 %v1728_v30  ;;  %1908 = vmatprep.subr.mxu1 %v1730_v24  ;;  %v1991_v30 = vld [vmem:[#allocation7 + $0xd58] sm:$0xff]  ;;  %v1988_v24 = vld [vmem:[#allocation7 + $0xd40] sm:$0xff] }
 0x2d2   :  { %1832 = vmatpush2.msra.mxu0 %v1727_v25  ;;  %1909 = vmatpush2.msra.mxu1 %v1729_v31  ;;  %v1990_v25 = vld [vmem:[#allocation7 + $0xd50] sm:$0xff]  ;;  %v1985_v31 = vld [vmem:[#allocation7 + $0xd28] sm:$0xff] }
 0x2d3   :  { %1833 = vmatprep.subr.mxu0 %v1724_v38  ;;  %1910 = vmatprep.subr.mxu1 %v1726_v39  ;;  %v1987_v38 = vld [vmem:[#allocation7 + $0xd38] sm:$0xff]  ;;  %v1984_v39 = vld [vmem:[#allocation7 + $0xd20] sm:$0xff] }
 0x2d4   :  { %1834 = vmatpush2.msra.mxu0 %v1723_v40  ;;  %1911 = vmatpush2.msra.mxu1 %v1725_v41  ;;  %v1986_v40 = vld [vmem:[#allocation7 + $0xd30] sm:$0xff]  ;;  %v1981_v41 = vld [vmem:[#allocation7 + $0xd08] sm:$0xff] }
 0x2d5   :  { %1835 = vmatprep.subr.mxu0 %v1720_v42  ;;  %1912 = vmatprep.subr.mxu1 %v1722_v43  ;;  %v1983_v42 = vld [vmem:[#allocation7 + $0xd18] sm:$0xff]  ;;  %v1980_v43 = vld [vmem:[#allocation7 + $0xd00] sm:$0xff] }
 0x2d6   :  { %1836 = vmatpush2.msra.mxu0 %v1719_v20  ;;  %1913 = vmatpush2.msra.mxu1 %v1721_v0  ;;  %v1982_v20 = vld [vmem:[#allocation7 + $0xd10] sm:$0xff]  ;;  %v1977_v0 = vld [vmem:[#allocation7 + $0xce8] sm:$0xff] }
 0x2d7   :  { %1837 = vmatprep.subr.mxu0 %v1716_v21  ;;  %1914 = vmatprep.subr.mxu1 %v1718_v19  ;;  %v1979_v21 = vld [vmem:[#allocation7 + $0xcf8] sm:$0xff]  ;;  %v1976_v19 = vld [vmem:[#allocation7 + $0xce0] sm:$0xff] }
 0x2d8   :  { %1838 = vmatpush2.msra.mxu0 %v1715_v17  ;;  %1915 = vmatpush2.msra.mxu1 %v1717_v33  ;;  %v1978_v17 = vld [vmem:[#allocation7 + $0xcf0] sm:$0xff]  ;;  %v1973_v33 = vld [vmem:[#allocation7 + $0xcc8] sm:$0xff] }
 0x2d9   :  { %1839 = vmatprep.subr.mxu0 %v1712_v35  ;;  %1916 = vmatprep.subr.mxu1 %v1714_v36  ;;  %v1975_v35 = vld [vmem:[#allocation7 + $0xcd8] sm:$0xff]  ;;  %v1972_v36 = vld [vmem:[#allocation7 + $0xcc0] sm:$0xff] }
 0x2da   :  { %1840 = vmatpush2.msra.mxu0 %v1711_v37  ;;  %1917 = vmatpush2.msra.mxu1 %v1713_v44  ;;  %v1974_v37 = vld [vmem:[#allocation7 + $0xcd0] sm:$0xff]  ;;  %v1969_v44 = vld [vmem:[#allocation7 + $0xca8] sm:$0xff] }
 0x2db   :  { %1841 = vmatprep.subr.mxu0 %v1708_v7  ;;  %1918 = vmatprep.subr.mxu1 %v1710_v51  ;;  %v1968_v7 = vld [vmem:[#allocation7 + $0xca0] sm:$0xff]  ;;  %v1970_v51 = vld [vmem:[#allocation7 + $0xcb0] sm:$0xff] }
 0x2dc   :  { %1842 = vmatpush2.msra.mxu0 %v1707_v52  ;;  %1919 = vmatpush2.msra.mxu1 %v1709_v54  ;;  %v1965_v52 = vld [vmem:[#allocation7 + $0xc88] sm:$0xff]  ;;  %v1967_v54 = vld [vmem:[#allocation7 + $0xc98] sm:$0xff] }
 0x2dd   :  { %1843 = vmatprep.subr.mxu0 %v1704_v58  ;;  %1920 = vmatprep.subr.mxu1 %v1706_v59  ;;  %v1966_v58 = vld [vmem:[#allocation7 + $0xc90] sm:$0xff]  ;;  %v1961_v59 = vld [vmem:[#allocation7 + $0xc68] sm:$0xff] }
 0x2de   :  { %1844 = vmatpush2.msra.mxu0 %v1703_v61  ;;  %1921 = vmatpush2.msra.mxu1 %v1705_v62  ;;  %v1960_v61 = vld [vmem:[#allocation7 + $0xc60] sm:$0xff]  ;;  %v1962_v62 = vld [vmem:[#allocation7 + $0xc70] sm:$0xff] }
 0x2df   :  { %1846 = vmatmul.mubr.f32.vlgmr.msra.gmra.mxu0 %v1773_v3  ;;  %1923 = vmatmul.mubr.f32.vlgmr.msra.gmra.mxu1 %v1773_v3  ;;  %v1958_v3 = vld [vmem:[#allocation7 + $0xc50] sm:$0xff] }
 0x2e0   :  { %2091 = vmatprep.subr.mxu0 %v2009_v1  ;;  %2168 = vmatprep.subr.mxu1 %v2011_v2  ;;  %v1959_v1 = vld [vmem:[#allocation7 + $0xc58] sm:$0xff]  ;;  %v1956_v2 = vld [vmem:[#allocation7 + $0xc40] sm:$0xff] }
 0x2e1   :  { %1851 = vmatprep.mubr.f32.mxu0 %v8702_v50  ;;  %1928 = vmatprep.mubr.f32.mxu1 %v8702_v50  ;;  %v2086_v50 = vsel %vm2080_vm7, %v2084_v48, %v8709_v13  ;;  %v2074_v48 = vld [vmem:[#allocation7 + $0xff0] sm:$0xff] }
 0x2e2   :  { %2092 = vmatpush1.msra.mxu0 %v2008_v4  ;;  %2169 = vmatpush1.msra.mxu1 %v2010_v5  ;;  %v1953_v4 = vld [vmem:[#allocation7 + $0xc28] sm:$0xff]  ;;  %v1955_v5 = vld [vmem:[#allocation7 + $0xc38] sm:$0xff] }
 0x2e3   :  { %2093 = vmatprep.subr.mxu0 %v2005_v8  ;;  %2170 = vmatprep.subr.mxu1 %v2007_v9  ;;  %v1954_v8 = vld [vmem:[#allocation7 + $0xc30] sm:$0xff]  ;;  %v1949_v9 = vld [vmem:[#allocation7 + $0xc08] sm:$0xff] }
 0x2e4   :  { %2094 = vmatpush1.msra.mxu0 %v2004_v10  ;;  %2171 = vmatpush1.msra.mxu1 %v2006_v11  ;;  %v1951_v10 = vld [vmem:[#allocation7 + $0xc18] sm:$0xff]  ;;  %v1948_v11 = vld [vmem:[#allocation7 + $0xc00] sm:$0xff] }
 0x2e5   :  { %1852 = vmatmul.mubr.f32.gmra.mxu0 %v1772_v60  ;;  %1929 = vmatmul.mubr.f32.gmra.mxu1 %v1772_v60  ;;  %v1963_v60 = vld [vmem:[#allocation7 + $0xc78] sm:$0xff] }
 0x2e6   :  { %2095 = vmatprep.subr.mxu0 %v2001_v14  ;;  %2172 = vmatprep.subr.mxu1 %v2003_v15  ;;  %v2073_v14 = vld [vmem:[#allocation7 + $0xfe8] sm:$0xff]  ;;  %v2075_v15 = vld [vmem:[#allocation7 + $0xff8] sm:$0xff] }
 0x2e7   :  { %2096 = vmatpush1.msra.mxu0 %v2000_v53  ;;  %2155 = vmatprep.mubr.f32.mxu0 %v2086_v50  ;;  %v2072_v53 = vld [vmem:[#allocation7 + $0xfe0] sm:$0xff] }
 0x2e8   :  { %2173 = vmatpush1.msra.mxu1 %v2002_v16  ;;  %2232 = vmatprep.mubr.f32.mxu1 %v2086_v50  ;;  %v2069_v16 = vld [vmem:[#allocation7 + $0xfc8] sm:$0xff]  ;;  %v2071_v50 = vld [vmem:[#allocation7 + $0xfd8] sm:$0xff] }
 0x2e9   :  { %2097 = vmatprep.subr.mxu0 %v1997_v18  ;;  %2174 = vmatprep.subr.mxu1 %v1999_v32  ;;  %v2068_v18 = vld [vmem:[#allocation7 + $0xfc0] sm:$0xff]  ;;  %v2070_v32 = vld [vmem:[#allocation7 + $0xfd0] sm:$0xff] }
 0x2ea   :  { %2098 = vmatpush1.msra.mxu0 %v1996_v34  ;;  %2175 = vmatpush1.msra.mxu1 %v1998_v22  ;;  %v2065_v34 = vld [vmem:[#allocation7 + $0xfa8] sm:$0xff]  ;;  %v2067_v22 = vld [vmem:[#allocation7 + $0xfb8] sm:$0xff] }
 0x2eb   :  { %2099 = vmatprep.subr.mxu0 %v1993_v23  ;;  %2176 = vmatprep.subr.mxu1 %v1995_v28  ;;  %v2064_v23 = vld [vmem:[#allocation7 + $0xfa0] sm:$0xff]  ;;  %v2066_v28 = vld [vmem:[#allocation7 + $0xfb0] sm:$0xff] }
 0x2ec   :  { %2100 = vmatpush1.msra.mxu0 %v1992_v29  ;;  %2177 = vmatpush1.msra.mxu1 %v1994_v26  ;;  %v2061_v29 = vld [vmem:[#allocation7 + $0xf88] sm:$0xff]  ;;  %v2063_v26 = vld [vmem:[#allocation7 + $0xf98] sm:$0xff] }
 0x2ed   :  { %2101 = vmatprep.subr.mxu0 %v1989_v27  ;;  %2178 = vmatprep.subr.mxu1 %v1991_v30  ;;  %v2060_v27 = vld [vmem:[#allocation7 + $0xf80] sm:$0xff]  ;;  %v2062_v30 = vld [vmem:[#allocation7 + $0xf90] sm:$0xff] }
 0x2ee   :  { %2102 = vmatpush1.msra.mxu0 %v1988_v24  ;;  %2179 = vmatpush1.msra.mxu1 %v1990_v25  ;;  %v2057_v24 = vld [vmem:[#allocation7 + $0xf68] sm:$0xff]  ;;  %v2059_v25 = vld [vmem:[#allocation7 + $0xf78] sm:$0xff] }
 0x2ef   :  { %2103 = vmatprep.subr.mxu0 %v1985_v31  ;;  %2180 = vmatprep.subr.mxu1 %v1987_v38  ;;  %v2056_v31 = vld [vmem:[#allocation7 + $0xf60] sm:$0xff]  ;;  %v2058_v38 = vld [vmem:[#allocation7 + $0xf70] sm:$0xff] }
 0x2f0   :  { %2104 = vmatpush1.msra.mxu0 %v1984_v39  ;;  %2181 = vmatpush1.msra.mxu1 %v1986_v40  ;;  %v2053_v39 = vld [vmem:[#allocation7 + $0xf48] sm:$0xff]  ;;  %v2055_v40 = vld [vmem:[#allocation7 + $0xf58] sm:$0xff] }
 0x2f1   :  { %2105 = vmatprep.subr.mxu0 %v1981_v41  ;;  %2182 = vmatprep.subr.mxu1 %v1983_v42  ;;  %v2052_v41 = vld [vmem:[#allocation7 + $0xf40] sm:$0xff]  ;;  %v2054_v42 = vld [vmem:[#allocation7 + $0xf50] sm:$0xff] }
 0x2f2   :  { %2106 = vmatpush1.msra.mxu0 %v1980_v43  ;;  %2183 = vmatpush1.msra.mxu1 %v1982_v20  ;;  %v2049_v43 = vld [vmem:[#allocation7 + $0xf28] sm:$0xff]  ;;  %v2051_v20 = vld [vmem:[#allocation7 + $0xf38] sm:$0xff] }
 0x2f3   :  { %2107 = vmatprep.subr.mxu0 %v1977_v0  ;;  %2184 = vmatprep.subr.mxu1 %v1979_v21  ;;  %v2048_v0 = vld [vmem:[#allocation7 + $0xf20] sm:$0xff]  ;;  %v2050_v21 = vld [vmem:[#allocation7 + $0xf30] sm:$0xff] }
 0x2f4   :  { %2108 = vmatpush1.msra.mxu0 %v1976_v19  ;;  %2185 = vmatpush1.msra.mxu1 %v1978_v17  ;;  %v2045_v19 = vld [vmem:[#allocation7 + $0xf08] sm:$0xff]  ;;  %v2047_v17 = vld [vmem:[#allocation7 + $0xf18] sm:$0xff] }
 0x2f5   :  { %2109 = vmatprep.subr.mxu0 %v1973_v33  ;;  %2186 = vmatprep.subr.mxu1 %v1975_v35  ;;  %v2044_v33 = vld [vmem:[#allocation7 + $0xf00] sm:$0xff]  ;;  %v2046_v35 = vld [vmem:[#allocation7 + $0xf10] sm:$0xff] }
 0x2f6   :  { %2110 = vmatpush1.msra.mxu0 %v1972_v36  ;;  %2187 = vmatpush1.msra.mxu1 %v1974_v37  ;;  %v2041_v36 = vld [vmem:[#allocation7 + $0xee8] sm:$0xff]  ;;  %v2043_v37 = vld [vmem:[#allocation7 + $0xef8] sm:$0xff] }
 0x2f7   :  { %2111 = vmatprep.subr.mxu0 %v1969_v44  ;;  %2188 = vmatprep.subr.mxu1 %v1971_v49  ;;  %v2040_v44 = vld [vmem:[#allocation7 + $0xee0] sm:$0xff]  ;;  %v2042_v49 = vld [vmem:[#allocation7 + $0xef0] sm:$0xff] }
 0x2f8   :  { %2112 = vmatpush1.msra.mxu0 %v1968_v7  ;;  %2189 = vmatpush1.msra.mxu1 %v1970_v51  ;;  %v2037_v7 = vld [vmem:[#allocation7 + $0xec8] sm:$0xff]  ;;  %v2039_v51 = vld [vmem:[#allocation7 + $0xed8] sm:$0xff] }
 0x2f9   :  { %2113 = vmatprep.subr.mxu0 %v1965_v52  ;;  %2190 = vmatprep.subr.mxu1 %v1967_v54  ;;  %v2036_v52 = vld [vmem:[#allocation7 + $0xec0] sm:$0xff]  ;;  %v2038_v54 = vld [vmem:[#allocation7 + $0xed0] sm:$0xff] }
 0x2fa   :  { %2114 = vmatpush1.msra.mxu0 %v1964_v57  ;;  %2191 = vmatpush1.msra.mxu1 %v1966_v58  ;;  %v2033_v57 = vld [vmem:[#allocation7 + $0xea8] sm:$0xff]  ;;  %v2035_v58 = vld [vmem:[#allocation7 + $0xeb8] sm:$0xff] }
 0x2fb   :  { %2115 = vmatprep.subr.mxu0 %v1961_v59  ;;  %2192 = vmatprep.subr.mxu1 %v1963_v60  ;;  %v2032_v59 = vld [vmem:[#allocation7 + $0xea0] sm:$0xff]  ;;  %v2034_v60 = vld [vmem:[#allocation7 + $0xeb0] sm:$0xff] }
 0x2fc   :  { %2116 = vmatpush1.msra.mxu0 %v1960_v61  ;;  %2193 = vmatpush1.msra.mxu1 %v1962_v62  ;;  %v2029_v61 = vld [vmem:[#allocation7 + $0xe88] sm:$0xff]  ;;  %v2031_v62 = vld [vmem:[#allocation7 + $0xe98] sm:$0xff] }
 0x2fd   :  { %2117 = vmatprep.subr.mxu0 %v1957_v63  ;;  %2194 = vmatprep.subr.mxu1 %v1959_v1  ;;  %v2028_v63 = vld [vmem:[#allocation7 + $0xe80] sm:$0xff]  ;;  %v2030_v1 = vld [vmem:[#allocation7 + $0xe90] sm:$0xff] }
 0x2fe   :  { %2118 = vmatpush1.msra.mxu0 %v1956_v2  ;;  %2195 = vmatpush1.msra.mxu1 %v1958_v3  ;;  %v2025_v2 = vld [vmem:[#allocation7 + $0xe68] sm:$0xff]  ;;  %v2027_v3 = vld [vmem:[#allocation7 + $0xe78] sm:$0xff] }
 0x2ff   :  { %2119 = vmatprep.subr.mxu0 %v1953_v4  ;;  %2196 = vmatprep.subr.mxu1 %v1955_v5  ;;  %v2024_v4 = vld [vmem:[#allocation7 + $0xe60] sm:$0xff]  ;;  %v2026_v5 = vld [vmem:[#allocation7 + $0xe70] sm:$0xff] }
 0x300   :  { %2120 = vmatpush1.msra.mxu0 %v1952_v6  ;;  %2197 = vmatpush1.msra.mxu1 %v1954_v8  ;;  %v2021_v6 = vld [vmem:[#allocation7 + $0xe48] sm:$0xff]  ;;  %v2023_v8 = vld [vmem:[#allocation7 + $0xe58] sm:$0xff] }
 0x301   :  { %2121 = vmatprep.subr.mxu0 %v1949_v9  ;;  %2198 = vmatprep.subr.mxu1 %v1951_v10  ;;  %v2020_v9 = vld [vmem:[#allocation7 + $0xe40] sm:$0xff]  ;;  %v2022_v10 = vld [vmem:[#allocation7 + $0xe50] sm:$0xff] }
 0x302   :  { %2122 = vmatpush1.msra.mxu0 %v1948_v11  ;;  %2199 = vmatpush1.msra.mxu1 %v1950_v12  ;;  %v1945_v11 = vld [vmem:[#allocation2 + $0x18] sm:$0x7f] }
 0x303   :  { %2123 = vmatprep.subr.mxu0 %v2073_v14  ;;  %2200 = vmatprep.subr.mxu1 %v2075_v15  ;;  %v2017_v12 = vld [vmem:[#allocation7 + $0xe28] sm:$0xff]  ;;  %v2019_v14 = vld [vmem:[#allocation7 + $0xe38] sm:$0xff]  ;;  %v2016_v15 = vld [vmem:[#allocation7 + $0xe20] sm:$0xff] }
 0x304   :  { %2124 = vmatpush2.msra.mxu0 %v2072_v53  ;;  %2201 = vmatpush2.msra.mxu1 %v2074_v48  ;;  %v2018_v53 = vld [vmem:[#allocation7 + $0xe30] sm:$0xff]  ;;  %v1943_v48 = vld [vmem:[#allocation2 + $0x10] sm:$0xf8] }
 0x305   :  { %2125 = vmatprep.subr.mxu0 %v2069_v16  ;;  %2202 = vmatprep.subr.mxu1 %v2071_v50  ;;  %v2013_v16 = vld [vmem:[#allocation7 + $0xe08] sm:$0xff]  ;;  %v2015_v50 = vld [vmem:[#allocation7 + $0xe18] sm:$0xff] }
 0x306   :  { %2126 = vmatpush2.msra.mxu0 %v2068_v18  ;;  %2203 = vmatpush2.msra.mxu1 %v2070_v32  ;;  %v2082_v18 = vrot.slane %v1945_v11, 3  ;;  %v2012_v32 = vld [vmem:[#allocation7 + $0xe00] sm:$0xff] }
 0x307   :  { %2127 = vmatprep.subr.mxu0 %v2065_v34  ;;  %2204 = vmatprep.subr.mxu1 %v2067_v22  ;;  %v2014_v34 = vld [vmem:[#allocation7 + $0xe10] sm:$0xff]  ;;  %v2081_v22 = vrot.slane %v1943_v48, 3 }
 0x308   :  { %2128 = vmatpush2.msra.mxu0 %v2064_v23  ;;  %2205 = vmatpush2.msra.mxu1 %v2066_v28 }
 0x309   :  { %2129 = vmatprep.subr.mxu0 %v2061_v29  ;;  %2206 = vmatprep.subr.mxu1 %v2063_v26  ;;  %v2083_v23 = vsel %vm2080_vm7, %v2081_v22, %v2082_v18 }
 0x30a   :  { %2130 = vmatpush2.msra.mxu0 %v2060_v27  ;;  %2207 = vmatpush2.msra.mxu1 %v2062_v30 }
 0x30b   :  { %2131 = vmatprep.subr.mxu0 %v2057_v24  ;;  %2208 = vmatprep.subr.mxu1 %v2059_v25 }
 0x30c   :  { %2132 = vmatpush2.msra.mxu0 %v2056_v31  ;;  %2209 = vmatpush2.msra.mxu1 %v2058_v38 }
 0x30d   :  { %2133 = vmatprep.subr.mxu0 %v2053_v39  ;;  %2210 = vmatprep.subr.mxu1 %v2055_v40 }
 0x30e   :  { %2134 = vmatpush2.msra.mxu0 %v2052_v41  ;;  %2211 = vmatpush2.msra.mxu1 %v2054_v42 }
 0x30f   :  { %2135 = vmatprep.subr.mxu0 %v2049_v43  ;;  %2212 = vmatprep.subr.mxu1 %v2051_v20 }
 0x310   :  { %2136 = vmatpush2.msra.mxu0 %v2048_v0  ;;  %2213 = vmatpush2.msra.mxu1 %v2050_v21 }
 0x311   :  { %2137 = vmatprep.subr.mxu0 %v2045_v19  ;;  %2214 = vmatprep.subr.mxu1 %v2047_v17 }
 0x312   :  { %2138 = vmatpush2.msra.mxu0 %v2044_v33  ;;  %2215 = vmatpush2.msra.mxu1 %v2046_v35 }
 0x313   :  { %2139 = vmatprep.subr.mxu0 %v2041_v36  ;;  %2216 = vmatprep.subr.mxu1 %v2043_v37 }
 0x314   :  { %2140 = vmatpush2.msra.mxu0 %v2040_v44  ;;  %2217 = vmatpush2.msra.mxu1 %v2042_v49 }
 0x315   :  { %2141 = vmatprep.subr.mxu0 %v2037_v7  ;;  %2218 = vmatprep.subr.mxu1 %v2039_v51 }
 0x316   :  { %2142 = vmatpush2.msra.mxu0 %v2036_v52  ;;  %2219 = vmatpush2.msra.mxu1 %v2038_v54 }
 0x317   :  { %2143 = vmatprep.subr.mxu0 %v2033_v57  ;;  %2220 = vmatprep.subr.mxu1 %v2035_v58 }
 0x318   :  { %2144 = vmatpush2.msra.mxu0 %v2032_v59  ;;  %2221 = vmatpush2.msra.mxu1 %v2034_v60  ;;  %v1392_v28 = vpop.f32.mrf.mxu0  ;;  %v1469_v29 = vpop.f32.mrf.mxu1 }
 0x319   :  { %2145 = vmatprep.subr.mxu0 %v2029_v61  ;;  %2222 = vmatprep.subr.mxu1 %v2031_v62 }
 0x31a   :  { %2146 = vmatpush2.msra.mxu0 %v2028_v63  ;;  %2223 = vmatpush2.msra.mxu1 %v2030_v1  ;;  %v1394_v26 = vpop.f32.mrf.mxu0  ;;  %v1471_v27 = vpop.f32.mrf.mxu1 }
 0x31b   :  { %2147 = vmatprep.subr.mxu0 %v2025_v2  ;;  %2224 = vmatprep.subr.mxu1 %v2027_v3 }
 0x31c   :  { %2148 = vmatpush2.msra.mxu0 %v2024_v4  ;;  %2225 = vmatpush2.msra.mxu1 %v2026_v5 }
 0x31d   :  { %2149 = vmatprep.subr.mxu0 %v2021_v6  ;;  %2226 = vmatprep.subr.mxu1 %v2023_v8 }
 0x31e   :  { %2150 = vmatpush2.msra.mxu0 %v2020_v9  ;;  %2227 = vmatpush2.msra.mxu1 %v2022_v10  ;;  %v1398_v30 = vpop.f32.mrf.mxu0  ;;  %v1475_v24 = vpop.f32.mrf.mxu1 }
 0x31f   :  { %2151 = vmatprep.subr.mxu0 %v2017_v12  ;;  %2228 = vmatprep.subr.mxu1 %v2019_v14 }
 0x320   :  { %2152 = vmatpush2.msra.mxu0 %v2016_v15  ;;  %2229 = vmatpush2.msra.mxu1 %v2018_v53  ;;  %v1400_v25 = vpop.f32.mrf.mxu0  ;;  %v1477_v31 = vpop.f32.mrf.mxu1 }
 0x321   :  { %2153 = vmatprep.subr.mxu0 %v2013_v16  ;;  %2230 = vmatprep.subr.mxu1 %v2015_v50 }
 0x322   :  { %2154 = vmatpush2.msra.mxu0 %v2012_v32  ;;  %2231 = vmatpush2.msra.mxu1 %v2014_v34 }
 0x323   :  { %2156 = vmatmul.mubr.f32.vlgmr.msra.gmra.mxu0 %v2083_v23  ;;  %2233 = vmatmul.mubr.f32.vlgmr.msra.gmra.mxu1 %v2083_v23 }
 0x324   :  { %2161 = vmatprep.mubr.f32.mxu0 %v8709_v13  ;;  %2238 = vmatprep.mubr.f32.mxu1 %v8709_v13 }
 0x327   :  { %2162 = vmatmul.mubr.f32.gmra.mxu0 %v2082_v18  ;;  %2239 = vmatmul.mubr.f32.gmra.mxu1 %v2082_v18 }
 0x328   :  { %2331 = vmatprep.mubr.f32.mxu0 %v9347_v45  ;;  %2404 = vmatprep.mubr.f32.mxu1 %v9347_v45 }
 0x35b   :  { %v1546_v38 = vpop.f32.mrf.mxu0  ;;  %v1623_v39 = vpop.f32.mrf.mxu1 }
 0x35c   :  { %v1547_v61 = vadd.f32 %v1546_v38, %v1392_v28  ;;  %v1624_v62 = vadd.f32 %v1623_v39, %v1469_v29  ;;  %v2450_v29 = vld [vmem:[#allocation9 + $0xf8] sm:$0xff]  ;;  %v2514_v38 = vld [vmem:[#allocation9 + $0x2e0] sm:$0xff] }
 0x35d   :  { %v1548_v40 = vpop.f32.mrf.mxu0  ;;  %v1625_v41 = vpop.f32.mrf.mxu1  ;;  %v2446_v39 = vld [vmem:[#allocation9 + $0xd8] sm:$0xff] }
 0x35e   :  { %v1549_v57 = vadd.f32 %v1548_v40, %v1394_v26  ;;  %v1626_v58 = vadd.f32 %v1625_v41, %v1471_v27  ;;  %v2517_v26 = vld [vmem:[#allocation9 + $0x2f8] sm:$0xff]  ;;  %v2449_v27 = vld [vmem:[#allocation9 + $0xf0] sm:$0xff] }
 0x35f   :  { %v2513_v40 = vld [vmem:[#allocation9 + $0x2d8] sm:$0xff]  ;;  %v2445_v41 = vld [vmem:[#allocation9 + $0xd0] sm:$0xff] }
 0x361   :  { %v1552_v42 = vpop.f32.mrf.mxu0  ;;  %v1629_v13 = vpop.f32.mrf.mxu1 }
 0x362   :  { %v1553_v7 = vadd.f32 %v1552_v42, %v1398_v30  ;;  %v1630_v51 = vadd.f32 %v1629_v13, %v1475_v24  ;;  %v2516_v30 = vld [vmem:[#allocation9 + $0x2f0] sm:$0xff]  ;;  %v2448_v24 = vld [vmem:[#allocation9 + $0xe8] sm:$0xff] }
 0x363   :  { %v1554_v43 = vpop.f32.mrf.mxu0  ;;  %v1631_v20 = vpop.f32.mrf.mxu1  ;;  %v2512_v42 = vld [vmem:[#allocation9 + $0x2d0] sm:$0xff]  ;;  %v2444_v13 = vld [vmem:[#allocation9 + $0xc8] sm:$0xff] }
 0x364   :  { %v1555_v59 = vadd.f32 %v1554_v43, %v1400_v25  ;;  %v1632_v60 = vadd.f32 %v1631_v20, %v1477_v31  ;;  %v2515_v25 = vld [vmem:[#allocation9 + $0x2e8] sm:$0xff]  ;;  %v2447_v31 = vld [vmem:[#allocation9 + $0xe0] sm:$0xff] }
 0x365   :  { %v2511_v43 = vld [vmem:[#allocation9 + $0x2c8] sm:$0xff]  ;;  %v2443_v20 = vld [vmem:[#allocation9 + $0xc0] sm:$0xff] }
 0x39f   :  { %v1847_v0 = vpop.f32.mrf.mxu0  ;;  %v1924_v21 = vpop.f32.mrf.mxu1 }
 0x3a0   :  { %v1935_v9 = vadd.f32 %v1847_v0, %v1547_v61  ;;  %v1937_v10 = vadd.f32 %v1924_v21, %v1624_v62  ;;  %v2510_v0 = vld [vmem:[#allocation9 + $0x2c0] sm:$0xff]  ;;  %v2442_v21 = vld [vmem:[#allocation9 + $0xb8] sm:$0xff]  ;;  %v2433_v62 = vld [vmem:[#allocation9 + $0x70] sm:$0xff] }
 0x3a1   :  { %v1849_v19 = vpop.f32.mrf.mxu0  ;;  %v1926_v17 = vpop.f32.mrf.mxu1  ;;  %v2501_v61 = vld [vmem:[#allocation9 + $0x278] sm:$0xff] }
 0x3a2   :  { %v1936_v4 = vadd.f32 %v1849_v19, %v1549_v57  ;;  %v1938_v5 = vadd.f32 %v1926_v17, %v1626_v58  ;;  %v2509_v19 = vld [vmem:[#allocation9 + $0x2b8] sm:$0xff]  ;;  %v2441_v17 = vld [vmem:[#allocation9 + $0xb0] sm:$0xff]  ;;  %v2503_v57 = vld [vmem:[#allocation9 + $0x288] sm:$0xff] }
 0x3a3   :  { %v2435_v58 = vld [vmem:[#allocation9 + $0x80] sm:$0xff] }
 0x3a5   :  { %v1853_v33 = vpop.f32.mrf.mxu0  ;;  %v1930_v35 = vpop.f32.mrf.mxu1 }
 0x3a6   :  { %v1939_v63 = vadd.f32 %v1853_v33, %v1553_v7  ;;  %v1941_v1 = vadd.f32 %v1930_v35, %v1630_v51  ;;  %v2508_v33 = vld [vmem:[#allocation9 + $0x2b0] sm:$0xff]  ;;  %v2440_v35 = vld [vmem:[#allocation9 + $0xa8] sm:$0xff]  ;;  %v2505_v7 = vld [vmem:[#allocation9 + $0x298] sm:$0xff] }
 0x3a7   :  { %v1855_v36 = vpop.f32.mrf.mxu0  ;;  %v1932_v37 = vpop.f32.mrf.mxu1  ;;  %v2437_v51 = vld [vmem:[#allocation9 + $0x90] sm:$0xff] }
 0x3a8   :  { %v1940_v6 = vadd.f32 %v1855_v36, %v1555_v59  ;;  %v1942_v8 = vadd.f32 %v1932_v37, %v1632_v60  ;;  %v2507_v36 = vld [vmem:[#allocation9 + $0x2a8] sm:$0xff]  ;;  %v2439_v37 = vld [vmem:[#allocation9 + $0xa0] sm:$0xff]  ;;  %v2434_v60 = vld [vmem:[#allocation9 + $0x78] sm:$0xff] }
 0x3a9   :  { %v2502_v59 = vld [vmem:[#allocation9 + $0x280] sm:$0xff] }
 0x3e3   :  { %v2157_v44 = vpop.f32.mrf.mxu0  ;;  %v2234_v49 = vpop.f32.mrf.mxu1 }
 0x3e4   :  { %v2245_v18 = vadd.f32 %v2157_v44, %v1935_v9  ;;  %v2247_v32 = vadd.f32 %v2234_v49, %v1937_v10  ;;  %v2506_v44 = vld [vmem:[#allocation9 + $0x2a0] sm:$0xff]  ;;  %v2438_v49 = vld [vmem:[#allocation9 + $0x98] sm:$0xff]  ;;  %v2496_v9 = vld [vmem:[#allocation9 + $0x250] sm:$0xff] }
 0x3e5   :  { %v2159_v52 = vpop.f32.mrf.mxu0  ;;  %v2236_v54 = vpop.f32.mrf.mxu1  ;;  %v2428_v10 = vld [vmem:[#allocation9 + $0x48] sm:$0xff] }
 0x3e6   :  { %v2246_v53 = vadd.f32 %v2159_v52, %v1936_v4  ;;  %v2248_v48 = vadd.f32 %v2236_v54, %v1938_v5  ;;  %v2253_v28 = vmax.f32 %v2245_v18, %v2247_v32  ;;  %v2504_v52 = vld [vmem:[#allocation9 + $0x290] sm:$0xff]  ;;  %v2436_v54 = vld [vmem:[#allocation9 + $0x88] sm:$0xff]  ;;  %v2498_v4 = vld [vmem:[#allocation9 + $0x260] sm:$0xff] }
 0x3e7   :  { %v2163_v2 = vpop.f32.mrf.mxu0  ;;  %v2240_v3 = vpop.f32.mrf.mxu1  ;;  %v2430_v5 = vld [vmem:[#allocation9 + $0x58] sm:$0xff]  ;;  %v2491_v18 = vld [vmem:[#allocation9 + $0x228] sm:$0xff]  ;;  %v2423_v32 = vld [vmem:[#allocation9 + $0x20] sm:$0xff] }
 0x3e8   :  { %v2249_v11 = vadd.f32 %v2163_v2, %v1939_v63  ;;  %v2251_v12 = vadd.f32 %v2240_v3, %v1941_v1  ;;  %v2254_v23 = vmax.f32 %v2246_v53, %v2248_v48  ;;  %v2500_v63 = vld [vmem:[#allocation9 + $0x270] sm:$0xff]  ;;  %v2432_v1 = vld [vmem:[#allocation9 + $0x68] sm:$0xff]  ;;  %v2431_v3 = vld [vmem:[#allocation9 + $0x60] sm:$0xff] }
 0x3e9   :  { %v2165_v14 = vpop.f32.mrf.mxu0  ;;  %v2242_v15 = vpop.f32.mrf.mxu1  ;;  %v2499_v2 = vld [vmem:[#allocation9 + $0x268] sm:$0xff]  ;;  %v2493_v53 = vld [vmem:[#allocation9 + $0x238] sm:$0xff]  ;;  %v2425_v48 = vld [vmem:[#allocation9 + $0x30] sm:$0xff] }
 0x3ea   :  { %v2250_v16 = vadd.f32 %v2165_v14, %v1940_v6  ;;  %v2252_v50 = vadd.f32 %v2242_v15, %v1942_v8  ;;  %v2255_v22 = vmax.f32 %v2249_v11, %v2251_v12  ;;  %v2497_v6 = vld [vmem:[#allocation9 + $0x258] sm:$0xff]  ;;  %v2429_v8 = vld [vmem:[#allocation9 + $0x50] sm:$0xff]  ;;  %v2495_v11 = vld [vmem:[#allocation9 + $0x248] sm:$0xff] }
 0x3eb   :  { %v2427_v12 = vld [vmem:[#allocation9 + $0x40] sm:$0xff]  ;;  %v2426_v15 = vld [vmem:[#allocation9 + $0x38] sm:$0xff] }
 0x3ec   :  { %v2256_v34 = vmax.f32 %v2250_v16, %v2252_v50  ;;  %v2494_v14 = vld [vmem:[#allocation9 + $0x240] sm:$0xff]  ;;  %v2492_v16 = vld [vmem:[#allocation9 + $0x230] sm:$0xff]  ;;  %v2424_v50 = vld [vmem:[#allocation9 + $0x28] sm:$0xff] }
 0x3ee   :  { %8219 = vmatprep.subr.msk.mxu0 %vm2260_vm8, %v2256_v34  ;;  %8222 = vmatprep.subr.msk.mxu1 %vm2260_vm8, %v2256_v34  ;;  %v2490_v34 = vld [vmem:[#allocation9 + $0x220] sm:$0xff] }
 0x3ef   :  { %8220 = vmatpush1.msk.msra.mxu0 %vm2260_vm8, %v2255_v22  ;;  %8223 = vmatpush1.msk.msra.mxu1 %vm2260_vm8, %v2255_v22  ;;  %v2422_v22 = vld [vmem:[#allocation9 + $0x18] sm:$0xff] }
 0x3f0   :  { %2297 = vmatprep.subr.mxu0 %v2254_v23  ;;  %2370 = vmatprep.subr.mxu1 %v2254_v23  ;;  %v2489_v23 = vld [vmem:[#allocation9 + $0x218] sm:$0xff] }
 0x3f1   :  { %2298 = vmatpush1.msra.mxu0 %v2253_v28  ;;  %2371 = vmatpush1.msra.mxu1 %v2253_v28  ;;  %v2421_v28 = vld [vmem:[#allocation9 + $0x10] sm:$0xff] }
 0x3f2   :  { %8221 = vmatmul.mubr.msk.f32.vlgmr.msra.gmra.mxu0 %vm2257_vm9, %v8670_v46  ;;  %8224 = vmatmul.mubr.msk.f32.vlgmr.msra.gmra.mxu1 %vm2257_vm9, %v8673_v47 }
 0x3f3   :  { %2627 = vmatprep.subr.mxu1 %v2450_v29  ;;  %2556 = vmatprep.subr.mxu0 %v2517_v26  ;;  %v2488_v29 = vld [vmem:[#allocation9 + $0x210] sm:$0xff]  ;;  %v2420_v26 = vld [vmem:[#allocation9 + $0x8] sm:$0xff] }
 0x3f4   :  { %2628 = vmatpush1.msra.mxu1 %v2449_v27  ;;  %2557 = vmatpush1.msra.mxu0 %v2516_v30  ;;  %v2487_v27 = vld [vmem:[#allocation9 + $0x208] sm:$0xff]  ;;  %v2419_v30 = vld [vmem:[#allocation9] sm:$0xff] }
 0x3f5   :  { %2629 = vmatprep.subr.mxu1 %v2448_v24  ;;  %2558 = vmatprep.subr.mxu0 %v2515_v25  ;;  %v2486_v24 = vld [vmem:[#allocation9 + $0x200] sm:$0xff]  ;;  %v2482_v25 = vld [vmem:[#allocation9 + $0x1f8] sm:$0xff] }
 0x3f6   :  { %2630 = vmatpush1.msra.mxu1 %v2447_v31  ;;  %2559 = vmatpush1.msra.mxu0 %v2514_v38  ;;  %v2549_v31 = vld [vmem:[#allocation9 + $0x3f8] sm:$0xff]  ;;  %v2481_v38 = vld [vmem:[#allocation9 + $0x1f0] sm:$0xff] }
 0x3f7   :  { %2631 = vmatprep.subr.mxu1 %v2446_v39  ;;  %2560 = vmatprep.subr.mxu0 %v2513_v40  ;;  %v2548_v39 = vld [vmem:[#allocation9 + $0x3f0] sm:$0xff]  ;;  %v2480_v40 = vld [vmem:[#allocation9 + $0x1e8] sm:$0xff] }
 0x3f8   :  { %2632 = vmatpush1.msra.mxu1 %v2445_v41  ;;  %2561 = vmatpush1.msra.mxu0 %v2512_v42  ;;  %v2547_v41 = vld [vmem:[#allocation9 + $0x3e8] sm:$0xff]  ;;  %v2479_v42 = vld [vmem:[#allocation9 + $0x1e0] sm:$0xff] }
 0x3f9   :  { %2633 = vmatprep.subr.mxu1 %v2444_v13  ;;  %2562 = vmatprep.subr.mxu0 %v2511_v43  ;;  %v2546_v13 = vld [vmem:[#allocation9 + $0x3e0] sm:$0xff]  ;;  %v2478_v43 = vld [vmem:[#allocation9 + $0x1d8] sm:$0xff] }
 0x3fa   :  { %2634 = vmatpush1.msra.mxu1 %v2443_v20  ;;  %2563 = vmatpush1.msra.mxu0 %v2510_v0  ;;  %v2545_v20 = vld [vmem:[#allocation9 + $0x3d8] sm:$0xff]  ;;  %v2477_v0 = vld [vmem:[#allocation9 + $0x1d0] sm:$0xff] }
 0x3fb   :  { %2635 = vmatprep.subr.mxu1 %v2442_v21  ;;  %2564 = vmatprep.subr.mxu0 %v2509_v19  ;;  %v2544_v21 = vld [vmem:[#allocation9 + $0x3d0] sm:$0xff]  ;;  %v2476_v19 = vld [vmem:[#allocation9 + $0x1c8] sm:$0xff] }
 0x3fc   :  { %2636 = vmatpush1.msra.mxu1 %v2441_v17  ;;  %2565 = vmatpush1.msra.mxu0 %v2508_v33  ;;  %v2543_v17 = vld [vmem:[#allocation9 + $0x3c8] sm:$0xff]  ;;  %v2475_v33 = vld [vmem:[#allocation9 + $0x1c0] sm:$0xff] }
 0x3fd   :  { %2637 = vmatprep.subr.mxu1 %v2440_v35  ;;  %2566 = vmatprep.subr.mxu0 %v2507_v36  ;;  %v2542_v35 = vld [vmem:[#allocation9 + $0x3c0] sm:$0xff]  ;;  %v2474_v36 = vld [vmem:[#allocation9 + $0x1b8] sm:$0xff] }
 0x3fe   :  { %2638 = vmatpush1.msra.mxu1 %v2439_v37  ;;  %2567 = vmatpush1.msra.mxu0 %v2506_v44  ;;  %v2541_v37 = vld [vmem:[#allocation9 + $0x3b8] sm:$0xff]  ;;  %v2473_v44 = vld [vmem:[#allocation9 + $0x1b0] sm:$0xff] }
 0x3ff   :  { %2639 = vmatprep.subr.mxu1 %v2438_v49  ;;  %2568 = vmatprep.subr.mxu0 %v2505_v7  ;;  %v2540_v49 = vld [vmem:[#allocation9 + $0x3b0] sm:$0xff]  ;;  %v2472_v7 = vld [vmem:[#allocation9 + $0x1a8] sm:$0xff] }
 0x400   :  { %2640 = vmatpush1.msra.mxu1 %v2437_v51  ;;  %2569 = vmatpush1.msra.mxu0 %v2504_v52  ;;  %v2539_v51 = vld [vmem:[#allocation9 + $0x3a8] sm:$0xff]  ;;  %v2471_v52 = vld [vmem:[#allocation9 + $0x1a0] sm:$0xff] }
 0x401   :  { %2641 = vmatprep.subr.mxu1 %v2436_v54  ;;  %2570 = vmatprep.subr.mxu0 %v2503_v57  ;;  %v2538_v54 = vld [vmem:[#allocation9 + $0x3a0] sm:$0xff]  ;;  %v2470_v57 = vld [vmem:[#allocation9 + $0x198] sm:$0xff] }
 0x402   :  { %2642 = vmatpush1.msra.mxu1 %v2435_v58  ;;  %2571 = vmatpush1.msra.mxu0 %v2502_v59  ;;  %v2537_v58 = vld [vmem:[#allocation9 + $0x398] sm:$0xff]  ;;  %v2469_v59 = vld [vmem:[#allocation9 + $0x190] sm:$0xff] }
 0x403   :  { %2643 = vmatprep.subr.mxu1 %v2434_v60  ;;  %2572 = vmatprep.subr.mxu0 %v2501_v61  ;;  %v2536_v60 = vld [vmem:[#allocation9 + $0x390] sm:$0xff]  ;;  %v2468_v61 = vld [vmem:[#allocation9 + $0x188] sm:$0xff] }
 0x404   :  { %2644 = vmatpush1.msra.mxu1 %v2433_v62  ;;  %2573 = vmatpush1.msra.mxu0 %v2500_v63  ;;  %v2535_v62 = vld [vmem:[#allocation9 + $0x388] sm:$0xff]  ;;  %v2467_v63 = vld [vmem:[#allocation9 + $0x180] sm:$0xff] }
 0x405   :  { %2645 = vmatprep.subr.mxu1 %v2432_v1  ;;  %2574 = vmatprep.subr.mxu0 %v2499_v2  ;;  %v2534_v1 = vld [vmem:[#allocation9 + $0x380] sm:$0xff]  ;;  %v2466_v2 = vld [vmem:[#allocation9 + $0x178] sm:$0xff] }
 0x406   :  { %2646 = vmatpush1.msra.mxu1 %v2431_v3  ;;  %2575 = vmatpush1.msra.mxu0 %v2498_v4  ;;  %v2533_v3 = vld [vmem:[#allocation9 + $0x378] sm:$0xff]  ;;  %v2465_v4 = vld [vmem:[#allocation9 + $0x170] sm:$0xff] }
 0x407   :  { %2647 = vmatprep.subr.mxu1 %v2430_v5  ;;  %2576 = vmatprep.subr.mxu0 %v2497_v6  ;;  %v2532_v5 = vld [vmem:[#allocation9 + $0x370] sm:$0xff]  ;;  %v2464_v6 = vld [vmem:[#allocation9 + $0x168] sm:$0xff] }
 0x408   :  { %2648 = vmatpush1.msra.mxu1 %v2429_v8  ;;  %2577 = vmatpush1.msra.mxu0 %v2496_v9  ;;  %v2531_v8 = vld [vmem:[#allocation9 + $0x368] sm:$0xff]  ;;  %v2463_v9 = vld [vmem:[#allocation9 + $0x160] sm:$0xff] }
 0x409   :  { %2649 = vmatprep.subr.mxu1 %v2428_v10  ;;  %2578 = vmatprep.subr.mxu0 %v2495_v11  ;;  %v2530_v10 = vld [vmem:[#allocation9 + $0x360] sm:$0xff]  ;;  %v2462_v11 = vld [vmem:[#allocation9 + $0x158] sm:$0xff] }
 0x40a   :  { %2650 = vmatpush1.msra.mxu1 %v2427_v12  ;;  %2579 = vmatpush1.msra.mxu0 %v2494_v14  ;;  %v2529_v12 = vld [vmem:[#allocation9 + $0x358] sm:$0xff]  ;;  %v2461_v14 = vld [vmem:[#allocation9 + $0x150] sm:$0xff] }
 0x40b   :  { %2651 = vmatprep.subr.mxu1 %v2426_v15  ;;  %2580 = vmatprep.subr.mxu0 %v2493_v53  ;;  %v2528_v15 = vld [vmem:[#allocation9 + $0x350] sm:$0xff]  ;;  %v2460_v53 = vld [vmem:[#allocation9 + $0x148] sm:$0xff] }
 0x40c   :  { %2652 = vmatpush1.msra.mxu1 %v2425_v48  ;;  %2581 = vmatpush1.msra.mxu0 %v2492_v16  ;;  %v2527_v48 = vld [vmem:[#allocation9 + $0x348] sm:$0xff]  ;;  %v2459_v16 = vld [vmem:[#allocation9 + $0x140] sm:$0xff] }
 0x40d   :  { %2653 = vmatprep.subr.mxu1 %v2424_v50  ;;  %2582 = vmatprep.subr.mxu0 %v2491_v18  ;;  %v2526_v50 = vld [vmem:[#allocation9 + $0x340] sm:$0xff]  ;;  %v2458_v18 = vld [vmem:[#allocation9 + $0x138] sm:$0xff] }
 0x40e   :  { %2654 = vmatpush1.msra.mxu1 %v2423_v32  ;;  %2583 = vmatpush1.msra.mxu0 %v2490_v34  ;;  %v2525_v32 = vld [vmem:[#allocation9 + $0x338] sm:$0xff]  ;;  %v2457_v34 = vld [vmem:[#allocation9 + $0x130] sm:$0xff] }
 0x40f   :  { %2655 = vmatprep.subr.mxu1 %v2422_v22  ;;  %2584 = vmatprep.subr.mxu0 %v2489_v23  ;;  %v2524_v22 = vld [vmem:[#allocation9 + $0x330] sm:$0xff]  ;;  %v2456_v23 = vld [vmem:[#allocation9 + $0x128] sm:$0xff] }
 0x410   :  { %2656 = vmatpush1.msra.mxu1 %v2421_v28  ;;  %2585 = vmatpush1.msra.mxu0 %v2488_v29  ;;  %v2523_v28 = vld [vmem:[#allocation9 + $0x328] sm:$0xff]  ;;  %v2455_v29 = vld [vmem:[#allocation9 + $0x120] sm:$0xff] }
 0x411   :  { %2657 = vmatprep.subr.mxu1 %v2420_v26  ;;  %2586 = vmatprep.subr.mxu0 %v2487_v27  ;;  %v2522_v26 = vld [vmem:[#allocation9 + $0x320] sm:$0xff]  ;;  %v2454_v27 = vld [vmem:[#allocation9 + $0x118] sm:$0xff] }
 0x412   :  { %2658 = vmatpush1.msra.mxu1 %v2419_v30  ;;  %2587 = vmatpush1.msra.mxu0 %v2486_v24  ;;  %v2521_v30 = vld [vmem:[#allocation9 + $0x318] sm:$0xff]  ;;  %v2453_v24 = vld [vmem:[#allocation9 + $0x110] sm:$0xff] }
 0x413   :  { %2659 = vmatprep.subr.mxu1 %v2482_v25  ;;  %2588 = vmatprep.subr.mxu0 %v2549_v31  ;;  %v2520_v25 = vld [vmem:[#allocation9 + $0x310] sm:$0xff]  ;;  %v2452_v31 = vld [vmem:[#allocation9 + $0x108] sm:$0xff] }
 0x414   :  { %2660 = vmatpush2.msra.mxu1 %v2481_v38  ;;  %2589 = vmatpush2.msra.mxu0 %v2548_v39  ;;  %v2519_v38 = vld [vmem:[#allocation9 + $0x308] sm:$0xff]  ;;  %v2451_v39 = vld [vmem:[#allocation9 + $0x100] sm:$0xff] }
 0x415   :  { %2661 = vmatprep.subr.mxu1 %v2480_v40  ;;  %2590 = vmatprep.subr.mxu0 %v2547_v41  ;;  %v2518_v40 = vld [vmem:[#allocation9 + $0x300] sm:$0xff]  ;;  %v2732_v41 = vld [vmem:[#allocation9 + $0x4f8] sm:$0xff] }
 0x416   :  { %2662 = vmatpush2.msra.mxu1 %v2479_v42  ;;  %2591 = vmatpush2.msra.mxu0 %v2546_v13 }
 0x417   :  { %2663 = vmatprep.subr.mxu1 %v2478_v43  ;;  %2592 = vmatprep.subr.mxu0 %v2545_v20 }
 0x418   :  { %2664 = vmatpush2.msra.mxu1 %v2477_v0  ;;  %2593 = vmatpush2.msra.mxu0 %v2544_v21 }
 0x419   :  { %2665 = vmatprep.subr.mxu1 %v2476_v19  ;;  %2594 = vmatprep.subr.mxu0 %v2543_v17 }
 0x41a   :  { %2666 = vmatpush2.msra.mxu1 %v2475_v33  ;;  %2595 = vmatpush2.msra.mxu0 %v2542_v35 }
 0x41b   :  { %2667 = vmatprep.subr.mxu1 %v2474_v36  ;;  %2596 = vmatprep.subr.mxu0 %v2541_v37 }
 0x41c   :  { %2668 = vmatpush2.msra.mxu1 %v2473_v44  ;;  %2597 = vmatpush2.msra.mxu0 %v2540_v49 }
 0x41d   :  { %2669 = vmatprep.subr.mxu1 %v2472_v7  ;;  %2598 = vmatprep.subr.mxu0 %v2539_v51  ;;  %v2731_v51 = vld [vmem:[#allocation9 + $0x4f0] sm:$0xff] }
 0x41e   :  { %2670 = vmatpush2.msra.mxu1 %v2471_v52  ;;  %2599 = vmatpush2.msra.mxu0 %v2538_v54  ;;  %v2730_v52 = vld [vmem:[#allocation9 + $0x4e8] sm:$0xff] }
 0x41f   :  { %2671 = vmatprep.subr.mxu1 %v2470_v57  ;;  %2600 = vmatprep.subr.mxu0 %v2537_v58  ;;  %v2729_v57 = vld [vmem:[#allocation9 + $0x4e0] sm:$0xff]  ;;  %v2728_v58 = vld [vmem:[#allocation9 + $0x4d8] sm:$0xff] }
 0x420   :  { %2672 = vmatpush2.msra.mxu1 %v2469_v59  ;;  %2601 = vmatpush2.msra.mxu0 %v2536_v60  ;;  %v2727_v59 = vld [vmem:[#allocation9 + $0x4d0] sm:$0xff]  ;;  %v2726_v60 = vld [vmem:[#allocation9 + $0x4c8] sm:$0xff] }
 0x421   :  { %2673 = vmatprep.subr.mxu1 %v2468_v61  ;;  %2602 = vmatprep.subr.mxu0 %v2535_v62  ;;  %v2725_v61 = vld [vmem:[#allocation9 + $0x4c0] sm:$0xff]  ;;  %v2724_v62 = vld [vmem:[#allocation9 + $0x4b8] sm:$0xff] }
 0x422   :  { %2674 = vmatpush2.msra.mxu1 %v2467_v63  ;;  %2603 = vmatpush2.msra.mxu0 %v2534_v1  ;;  %v2723_v63 = vld [vmem:[#allocation9 + $0x4b0] sm:$0xff]  ;;  %v2722_v1 = vld [vmem:[#allocation9 + $0x4a8] sm:$0xff] }
 0x423   :  { %2675 = vmatprep.subr.mxu1 %v2466_v2  ;;  %2604 = vmatprep.subr.mxu0 %v2533_v3  ;;  %v2721_v2 = vld [vmem:[#allocation9 + $0x4a0] sm:$0xff]  ;;  %v2720_v3 = vld [vmem:[#allocation9 + $0x498] sm:$0xff] }
 0x424   :  { %2676 = vmatpush2.msra.mxu1 %v2465_v4  ;;  %2605 = vmatpush2.msra.mxu0 %v2532_v5  ;;  %v2719_v4 = vld [vmem:[#allocation9 + $0x490] sm:$0xff]  ;;  %v2718_v5 = vld [vmem:[#allocation9 + $0x488] sm:$0xff] }
 0x425   :  { %2677 = vmatprep.subr.mxu1 %v2464_v6  ;;  %2606 = vmatprep.subr.mxu0 %v2531_v8  ;;  %v2717_v6 = vld [vmem:[#allocation9 + $0x480] sm:$0xff]  ;;  %v2716_v8 = vld [vmem:[#allocation9 + $0x478] sm:$0xff] }
 0x426   :  { %2678 = vmatpush2.msra.mxu1 %v2463_v9  ;;  %2607 = vmatpush2.msra.mxu0 %v2530_v10  ;;  %v2715_v9 = vld [vmem:[#allocation9 + $0x470] sm:$0xff]  ;;  %v2714_v10 = vld [vmem:[#allocation9 + $0x468] sm:$0xff] }
 0x427   :  { %2679 = vmatprep.subr.mxu1 %v2462_v11  ;;  %2608 = vmatprep.subr.mxu0 %v2529_v12  ;;  %v2713_v11 = vld [vmem:[#allocation9 + $0x460] sm:$0xff]  ;;  %v2712_v12 = vld [vmem:[#allocation9 + $0x458] sm:$0xff] }
 0x428   :  { %2680 = vmatpush2.msra.mxu1 %v2461_v14  ;;  %2609 = vmatpush2.msra.mxu0 %v2528_v15  ;;  %v2711_v14 = vld [vmem:[#allocation9 + $0x450] sm:$0xff]  ;;  %v2710_v15 = vld [vmem:[#allocation9 + $0x448] sm:$0xff] }
 0x429   :  { %2681 = vmatprep.subr.mxu1 %v2460_v53  ;;  %2610 = vmatprep.subr.mxu0 %v2527_v48  ;;  %v2709_v53 = vld [vmem:[#allocation9 + $0x440] sm:$0xff]  ;;  %v2708_v48 = vld [vmem:[#allocation9 + $0x438] sm:$0xff] }
 0x42a   :  { %2682 = vmatpush2.msra.mxu1 %v2459_v16  ;;  %2611 = vmatpush2.msra.mxu0 %v2526_v50  ;;  %v2707_v16 = vld [vmem:[#allocation9 + $0x430] sm:$0xff]  ;;  %v2706_v50 = vld [vmem:[#allocation9 + $0x428] sm:$0xff] }
 0x42b   :  { %2683 = vmatprep.subr.mxu1 %v2458_v18  ;;  %2612 = vmatprep.subr.mxu0 %v2525_v32  ;;  %v2705_v18 = vld [vmem:[#allocation9 + $0x420] sm:$0xff]  ;;  %v2704_v32 = vld [vmem:[#allocation9 + $0x418] sm:$0xff] }
 0x42c   :  { %2684 = vmatpush2.msra.mxu1 %v2457_v34  ;;  %2613 = vmatpush2.msra.mxu0 %v2524_v22  ;;  %v2703_v34 = vld [vmem:[#allocation9 + $0x410] sm:$0xff]  ;;  %v2702_v22 = vld [vmem:[#allocation9 + $0x408] sm:$0xff] }
 0x42d   :  { %2685 = vmatprep.subr.mxu1 %v2456_v23  ;;  %2614 = vmatprep.subr.mxu0 %v2523_v28  ;;  %v2701_v23 = vld [vmem:[#allocation9 + $0x400] sm:$0xff]  ;;  %v2764_v28 = vld [vmem:[#allocation9 + $0x5f8] sm:$0xff] }
 0x42e   :  { %2686 = vmatpush2.msra.mxu1 %v2455_v29  ;;  %2615 = vmatpush2.msra.mxu0 %v2522_v26  ;;  %v2763_v29 = vld [vmem:[#allocation9 + $0x5f0] sm:$0xff]  ;;  %v2762_v26 = vld [vmem:[#allocation9 + $0x5e8] sm:$0xff] }
 0x42f   :  { %2687 = vmatprep.subr.mxu1 %v2454_v27  ;;  %2616 = vmatprep.subr.mxu0 %v2521_v30  ;;  %v2761_v27 = vld [vmem:[#allocation9 + $0x5e0] sm:$0xff]  ;;  %v2760_v30 = vld [vmem:[#allocation9 + $0x5d8] sm:$0xff] }
 0x430   :  { %2688 = vmatpush2.msra.mxu1 %v2453_v24  ;;  %2617 = vmatpush2.msra.mxu0 %v2520_v25  ;;  %v2759_v24 = vld [vmem:[#allocation9 + $0x5d0] sm:$0xff]  ;;  %v2758_v25 = vld [vmem:[#allocation9 + $0x5c8] sm:$0xff] }
 0x431   :  { %2689 = vmatprep.subr.mxu1 %v2452_v31  ;;  %2618 = vmatprep.subr.mxu0 %v2519_v38  ;;  %v2757_v31 = vld [vmem:[#allocation9 + $0x5c0] sm:$0xff]  ;;  %v2756_v38 = vld [vmem:[#allocation9 + $0x5b8] sm:$0xff] }
 0x432   :  { %2690 = vmatpush2.msra.mxu1 %v2451_v39  ;;  %2619 = vmatpush2.msra.mxu0 %v2518_v40  ;;  %v2755_v39 = vld [vmem:[#allocation9 + $0x5b0] sm:$0xff]  ;;  %v2754_v40 = vld [vmem:[#allocation9 + $0x5a8] sm:$0xff] }
 0x433   :  { %2771 = vmatprep.subr.mxu0 %v2732_v41  ;;  %v2753_v41 = vld [vmem:[#allocation9 + $0x5a0] sm:$0xff] }
 0x4b2   :  { %v2333_v42 = vpop.f32.mrf.mxu0  ;;  %v2406_v13 = vpop.f32.mrf.mxu1 }
 0x4b3   :  { %v2411_v43 = vmax.f32 %v2333_v42, %v2406_v13  ;;  %v2752_v42 = vld [vmem:[#allocation9 + $0x598] sm:$0xff]  ;;  %v2751_v13 = vld [vmem:[#allocation9 + $0x590] sm:$0xff] }
 0x4b4   :  { %v2335_v20 = vpop.f32.mrf.mxu0  ;;  %v2408_v0 = vpop.f32.mrf.mxu1 }
 0x4b5   :  { %v2413_v21 = vmax.f32 %v2411_v43, 0.0  ;;  %v2412_v19 = vmax.f32 %v2335_v20, %v2408_v0  ;;  %v2750_v43 = vld [vmem:[#allocation9 + $0x588] sm:$0xff]  ;;  %v2749_v20 = vld [vmem:[#allocation9 + $0x580] sm:$0xff]  ;;  %v2748_v0 = vld [vmem:[#allocation9 + $0x578] sm:$0xff] }
 0x4b7   :  { %2415 = vst [vmem:[#allocation3] sm:$0x3f] %v2413_v21  ;;  %v2414_v17 = vmax.f32 %v2412_v19, 0.0  ;;  %v2747_v21 = vld [vmem:[#allocation9 + $0x570] sm:$0xff]  ;;  %v2746_v19 = vld [vmem:[#allocation9 + $0x568] sm:$0xff] }
 0x4b9   :  { %2416 = vst [vmem:[#allocation3 + $0x8] sm:$0x3f] %v2414_v17  ;;  %v2745_v17 = vld [vmem:[#allocation9 + $0x560] sm:$0xff] }
 0x4be   :  { %v2483_v33 = vld [vmem:[#allocation3] sm:$0x1e] }
 0x4bf   :  { %v2417_v44 = vld [vmem:[#allocation3] sm:$0xf]  ;;  %v2552_v7 = vrot.slane %v2483_v33, 1  ;;  %v2744_v33 = vld [vmem:[#allocation9 + $0x558] sm:$0xff] }
 0x4c0   :  { %v2418_v35 = vld [vmem:[#allocation3 + $0x8] sm:$0xf] }
 0x4c1   :  { %v2484_v36 = vld [vmem:[#allocation3 + $0x8] sm:$0x1e]  ;;  %2691 = vmatprep.mubr.f32.mxu1 %v2418_v35  ;;  %v2743_v35 = vld [vmem:[#allocation9 + $0x550] sm:$0xff] }
 0x4c2   :  { %v2699_v37 = vld [vmem:[#allocation3 + $0x8] sm:$0x3c]  ;;  %v2553_v49 = vrot.slane %v2484_v36, 1  ;;  %2692 = vmatmul.mubr.f32.vlgmr.msra.gmra.mxu1 %v2417_v44  ;;  %v2742_v36 = vld [vmem:[#allocation9 + $0x548] sm:$0xff] }
 0x4c3   :  { %v2768_v54 = vrot.slane %v2699_v37, 2  ;;  %v2741_v37 = vld [vmem:[#allocation9 + $0x540] sm:$0xff]  ;;  %v2740_v44 = vld [vmem:[#allocation9 + $0x538] sm:$0xff] }
 0x4c4   :  { %2620 = vmatprep.mubr.f32.mxu0 %v2553_v49  ;;  %v2739_v49 = vld [vmem:[#allocation9 + $0x530] sm:$0xff] }
 0x4c5   :  { %2621 = vmatmul.mubr.f32.vlgmr.msra.gmra.mxu0 %v2552_v7  ;;  %v2738_v7 = vld [vmem:[#allocation9 + $0x528] sm:$0xff] }
 0x4c6   :  { %2772 = vmatpush1.msra.mxu0 %v2731_v51  ;;  %2835 = vmatprep.mubr.f32.mxu0 %v2768_v54  ;;  %v2737_v51 = vld [vmem:[#allocation9 + $0x520] sm:$0xff]  ;;  %v2735_v54 = vld [vmem:[#allocation9 + $0x510] sm:$0xff] }
 0x4c7   :  { %2773 = vmatprep.subr.mxu0 %v2730_v52  ;;  %v2736_v52 = vld [vmem:[#allocation9 + $0x518] sm:$0xff] }
 0x4c8   :  { %2774 = vmatpush1.msra.mxu0 %v2729_v57  ;;  %v2734_v57 = vld [vmem:[#allocation9 + $0x508] sm:$0xff] }
 0x4c9   :  { %2775 = vmatprep.subr.mxu0 %v2728_v58  ;;  %v2698_v58 = vld [vmem:[#allocation3] sm:$0x3c] }
 0x4ca   :  { %2776 = vmatpush1.msra.mxu0 %v2727_v59  ;;  %v2733_v59 = vld [vmem:[#allocation9 + $0x500] sm:$0xff] }
 0x4cb   :  { %2777 = vmatprep.subr.mxu0 %v2726_v60  ;;  %v2767_v60 = vrot.slane %v2698_v58, 2  ;;  %v2980_v58 = vld [vmem:[#allocation10 + $0x428] sm:$0xff] }
 0x4cc   :  { %2778 = vmatpush1.msra.mxu0 %v2725_v61  ;;  %v3036_v61 = vld [vmem:[#allocation10 + $0x5e8] sm:$0xff] }
 0x4cd   :  { %2779 = vmatprep.subr.mxu0 %v2724_v62  ;;  %v3038_v62 = vld [vmem:[#allocation10 + $0x5f8] sm:$0xff]  ;;  %3109 = vmatprep.subr.mxu1 %v3036_v61  ;;  %v2981_v61 = vld [vmem:[#allocation10 + $0x430] sm:$0xff] }
 0x4ce   :  { %2780 = vmatpush1.msra.mxu0 %v2723_v63  ;;  %v3035_v63 = vld [vmem:[#allocation10 + $0x5e0] sm:$0xff] }
 0x4cf   :  { %2781 = vmatprep.subr.mxu0 %v2722_v1  ;;  %v3037_v1 = vld [vmem:[#allocation10 + $0x5f0] sm:$0xff]  ;;  %3110 = vmatpush1.msra.mxu1 %v3035_v63  ;;  %v2978_v63 = vld [vmem:[#allocation10 + $0x418] sm:$0xff] }
 0x4d0   :  { %2782 = vmatpush1.msra.mxu0 %v2721_v2  ;;  %v3032_v2 = vld [vmem:[#allocation10 + $0x5c8] sm:$0xff] }
 0x4d1   :  { %2783 = vmatprep.subr.mxu0 %v2720_v3  ;;  %v3034_v3 = vld [vmem:[#allocation10 + $0x5d8] sm:$0xff]  ;;  %3111 = vmatprep.subr.mxu1 %v3032_v2  ;;  %v2977_v2 = vld [vmem:[#allocation10 + $0x410] sm:$0xff] }
 0x4d2   :  { %2784 = vmatpush1.msra.mxu0 %v2719_v4  ;;  %v3031_v4 = vld [vmem:[#allocation10 + $0x5c0] sm:$0xff] }
 0x4d3   :  { %2785 = vmatprep.subr.mxu0 %v2718_v5  ;;  %v3033_v5 = vld [vmem:[#allocation10 + $0x5d0] sm:$0xff]  ;;  %3112 = vmatpush1.msra.mxu1 %v3031_v4  ;;  %v3102_v4 = vld [vmem:[#allocation10 + $0x7f8] sm:$0xff] }
 0x4d4   :  { %2786 = vmatpush1.msra.mxu0 %v2717_v6  ;;  %v3028_v6 = vld [vmem:[#allocation10 + $0x5a8] sm:$0xff] }
 0x4d5   :  { %2787 = vmatprep.subr.mxu0 %v2716_v8  ;;  %v3030_v8 = vld [vmem:[#allocation10 + $0x5b8] sm:$0xff]  ;;  %3113 = vmatprep.subr.mxu1 %v3028_v6  ;;  %v3101_v6 = vld [vmem:[#allocation10 + $0x7f0] sm:$0xff] }
 0x4d6   :  { %2788 = vmatpush1.msra.mxu0 %v2715_v9  ;;  %v3027_v9 = vld [vmem:[#allocation10 + $0x5a0] sm:$0xff] }
 0x4d7   :  { %2789 = vmatprep.subr.mxu0 %v2714_v10  ;;  %v3029_v10 = vld [vmem:[#allocation10 + $0x5b0] sm:$0xff]  ;;  %3114 = vmatpush1.msra.mxu1 %v3027_v9  ;;  %v3098_v9 = vld [vmem:[#allocation10 + $0x7d8] sm:$0xff] }
 0x4d8   :  { %2790 = vmatpush1.msra.mxu0 %v2713_v11  ;;  %v3024_v11 = vld [vmem:[#allocation10 + $0x588] sm:$0xff] }
 0x4d9   :  { %2791 = vmatprep.subr.mxu0 %v2712_v12  ;;  %v3026_v12 = vld [vmem:[#allocation10 + $0x598] sm:$0xff]  ;;  %3115 = vmatprep.subr.mxu1 %v3024_v11  ;;  %v3097_v11 = vld [vmem:[#allocation10 + $0x7d0] sm:$0xff] }
 0x4da   :  { %2792 = vmatpush1.msra.mxu0 %v2711_v14  ;;  %v3023_v14 = vld [vmem:[#allocation10 + $0x580] sm:$0xff] }
 0x4db   :  { %2793 = vmatprep.subr.mxu0 %v2710_v15  ;;  %v3025_v15 = vld [vmem:[#allocation10 + $0x590] sm:$0xff]  ;;  %3116 = vmatpush1.msra.mxu1 %v3023_v14  ;;  %v3094_v14 = vld [vmem:[#allocation10 + $0x7b8] sm:$0xff] }
 0x4dc   :  { %2794 = vmatpush1.msra.mxu0 %v2709_v53  ;;  %v3020_v53 = vld [vmem:[#allocation10 + $0x568] sm:$0xff] }
 0x4dd   :  { %2795 = vmatprep.subr.mxu0 %v2708_v48  ;;  %v3022_v48 = vld [vmem:[#allocation10 + $0x578] sm:$0xff]  ;;  %3117 = vmatprep.subr.mxu1 %v3020_v53  ;;  %v3093_v53 = vld [vmem:[#allocation10 + $0x7b0] sm:$0xff] }
 0x4de   :  { %2796 = vmatpush1.msra.mxu0 %v2707_v16  ;;  %v3019_v16 = vld [vmem:[#allocation10 + $0x560] sm:$0xff] }
 0x4df   :  { %2797 = vmatprep.subr.mxu0 %v2706_v50  ;;  %v3021_v50 = vld [vmem:[#allocation10 + $0x570] sm:$0xff]  ;;  %3118 = vmatpush1.msra.mxu1 %v3019_v16  ;;  %v3090_v16 = vld [vmem:[#allocation10 + $0x798] sm:$0xff] }
 0x4e0   :  { %2798 = vmatpush1.msra.mxu0 %v2705_v18  ;;  %v3016_v18 = vld [vmem:[#allocation10 + $0x548] sm:$0xff] }
 0x4e1   :  { %2799 = vmatprep.subr.mxu0 %v2704_v32  ;;  %v3018_v32 = vld [vmem:[#allocation10 + $0x558] sm:$0xff]  ;;  %3119 = vmatprep.subr.mxu1 %v3016_v18  ;;  %v3089_v18 = vld [vmem:[#allocation10 + $0x790] sm:$0xff] }
 0x4e2   :  { %2800 = vmatpush1.msra.mxu0 %v2703_v34  ;;  %v3015_v34 = vld [vmem:[#allocation10 + $0x540] sm:$0xff] }
 0x4e3   :  { %2801 = vmatprep.subr.mxu0 %v2702_v22  ;;  %v3017_v22 = vld [vmem:[#allocation10 + $0x550] sm:$0xff]  ;;  %3120 = vmatpush1.msra.mxu1 %v3015_v34  ;;  %v3086_v34 = vld [vmem:[#allocation10 + $0x778] sm:$0xff] }
 0x4e4   :  { %2802 = vmatpush1.msra.mxu0 %v2701_v23  ;;  %v3012_v23 = vld [vmem:[#allocation10 + $0x528] sm:$0xff] }
 0x4e5   :  { %2803 = vmatprep.subr.mxu0 %v2764_v28  ;;  %v3014_v28 = vld [vmem:[#allocation10 + $0x538] sm:$0xff]  ;;  %3121 = vmatprep.subr.mxu1 %v3012_v23  ;;  %v3085_v23 = vld [vmem:[#allocation10 + $0x770] sm:$0xff] }
 0x4e6   :  { %2804 = vmatpush2.msra.mxu0 %v2763_v29  ;;  %v3011_v29 = vld [vmem:[#allocation10 + $0x520] sm:$0xff] }
 0x4e7   :  { %2805 = vmatprep.subr.mxu0 %v2762_v26  ;;  %v3013_v26 = vld [vmem:[#allocation10 + $0x530] sm:$0xff]  ;;  %3122 = vmatpush1.msra.mxu1 %v3011_v29  ;;  %v3082_v29 = vld [vmem:[#allocation10 + $0x758] sm:$0xff] }
 0x4e8   :  { %2806 = vmatpush2.msra.mxu0 %v2761_v27  ;;  %v3008_v27 = vld [vmem:[#allocation10 + $0x508] sm:$0xff] }
 0x4e9   :  { %2807 = vmatprep.subr.mxu0 %v2760_v30  ;;  %v3010_v30 = vld [vmem:[#allocation10 + $0x518] sm:$0xff]  ;;  %3123 = vmatprep.subr.mxu1 %v3008_v27  ;;  %v3081_v27 = vld [vmem:[#allocation10 + $0x750] sm:$0xff] }
 0x4ea   :  { %2808 = vmatpush2.msra.mxu0 %v2759_v24  ;;  %v3007_v24 = vld [vmem:[#allocation10 + $0x500] sm:$0xff] }
 0x4eb   :  { %2809 = vmatprep.subr.mxu0 %v2758_v25  ;;  %v3009_v25 = vld [vmem:[#allocation10 + $0x510] sm:$0xff]  ;;  %3124 = vmatpush1.msra.mxu1 %v3007_v24  ;;  %v3078_v24 = vld [vmem:[#allocation10 + $0x738] sm:$0xff] }
 0x4ec   :  { %2810 = vmatpush2.msra.mxu0 %v2757_v31  ;;  %v3004_v31 = vld [vmem:[#allocation10 + $0x4e8] sm:$0xff] }
 0x4ed   :  { %2811 = vmatprep.subr.mxu0 %v2756_v38  ;;  %v3006_v38 = vld [vmem:[#allocation10 + $0x4f8] sm:$0xff]  ;;  %3125 = vmatprep.subr.mxu1 %v3004_v31  ;;  %v3077_v31 = vld [vmem:[#allocation10 + $0x730] sm:$0xff] }
 0x4ee   :  { %2812 = vmatpush2.msra.mxu0 %v2755_v39  ;;  %v3003_v39 = vld [vmem:[#allocation10 + $0x4e0] sm:$0xff] }
 0x4ef   :  { %2813 = vmatprep.subr.mxu0 %v2754_v40  ;;  %v3005_v40 = vld [vmem:[#allocation10 + $0x4f0] sm:$0xff]  ;;  %3126 = vmatpush1.msra.mxu1 %v3003_v39  ;;  %v3074_v39 = vld [vmem:[#allocation10 + $0x718] sm:$0xff] }
 0x4f0   :  { %2814 = vmatpush2.msra.mxu0 %v2753_v41  ;;  %v3000_v41 = vld [vmem:[#allocation10 + $0x4c8] sm:$0xff] }
 0x4f1   :  { %2815 = vmatprep.subr.mxu0 %v2752_v42  ;;  %v3002_v42 = vld [vmem:[#allocation10 + $0x4d8] sm:$0xff]  ;;  %3127 = vmatprep.subr.mxu1 %v3000_v41  ;;  %v3073_v41 = vld [vmem:[#allocation10 + $0x710] sm:$0xff] }
 0x4f2   :  { %2816 = vmatpush2.msra.mxu0 %v2751_v13  ;;  %v2999_v13 = vld [vmem:[#allocation10 + $0x4c0] sm:$0xff] }
 0x4f3   :  { %2817 = vmatprep.subr.mxu0 %v2750_v43  ;;  %v3001_v43 = vld [vmem:[#allocation10 + $0x4d0] sm:$0xff]  ;;  %3128 = vmatpush1.msra.mxu1 %v2999_v13  ;;  %v3070_v13 = vld [vmem:[#allocation10 + $0x6f8] sm:$0xff] }
 0x4f4   :  { %2818 = vmatpush2.msra.mxu0 %v2749_v20  ;;  %v2996_v20 = vld [vmem:[#allocation10 + $0x4a8] sm:$0xff] }
 0x4f5   :  { %2819 = vmatprep.subr.mxu0 %v2748_v0  ;;  %v2998_v0 = vld [vmem:[#allocation10 + $0x4b8] sm:$0xff]  ;;  %3129 = vmatprep.subr.mxu1 %v2996_v20  ;;  %v3069_v20 = vld [vmem:[#allocation10 + $0x6f0] sm:$0xff] }
 0x4f6   :  { %2820 = vmatpush2.msra.mxu0 %v2747_v21  ;;  %v2995_v21 = vld [vmem:[#allocation10 + $0x4a0] sm:$0xff] }
 0x4f7   :  { %2821 = vmatprep.subr.mxu0 %v2746_v19  ;;  %v2997_v19 = vld [vmem:[#allocation10 + $0x4b0] sm:$0xff]  ;;  %3130 = vmatpush1.msra.mxu1 %v2995_v21  ;;  %v3066_v21 = vld [vmem:[#allocation10 + $0x6d8] sm:$0xff] }
 0x4f8   :  { %2822 = vmatpush2.msra.mxu0 %v2745_v17  ;;  %v2992_v17 = vld [vmem:[#allocation10 + $0x488] sm:$0xff] }
 0x4f9   :  { %2823 = vmatprep.subr.mxu0 %v2744_v33  ;;  %v2994_v33 = vld [vmem:[#allocation10 + $0x498] sm:$0xff]  ;;  %3131 = vmatprep.subr.mxu1 %v2992_v17  ;;  %v3065_v17 = vld [vmem:[#allocation10 + $0x6d0] sm:$0xff] }
 0x4fa   :  { %2824 = vmatpush2.msra.mxu0 %v2743_v35  ;;  %v2991_v35 = vld [vmem:[#allocation10 + $0x480] sm:$0xff] }
 0x4fb   :  { %2825 = vmatprep.subr.mxu0 %v2742_v36  ;;  %v2993_v36 = vld [vmem:[#allocation10 + $0x490] sm:$0xff]  ;;  %3132 = vmatpush1.msra.mxu1 %v2991_v35  ;;  %v3062_v35 = vld [vmem:[#allocation10 + $0x6b8] sm:$0xff] }
 0x4fc   :  { %2826 = vmatpush2.msra.mxu0 %v2741_v37  ;;  %v2988_v37 = vld [vmem:[#allocation10 + $0x468] sm:$0xff] }
 0x4fd   :  { %2827 = vmatprep.subr.mxu0 %v2740_v44  ;;  %v2990_v44 = vld [vmem:[#allocation10 + $0x478] sm:$0xff]  ;;  %3133 = vmatprep.subr.mxu1 %v2988_v37  ;;  %v3061_v37 = vld [vmem:[#allocation10 + $0x6b0] sm:$0xff] }
 0x4fe   :  { %2828 = vmatpush2.msra.mxu0 %v2739_v49  ;;  %v2987_v49 = vld [vmem:[#allocation10 + $0x460] sm:$0xff] }
 0x4ff   :  { %2829 = vmatprep.subr.mxu0 %v2738_v7  ;;  %v2989_v7 = vld [vmem:[#allocation10 + $0x470] sm:$0xff]  ;;  %3134 = vmatpush1.msra.mxu1 %v2987_v49  ;;  %v3058_v49 = vld [vmem:[#allocation10 + $0x698] sm:$0xff] }
 0x500   :  { %2830 = vmatpush2.msra.mxu0 %v2737_v51  ;;  %v2984_v51 = vld [vmem:[#allocation10 + $0x448] sm:$0xff] }
 0x501   :  { %2831 = vmatprep.subr.mxu0 %v2736_v52  ;;  %v2986_v52 = vld [vmem:[#allocation10 + $0x458] sm:$0xff]  ;;  %3135 = vmatprep.subr.mxu1 %v2984_v51  ;;  %v3057_v51 = vld [vmem:[#allocation10 + $0x690] sm:$0xff] }
 0x502   :  { %2832 = vmatpush2.msra.mxu0 %v2735_v54  ;;  %v2983_v54 = vld [vmem:[#allocation10 + $0x440] sm:$0xff] }
 0x503   :  { %2833 = vmatprep.subr.mxu0 %v2734_v57  ;;  %v2985_v57 = vld [vmem:[#allocation10 + $0x450] sm:$0xff]  ;;  %3136 = vmatpush1.msra.mxu1 %v2983_v54  ;;  %v3054_v54 = vld [vmem:[#allocation10 + $0x678] sm:$0xff] }
 0x504   :  { %2834 = vmatpush2.msra.mxu0 %v2733_v59  ;;  %v2982_v59 = vld [vmem:[#allocation10 + $0x438] sm:$0xff]  ;;  %3137 = vmatprep.subr.mxu1 %v2980_v58  ;;  %v3053_v58 = vld [vmem:[#allocation10 + $0x670] sm:$0xff] }
 0x505   :  { %2836 = vmatmul.mubr.f32.vlgmr.msra.gmra.mxu0 %v2767_v60  ;;  %3180 = vmatprep.subr.mxu0 %v3038_v62  ;;  %v2979_v60 = vld [vmem:[#allocation10 + $0x420] sm:$0xff]  ;;  %v2976_v62 = vld [vmem:[#allocation10 + $0x408] sm:$0xff] }
 0x506   :  { %3181 = vmatpush1.msra.mxu0 %v3037_v1  ;;  %v2975_v1 = vld [vmem:[#allocation10 + $0x400] sm:$0xff]  ;;  %3138 = vmatpush1.msra.mxu1 %v2979_v60  ;;  %v3050_v60 = vld [vmem:[#allocation10 + $0x658] sm:$0xff] }
 0x507   :  { %3182 = vmatprep.subr.mxu0 %v3034_v3  ;;  %v3100_v3 = vld [vmem:[#allocation10 + $0x7e8] sm:$0xff]  ;;  %3139 = vmatprep.subr.mxu1 %v2976_v62  ;;  %v3049_v62 = vld [vmem:[#allocation10 + $0x650] sm:$0xff] }
 0x508   :  { %3183 = vmatpush1.msra.mxu0 %v3033_v5  ;;  %v3099_v5 = vld [vmem:[#allocation10 + $0x7e0] sm:$0xff]  ;;  %3140 = vmatpush1.msra.mxu1 %v2975_v1  ;;  %v3046_v1 = vld [vmem:[#allocation10 + $0x638] sm:$0xff] }
 0x509   :  { %3184 = vmatprep.subr.mxu0 %v3030_v8  ;;  %v3096_v8 = vld [vmem:[#allocation10 + $0x7c8] sm:$0xff]  ;;  %3141 = vmatprep.subr.mxu1 %v3100_v3  ;;  %v3045_v3 = vld [vmem:[#allocation10 + $0x630] sm:$0xff] }
 0x50a   :  { %3185 = vmatpush1.msra.mxu0 %v3029_v10  ;;  %v3095_v10 = vld [vmem:[#allocation10 + $0x7c0] sm:$0xff]  ;;  %3142 = vmatpush2.msra.mxu1 %v3099_v5  ;;  %v3042_v5 = vld [vmem:[#allocation10 + $0x618] sm:$0xff] }
 0x50b   :  { %3186 = vmatprep.subr.mxu0 %v3026_v12  ;;  %v3092_v12 = vld [vmem:[#allocation10 + $0x7a8] sm:$0xff]  ;;  %3143 = vmatprep.subr.mxu1 %v3096_v8  ;;  %v3041_v8 = vld [vmem:[#allocation10 + $0x610] sm:$0xff] }
 0x50c   :  { %3187 = vmatpush1.msra.mxu0 %v3025_v15  ;;  %v3091_v15 = vld [vmem:[#allocation10 + $0x7a0] sm:$0xff]  ;;  %3144 = vmatpush2.msra.mxu1 %v3095_v10  ;;  %v2909_v10 = vld [vmem:[#allocation10 + $0x1f8] sm:$0xff] }
 0x50d   :  { %3188 = vmatprep.subr.mxu0 %v3022_v48  ;;  %v3088_v48 = vld [vmem:[#allocation10 + $0x788] sm:$0xff]  ;;  %3145 = vmatprep.subr.mxu1 %v3092_v12 }
 0x50e   :  { %3189 = vmatpush1.msra.mxu0 %v3021_v50  ;;  %v3087_v50 = vld [vmem:[#allocation10 + $0x780] sm:$0xff]  ;;  %3146 = vmatpush2.msra.mxu1 %v3091_v15 }
 0x50f   :  { %3190 = vmatprep.subr.mxu0 %v3018_v32  ;;  %v3084_v32 = vld [vmem:[#allocation10 + $0x768] sm:$0xff]  ;;  %3147 = vmatprep.subr.mxu1 %v3088_v48 }
 0x510   :  { %3191 = vmatpush1.msra.mxu0 %v3017_v22  ;;  %v3083_v22 = vld [vmem:[#allocation10 + $0x760] sm:$0xff]  ;;  %3148 = vmatpush2.msra.mxu1 %v3087_v50 }
 0x511   :  { %3192 = vmatprep.subr.mxu0 %v3014_v28  ;;  %v3080_v28 = vld [vmem:[#allocation10 + $0x748] sm:$0xff]  ;;  %3149 = vmatprep.subr.mxu1 %v3084_v32 }
 0x512   :  { %3193 = vmatpush1.msra.mxu0 %v3013_v26  ;;  %v3079_v26 = vld [vmem:[#allocation10 + $0x740] sm:$0xff]  ;;  %3150 = vmatpush2.msra.mxu1 %v3083_v22 }
 0x513   :  { %3194 = vmatprep.subr.mxu0 %v3010_v30  ;;  %v3076_v30 = vld [vmem:[#allocation10 + $0x728] sm:$0xff]  ;;  %3151 = vmatprep.subr.mxu1 %v3080_v28 }
 0x514   :  { %3195 = vmatpush1.msra.mxu0 %v3009_v25  ;;  %v3075_v25 = vld [vmem:[#allocation10 + $0x720] sm:$0xff]  ;;  %3152 = vmatpush2.msra.mxu1 %v3079_v26  ;;  %v2908_v26 = vld [vmem:[#allocation10 + $0x1f0] sm:$0xff] }
 0x515   :  { %3196 = vmatprep.subr.mxu0 %v3006_v38  ;;  %v3072_v38 = vld [vmem:[#allocation10 + $0x708] sm:$0xff]  ;;  %3153 = vmatprep.subr.mxu1 %v3076_v30  ;;  %v2905_v30 = vld [vmem:[#allocation10 + $0x1d8] sm:$0xff] }
 0x516   :  { %3197 = vmatpush1.msra.mxu0 %v3005_v40  ;;  %v3071_v40 = vld [vmem:[#allocation10 + $0x700] sm:$0xff]  ;;  %3154 = vmatpush2.msra.mxu1 %v3075_v25  ;;  %v2904_v25 = vld [vmem:[#allocation10 + $0x1d0] sm:$0xff] }
 0x517   :  { %3198 = vmatprep.subr.mxu0 %v3002_v42  ;;  %v3068_v42 = vld [vmem:[#allocation10 + $0x6e8] sm:$0xff]  ;;  %3155 = vmatprep.subr.mxu1 %v3072_v38  ;;  %v2901_v38 = vld [vmem:[#allocation10 + $0x1b8] sm:$0xff] }
 0x518   :  { %3199 = vmatpush1.msra.mxu0 %v3001_v43  ;;  %v3067_v43 = vld [vmem:[#allocation10 + $0x6e0] sm:$0xff]  ;;  %3156 = vmatpush2.msra.mxu1 %v3071_v40  ;;  %v2900_v40 = vld [vmem:[#allocation10 + $0x1b0] sm:$0xff] }
 0x519   :  { %3200 = vmatprep.subr.mxu0 %v2998_v0  ;;  %v3064_v0 = vld [vmem:[#allocation10 + $0x6c8] sm:$0xff]  ;;  %3157 = vmatprep.subr.mxu1 %v3068_v42  ;;  %v2897_v42 = vld [vmem:[#allocation10 + $0x198] sm:$0xff] }
 0x51a   :  { %3201 = vmatpush1.msra.mxu0 %v2997_v19  ;;  %v3063_v19 = vld [vmem:[#allocation10 + $0x6c0] sm:$0xff]  ;;  %3158 = vmatpush2.msra.mxu1 %v3067_v43  ;;  %v2896_v43 = vld [vmem:[#allocation10 + $0x190] sm:$0xff] }
 0x51b   :  { %3202 = vmatprep.subr.mxu0 %v2994_v33  ;;  %v3060_v33 = vld [vmem:[#allocation10 + $0x6a8] sm:$0xff]  ;;  %3159 = vmatprep.subr.mxu1 %v3064_v0  ;;  %v2893_v0 = vld [vmem:[#allocation10 + $0x178] sm:$0xff] }
 0x51c   :  { %3203 = vmatpush1.msra.mxu0 %v2993_v36  ;;  %v3059_v36 = vld [vmem:[#allocation10 + $0x6a0] sm:$0xff]  ;;  %3160 = vmatpush2.msra.mxu1 %v3063_v19  ;;  %v2892_v19 = vld [vmem:[#allocation10 + $0x170] sm:$0xff] }
 0x51d   :  { %3204 = vmatprep.subr.mxu0 %v2990_v44  ;;  %v3056_v44 = vld [vmem:[#allocation10 + $0x688] sm:$0xff]  ;;  %3161 = vmatprep.subr.mxu1 %v3060_v33  ;;  %v2889_v33 = vld [vmem:[#allocation10 + $0x158] sm:$0xff] }
 0x51e   :  { %3205 = vmatpush1.msra.mxu0 %v2989_v7  ;;  %3162 = vmatpush2.msra.mxu1 %v3059_v36  ;;  %v3055_v7 = vld [vmem:[#allocation10 + $0x680] sm:$0xff]  ;;  %v2888_v36 = vld [vmem:[#allocation10 + $0x150] sm:$0xff] }
 0x51f   :  { %3206 = vmatprep.subr.mxu0 %v2986_v52  ;;  %3163 = vmatprep.subr.mxu1 %v3056_v44  ;;  %v3052_v52 = vld [vmem:[#allocation10 + $0x668] sm:$0xff]  ;;  %v2885_v44 = vld [vmem:[#allocation10 + $0x138] sm:$0xff] }
 0x520   :  { %3207 = vmatpush1.msra.mxu0 %v2985_v57  ;;  %3164 = vmatpush2.msra.mxu1 %v3055_v7  ;;  %v3051_v57 = vld [vmem:[#allocation10 + $0x660] sm:$0xff]  ;;  %v2884_v7 = vld [vmem:[#allocation10 + $0x130] sm:$0xff] }
 0x521   :  { %3208 = vmatprep.subr.mxu0 %v2982_v59  ;;  %3165 = vmatprep.subr.mxu1 %v3052_v52  ;;  %v3048_v59 = vld [vmem:[#allocation10 + $0x648] sm:$0xff]  ;;  %v2881_v52 = vld [vmem:[#allocation10 + $0x118] sm:$0xff] }
 0x522   :  { %3209 = vmatpush1.msra.mxu0 %v2981_v61  ;;  %3166 = vmatpush2.msra.mxu1 %v3051_v57  ;;  %v3047_v61 = vld [vmem:[#allocation10 + $0x640] sm:$0xff]  ;;  %v2880_v57 = vld [vmem:[#allocation10 + $0x110] sm:$0xff] }
 0x523   :  { %3210 = vmatprep.subr.mxu0 %v2978_v63  ;;  %3167 = vmatprep.subr.mxu1 %v3048_v59  ;;  %v3044_v63 = vld [vmem:[#allocation10 + $0x628] sm:$0xff]  ;;  %v2877_v59 = vld [vmem:[#allocation10 + $0xf8] sm:$0xff] }
 0x524   :  { %3211 = vmatpush1.msra.mxu0 %v2977_v2  ;;  %3168 = vmatpush2.msra.mxu1 %v3047_v61  ;;  %v3043_v2 = vld [vmem:[#allocation10 + $0x620] sm:$0xff]  ;;  %v2876_v61 = vld [vmem:[#allocation10 + $0xf0] sm:$0xff] }
 0x525   :  { %3212 = vmatprep.subr.mxu0 %v3102_v4  ;;  %3169 = vmatprep.subr.mxu1 %v3044_v63  ;;  %v3040_v4 = vld [vmem:[#allocation10 + $0x608] sm:$0xff]  ;;  %v2873_v63 = vld [vmem:[#allocation10 + $0xd8] sm:$0xff] }
 0x526   :  { %3213 = vmatpush2.msra.mxu0 %v3101_v6  ;;  %3170 = vmatpush2.msra.mxu1 %v3043_v2  ;;  %v3039_v6 = vld [vmem:[#allocation10 + $0x600] sm:$0xff]  ;;  %v2872_v2 = vld [vmem:[#allocation10 + $0xd0] sm:$0xff] }
 0x527   :  { %3214 = vmatprep.subr.mxu0 %v3098_v9  ;;  %3171 = vmatprep.subr.mxu1 %v3040_v4  ;;  %v2907_v9 = vld [vmem:[#allocation10 + $0x1e8] sm:$0xff]  ;;  %v2869_v4 = vld [vmem:[#allocation10 + $0xb8] sm:$0xff] }
 0x528   :  { %3215 = vmatpush2.msra.mxu0 %v3097_v11  ;;  %3172 = vmatpush2.msra.mxu1 %v3039_v6  ;;  %v2868_v6 = vld [vmem:[#allocation10 + $0xb0] sm:$0xff] }
 0x529   :  { %3216 = vmatprep.subr.mxu0 %v3094_v14  ;;  %3251 = vmatprep.subr.mxu1 %v2907_v9  ;;  %v2865_v9 = vld [vmem:[#allocation10 + $0x98] sm:$0xff] }
 0x52a   :  { %3217 = vmatpush2.msra.mxu0 %v3093_v53 }
 0x52b   :  { %3218 = vmatprep.subr.mxu0 %v3090_v16 }
 0x52c   :  { %3219 = vmatpush2.msra.mxu0 %v3089_v18 }
 0x52d   :  { %3220 = vmatprep.subr.mxu0 %v3086_v34 }
 0x52e   :  { %3221 = vmatpush2.msra.mxu0 %v3085_v23 }
 0x52f   :  { %3222 = vmatprep.subr.mxu0 %v3082_v29  ;;  %v2906_v29 = vld [vmem:[#allocation10 + $0x1e0] sm:$0xff] }
 0x530   :  { %3223 = vmatpush2.msra.mxu0 %v3081_v27  ;;  %v2903_v27 = vld [vmem:[#allocation10 + $0x1c8] sm:$0xff] }
 0x531   :  { %3224 = vmatprep.subr.mxu0 %v3078_v24  ;;  %v2902_v24 = vld [vmem:[#allocation10 + $0x1c0] sm:$0xff] }
 0x532   :  { %3225 = vmatpush2.msra.mxu0 %v3077_v31  ;;  %v2899_v31 = vld [vmem:[#allocation10 + $0x1a8] sm:$0xff] }
 0x533   :  { %3226 = vmatprep.subr.mxu0 %v3074_v39  ;;  %v2898_v39 = vld [vmem:[#allocation10 + $0x1a0] sm:$0xff] }
 0x534   :  { %3227 = vmatpush2.msra.mxu0 %v3073_v41  ;;  %v2895_v41 = vld [vmem:[#allocation10 + $0x188] sm:$0xff] }
 0x535   :  { %3228 = vmatprep.subr.mxu0 %v3070_v13  ;;  %v2894_v13 = vld [vmem:[#allocation10 + $0x180] sm:$0xff] }
 0x536   :  { %3229 = vmatpush2.msra.mxu0 %v3069_v20  ;;  %v2891_v20 = vld [vmem:[#allocation10 + $0x168] sm:$0xff] }
 0x537   :  { %3230 = vmatprep.subr.mxu0 %v3066_v21  ;;  %v2890_v21 = vld [vmem:[#allocation10 + $0x160] sm:$0xff] }
 0x538   :  { %3231 = vmatpush2.msra.mxu0 %v3065_v17  ;;  %v2887_v17 = vld [vmem:[#allocation10 + $0x148] sm:$0xff] }
 0x539   :  { %3232 = vmatprep.subr.mxu0 %v3062_v35  ;;  %v2886_v35 = vld [vmem:[#allocation10 + $0x140] sm:$0xff] }
 0x53a   :  { %3233 = vmatpush2.msra.mxu0 %v3061_v37  ;;  %v2883_v37 = vld [vmem:[#allocation10 + $0x128] sm:$0xff] }
 0x53b   :  { %3234 = vmatprep.subr.mxu0 %v3058_v49  ;;  %v2882_v49 = vld [vmem:[#allocation10 + $0x120] sm:$0xff] }
 0x53c   :  { %3235 = vmatpush2.msra.mxu0 %v3057_v51  ;;  %v2879_v51 = vld [vmem:[#allocation10 + $0x108] sm:$0xff] }
 0x53d   :  { %3236 = vmatprep.subr.mxu0 %v3054_v54  ;;  %v2878_v54 = vld [vmem:[#allocation10 + $0x100] sm:$0xff] }
 0x53e   :  { %3237 = vmatpush2.msra.mxu0 %v3053_v58  ;;  %v2875_v58 = vld [vmem:[#allocation10 + $0xe8] sm:$0xff] }
 0x53f   :  { %3238 = vmatprep.subr.mxu0 %v3050_v60  ;;  %v2874_v60 = vld [vmem:[#allocation10 + $0xe0] sm:$0xff] }
 0x540   :  { %3239 = vmatpush2.msra.mxu0 %v3049_v62  ;;  %v2871_v62 = vld [vmem:[#allocation10 + $0xc8] sm:$0xff] }
 0x541   :  { %3240 = vmatprep.subr.mxu0 %v3046_v1  ;;  %v2870_v1 = vld [vmem:[#allocation10 + $0xc0] sm:$0xff] }
 0x542   :  { %3241 = vmatpush2.msra.mxu0 %v3045_v3  ;;  %v2867_v3 = vld [vmem:[#allocation10 + $0xa8] sm:$0xff] }
 0x543   :  { %3242 = vmatprep.subr.mxu0 %v3042_v5  ;;  %v2866_v5 = vld [vmem:[#allocation10 + $0xa0] sm:$0xff] }
 0x544   :  { %3243 = vmatpush2.msra.mxu0 %v3041_v8  ;;  %v2863_v8 = vld [vmem:[#allocation10 + $0x88] sm:$0xff] }
 0x545   :  { %3322 = vmatprep.subr.mxu0 %v2909_v10  ;;  %v2862_v10 = vld [vmem:[#allocation10 + $0x80] sm:$0xff] }
 0x582   :  { %v2693_v12 = vpop.f32.mrf.mxu1 }
 0x584   :  { %v2695_v53 = vpop.f32.mrf.mxu1 }
 0x585   :  { %v2622_v11 = vpop.f32.mrf.mxu0 }
 0x586   :  { %v2694_v15 = vadd.f32 %v2693_v12, %v2622_v11  ;;  %v2864_v11 = vld [vmem:[#allocation10 + $0x90] sm:$0xff]  ;;  %v2859_v12 = vld [vmem:[#allocation10 + $0x68] sm:$0xff] }
 0x587   :  { %v2624_v14 = vpop.f32.mrf.mxu0 }
 0x588   :  { %v2696_v16 = vadd.f32 %v2695_v53, %v2624_v14  ;;  %v2861_v14 = vld [vmem:[#allocation10 + $0x78] sm:$0xff]  ;;  %v2860_v53 = vld [vmem:[#allocation10 + $0x70] sm:$0xff] }
 0x5c5   :  { %v2837_v48 = vpop.f32.mrf.mxu0 }
 0x5c6   :  { %v2842_v50 = vadd.f32 %v2837_v48, %v2694_v15  ;;  %v2858_v15 = vld [vmem:[#allocation10 + $0x60] sm:$0xff]  ;;  %v2855_v48 = vld [vmem:[#allocation10 + $0x48] sm:$0xff] }
 0x5c7   :  { %v2839_v18 = vpop.f32.mrf.mxu0 }
 0x5c8   :  { %v2843_v32 = vadd.f32 %v2839_v18, %v2696_v16  ;;  %v8726_v34 = vmax.f32 %v2842_v50, 0.0  ;;  %v2857_v16 = vld [vmem:[#allocation10 + $0x58] sm:$0xff]  ;;  %v2854_v50 = vld [vmem:[#allocation10 + $0x40] sm:$0xff]  ;;  %v2856_v18 = vld [vmem:[#allocation10 + $0x50] sm:$0xff] }
 0x5ca   :  { %v8728_v22 = vmax.f32 %v2843_v32, 0.0  ;;  %v3105_v28 = vrot.slane %v8726_v34, 1  ;;  %v2851_v32 = vld [vmem:[#allocation10 + $0x28] sm:$0xff] }
 0x5cc   :  { %v3106_v23 = vrot.slane %v8728_v22, 1 }
 0x5ce   :  { %3173 = vmatprep.mubr.f32.mxu1 %v3106_v23  ;;  %3244 = vmatprep.mubr.f32.mxu0 %v3106_v23  ;;  %v2853_v23 = vld [vmem:[#allocation10 + $0x38] sm:$0xff] }
 0x5cf   :  { %3174 = vmatmul.mubr.f32.vlgmr.msra.gmra.mxu1 %v3105_v28  ;;  %3245 = vmatmul.mubr.f32.vlgmr.msra.gmra.mxu0 %v3105_v28  ;;  %v2850_v28 = vld [vmem:[#allocation10 + $0x20] sm:$0xff] }
 0x5d0   :  { %3252 = vmatpush1.msra.mxu1 %v2906_v29  ;;  %3323 = vmatpush1.msra.mxu0 %v2908_v26  ;;  %v2852_v29 = vld [vmem:[#allocation10 + $0x30] sm:$0xff]  ;;  %v2847_v26 = vld [vmem:[#allocation10 + $0x8] sm:$0xff] }
 0x5d1   :  { %3253 = vmatprep.subr.mxu1 %v2903_v27  ;;  %3315 = vmatprep.mubr.f32.mxu1 %v8728_v22  ;;  %v2849_v27 = vld [vmem:[#allocation10 + $0x18] sm:$0xff] }
 0x5d2   :  { %3324 = vmatprep.subr.mxu0 %v2905_v30  ;;  %3386 = vmatprep.mubr.f32.mxu0 %v8728_v22  ;;  %v2846_v30 = vld [vmem:[#allocation10] sm:$0xff] }
 0x5d3   :  { %3254 = vmatpush1.msra.mxu1 %v2902_v24  ;;  %3325 = vmatpush1.msra.mxu0 %v2904_v25  ;;  %v2848_v24 = vld [vmem:[#allocation10 + $0x10] sm:$0xff]  ;;  %v2971_v25 = vld [vmem:[#allocation10 + $0x3e8] sm:$0xff] }
 0x5d4   :  { %3255 = vmatprep.subr.mxu1 %v2899_v31  ;;  %3326 = vmatprep.subr.mxu0 %v2901_v38  ;;  %v2973_v31 = vld [vmem:[#allocation10 + $0x3f8] sm:$0xff]  ;;  %v2970_v38 = vld [vmem:[#allocation10 + $0x3e0] sm:$0xff] }
 0x5d5   :  { %3256 = vmatpush1.msra.mxu1 %v2898_v39  ;;  %3327 = vmatpush1.msra.mxu0 %v2900_v40  ;;  %v2972_v39 = vld [vmem:[#allocation10 + $0x3f0] sm:$0xff]  ;;  %v2967_v40 = vld [vmem:[#allocation10 + $0x3c8] sm:$0xff] }
 0x5d6   :  { %3257 = vmatprep.subr.mxu1 %v2895_v41  ;;  %3328 = vmatprep.subr.mxu0 %v2897_v42  ;;  %v2969_v41 = vld [vmem:[#allocation10 + $0x3d8] sm:$0xff]  ;;  %v2966_v42 = vld [vmem:[#allocation10 + $0x3c0] sm:$0xff] }
 0x5d7   :  { %3258 = vmatpush1.msra.mxu1 %v2894_v13  ;;  %3329 = vmatpush1.msra.mxu0 %v2896_v43  ;;  %v2968_v13 = vld [vmem:[#allocation10 + $0x3d0] sm:$0xff]  ;;  %v2963_v43 = vld [vmem:[#allocation10 + $0x3a8] sm:$0xff] }
 0x5d8   :  { %3259 = vmatprep.subr.mxu1 %v2891_v20  ;;  %3330 = vmatprep.subr.mxu0 %v2893_v0  ;;  %v2965_v20 = vld [vmem:[#allocation10 + $0x3b8] sm:$0xff]  ;;  %v2962_v0 = vld [vmem:[#allocation10 + $0x3a0] sm:$0xff] }
 0x5d9   :  { %3260 = vmatpush1.msra.mxu1 %v2890_v21  ;;  %3331 = vmatpush1.msra.mxu0 %v2892_v19  ;;  %v2964_v21 = vld [vmem:[#allocation10 + $0x3b0] sm:$0xff]  ;;  %v2959_v19 = vld [vmem:[#allocation10 + $0x388] sm:$0xff] }
 0x5da   :  { %3261 = vmatprep.subr.mxu1 %v2887_v17  ;;  %3332 = vmatprep.subr.mxu0 %v2889_v33  ;;  %v2961_v17 = vld [vmem:[#allocation10 + $0x398] sm:$0xff]  ;;  %v2958_v33 = vld [vmem:[#allocation10 + $0x380] sm:$0xff] }
 0x5db   :  { %3262 = vmatpush1.msra.mxu1 %v2886_v35  ;;  %3333 = vmatpush1.msra.mxu0 %v2888_v36  ;;  %v2960_v35 = vld [vmem:[#allocation10 + $0x390] sm:$0xff]  ;;  %v2955_v36 = vld [vmem:[#allocation10 + $0x368] sm:$0xff] }
 0x5dc   :  { %3263 = vmatprep.subr.mxu1 %v2883_v37  ;;  %3334 = vmatprep.subr.mxu0 %v2885_v44  ;;  %v2957_v37 = vld [vmem:[#allocation10 + $0x378] sm:$0xff]  ;;  %v2954_v44 = vld [vmem:[#allocation10 + $0x360] sm:$0xff] }
 0x5dd   :  { %3264 = vmatpush1.msra.mxu1 %v2882_v49  ;;  %3335 = vmatpush1.msra.mxu0 %v2884_v7  ;;  %v2956_v49 = vld [vmem:[#allocation10 + $0x370] sm:$0xff]  ;;  %v2951_v7 = vld [vmem:[#allocation10 + $0x348] sm:$0xff] }
 0x5de   :  { %3265 = vmatprep.subr.mxu1 %v2879_v51  ;;  %3336 = vmatprep.subr.mxu0 %v2881_v52  ;;  %v2953_v51 = vld [vmem:[#allocation10 + $0x358] sm:$0xff]  ;;  %v2950_v52 = vld [vmem:[#allocation10 + $0x340] sm:$0xff] }
 0x5df   :  { %3266 = vmatpush1.msra.mxu1 %v2878_v54  ;;  %3337 = vmatpush1.msra.mxu0 %v2880_v57  ;;  %v2952_v54 = vld [vmem:[#allocation10 + $0x350] sm:$0xff]  ;;  %v2947_v57 = vld [vmem:[#allocation10 + $0x328] sm:$0xff] }
 0x5e0   :  { %3267 = vmatprep.subr.mxu1 %v2875_v58  ;;  %3338 = vmatprep.subr.mxu0 %v2877_v59  ;;  %v2949_v58 = vld [vmem:[#allocation10 + $0x338] sm:$0xff]  ;;  %v2946_v59 = vld [vmem:[#allocation10 + $0x320] sm:$0xff] }
 0x5e1   :  { %3268 = vmatpush1.msra.mxu1 %v2874_v60  ;;  %3339 = vmatpush1.msra.mxu0 %v2876_v61  ;;  %v2948_v60 = vld [vmem:[#allocation10 + $0x330] sm:$0xff]  ;;  %v2943_v61 = vld [vmem:[#allocation10 + $0x308] sm:$0xff] }
 0x5e2   :  { %3269 = vmatprep.subr.mxu1 %v2871_v62  ;;  %3340 = vmatprep.subr.mxu0 %v2873_v63  ;;  %v2945_v62 = vld [vmem:[#allocation10 + $0x318] sm:$0xff]  ;;  %v2942_v63 = vld [vmem:[#allocation10 + $0x300] sm:$0xff] }
 0x5e3   :  { %3270 = vmatpush1.msra.mxu1 %v2870_v1  ;;  %3341 = vmatpush1.msra.mxu0 %v2872_v2  ;;  %v2944_v1 = vld [vmem:[#allocation10 + $0x310] sm:$0xff]  ;;  %v2939_v2 = vld [vmem:[#allocation10 + $0x2e8] sm:$0xff] }
 0x5e4   :  { %3271 = vmatprep.subr.mxu1 %v2867_v3  ;;  %3342 = vmatprep.subr.mxu0 %v2869_v4  ;;  %v2941_v3 = vld [vmem:[#allocation10 + $0x2f8] sm:$0xff]  ;;  %v2938_v4 = vld [vmem:[#allocation10 + $0x2e0] sm:$0xff] }
 0x5e5   :  { %3272 = vmatpush1.msra.mxu1 %v2866_v5  ;;  %3343 = vmatpush1.msra.mxu0 %v2868_v6  ;;  %v2940_v5 = vld [vmem:[#allocation10 + $0x2f0] sm:$0xff]  ;;  %v2935_v6 = vld [vmem:[#allocation10 + $0x2c8] sm:$0xff] }
 0x5e6   :  { %3273 = vmatprep.subr.mxu1 %v2863_v8  ;;  %3344 = vmatprep.subr.mxu0 %v2865_v9  ;;  %v2937_v8 = vld [vmem:[#allocation10 + $0x2d8] sm:$0xff]  ;;  %v2934_v9 = vld [vmem:[#allocation10 + $0x2c0] sm:$0xff] }
 0x5e7   :  { %3274 = vmatpush1.msra.mxu1 %v2862_v10  ;;  %3345 = vmatpush1.msra.mxu0 %v2864_v11  ;;  %v2936_v10 = vld [vmem:[#allocation10 + $0x2d0] sm:$0xff]  ;;  %v2931_v11 = vld [vmem:[#allocation10 + $0x2a8] sm:$0xff] }
 0x5e8   :  { %3275 = vmatprep.subr.mxu1 %v2859_v12  ;;  %3346 = vmatprep.subr.mxu0 %v2861_v14  ;;  %v2933_v12 = vld [vmem:[#allocation10 + $0x2b8] sm:$0xff]  ;;  %v2930_v14 = vld [vmem:[#allocation10 + $0x2a0] sm:$0xff] }
 0x5e9   :  { %3276 = vmatpush1.msra.mxu1 %v2858_v15  ;;  %3347 = vmatpush1.msra.mxu0 %v2860_v53  ;;  %v2932_v15 = vld [vmem:[#allocation10 + $0x2b0] sm:$0xff]  ;;  %v2927_v53 = vld [vmem:[#allocation10 + $0x288] sm:$0xff] }
 0x5ea   :  { %3277 = vmatprep.subr.mxu1 %v2855_v48  ;;  %3348 = vmatprep.subr.mxu0 %v2857_v16  ;;  %v2929_v48 = vld [vmem:[#allocation10 + $0x298] sm:$0xff]  ;;  %v2926_v16 = vld [vmem:[#allocation10 + $0x280] sm:$0xff] }
 0x5eb   :  { %3278 = vmatpush1.msra.mxu1 %v2854_v50  ;;  %3349 = vmatpush1.msra.mxu0 %v2856_v18  ;;  %v2928_v50 = vld [vmem:[#allocation10 + $0x290] sm:$0xff]  ;;  %v2923_v18 = vld [vmem:[#allocation10 + $0x268] sm:$0xff] }
 0x5ec   :  { %3279 = vmatprep.subr.mxu1 %v2851_v32  ;;  %3350 = vmatprep.subr.mxu0 %v2853_v23  ;;  %v2925_v32 = vld [vmem:[#allocation10 + $0x278] sm:$0xff]  ;;  %v2922_v23 = vld [vmem:[#allocation10 + $0x260] sm:$0xff] }
 0x5ed   :  { %3280 = vmatpush1.msra.mxu1 %v2850_v28  ;;  %3351 = vmatpush1.msra.mxu0 %v2852_v29  ;;  %v2924_v28 = vld [vmem:[#allocation10 + $0x270] sm:$0xff]  ;;  %v2919_v29 = vld [vmem:[#allocation10 + $0x248] sm:$0xff] }
 0x5ee   :  { %3281 = vmatprep.subr.mxu1 %v2847_v26  ;;  %3352 = vmatprep.subr.mxu0 %v2849_v27  ;;  %v2921_v26 = vld [vmem:[#allocation10 + $0x258] sm:$0xff]  ;;  %v2918_v27 = vld [vmem:[#allocation10 + $0x240] sm:$0xff] }
 0x5ef   :  { %3282 = vmatpush1.msra.mxu1 %v2846_v30  ;;  %3353 = vmatpush1.msra.mxu0 %v2848_v24  ;;  %v2920_v30 = vld [vmem:[#allocation10 + $0x250] sm:$0xff]  ;;  %v2915_v24 = vld [vmem:[#allocation10 + $0x228] sm:$0xff] }
 0x5f0   :  { %3283 = vmatprep.subr.mxu1 %v2971_v25  ;;  %3354 = vmatprep.subr.mxu0 %v2973_v31  ;;  %v2917_v25 = vld [vmem:[#allocation10 + $0x238] sm:$0xff]  ;;  %v2914_v31 = vld [vmem:[#allocation10 + $0x220] sm:$0xff] }
 0x5f1   :  { %3284 = vmatpush2.msra.mxu1 %v2970_v38  ;;  %3355 = vmatpush2.msra.mxu0 %v2972_v39  ;;  %v2916_v38 = vld [vmem:[#allocation10 + $0x230] sm:$0xff]  ;;  %v2911_v39 = vld [vmem:[#allocation10 + $0x208] sm:$0xff] }
 0x5f2   :  { %3285 = vmatprep.subr.mxu1 %v2967_v40  ;;  %3356 = vmatprep.subr.mxu0 %v2969_v41  ;;  %v2913_v40 = vld [vmem:[#allocation10 + $0x218] sm:$0xff]  ;;  %v2910_v41 = vld [vmem:[#allocation10 + $0x200] sm:$0xff] }
 0x5f3   :  { %3286 = vmatpush2.msra.mxu1 %v2966_v42  ;;  %3357 = vmatpush2.msra.mxu0 %v2968_v13  ;;  %v2912_v42 = vld [vmem:[#allocation10 + $0x210] sm:$0xff]  ;;  %v3455_v13 = vld [vmem:[#allocation10 + $0x9e8] sm:$0xff] }
 0x5f4   :  { %3287 = vmatprep.subr.mxu1 %v2963_v43  ;;  %3358 = vmatprep.subr.mxu0 %v2965_v20  ;;  %v3457_v43 = vld [vmem:[#allocation10 + $0x9f8] sm:$0xff]  ;;  %v3454_v20 = vld [vmem:[#allocation10 + $0x9e0] sm:$0xff] }
 0x5f5   :  { %3288 = vmatpush2.msra.mxu1 %v2962_v0  ;;  %3359 = vmatpush2.msra.mxu0 %v2964_v21  ;;  %v3523_v0 = vrot.slane %v8728_v22, 2  ;;  %v3456_v21 = vld [vmem:[#allocation10 + $0x9f0] sm:$0xff] }
 0x5f6   :  { %3289 = vmatprep.subr.mxu1 %v2959_v19  ;;  %3360 = vmatprep.subr.mxu0 %v2961_v17  ;;  %v3451_v19 = vld [vmem:[#allocation10 + $0x9c8] sm:$0xff]  ;;  %v3453_v17 = vld [vmem:[#allocation10 + $0x9d8] sm:$0xff] }
 0x5f7   :  { %3290 = vmatpush2.msra.mxu1 %v2958_v33  ;;  %3361 = vmatpush2.msra.mxu0 %v2960_v35  ;;  %v3450_v33 = vld [vmem:[#allocation10 + $0x9c0] sm:$0xff]  ;;  %v3452_v35 = vld [vmem:[#allocation10 + $0x9d0] sm:$0xff] }
 0x5f8   :  { %3291 = vmatprep.subr.mxu1 %v2955_v36  ;;  %3362 = vmatprep.subr.mxu0 %v2957_v37  ;;  %v3447_v36 = vld [vmem:[#allocation10 + $0x9a8] sm:$0xff]  ;;  %v3449_v37 = vld [vmem:[#allocation10 + $0x9b8] sm:$0xff] }
 0x5f9   :  { %3292 = vmatpush2.msra.mxu1 %v2954_v44  ;;  %3363 = vmatpush2.msra.mxu0 %v2956_v49  ;;  %v3446_v44 = vld [vmem:[#allocation10 + $0x9a0] sm:$0xff]  ;;  %v3448_v49 = vld [vmem:[#allocation10 + $0x9b0] sm:$0xff] }
 0x5fa   :  { %3293 = vmatprep.subr.mxu1 %v2951_v7  ;;  %3364 = vmatprep.subr.mxu0 %v2953_v51  ;;  %v3443_v7 = vld [vmem:[#allocation10 + $0x988] sm:$0xff]  ;;  %v3445_v51 = vld [vmem:[#allocation10 + $0x998] sm:$0xff] }
 0x5fb   :  { %3294 = vmatpush2.msra.mxu1 %v2950_v52  ;;  %3365 = vmatpush2.msra.mxu0 %v2952_v54  ;;  %v3442_v52 = vld [vmem:[#allocation10 + $0x980] sm:$0xff]  ;;  %v3444_v54 = vld [vmem:[#allocation10 + $0x990] sm:$0xff] }
 0x5fc   :  { %3295 = vmatprep.subr.mxu1 %v2947_v57  ;;  %3366 = vmatprep.subr.mxu0 %v2949_v58  ;;  %v3439_v57 = vld [vmem:[#allocation10 + $0x968] sm:$0xff]  ;;  %v3441_v58 = vld [vmem:[#allocation10 + $0x978] sm:$0xff] }
 0x5fd   :  { %3296 = vmatpush2.msra.mxu1 %v2946_v59  ;;  %3367 = vmatpush2.msra.mxu0 %v2948_v60  ;;  %v3438_v59 = vld [vmem:[#allocation10 + $0x960] sm:$0xff]  ;;  %v3440_v60 = vld [vmem:[#allocation10 + $0x970] sm:$0xff] }
 0x5fe   :  { %3297 = vmatprep.subr.mxu1 %v2943_v61  ;;  %3368 = vmatprep.subr.mxu0 %v2945_v62  ;;  %v3435_v61 = vld [vmem:[#allocation10 + $0x948] sm:$0xff]  ;;  %v3437_v62 = vld [vmem:[#allocation10 + $0x958] sm:$0xff] }
 0x5ff   :  { %3298 = vmatpush2.msra.mxu1 %v2942_v63  ;;  %3369 = vmatpush2.msra.mxu0 %v2944_v1  ;;  %v3434_v63 = vld [vmem:[#allocation10 + $0x940] sm:$0xff]  ;;  %v3436_v1 = vld [vmem:[#allocation10 + $0x950] sm:$0xff] }
 0x600   :  { %3299 = vmatprep.subr.mxu1 %v2939_v2  ;;  %3370 = vmatprep.subr.mxu0 %v2941_v3  ;;  %v3431_v2 = vld [vmem:[#allocation10 + $0x928] sm:$0xff]  ;;  %v3433_v3 = vld [vmem:[#allocation10 + $0x938] sm:$0xff] }
 0x601   :  { %3300 = vmatpush2.msra.mxu1 %v2938_v4  ;;  %3371 = vmatpush2.msra.mxu0 %v2940_v5  ;;  %v3430_v4 = vld [vmem:[#allocation10 + $0x920] sm:$0xff]  ;;  %v3432_v5 = vld [vmem:[#allocation10 + $0x930] sm:$0xff] }
 0x602   :  { %3301 = vmatprep.subr.mxu1 %v2935_v6  ;;  %3372 = vmatprep.subr.mxu0 %v2937_v8  ;;  %v3427_v6 = vld [vmem:[#allocation10 + $0x908] sm:$0xff]  ;;  %v3429_v8 = vld [vmem:[#allocation10 + $0x918] sm:$0xff] }
 0x603   :  { %3302 = vmatpush2.msra.mxu1 %v2934_v9  ;;  %3373 = vmatpush2.msra.mxu0 %v2936_v10  ;;  %v3426_v9 = vld [vmem:[#allocation10 + $0x900] sm:$0xff]  ;;  %v3428_v10 = vld [vmem:[#allocation10 + $0x910] sm:$0xff] }
 0x604   :  { %3303 = vmatprep.subr.mxu1 %v2931_v11  ;;  %3374 = vmatprep.subr.mxu0 %v2933_v12  ;;  %v3423_v11 = vld [vmem:[#allocation10 + $0x8e8] sm:$0xff]  ;;  %v3425_v12 = vld [vmem:[#allocation10 + $0x8f8] sm:$0xff] }
 0x605   :  { %3304 = vmatpush2.msra.mxu1 %v2930_v14  ;;  %3375 = vmatpush2.msra.mxu0 %v2932_v15  ;;  %v3422_v14 = vld [vmem:[#allocation10 + $0x8e0] sm:$0xff]  ;;  %v3424_v15 = vld [vmem:[#allocation10 + $0x8f0] sm:$0xff] }
 0x606   :  { %3305 = vmatprep.subr.mxu1 %v2927_v53  ;;  %3376 = vmatprep.subr.mxu0 %v2929_v48  ;;  %v3419_v53 = vld [vmem:[#allocation10 + $0x8c8] sm:$0xff]  ;;  %v3421_v48 = vld [vmem:[#allocation10 + $0x8d8] sm:$0xff] }
 0x607   :  { %3306 = vmatpush2.msra.mxu1 %v2926_v16  ;;  %3377 = vmatpush2.msra.mxu0 %v2928_v50  ;;  %v3418_v16 = vld [vmem:[#allocation10 + $0x8c0] sm:$0xff]  ;;  %v3420_v50 = vld [vmem:[#allocation10 + $0x8d0] sm:$0xff] }
 0x608   :  { %3307 = vmatprep.subr.mxu1 %v2923_v18  ;;  %3378 = vmatprep.subr.mxu0 %v2925_v32  ;;  %v3415_v18 = vld [vmem:[#allocation10 + $0x8a8] sm:$0xff]  ;;  %v3417_v32 = vld [vmem:[#allocation10 + $0x8b8] sm:$0xff] }
 0x609   :  { %3308 = vmatpush2.msra.mxu1 %v2922_v23  ;;  %3379 = vmatpush2.msra.mxu0 %v2924_v28  ;;  %v3414_v23 = vld [vmem:[#allocation10 + $0x8a0] sm:$0xff]  ;;  %v3416_v28 = vld [vmem:[#allocation10 + $0x8b0] sm:$0xff] }
 0x60a   :  { %3309 = vmatprep.subr.mxu1 %v2919_v29  ;;  %3380 = vmatprep.subr.mxu0 %v2921_v26  ;;  %v3411_v29 = vld [vmem:[#allocation10 + $0x888] sm:$0xff]  ;;  %v3413_v26 = vld [vmem:[#allocation10 + $0x898] sm:$0xff] }
 0x60b   :  { %3310 = vmatpush2.msra.mxu1 %v2918_v27  ;;  %3381 = vmatpush2.msra.mxu0 %v2920_v30  ;;  %v3410_v27 = vld [vmem:[#allocation10 + $0x880] sm:$0xff]  ;;  %v3412_v30 = vld [vmem:[#allocation10 + $0x890] sm:$0xff] }
 0x60c   :  { %3311 = vmatprep.subr.mxu1 %v2915_v24  ;;  %3382 = vmatprep.subr.mxu0 %v2917_v25  ;;  %v3407_v24 = vld [vmem:[#allocation10 + $0x868] sm:$0xff]  ;;  %v3409_v25 = vld [vmem:[#allocation10 + $0x878] sm:$0xff] }
 0x60d   :  { %3312 = vmatpush2.msra.mxu1 %v2914_v31  ;;  %3383 = vmatpush2.msra.mxu0 %v2916_v38  ;;  %v3406_v31 = vld [vmem:[#allocation10 + $0x860] sm:$0xff]  ;;  %v3408_v38 = vld [vmem:[#allocation10 + $0x870] sm:$0xff] }
 0x60e   :  { %3313 = vmatprep.subr.mxu1 %v2911_v39  ;;  %3384 = vmatprep.subr.mxu0 %v2913_v40  ;;  %v3403_v39 = vld [vmem:[#allocation10 + $0x848] sm:$0xff]  ;;  %v3405_v40 = vld [vmem:[#allocation10 + $0x858] sm:$0xff] }
 0x60f   :  { %3314 = vmatpush2.msra.mxu1 %v2910_v41  ;;  %3385 = vmatpush2.msra.mxu0 %v2912_v42  ;;  %v3402_v41 = vld [vmem:[#allocation10 + $0x840] sm:$0xff]  ;;  %v3404_v42 = vld [vmem:[#allocation10 + $0x850] sm:$0xff] }
 0x610   :  { %3316 = vmatmul.mubr.f32.vlgmr.msra.gmra.mxu1 %v8726_v34  ;;  %3387 = vmatmul.mubr.f32.vlgmr.msra.gmra.mxu0 %v8726_v34 }
 0x611   :  { %3526 = vmatprep.subr.mxu1 %v3455_v13  ;;  %3597 = vmatprep.subr.mxu0 %v3457_v43  ;;  %v3399_v13 = vld [vmem:[#allocation10 + $0x828] sm:$0xff]  ;;  %v3401_v43 = vld [vmem:[#allocation10 + $0x838] sm:$0xff] }
 0x612   :  { %3527 = vmatpush1.msra.mxu1 %v3454_v20  ;;  %3590 = vmatprep.mubr.f32.mxu1 %v3523_v0  ;;  %v3398_v20 = vld [vmem:[#allocation10 + $0x820] sm:$0xff] }
 0x613   :  { %3598 = vmatpush1.msra.mxu0 %v3456_v21  ;;  %3661 = vmatprep.mubr.f32.mxu0 %v3523_v0  ;;  %v3400_v0 = vld [vmem:[#allocation10 + $0x830] sm:$0xff]  ;;  %v3395_v21 = vld [vmem:[#allocation10 + $0x808] sm:$0xff] }
 0x614   :  { %3528 = vmatprep.subr.mxu1 %v3451_v19  ;;  %3599 = vmatprep.subr.mxu0 %v3453_v17  ;;  %v3397_v19 = vld [vmem:[#allocation10 + $0x818] sm:$0xff]  ;;  %v3394_v17 = vld [vmem:[#allocation10 + $0x800] sm:$0xff] }
 0x615   :  { %3529 = vmatpush1.msra.mxu1 %v3450_v33  ;;  %3600 = vmatpush1.msra.mxu0 %v3452_v35  ;;  %v3396_v33 = vld [vmem:[#allocation10 + $0x810] sm:$0xff]  ;;  %v3519_v35 = vld [vmem:[#allocation10 + $0xbe8] sm:$0xff] }
 0x616   :  { %3530 = vmatprep.subr.mxu1 %v3447_v36  ;;  %3601 = vmatprep.subr.mxu0 %v3449_v37  ;;  %v3521_v36 = vld [vmem:[#allocation10 + $0xbf8] sm:$0xff]  ;;  %v3518_v37 = vld [vmem:[#allocation10 + $0xbe0] sm:$0xff] }
 0x617   :  { %3531 = vmatpush1.msra.mxu1 %v3446_v44  ;;  %3602 = vmatpush1.msra.mxu0 %v3448_v49  ;;  %v3520_v44 = vld [vmem:[#allocation10 + $0xbf0] sm:$0xff]  ;;  %v3515_v49 = vld [vmem:[#allocation10 + $0xbc8] sm:$0xff] }
 0x618   :  { %3532 = vmatprep.subr.mxu1 %v3443_v7  ;;  %3603 = vmatprep.subr.mxu0 %v3445_v51  ;;  %v3517_v7 = vld [vmem:[#allocation10 + $0xbd8] sm:$0xff]  ;;  %v3514_v51 = vld [vmem:[#allocation10 + $0xbc0] sm:$0xff] }
 0x619   :  { %3533 = vmatpush1.msra.mxu1 %v3442_v52  ;;  %3604 = vmatpush1.msra.mxu0 %v3444_v54  ;;  %v3516_v52 = vld [vmem:[#allocation10 + $0xbd0] sm:$0xff]  ;;  %v3511_v54 = vld [vmem:[#allocation10 + $0xba8] sm:$0xff] }
 0x61a   :  { %3534 = vmatprep.subr.mxu1 %v3439_v57  ;;  %3605 = vmatprep.subr.mxu0 %v3441_v58  ;;  %v3513_v57 = vld [vmem:[#allocation10 + $0xbb8] sm:$0xff]  ;;  %v3510_v58 = vld [vmem:[#allocation10 + $0xba0] sm:$0xff] }
 0x61b   :  { %3535 = vmatpush1.msra.mxu1 %v3438_v59  ;;  %3606 = vmatpush1.msra.mxu0 %v3440_v60  ;;  %v3512_v59 = vld [vmem:[#allocation10 + $0xbb0] sm:$0xff]  ;;  %v3507_v60 = vld [vmem:[#allocation10 + $0xb88] sm:$0xff] }
 0x61c   :  { %3536 = vmatprep.subr.mxu1 %v3435_v61  ;;  %3607 = vmatprep.subr.mxu0 %v3437_v62  ;;  %v3509_v61 = vld [vmem:[#allocation10 + $0xb98] sm:$0xff]  ;;  %v3506_v62 = vld [vmem:[#allocation10 + $0xb80] sm:$0xff] }
 0x61d   :  { %3537 = vmatpush1.msra.mxu1 %v3434_v63  ;;  %3608 = vmatpush1.msra.mxu0 %v3436_v1  ;;  %v3508_v63 = vld [vmem:[#allocation10 + $0xb90] sm:$0xff]  ;;  %v3503_v1 = vld [vmem:[#allocation10 + $0xb68] sm:$0xff] }
 0x61e   :  { %3538 = vmatprep.subr.mxu1 %v3431_v2  ;;  %3609 = vmatprep.subr.mxu0 %v3433_v3  ;;  %v3505_v2 = vld [vmem:[#allocation10 + $0xb78] sm:$0xff]  ;;  %v3502_v3 = vld [vmem:[#allocation10 + $0xb60] sm:$0xff] }
 0x61f   :  { %3539 = vmatpush1.msra.mxu1 %v3430_v4  ;;  %3610 = vmatpush1.msra.mxu0 %v3432_v5  ;;  %v3504_v4 = vld [vmem:[#allocation10 + $0xb70] sm:$0xff]  ;;  %v3499_v5 = vld [vmem:[#allocation10 + $0xb48] sm:$0xff] }
 0x620   :  { %3540 = vmatprep.subr.mxu1 %v3427_v6  ;;  %3611 = vmatprep.subr.mxu0 %v3429_v8  ;;  %v3501_v6 = vld [vmem:[#allocation10 + $0xb58] sm:$0xff]  ;;  %v3498_v8 = vld [vmem:[#allocation10 + $0xb40] sm:$0xff] }
 0x621   :  { %3541 = vmatpush1.msra.mxu1 %v3426_v9  ;;  %3612 = vmatpush1.msra.mxu0 %v3428_v10  ;;  %v3500_v9 = vld [vmem:[#allocation10 + $0xb50] sm:$0xff]  ;;  %v3495_v10 = vld [vmem:[#allocation10 + $0xb28] sm:$0xff] }
 0x622   :  { %3542 = vmatprep.subr.mxu1 %v3423_v11  ;;  %3613 = vmatprep.subr.mxu0 %v3425_v12  ;;  %v3497_v11 = vld [vmem:[#allocation10 + $0xb38] sm:$0xff]  ;;  %v3494_v12 = vld [vmem:[#allocation10 + $0xb20] sm:$0xff] }
 0x623   :  { %3543 = vmatpush1.msra.mxu1 %v3422_v14  ;;  %3614 = vmatpush1.msra.mxu0 %v3424_v15  ;;  %v3496_v14 = vld [vmem:[#allocation10 + $0xb30] sm:$0xff]  ;;  %v3491_v15 = vld [vmem:[#allocation10 + $0xb08] sm:$0xff] }
 0x624   :  { %3544 = vmatprep.subr.mxu1 %v3419_v53  ;;  %3615 = vmatprep.subr.mxu0 %v3421_v48  ;;  %v3493_v53 = vld [vmem:[#allocation10 + $0xb18] sm:$0xff]  ;;  %v3490_v48 = vld [vmem:[#allocation10 + $0xb00] sm:$0xff] }
 0x625   :  { %3545 = vmatpush1.msra.mxu1 %v3418_v16  ;;  %3616 = vmatpush1.msra.mxu0 %v3420_v50  ;;  %v3492_v16 = vld [vmem:[#allocation10 + $0xb10] sm:$0xff]  ;;  %v3487_v50 = vld [vmem:[#allocation10 + $0xae8] sm:$0xff] }
 0x626   :  { %3546 = vmatprep.subr.mxu1 %v3415_v18  ;;  %3617 = vmatprep.subr.mxu0 %v3417_v32  ;;  %v3489_v18 = vld [vmem:[#allocation10 + $0xaf8] sm:$0xff]  ;;  %v3486_v32 = vld [vmem:[#allocation10 + $0xae0] sm:$0xff] }
 0x627   :  { %3547 = vmatpush1.msra.mxu1 %v3414_v23  ;;  %3618 = vmatpush1.msra.mxu0 %v3416_v28  ;;  %v3488_v23 = vld [vmem:[#allocation10 + $0xaf0] sm:$0xff]  ;;  %v3483_v28 = vld [vmem:[#allocation10 + $0xac8] sm:$0xff] }
 0x628   :  { %3548 = vmatprep.subr.mxu1 %v3411_v29  ;;  %3619 = vmatprep.subr.mxu0 %v3413_v26  ;;  %v3485_v29 = vld [vmem:[#allocation10 + $0xad8] sm:$0xff]  ;;  %v3482_v26 = vld [vmem:[#allocation10 + $0xac0] sm:$0xff] }
 0x629   :  { %3549 = vmatpush1.msra.mxu1 %v3410_v27  ;;  %3620 = vmatpush1.msra.mxu0 %v3412_v30  ;;  %v3484_v27 = vld [vmem:[#allocation10 + $0xad0] sm:$0xff]  ;;  %v3479_v30 = vld [vmem:[#allocation10 + $0xaa8] sm:$0xff] }
 0x62a   :  { %3550 = vmatprep.subr.mxu1 %v3407_v24  ;;  %3621 = vmatprep.subr.mxu0 %v3409_v25  ;;  %v3481_v24 = vld [vmem:[#allocation10 + $0xab8] sm:$0xff]  ;;  %v3478_v25 = vld [vmem:[#allocation10 + $0xaa0] sm:$0xff] }
 0x62b   :  { %3551 = vmatpush1.msra.mxu1 %v3406_v31  ;;  %3622 = vmatpush1.msra.mxu0 %v3408_v38  ;;  %v3480_v31 = vld [vmem:[#allocation10 + $0xab0] sm:$0xff]  ;;  %v3475_v38 = vld [vmem:[#allocation10 + $0xa88] sm:$0xff] }
 0x62c   :  { %3552 = vmatprep.subr.mxu1 %v3403_v39  ;;  %3623 = vmatprep.subr.mxu0 %v3405_v40  ;;  %v3477_v39 = vld [vmem:[#allocation10 + $0xa98] sm:$0xff]  ;;  %v3474_v40 = vld [vmem:[#allocation10 + $0xa80] sm:$0xff] }
 0x62d   :  { %3553 = vmatpush1.msra.mxu1 %v3402_v41  ;;  %3624 = vmatpush1.msra.mxu0 %v3404_v42  ;;  %v3476_v41 = vld [vmem:[#allocation10 + $0xa90] sm:$0xff]  ;;  %v3471_v42 = vld [vmem:[#allocation10 + $0xa68] sm:$0xff] }
 0x62e   :  { %3554 = vmatprep.subr.mxu1 %v3399_v13  ;;  %3625 = vmatprep.subr.mxu0 %v3401_v43  ;;  %v3473_v13 = vld [vmem:[#allocation10 + $0xa78] sm:$0xff]  ;;  %v3470_v43 = vld [vmem:[#allocation10 + $0xa60] sm:$0xff] }
 0x62f   :  { %3555 = vmatpush1.msra.mxu1 %v3398_v20  ;;  %3626 = vmatpush1.msra.mxu0 %v3400_v0  ;;  %v3472_v20 = vld [vmem:[#allocation10 + $0xa70] sm:$0xff]  ;;  %v3467_v0 = vld [vmem:[#allocation10 + $0xa48] sm:$0xff] }
 0x630   :  { %3556 = vmatprep.subr.mxu1 %v3395_v21  ;;  %3627 = vmatprep.subr.mxu0 %v3397_v19  ;;  %v3469_v21 = vld [vmem:[#allocation10 + $0xa58] sm:$0xff]  ;;  %v3466_v19 = vld [vmem:[#allocation10 + $0xa40] sm:$0xff] }
 0x631   :  { %3557 = vmatpush1.msra.mxu1 %v3394_v17  ;;  %3628 = vmatpush1.msra.mxu0 %v3396_v33  ;;  %v3468_v17 = vld [vmem:[#allocation10 + $0xa50] sm:$0xff]  ;;  %v3463_v33 = vld [vmem:[#allocation10 + $0xa28] sm:$0xff] }
 0x632   :  { %3558 = vmatprep.subr.mxu1 %v3519_v35  ;;  %3629 = vmatprep.subr.mxu0 %v3521_v36  ;;  %v3465_v35 = vld [vmem:[#allocation10 + $0xa38] sm:$0xff]  ;;  %v3462_v36 = vld [vmem:[#allocation10 + $0xa20] sm:$0xff] }
 0x633   :  { %3559 = vmatpush2.msra.mxu1 %v3518_v37  ;;  %3630 = vmatpush2.msra.mxu0 %v3520_v44  ;;  %v3464_v37 = vld [vmem:[#allocation10 + $0xa30] sm:$0xff]  ;;  %v3459_v44 = vld [vmem:[#allocation10 + $0xa08] sm:$0xff] }
 0x634   :  { %3560 = vmatprep.subr.mxu1 %v3515_v49  ;;  %3631 = vmatprep.subr.mxu0 %v3517_v7  ;;  %v3461_v49 = vld [vmem:[#allocation10 + $0xa18] sm:$0xff]  ;;  %v3458_v7 = vld [vmem:[#allocation10 + $0xa00] sm:$0xff] }
 0x635   :  { %3561 = vmatpush2.msra.mxu1 %v3514_v51  ;;  %3632 = vmatpush2.msra.mxu0 %v3516_v52  ;;  %v3460_v51 = vld [vmem:[#allocation10 + $0xa10] sm:$0xff]  ;;  %v3522_v52 = vrot.slane %v8726_v34, 2 }
 0x636   :  { %3562 = vmatprep.subr.mxu1 %v3511_v54  ;;  %3633 = vmatprep.subr.mxu0 %v3513_v57  ;;  %v3734_v54 = vld [vmem:[#allocation10 + $0xde8] sm:$0xff]  ;;  %v3736_v57 = vld [vmem:[#allocation10 + $0xdf8] sm:$0xff] }
 0x637   :  { %3563 = vmatpush2.msra.mxu1 %v3510_v58  ;;  %3634 = vmatpush2.msra.mxu0 %v3512_v59  ;;  %v3733_v58 = vld [vmem:[#allocation10 + $0xde0] sm:$0xff]  ;;  %v3802_v59 = vrot.slane %v8728_v22, 3  ;;  %v3722_v22 = vld [vmem:[#allocation10 + $0xd88] sm:$0xff] }
 0x638   :  { %3564 = vmatprep.subr.mxu1 %v3507_v60  ;;  %3635 = vmatprep.subr.mxu0 %v3509_v61  ;;  %v3735_v60 = vld [vmem:[#allocation10 + $0xdf0] sm:$0xff]  ;;  %v3730_v61 = vld [vmem:[#allocation10 + $0xdc8] sm:$0xff] }
 0x639   :  { %3565 = vmatpush2.msra.mxu1 %v3506_v62  ;;  %3636 = vmatpush2.msra.mxu0 %v3508_v63  ;;  %v3732_v62 = vld [vmem:[#allocation10 + $0xdd8] sm:$0xff]  ;;  %v3729_v63 = vld [vmem:[#allocation10 + $0xdc0] sm:$0xff] }
 0x63a   :  { %3566 = vmatprep.subr.mxu1 %v3503_v1  ;;  %3637 = vmatprep.subr.mxu0 %v3505_v2  ;;  %v3731_v1 = vld [vmem:[#allocation10 + $0xdd0] sm:$0xff]  ;;  %v3726_v2 = vld [vmem:[#allocation10 + $0xda8] sm:$0xff] }
 0x63b   :  { %3567 = vmatpush2.msra.mxu1 %v3502_v3  ;;  %3638 = vmatpush2.msra.mxu0 %v3504_v4  ;;  %v3728_v3 = vld [vmem:[#allocation10 + $0xdb8] sm:$0xff]  ;;  %v3725_v4 = vld [vmem:[#allocation10 + $0xda0] sm:$0xff] }
 0x63c   :  { %3568 = vmatprep.subr.mxu1 %v3499_v5  ;;  %3639 = vmatprep.subr.mxu0 %v3501_v6  ;;  %v3727_v5 = vld [vmem:[#allocation10 + $0xdb0] sm:$0xff]  ;;  %v3724_v6 = vld [vmem:[#allocation10 + $0xd98] sm:$0xff] }
 0x63d   :  { %3569 = vmatpush2.msra.mxu1 %v3498_v8  ;;  %3640 = vmatpush2.msra.mxu0 %v3500_v9  ;;  %v3721_v8 = vld [vmem:[#allocation10 + $0xd80] sm:$0xff]  ;;  %v3723_v9 = vld [vmem:[#allocation10 + $0xd90] sm:$0xff] }
 0x63e   :  { %3570 = vmatprep.subr.mxu1 %v3495_v10  ;;  %3641 = vmatprep.subr.mxu0 %v3497_v11  ;;  %v3718_v10 = vld [vmem:[#allocation10 + $0xd68] sm:$0xff]  ;;  %v3720_v11 = vld [vmem:[#allocation10 + $0xd78] sm:$0xff] }
 0x63f   :  { %3571 = vmatpush2.msra.mxu1 %v3494_v12  ;;  %3642 = vmatpush2.msra.mxu0 %v3496_v14  ;;  %v3717_v12 = vld [vmem:[#allocation10 + $0xd60] sm:$0xff]  ;;  %v3719_v14 = vld [vmem:[#allocation10 + $0xd70] sm:$0xff] }
 0x640   :  { %3572 = vmatprep.subr.mxu1 %v3491_v15  ;;  %3643 = vmatprep.subr.mxu0 %v3493_v53  ;;  %v3714_v15 = vld [vmem:[#allocation10 + $0xd48] sm:$0xff]  ;;  %v3716_v53 = vld [vmem:[#allocation10 + $0xd58] sm:$0xff] }
 0x641   :  { %3573 = vmatpush2.msra.mxu1 %v3490_v48  ;;  %3644 = vmatpush2.msra.mxu0 %v3492_v16  ;;  %v3713_v48 = vld [vmem:[#allocation10 + $0xd40] sm:$0xff]  ;;  %v3715_v16 = vld [vmem:[#allocation10 + $0xd50] sm:$0xff] }
 0x642   :  { %3574 = vmatprep.subr.mxu1 %v3487_v50  ;;  %3645 = vmatprep.subr.mxu0 %v3489_v18  ;;  %v3710_v50 = vld [vmem:[#allocation10 + $0xd28] sm:$0xff]  ;;  %v3712_v18 = vld [vmem:[#allocation10 + $0xd38] sm:$0xff] }
 0x643   :  { %3575 = vmatpush2.msra.mxu1 %v3486_v32  ;;  %3646 = vmatpush2.msra.mxu0 %v3488_v23  ;;  %v3709_v32 = vld [vmem:[#allocation10 + $0xd20] sm:$0xff]  ;;  %v3711_v23 = vld [vmem:[#allocation10 + $0xd30] sm:$0xff] }
 0x644   :  { %3576 = vmatprep.subr.mxu1 %v3483_v28  ;;  %3647 = vmatprep.subr.mxu0 %v3485_v29  ;;  %v3706_v28 = vld [vmem:[#allocation10 + $0xd08] sm:$0xff]  ;;  %v3708_v29 = vld [vmem:[#allocation10 + $0xd18] sm:$0xff] }
 0x645   :  { %3577 = vmatpush2.msra.mxu1 %v3482_v26  ;;  %3648 = vmatpush2.msra.mxu0 %v3484_v27  ;;  %v3705_v26 = vld [vmem:[#allocation10 + $0xd00] sm:$0xff]  ;;  %v3707_v27 = vld [vmem:[#allocation10 + $0xd10] sm:$0xff] }
 0x646   :  { %3578 = vmatprep.subr.mxu1 %v3479_v30  ;;  %3649 = vmatprep.subr.mxu0 %v3481_v24  ;;  %v3702_v30 = vld [vmem:[#allocation10 + $0xce8] sm:$0xff]  ;;  %v3704_v24 = vld [vmem:[#allocation10 + $0xcf8] sm:$0xff] }
 0x647   :  { %3579 = vmatpush2.msra.mxu1 %v3478_v25  ;;  %3650 = vmatpush2.msra.mxu0 %v3480_v31  ;;  %v3701_v25 = vld [vmem:[#allocation10 + $0xce0] sm:$0xff]  ;;  %v3703_v31 = vld [vmem:[#allocation10 + $0xcf0] sm:$0xff] }
 0x648   :  { %3580 = vmatprep.subr.mxu1 %v3475_v38  ;;  %3651 = vmatprep.subr.mxu0 %v3477_v39  ;;  %v3698_v38 = vld [vmem:[#allocation10 + $0xcc8] sm:$0xff]  ;;  %v3700_v39 = vld [vmem:[#allocation10 + $0xcd8] sm:$0xff] }
 0x649   :  { %3581 = vmatpush2.msra.mxu1 %v3474_v40  ;;  %3652 = vmatpush2.msra.mxu0 %v3476_v41  ;;  %v3697_v40 = vld [vmem:[#allocation10 + $0xcc0] sm:$0xff]  ;;  %v3699_v41 = vld [vmem:[#allocation10 + $0xcd0] sm:$0xff] }
 0x64a   :  { %3582 = vmatprep.subr.mxu1 %v3471_v42  ;;  %3653 = vmatprep.subr.mxu0 %v3473_v13  ;;  %v3694_v42 = vld [vmem:[#allocation10 + $0xca8] sm:$0xff]  ;;  %v3696_v13 = vld [vmem:[#allocation10 + $0xcb8] sm:$0xff] }
 0x64b   :  { %3583 = vmatpush2.msra.mxu1 %v3470_v43  ;;  %3654 = vmatpush2.msra.mxu0 %v3472_v20  ;;  %v3693_v43 = vld [vmem:[#allocation10 + $0xca0] sm:$0xff]  ;;  %v3695_v20 = vld [vmem:[#allocation10 + $0xcb0] sm:$0xff] }
 0x64c   :  { %3584 = vmatprep.subr.mxu1 %v3467_v0  ;;  %3655 = vmatprep.subr.mxu0 %v3469_v21  ;;  %v3690_v0 = vld [vmem:[#allocation10 + $0xc88] sm:$0xff]  ;;  %v3692_v21 = vld [vmem:[#allocation10 + $0xc98] sm:$0xff] }
 0x64d   :  { %3585 = vmatpush2.msra.mxu1 %v3466_v19  ;;  %3656 = vmatpush2.msra.mxu0 %v3468_v17  ;;  %v3689_v19 = vld [vmem:[#allocation10 + $0xc80] sm:$0xff]  ;;  %v3691_v17 = vld [vmem:[#allocation10 + $0xc90] sm:$0xff] }
 0x64e   :  { %3586 = vmatprep.subr.mxu1 %v3463_v33  ;;  %3657 = vmatprep.subr.mxu0 %v3465_v35  ;;  %v3686_v33 = vld [vmem:[#allocation10 + $0xc68] sm:$0xff]  ;;  %v3688_v35 = vld [vmem:[#allocation10 + $0xc78] sm:$0xff] }
 0x64f   :  { %3587 = vmatpush2.msra.mxu1 %v3462_v36  ;;  %3658 = vmatpush2.msra.mxu0 %v3464_v37  ;;  %v3685_v36 = vld [vmem:[#allocation10 + $0xc60] sm:$0xff]  ;;  %v3687_v37 = vld [vmem:[#allocation10 + $0xc70] sm:$0xff] }
 0x650   :  { %3588 = vmatprep.subr.mxu1 %v3459_v44  ;;  %3659 = vmatprep.subr.mxu0 %v3461_v49  ;;  %v3682_v44 = vld [vmem:[#allocation10 + $0xc48] sm:$0xff]  ;;  %v3684_v49 = vld [vmem:[#allocation10 + $0xc58] sm:$0xff] }
 0x651   :  { %3589 = vmatpush2.msra.mxu1 %v3458_v7  ;;  %3660 = vmatpush2.msra.mxu0 %v3460_v51  ;;  %v3681_v7 = vld [vmem:[#allocation10 + $0xc40] sm:$0xff]  ;;  %v3683_v51 = vld [vmem:[#allocation10 + $0xc50] sm:$0xff] }
 0x652   :  { %3591 = vmatmul.mubr.f32.vlgmr.msra.gmra.mxu1 %v3522_v52  ;;  %3662 = vmatmul.mubr.f32.vlgmr.msra.gmra.mxu0 %v3522_v52  ;;  %v3678_v52 = vld [vmem:[#allocation10 + $0xc28] sm:$0xff] }
 0x653   :  { %3805 = vmatprep.subr.mxu1 %v3734_v54  ;;  %3876 = vmatprep.subr.mxu0 %v3736_v57  ;;  %v3680_v54 = vld [vmem:[#allocation10 + $0xc38] sm:$0xff]  ;;  %v3677_v57 = vld [vmem:[#allocation10 + $0xc20] sm:$0xff] }
 0x654   :  { %3806 = vmatpush1.msra.mxu1 %v3733_v58  ;;  %3869 = vmatprep.mubr.f32.mxu1 %v3802_v59  ;;  %v3679_v58 = vld [vmem:[#allocation10 + $0xc30] sm:$0xff] }
 0x655   :  { %3877 = vmatpush1.msra.mxu0 %v3735_v60  ;;  %3940 = vmatprep.mubr.f32.mxu0 %v3802_v59  ;;  %v3674_v59 = vld [vmem:[#allocation10 + $0xc08] sm:$0xff]  ;;  %v3676_v60 = vld [vmem:[#allocation10 + $0xc18] sm:$0xff] }
 0x656   :  { %3807 = vmatprep.subr.mxu1 %v3730_v61  ;;  %3878 = vmatprep.subr.mxu0 %v3732_v62  ;;  %v3673_v61 = vld [vmem:[#allocation10 + $0xc00] sm:$0xff]  ;;  %v3675_v62 = vld [vmem:[#allocation10 + $0xc10] sm:$0xff] }
 0x657   :  { %3808 = vmatpush1.msra.mxu1 %v3729_v63  ;;  %3879 = vmatpush1.msra.mxu0 %v3731_v1  ;;  %v3798_v63 = vld [vmem:[#allocation10 + $0xfe8] sm:$0xff]  ;;  %v3800_v1 = vld [vmem:[#allocation10 + $0xff8] sm:$0xff] }
 0x658   :  { %3809 = vmatprep.subr.mxu1 %v3726_v2  ;;  %3880 = vmatprep.subr.mxu0 %v3728_v3  ;;  %v3797_v2 = vld [vmem:[#allocation10 + $0xfe0] sm:$0xff]  ;;  %v3799_v3 = vld [vmem:[#allocation10 + $0xff0] sm:$0xff] }
 0x659   :  { %3810 = vmatpush1.msra.mxu1 %v3725_v4  ;;  %3881 = vmatpush1.msra.mxu0 %v3727_v5  ;;  %v3794_v4 = vld [vmem:[#allocation10 + $0xfc8] sm:$0xff]  ;;  %v3796_v5 = vld [vmem:[#allocation10 + $0xfd8] sm:$0xff] }
 0x65a   :  { %3811 = vmatprep.subr.mxu1 %v3722_v22  ;;  %3882 = vmatprep.subr.mxu0 %v3724_v6  ;;  %v3793_v22 = vld [vmem:[#allocation10 + $0xfc0] sm:$0xff]  ;;  %v3795_v6 = vld [vmem:[#allocation10 + $0xfd0] sm:$0xff] }
 0x65b   :  { %3812 = vmatpush1.msra.mxu1 %v3721_v8  ;;  %3883 = vmatpush1.msra.mxu0 %v3723_v9  ;;  %v3790_v8 = vld [vmem:[#allocation10 + $0xfa8] sm:$0xff]  ;;  %v3792_v9 = vld [vmem:[#allocation10 + $0xfb8] sm:$0xff] }
 0x65c   :  { %3813 = vmatprep.subr.mxu1 %v3718_v10  ;;  %3884 = vmatprep.subr.mxu0 %v3720_v11  ;;  %v3789_v10 = vld [vmem:[#allocation10 + $0xfa0] sm:$0xff]  ;;  %v3791_v11 = vld [vmem:[#allocation10 + $0xfb0] sm:$0xff] }
 0x65d   :  { %3814 = vmatpush1.msra.mxu1 %v3717_v12  ;;  %3885 = vmatpush1.msra.mxu0 %v3719_v14  ;;  %v3786_v12 = vld [vmem:[#allocation10 + $0xf88] sm:$0xff]  ;;  %v3788_v14 = vld [vmem:[#allocation10 + $0xf98] sm:$0xff] }
 0x65e   :  { %3815 = vmatprep.subr.mxu1 %v3714_v15  ;;  %3886 = vmatprep.subr.mxu0 %v3716_v53  ;;  %v3785_v15 = vld [vmem:[#allocation10 + $0xf80] sm:$0xff]  ;;  %v3787_v53 = vld [vmem:[#allocation10 + $0xf90] sm:$0xff] }
 0x65f   :  { %3816 = vmatpush1.msra.mxu1 %v3713_v48  ;;  %3887 = vmatpush1.msra.mxu0 %v3715_v16  ;;  %v3782_v48 = vld [vmem:[#allocation10 + $0xf68] sm:$0xff]  ;;  %v3784_v16 = vld [vmem:[#allocation10 + $0xf78] sm:$0xff] }
 0x660   :  { %3817 = vmatprep.subr.mxu1 %v3710_v50  ;;  %3888 = vmatprep.subr.mxu0 %v3712_v18  ;;  %v3781_v50 = vld [vmem:[#allocation10 + $0xf60] sm:$0xff]  ;;  %v3783_v18 = vld [vmem:[#allocation10 + $0xf70] sm:$0xff] }
 0x661   :  { %3818 = vmatpush1.msra.mxu1 %v3709_v32  ;;  %3889 = vmatpush1.msra.mxu0 %v3711_v23  ;;  %v3778_v32 = vld [vmem:[#allocation10 + $0xf48] sm:$0xff]  ;;  %v3780_v23 = vld [vmem:[#allocation10 + $0xf58] sm:$0xff] }
 0x662   :  { %3819 = vmatprep.subr.mxu1 %v3706_v28  ;;  %3890 = vmatprep.subr.mxu0 %v3708_v29  ;;  %v3777_v28 = vld [vmem:[#allocation10 + $0xf40] sm:$0xff]  ;;  %v3779_v29 = vld [vmem:[#allocation10 + $0xf50] sm:$0xff] }
 0x663   :  { %3820 = vmatpush1.msra.mxu1 %v3705_v26  ;;  %3891 = vmatpush1.msra.mxu0 %v3707_v27  ;;  %v3774_v26 = vld [vmem:[#allocation10 + $0xf28] sm:$0xff]  ;;  %v3776_v27 = vld [vmem:[#allocation10 + $0xf38] sm:$0xff] }
 0x664   :  { %3821 = vmatprep.subr.mxu1 %v3702_v30  ;;  %3892 = vmatprep.subr.mxu0 %v3704_v24  ;;  %v3773_v30 = vld [vmem:[#allocation10 + $0xf20] sm:$0xff]  ;;  %v3775_v24 = vld [vmem:[#allocation10 + $0xf30] sm:$0xff] }
 0x665   :  { %3822 = vmatpush1.msra.mxu1 %v3701_v25  ;;  %3893 = vmatpush1.msra.mxu0 %v3703_v31  ;;  %v3770_v25 = vld [vmem:[#allocation10 + $0xf08] sm:$0xff]  ;;  %v3772_v31 = vld [vmem:[#allocation10 + $0xf18] sm:$0xff] }
 0x666   :  { %3823 = vmatprep.subr.mxu1 %v3698_v38  ;;  %3894 = vmatprep.subr.mxu0 %v3700_v39  ;;  %v3769_v38 = vld [vmem:[#allocation10 + $0xf00] sm:$0xff]  ;;  %v3771_v39 = vld [vmem:[#allocation10 + $0xf10] sm:$0xff] }
 0x667   :  { %3824 = vmatpush1.msra.mxu1 %v3697_v40  ;;  %3895 = vmatpush1.msra.mxu0 %v3699_v41  ;;  %v3766_v40 = vld [vmem:[#allocation10 + $0xee8] sm:$0xff]  ;;  %v3768_v41 = vld [vmem:[#allocation10 + $0xef8] sm:$0xff] }
 0x668   :  { %3825 = vmatprep.subr.mxu1 %v3694_v42  ;;  %3896 = vmatprep.subr.mxu0 %v3696_v13  ;;  %v3765_v42 = vld [vmem:[#allocation10 + $0xee0] sm:$0xff]  ;;  %v3767_v13 = vld [vmem:[#allocation10 + $0xef0] sm:$0xff] }
 0x669   :  { %3826 = vmatpush1.msra.mxu1 %v3693_v43  ;;  %3897 = vmatpush1.msra.mxu0 %v3695_v20  ;;  %v3762_v43 = vld [vmem:[#allocation10 + $0xec8] sm:$0xff]  ;;  %v3764_v20 = vld [vmem:[#allocation10 + $0xed8] sm:$0xff] }
 0x66a   :  { %3827 = vmatprep.subr.mxu1 %v3690_v0  ;;  %3898 = vmatprep.subr.mxu0 %v3692_v21  ;;  %v3761_v0 = vld [vmem:[#allocation10 + $0xec0] sm:$0xff]  ;;  %v3763_v21 = vld [vmem:[#allocation10 + $0xed0] sm:$0xff] }
 0x66b   :  { %3828 = vmatpush1.msra.mxu1 %v3689_v19  ;;  %3899 = vmatpush1.msra.mxu0 %v3691_v17  ;;  %v3758_v19 = vld [vmem:[#allocation10 + $0xea8] sm:$0xff]  ;;  %v3760_v17 = vld [vmem:[#allocation10 + $0xeb8] sm:$0xff] }
 0x66c   :  { %3829 = vmatprep.subr.mxu1 %v3686_v33  ;;  %3900 = vmatprep.subr.mxu0 %v3688_v35  ;;  %v3757_v33 = vld [vmem:[#allocation10 + $0xea0] sm:$0xff]  ;;  %v3759_v35 = vld [vmem:[#allocation10 + $0xeb0] sm:$0xff] }
 0x66d   :  { %3830 = vmatpush1.msra.mxu1 %v3685_v36  ;;  %3901 = vmatpush1.msra.mxu0 %v3687_v37  ;;  %v3754_v36 = vld [vmem:[#allocation10 + $0xe88] sm:$0xff]  ;;  %v3756_v37 = vld [vmem:[#allocation10 + $0xe98] sm:$0xff] }
 0x66e   :  { %3831 = vmatprep.subr.mxu1 %v3682_v44  ;;  %3902 = vmatprep.subr.mxu0 %v3684_v49  ;;  %v3753_v44 = vld [vmem:[#allocation10 + $0xe80] sm:$0xff]  ;;  %v3755_v49 = vld [vmem:[#allocation10 + $0xe90] sm:$0xff] }
 0x66f   :  { %3832 = vmatpush1.msra.mxu1 %v3681_v7  ;;  %3903 = vmatpush1.msra.mxu0 %v3683_v51  ;;  %v3750_v7 = vld [vmem:[#allocation10 + $0xe68] sm:$0xff]  ;;  %v3752_v51 = vld [vmem:[#allocation10 + $0xe78] sm:$0xff] }
 0x670   :  { %3833 = vmatprep.subr.mxu1 %v3678_v52  ;;  %3904 = vmatprep.subr.mxu0 %v3680_v54  ;;  %v3749_v52 = vld [vmem:[#allocation10 + $0xe60] sm:$0xff]  ;;  %v3751_v54 = vld [vmem:[#allocation10 + $0xe70] sm:$0xff] }
 0x671   :  { %3834 = vmatpush1.msra.mxu1 %v3677_v57  ;;  %3905 = vmatpush1.msra.mxu0 %v3679_v58  ;;  %v3746_v57 = vld [vmem:[#allocation10 + $0xe48] sm:$0xff]  ;;  %v3748_v58 = vld [vmem:[#allocation10 + $0xe58] sm:$0xff] }
 0x672   :  { %3835 = vmatprep.subr.mxu1 %v3674_v59  ;;  %3906 = vmatprep.subr.mxu0 %v3676_v60  ;;  %v3745_v59 = vld [vmem:[#allocation10 + $0xe40] sm:$0xff]  ;;  %v3747_v60 = vld [vmem:[#allocation10 + $0xe50] sm:$0xff] }
 0x673   :  { %3836 = vmatpush1.msra.mxu1 %v3673_v61  ;;  %3907 = vmatpush1.msra.mxu0 %v3675_v62  ;;  %v3742_v61 = vld [vmem:[#allocation10 + $0xe28] sm:$0xff]  ;;  %v3744_v62 = vld [vmem:[#allocation10 + $0xe38] sm:$0xff] }
 0x674   :  { %3837 = vmatprep.subr.mxu1 %v3798_v63  ;;  %3908 = vmatprep.subr.mxu0 %v3800_v1  ;;  %v3741_v63 = vld [vmem:[#allocation10 + $0xe20] sm:$0xff]  ;;  %v3743_v1 = vld [vmem:[#allocation10 + $0xe30] sm:$0xff] }
 0x675   :  { %3838 = vmatpush2.msra.mxu1 %v3797_v2  ;;  %3909 = vmatpush2.msra.mxu0 %v3799_v3  ;;  %v3738_v2 = vld [vmem:[#allocation10 + $0xe08] sm:$0xff]  ;;  %v3740_v3 = vld [vmem:[#allocation10 + $0xe18] sm:$0xff] }
 0x676   :  { %3839 = vmatprep.subr.mxu1 %v3794_v4  ;;  %3910 = vmatprep.subr.mxu0 %v3796_v5  ;;  %v3737_v4 = vld [vmem:[#allocation10 + $0xe00] sm:$0xff]  ;;  %v3739_v5 = vld [vmem:[#allocation10 + $0xe10] sm:$0xff] }
 0x677   :  { %3840 = vmatpush2.msra.mxu1 %v3793_v22  ;;  %3911 = vmatpush2.msra.mxu0 %v3795_v6  ;;  %v3801_v22 = vrot.slane %v8726_v34, 3  ;;  %v3986_v6 = vld [vmem:[%s9330_s5 + $0xf8] sm:$0xff]  ;;  %v3985_v34 = vld [vmem:[%s9330_s5 + $0xf0] sm:$0xff] }
 0x678   :  { %3841 = vmatprep.subr.mxu1 %v3790_v8  ;;  %3912 = vmatprep.subr.mxu0 %v3792_v9  ;;  %v3970_v8 = vld [vmem:[%s9330_s5 + $0x78] sm:$0xff] }
 0x679   :  { %3842 = vmatpush2.msra.mxu1 %v3789_v10  ;;  %3913 = vmatpush2.msra.mxu0 %v3791_v11  ;;  %v4295_v9 = vld [vmem:[#allocation4 + $0x3e8] sm:$0xff]  ;;  %v4294_v10 = vld [vmem:[#allocation4 + $0x3e0] sm:$0xff] }
 0x67a   :  { %3843 = vmatprep.subr.mxu1 %v3786_v12  ;;  %3914 = vmatprep.subr.mxu0 %v3788_v14  ;;  %v3969_v11 = vld [vmem:[%s9330_s5 + $0x70] sm:$0xff]  ;;  %v4291_v12 = vld [vmem:[#allocation4 + $0x3c8] sm:$0xff]  ;;  %v3984_v14 = vld [vmem:[%s9330_s5 + $0xe8] sm:$0xff] }
 0x67b   :  { %3844 = vmatpush2.msra.mxu1 %v3785_v15  ;;  %3915 = vmatpush2.msra.mxu0 %v3787_v53  ;;  %v4290_v15 = vld [vmem:[#allocation4 + $0x3c0] sm:$0xff]  ;;  %v3968_v53 = vld [vmem:[%s9330_s5 + $0x68] sm:$0xff] }
 0x67c   :  { %3845 = vmatprep.subr.mxu1 %v3782_v48  ;;  %3916 = vmatprep.subr.mxu0 %v3784_v16  ;;  %v4287_v48 = vld [vmem:[#allocation4 + $0x3a8] sm:$0xff]  ;;  %v3983_v16 = vld [vmem:[%s9330_s5 + $0xe0] sm:$0xff] }
 0x67d   :  { %3846 = vmatpush2.msra.mxu1 %v3781_v50  ;;  %3917 = vmatpush2.msra.mxu0 %v3783_v18  ;;  %v4286_v50 = vld [vmem:[#allocation4 + $0x3a0] sm:$0xff]  ;;  %v4283_v18 = vld [vmem:[#allocation4 + $0x388] sm:$0xff] }
 0x67e   :  { %3847 = vmatprep.subr.mxu1 %v3778_v32  ;;  %3918 = vmatprep.subr.mxu0 %v3780_v23  ;;  %v3967_v32 = vld [vmem:[%s9330_s5 + $0x60] sm:$0xff]  ;;  %v4282_v23 = vld [vmem:[#allocation4 + $0x380] sm:$0xff] }
 0x67f   :  { %3848 = vmatpush2.msra.mxu1 %v3777_v28  ;;  %3919 = vmatpush2.msra.mxu0 %v3779_v29  ;;  %v3982_v28 = vld [vmem:[%s9330_s5 + $0xd8] sm:$0xff] }
 0x680   :  { %3849 = vmatprep.subr.mxu1 %v3774_v26  ;;  %3920 = vmatprep.subr.mxu0 %v3776_v27  ;;  %v4279_v29 = vld [vmem:[#allocation4 + $0x368] sm:$0xff]  ;;  %v4278_v27 = vld [vmem:[#allocation4 + $0x360] sm:$0xff] }
 0x681   :  { %3850 = vmatpush2.msra.mxu1 %v3773_v30  ;;  %3921 = vmatpush2.msra.mxu0 %v3775_v24  ;;  %v3966_v26 = vld [vmem:[%s9330_s5 + $0x58] sm:$0xff]  ;;  %v3981_v30 = vld [vmem:[%s9330_s5 + $0xd0] sm:$0xff] }
 0x682   :  { %3851 = vmatprep.subr.mxu1 %v3770_v25  ;;  %3922 = vmatprep.subr.mxu0 %v3772_v31  ;;  %v4275_v24 = vld [vmem:[#allocation4 + $0x348] sm:$0xff]  ;;  %v3965_v25 = vld [vmem:[%s9330_s5 + $0x50] sm:$0xff] }
 0x683   :  { %3852 = vmatpush2.msra.mxu1 %v3769_v38  ;;  %3923 = vmatpush2.msra.mxu0 %v3771_v39  ;;  %v4274_v31 = vld [vmem:[#allocation4 + $0x340] sm:$0xff]  ;;  %v3980_v38 = vld [vmem:[%s9330_s5 + $0xc8] sm:$0xff]  ;;  %v4271_v39 = vld [vmem:[#allocation4 + $0x328] sm:$0xff] }
 0x684   :  { %3853 = vmatprep.subr.mxu1 %v3766_v40  ;;  %3924 = vmatprep.subr.mxu0 %v3768_v41  ;;  %v3964_v40 = vld [vmem:[%s9330_s5 + $0x48] sm:$0xff]  ;;  %v4270_v41 = vld [vmem:[#allocation4 + $0x320] sm:$0xff] }
 0x685   :  { %3854 = vmatpush2.msra.mxu1 %v3765_v42  ;;  %3925 = vmatpush2.msra.mxu0 %v3767_v13  ;;  %v3979_v42 = vld [vmem:[%s9330_s5 + $0xc0] sm:$0xff]  ;;  %v4267_v13 = vld [vmem:[#allocation4 + $0x308] sm:$0xff] }
 0x686   :  { %3855 = vmatprep.subr.mxu1 %v3762_v43  ;;  %3926 = vmatprep.subr.mxu0 %v3764_v20  ;;  %v3963_v43 = vld [vmem:[%s9330_s5 + $0x40] sm:$0xff]  ;;  %v4266_v20 = vld [vmem:[#allocation4 + $0x300] sm:$0xff] }
 0x687   :  { %3856 = vmatpush2.msra.mxu1 %v3761_v0  ;;  %3927 = vmatpush2.msra.mxu0 %v3763_v21  ;;  %v3978_v0 = vld [vmem:[%s9330_s5 + $0xb8] sm:$0xff] }
 0x688   :  { %3857 = vmatprep.subr.mxu1 %v3758_v19  ;;  %3928 = vmatprep.subr.mxu0 %v3760_v17  ;;  %v4263_v21 = vld [vmem:[#allocation4 + $0x2e8] sm:$0xff]  ;;  %v4262_v17 = vld [vmem:[#allocation4 + $0x2e0] sm:$0xff] }
 0x689   :  { %3858 = vmatpush2.msra.mxu1 %v3757_v33  ;;  %3929 = vmatpush2.msra.mxu0 %v3759_v35  ;;  %v3962_v19 = vld [vmem:[%s9330_s5 + $0x38] sm:$0xff]  ;;  %v3977_v33 = vld [vmem:[%s9330_s5 + $0xb0] sm:$0xff] }
 0x68a   :  { %3859 = vmatprep.subr.mxu1 %v3754_v36  ;;  %3930 = vmatprep.subr.mxu0 %v3756_v37  ;;  %v4259_v35 = vld [vmem:[#allocation4 + $0x2c8] sm:$0xff]  ;;  %v3961_v36 = vld [vmem:[%s9330_s5 + $0x30] sm:$0xff] }
 0x68b   :  { %3860 = vmatpush2.msra.mxu1 %v3753_v44  ;;  %3931 = vmatpush2.msra.mxu0 %v3755_v49  ;;  %v4258_v37 = vld [vmem:[#allocation4 + $0x2c0] sm:$0xff]  ;;  %v3976_v44 = vld [vmem:[%s9330_s5 + $0xa8] sm:$0xff]  ;;  %v4255_v49 = vld [vmem:[#allocation4 + $0x2a8] sm:$0xff] }
 0x68c   :  { %3861 = vmatprep.subr.mxu1 %v3750_v7  ;;  %3932 = vmatprep.subr.mxu0 %v3752_v51  ;;  %v3960_v7 = vld [vmem:[%s9330_s5 + $0x28] sm:$0xff]  ;;  %v4254_v51 = vld [vmem:[#allocation4 + $0x2a0] sm:$0xff] }
 0x68d   :  { %3862 = vmatpush2.msra.mxu1 %v3749_v52  ;;  %3933 = vmatpush2.msra.mxu0 %v3751_v54  ;;  %v3975_v52 = vld [vmem:[%s9330_s5 + $0xa0] sm:$0xff]  ;;  %v4251_v54 = vld [vmem:[#allocation4 + $0x288] sm:$0xff] }
 0x68e   :  { %3863 = vmatprep.subr.mxu1 %v3746_v57  ;;  %3934 = vmatprep.subr.mxu0 %v3748_v58  ;;  %v3959_v57 = vld [vmem:[%s9330_s5 + $0x20] sm:$0xff]  ;;  %v4250_v58 = vld [vmem:[#allocation4 + $0x280] sm:$0xff] }
 0x68f   :  { %3864 = vmatpush2.msra.mxu1 %v3745_v59  ;;  %3935 = vmatpush2.msra.mxu0 %v3747_v60  ;;  %v3974_v59 = vld [vmem:[%s9330_s5 + $0x98] sm:$0xff] }
 0x690   :  { %3865 = vmatprep.subr.mxu1 %v3742_v61  ;;  %3936 = vmatprep.subr.mxu0 %v3744_v62  ;;  %v3958_v60 = vld [vmem:[%s9330_s5 + $0x18] sm:$0xff]  ;;  %v3973_v62 = vld [vmem:[%s9330_s5 + $0x90] sm:$0xff] }
 0x691   :  { %3866 = vmatpush2.msra.mxu1 %v3741_v63  ;;  %3937 = vmatpush2.msra.mxu0 %v3743_v1  ;;  %v4247_v61 = vld [vmem:[#allocation4 + $0x268] sm:$0xff]  ;;  %v4246_v63 = vld [vmem:[#allocation4 + $0x260] sm:$0xff] }
 0x692   :  { %3867 = vmatprep.subr.mxu1 %v3738_v2  ;;  %3938 = vmatprep.subr.mxu0 %v3740_v3  ;;  %v3957_v1 = vld [vmem:[%s9330_s5 + $0x10] sm:$0xff]  ;;  %v4243_v2 = vld [vmem:[#allocation4 + $0x248] sm:$0xff]  ;;  %v3972_v3 = vld [vmem:[%s9330_s5 + $0x88] sm:$0xff] }
 0x693   :  { %3868 = vmatpush2.msra.mxu1 %v3737_v4  ;;  %3939 = vmatpush2.msra.mxu0 %v3739_v5  ;;  %v4242_v4 = vld [vmem:[#allocation4 + $0x240] sm:$0xff]  ;;  %v3956_v5 = vld [vmem:[%s9330_s5 + $0x8] sm:$0xff] }
 0x694   :  { %3870 = vmatmul.mubr.f32.vlgmr.msra.gmra.mxu1 %v3801_v22  ;;  %3941 = vmatmul.mubr.f32.vlgmr.msra.gmra.mxu0 %v3801_v22  ;;  %v4239_v22 = vld [vmem:[#allocation4 + $0x228] sm:$0xff] }
 0x695   :  { %4362 = vmatprep.mubr.f32.mxu0 %v9347_v45  ;;  %8251 = vmatprep.subr.mxu1 %v3986_v6  ;;  %v3971_v6 = vld [vmem:[%s9330_s5 + $0x80] sm:$0xff] }
 0x696   :  { %4298 = vmatprep.subr.mxu0 %v4295_v9  ;;  %8252 = vmatpush3.msra.mxu1 %v3970_v8  ;;  %v4238_v8 = vld [vmem:[#allocation4 + $0x220] sm:$0xff]  ;;  %v3955_v9 = vld [vmem:[%s9330_s5] sm:$0xff] }
 0x697   :  { %4299 = vmatpush1.msra.mxu0 %v4294_v10  ;;  %8253 = vmatprep.subr.mxu1 %v3985_v34  ;;  %v4235_v34 = vld [vmem:[#allocation4 + $0x208] sm:$0xff] }
 0x698   :  { %4300 = vmatprep.subr.mxu0 %v4291_v12  ;;  %8254 = vmatpush3.msra.mxu1 %v3969_v11  ;;  %v4018_v10 = vld [vmem:[%s9330_s5 + $0x1f8] sm:$0xff]  ;;  %v4234_v11 = vld [vmem:[#allocation4 + $0x200] sm:$0xff] }
 0x699   :  { %4301 = vmatpush1.msra.mxu0 %v4290_v15  ;;  %8255 = vmatprep.subr.mxu1 %v3984_v14  ;;  %v4227_v12 = vld [vmem:[#allocation4 + $0x1e8] sm:$0xff]  ;;  %v8843_v14 = vld [vmem:[%s9325_s0 + $0x21] sm:$0xff]  ;;  %v4226_v15 = vld [vmem:[#allocation4 + $0x1e0] sm:$0xff] }
 0x69a   :  { %4302 = vmatprep.subr.mxu0 %v4287_v48  ;;  %8256 = vmatpush3.msra.mxu1 %v3968_v53  ;;  %v4223_v53 = vld [vmem:[#allocation4 + $0x1c8] sm:$0xff]  ;;  %v4222_v48 = vld [vmem:[#allocation4 + $0x1c0] sm:$0xff] }
 0x69b   :  { %4303 = vmatpush1.msra.mxu0 %v4286_v50  ;;  %8257 = vmatprep.subr.mxu1 %v3983_v16  ;;  %v4219_v16 = vld [vmem:[#allocation4 + $0x1a8] sm:$0xff]  ;;  %v4218_v50 = vld [vmem:[#allocation4 + $0x1a0] sm:$0xff] }
 0x69c   :  { %4304 = vmatprep.subr.mxu0 %v4283_v18  ;;  %8258 = vmatpush3.msra.mxu1 %v3967_v32  ;;  %v4215_v18 = vld [vmem:[#allocation4 + $0x188] sm:$0xff]  ;;  %v4214_v32 = vld [vmem:[#allocation4 + $0x180] sm:$0xff] }
 0x69d   :  { %4305 = vmatpush1.msra.mxu0 %v4282_v23  ;;  %8259 = vmatprep.subr.mxu1 %v3982_v28  ;;  %v4211_v23 = vld [vmem:[#allocation4 + $0x168] sm:$0xff]  ;;  %v4210_v28 = vld [vmem:[#allocation4 + $0x160] sm:$0xff] }
 0x69e   :  { %4306 = vmatprep.subr.mxu0 %v4279_v29  ;;  %8260 = vmatpush3.msra.mxu1 %v3966_v26  ;;  %v4207_v29 = vld [vmem:[#allocation4 + $0x148] sm:$0xff]  ;;  %v4206_v26 = vld [vmem:[#allocation4 + $0x140] sm:$0xff] }
 0x69f   :  { %4307 = vmatpush1.msra.mxu0 %v4278_v27  ;;  %8261 = vmatprep.subr.mxu1 %v3981_v30  ;;  %v4203_v27 = vld [vmem:[#allocation4 + $0x128] sm:$0xff]  ;;  %v4202_v30 = vld [vmem:[#allocation4 + $0x120] sm:$0xff] }
 0x6a0   :  { %4308 = vmatprep.subr.mxu0 %v4275_v24  ;;  %8262 = vmatpush3.msra.mxu1 %v3965_v25  ;;  %v4199_v24 = vld [vmem:[#allocation4 + $0x108] sm:$0xff]  ;;  %v4198_v25 = vld [vmem:[#allocation4 + $0x100] sm:$0xff] }
 0x6a1   :  { %4309 = vmatpush1.msra.mxu0 %v4274_v31  ;;  %8263 = vmatprep.subr.mxu1 %v3980_v38  ;;  %v4195_v31 = vld [vmem:[#allocation4 + $0xe8] sm:$0xff]  ;;  %v4194_v38 = vld [vmem:[#allocation4 + $0xe0] sm:$0xff] }
 0x6a2   :  { %4310 = vmatprep.subr.mxu0 %v4271_v39  ;;  %8264 = vmatpush3.msra.mxu1 %v3964_v40  ;;  %v4191_v39 = vld [vmem:[#allocation4 + $0xc8] sm:$0xff]  ;;  %v4190_v40 = vld [vmem:[#allocation4 + $0xc0] sm:$0xff] }
 0x6a3   :  { %4311 = vmatpush1.msra.mxu0 %v4270_v41  ;;  %8265 = vmatprep.subr.mxu1 %v3979_v42  ;;  %v4187_v41 = vld [vmem:[#allocation4 + $0xa8] sm:$0xff]  ;;  %v8850_v42 = vld [vmem:[%s9325_s0 + $0x29] sm:$0xff] }
 0x6a4   :  { %4312 = vmatprep.subr.mxu0 %v4267_v13  ;;  %8266 = vmatpush3.msra.mxu1 %v3963_v43  ;;  %v4186_v13 = vld [vmem:[#allocation4 + $0xa0] sm:$0xff]  ;;  %v4183_v43 = vld [vmem:[#allocation4 + $0x88] sm:$0xff] }
 0x6a5   :  { %4313 = vmatpush1.msra.mxu0 %v4266_v20  ;;  %8267 = vmatprep.subr.mxu1 %v3978_v0  ;;  %v4182_v20 = vld [vmem:[#allocation4 + $0x80] sm:$0xff]  ;;  %v4179_v0 = vld [vmem:[#allocation4 + $0x68] sm:$0xff] }
 0x6a6   :  { %4314 = vmatprep.subr.mxu0 %v4263_v21  ;;  %8268 = vmatpush3.msra.mxu1 %v3962_v19  ;;  %v8857_v21 = vld [vmem:[%s9325_s0 + $0x31] sm:$0xff] }
 0x6a7   :  { %4315 = vmatpush1.msra.mxu0 %v4262_v17  ;;  %8269 = vmatprep.subr.mxu1 %v3977_v33  ;;  %v4178_v19 = vld [vmem:[#allocation4 + $0x60] sm:$0xff]  ;;  %v4175_v17 = vld [vmem:[#allocation4 + $0x48] sm:$0xff] }
 0x6a8   :  { %4316 = vmatprep.subr.mxu0 %v4259_v35  ;;  %8270 = vmatpush3.msra.mxu1 %v3961_v36  ;;  %v4174_v33 = vld [vmem:[#allocation4 + $0x40] sm:$0xff]  ;;  %v4171_v35 = vld [vmem:[#allocation4 + $0x28] sm:$0xff] }
 0x6a9   :  { %4317 = vmatpush1.msra.mxu0 %v4258_v37  ;;  %8271 = vmatprep.subr.mxu1 %v3976_v44  ;;  %v8864_v36 = vld [vmem:[%s9325_s0 + $0x39] sm:$0x3f]  ;;  %v4170_v37 = vld [vmem:[#allocation4 + $0x20] sm:$0xff] }
 0x6aa   :  { %4318 = vmatprep.subr.mxu0 %v4255_v49  ;;  %8272 = vmatpush3.msra.mxu1 %v3960_v7  ;;  %v4167_v44 = vld [vmem:[#allocation4 + $0x8] sm:$0xff]  ;;  %v4166_v49 = vld [vmem:[#allocation4] sm:$0xff] }
 0x6ab   :  { %4319 = vmatpush1.msra.mxu0 %v4254_v51  ;;  %8273 = vmatprep.subr.mxu1 %v3975_v52  ;;  %v4719_v7 = vld [vmem:[#allocation4 + $0x5e8] sm:$0xff]  ;;  %v8871_v51 = vld [vmem:[%s9325_s0 + $0x20] sm:$0xff]  ;;  %v4718_v52 = vld [vmem:[#allocation4 + $0x5e0] sm:$0xff] }
 0x6ac   :  { %4320 = vmatprep.subr.mxu0 %v4251_v54  ;;  %8274 = vmatpush3.msra.mxu1 %v3959_v57  ;;  %v4715_v54 = vld [vmem:[#allocation4 + $0x5c8] sm:$0xff]  ;;  %v4714_v57 = vld [vmem:[#allocation4 + $0x5c0] sm:$0xff] }
 0x6ad   :  { %4321 = vmatpush1.msra.mxu0 %v4250_v58  ;;  %8275 = vmatprep.subr.mxu1 %v3974_v59  ;;  %v4711_v58 = vld [vmem:[#allocation4 + $0x5a8] sm:$0xff]  ;;  %v4710_v59 = vld [vmem:[#allocation4 + $0x5a0] sm:$0xff] }
 0x6ae   :  { %8276 = vmatpush3.msra.mxu1 %v3958_v60  ;;  %4322 = vmatprep.subr.mxu0 %v4247_v61  ;;  %v4707_v60 = vld [vmem:[#allocation4 + $0x588] sm:$0xff]  ;;  %v4706_v61 = vld [vmem:[#allocation4 + $0x580] sm:$0xff] }
 0x6af   :  { %8277 = vmatprep.subr.mxu1 %v3973_v62  ;;  %4323 = vmatpush1.msra.mxu0 %v4246_v63  ;;  %v4703_v62 = vld [vmem:[#allocation4 + $0x568] sm:$0xff]  ;;  %v4702_v63 = vld [vmem:[#allocation4 + $0x560] sm:$0xff] }
 0x6b0   :  { %8278 = vmatpush3.msra.mxu1 %v3957_v1  ;;  %4324 = vmatprep.subr.mxu0 %v4243_v2  ;;  %v4699_v1 = vld [vmem:[#allocation4 + $0x548] sm:$0xff]  ;;  %v4698_v2 = vld [vmem:[#allocation4 + $0x540] sm:$0xff] }
 0x6b1   :  { %8279 = vmatprep.subr.mxu1 %v3972_v3  ;;  %4325 = vmatpush1.msra.mxu0 %v4242_v4  ;;  %v4695_v3 = vld [vmem:[#allocation4 + $0x528] sm:$0xff]  ;;  %v4694_v4 = vld [vmem:[#allocation4 + $0x520] sm:$0xff] }
 0x6b2   :  { %8280 = vmatpush3.msra.mxu1 %v3956_v5  ;;  %4326 = vmatprep.subr.mxu0 %v4239_v22  ;;  %v4691_v5 = vld [vmem:[#allocation4 + $0x508] sm:$0xff]  ;;  %v4690_v22 = vld [vmem:[#allocation4 + $0x500] sm:$0xff] }
 0x6b3   :  { %8281 = vmatprep.subr.mxu1 %v3971_v6  ;;  %4327 = vmatpush1.msra.mxu0 %v4238_v8  ;;  %v4687_v6 = vld [vmem:[#allocation4 + $0x4e8] sm:$0xff]  ;;  %v4686_v8 = vld [vmem:[#allocation4 + $0x4e0] sm:$0xff] }
 0x6b4   :  { %8282 = vmatpush3.msra.mxu1 %v3955_v9  ;;  %4328 = vmatprep.subr.mxu0 %v4235_v34  ;;  %v4683_v9 = vld [vmem:[#allocation4 + $0x4c8] sm:$0xff]  ;;  %v4682_v34 = vld [vmem:[#allocation4 + $0x4c0] sm:$0xff] }
 0x6b5   :  { %8286 = vmatprep.subr.mxu1 %v4018_v10  ;;  %4329 = vmatpush1.msra.mxu0 %v4234_v11  ;;  %v8878_v10 = vld [vmem:[%s9325_s0 + $0x28] sm:$0xff]  ;;  %v4679_v11 = vld [vmem:[#allocation4 + $0x4a8] sm:$0xff] }
 0x6b6   :  { %4476 = vmatprep.subr.mxu0 %v4227_v12  ;;  %4363 = vmatmul.mubr.f32.vlgmr.msra.gmra.mxu0 %v8843_v14  ;;  %v4678_v12 = vld [vmem:[#allocation4 + $0x4a0] sm:$0xff] }
 0x6b7   :  { %4477 = vmatpush1.msra.mxu0 %v4226_v15  ;;  %4368 = vmatprep.mubr.f32.mxu0 %v9347_v45  ;;  %v4675_v15 = vld [vmem:[#allocation4 + $0x488] sm:$0xff] }
 0x6b8   :  { %4478 = vmatprep.subr.mxu0 %v4223_v53  ;;  %v4674_v53 = vld [vmem:[#allocation4 + $0x480] sm:$0xff] }
 0x6b9   :  { %4479 = vmatpush1.msra.mxu0 %v4222_v48  ;;  %v8885_v48 = vld [vmem:[%s9325_s0 + $0x30] sm:$0xff] }
 0x6ba   :  { %4480 = vmatprep.subr.mxu0 %v4219_v16  ;;  %4369 = vmatmul.mubr.f32.gmra.mxu0 %v8850_v42  ;;  %v4671_v16 = vld [vmem:[#allocation4 + $0x468] sm:$0xff] }
 0x6bb   :  { %4481 = vmatpush1.msra.mxu0 %v4218_v50  ;;  %4374 = vmatprep.mubr.f32.mxu0 %v9347_v45  ;;  %v4670_v50 = vld [vmem:[#allocation4 + $0x460] sm:$0xff] }
 0x6bc   :  { %4482 = vmatprep.subr.mxu0 %v4215_v18  ;;  %v4667_v18 = vld [vmem:[#allocation4 + $0x448] sm:$0xff] }
 0x6bd   :  { %4483 = vmatpush1.msra.mxu0 %v4214_v32  ;;  %v4666_v32 = vld [vmem:[#allocation4 + $0x440] sm:$0xff] }
 0x6be   :  { %4484 = vmatprep.subr.mxu0 %v4211_v23  ;;  %4375 = vmatmul.mubr.f32.gmra.mxu0 %v8857_v21  ;;  %v8892_v23 = vld [vmem:[%s9325_s0 + $0x38] sm:$0x3f] }
 0x6bf   :  { %4485 = vmatpush1.msra.mxu0 %v4210_v28  ;;  %4380 = vmatprep.mubr.f32.mxu0 %v9347_v45  ;;  %v4663_v28 = vld [vmem:[#allocation4 + $0x428] sm:$0xff] }
 0x6c0   :  { %4486 = vmatprep.subr.mxu0 %v4207_v29  ;;  %v4662_v29 = vld [vmem:[#allocation4 + $0x420] sm:$0xff] }
 0x6c1   :  { %4487 = vmatpush1.msra.mxu0 %v4206_v26  ;;  %v4659_v26 = vld [vmem:[#allocation4 + $0x408] sm:$0xff] }
 0x6c2   :  { %4488 = vmatprep.subr.mxu0 %v4203_v27  ;;  %4381 = vmatmul.mubr.f32.gmra.mxu0 %v8864_v36  ;;  %v4658_v27 = vld [vmem:[#allocation4 + $0x400] sm:$0xff] }
 0x6c3   :  { %4489 = vmatpush1.msra.mxu0 %v4202_v30  ;;  %4540 = vmatprep.mubr.f32.mxu0 %v9347_v45  ;;  %v8899_v30 = vld [vmem:[%s9325_s0 + $0x22] sm:$0xff] }
 0x6c4   :  { %4490 = vmatprep.subr.mxu0 %v4199_v24  ;;  %v8906_v24 = vld [vmem:[%s9325_s0 + $0x2a] sm:$0xff] }
 0x6c5   :  { %4491 = vmatpush1.msra.mxu0 %v4198_v25  ;;  %v8913_v25 = vld [vmem:[%s9325_s0 + $0x32] sm:$0xff] }
 0x6c6   :  { %4492 = vmatprep.subr.mxu0 %v4195_v31  ;;  %v8920_v31 = vld [vmem:[%s9325_s0 + $0x3a] sm:$0x3f] }
 0x6c7   :  { %4493 = vmatpush1.msra.mxu0 %v4194_v38  ;;  %v3175_v38 = vpop.f32.mrf.mxu1 }
 0x6c8   :  { %4494 = vmatprep.subr.mxu0 %v4191_v39  ;;  %v8924_v39 = vpop.f32.mrf.mxu0 }
 0x6c9   :  { %4495 = vmatpush1.msra.mxu0 %v4190_v40  ;;  %v3177_v40 = vpop.f32.mrf.mxu1 }
 0x6ca   :  { %4496 = vmatprep.subr.mxu0 %v4187_v41  ;;  %v3248_v41 = vpop.f32.mrf.mxu0 }
 0x6cb   :  { %4497 = vmatpush1.msra.mxu0 %v4186_v13 }
 0x6cc   :  { %4498 = vmatprep.subr.mxu0 %v4183_v43 }
 0x6cd   :  { %4499 = vmatpush1.msra.mxu0 %v4182_v20 }
 0x6ce   :  { %4500 = vmatprep.subr.mxu0 %v4179_v0 }
 0x6cf   :  { %4501 = vmatpush1.msra.mxu0 %v4178_v19 }
 0x6d0   :  { %4502 = vmatprep.subr.mxu0 %v4175_v17  ;;  %v3317_v13 = vpop.f32.mrf.mxu1  ;;  %v8926_v43 = vpop.f32.mrf.mxu0 }
 0x6d1   :  { %4503 = vmatpush1.msra.mxu0 %v4174_v33  ;;  %v3318_v33 = vadd.f32 %v3317_v13, %v3175_v38  ;;  %v4008_v38 = vld [vmem:[%s9330_s5 + $0x1a8] sm:$0xff]  ;;  %v3991_v13 = vld [vmem:[%s9330_s5 + $0x120] sm:$0xff] }
 0x6d2   :  { %4504 = vmatprep.subr.mxu0 %v4171_v35  ;;  %v3319_v20 = vpop.f32.mrf.mxu1  ;;  %v3390_v0 = vpop.f32.mrf.mxu0 }
 0x6d3   :  { %4505 = vmatpush1.msra.mxu0 %v4170_v37 }
 0x6d4   :  { %4506 = vmatprep.subr.mxu0 %v4167_v44  ;;  %v3320_v44 = vadd.f32 %v3319_v20, %v3177_v40  ;;  %v3992_v40 = vld [vmem:[%s9330_s5 + $0x128] sm:$0xff]  ;;  %v4006_v20 = vld [vmem:[%s9330_s5 + $0x198] sm:$0xff] }
 0x6d5   :  { %4507 = vmatpush1.msra.mxu0 %v4166_v49  ;;  %v3391_v49 = vadd.f32 %v3390_v0, %v3248_v41  ;;  %v4007_v41 = vld [vmem:[%s9330_s5 + $0x1a0] sm:$0xff]  ;;  %v3389_v0 = vadd.f32 %v8926_v43, %v8924_v39  ;;  %v4004_v39 = vld [vmem:[%s9330_s5 + $0x188] sm:$0xff] }
 0x6d6   :  { %4722 = vmatprep.subr.mxu0 %v4719_v7  ;;  %4541 = vmatmul.mubr.f32.vlgmr.msra.gmra.mxu0 %v8871_v51 }
 0x6d7   :  { %4723 = vmatpush1.msra.mxu0 %v4718_v52  ;;  %4546 = vmatprep.mubr.f32.mxu0 %v9347_v45 }
 0x6d8   :  { %4724 = vmatprep.subr.mxu0 %v4715_v54 }
 0x6d9   :  { %4725 = vmatpush1.msra.mxu0 %v4714_v57 }
 0x6da   :  { %4726 = vmatprep.subr.mxu0 %v4711_v58  ;;  %4547 = vmatmul.mubr.f32.gmra.mxu0 %v8878_v10 }
 0x6db   :  { %4727 = vmatpush1.msra.mxu0 %v4710_v59  ;;  %4552 = vmatprep.mubr.f32.mxu0 %v9347_v45 }
 0x6dc   :  { %4728 = vmatprep.subr.mxu0 %v4707_v60 }
 0x6dd   :  { %4729 = vmatpush1.msra.mxu0 %v4706_v61 }
 0x6de   :  { %4730 = vmatprep.subr.mxu0 %v4703_v62  ;;  %4553 = vmatmul.mubr.f32.gmra.mxu0 %v8885_v48 }
 0x6df   :  { %4731 = vmatpush1.msra.mxu0 %v4702_v63  ;;  %4558 = vmatprep.mubr.f32.mxu0 %v9347_v45 }
 0x6e0   :  { %4732 = vmatprep.subr.mxu0 %v4699_v1 }
 0x6e1   :  { %4733 = vmatpush1.msra.mxu0 %v4698_v2 }
 0x6e2   :  { %4734 = vmatprep.subr.mxu0 %v4695_v3  ;;  %4559 = vmatmul.mubr.f32.gmra.mxu0 %v8892_v23  ;;  %v4002_v3 = vld [vmem:[%s9330_s5 + $0x178] sm:$0xff] }
 0x6e3   :  { %4735 = vmatpush1.msra.mxu0 %v4694_v4  ;;  %4786 = vmatprep.mubr.f32.mxu0 %v9347_v45 }
 0x6e4   :  { %4736 = vmatprep.subr.mxu0 %v4691_v5  ;;  %v4017_v5 = vld [vmem:[%s9330_s5 + $0x1f0] sm:$0xff] }
 0x6e5   :  { %4737 = vmatpush1.msra.mxu0 %v4690_v22  ;;  %v4001_v22 = vld [vmem:[%s9330_s5 + $0x170] sm:$0xff] }
 0x6e6   :  { %4738 = vmatprep.subr.mxu0 %v4687_v6  ;;  %v4016_v6 = vld [vmem:[%s9330_s5 + $0x1e8] sm:$0xff] }
 0x6e7   :  { %4739 = vmatpush1.msra.mxu0 %v4686_v8  ;;  %v4000_v8 = vld [vmem:[%s9330_s5 + $0x168] sm:$0xff] }
 0x6e8   :  { %4740 = vmatprep.subr.mxu0 %v4683_v9  ;;  %v4015_v9 = vld [vmem:[%s9330_s5 + $0x1e0] sm:$0xff] }
 0x6e9   :  { %4741 = vmatpush1.msra.mxu0 %v4682_v34  ;;  %v3999_v34 = vld [vmem:[%s9330_s5 + $0x160] sm:$0xff] }
 0x6ea   :  { %4742 = vmatprep.subr.mxu0 %v4679_v11  ;;  %v4014_v11 = vld [vmem:[%s9330_s5 + $0x1d8] sm:$0xff] }
 0x6eb   :  { %4743 = vmatpush1.msra.mxu0 %v4678_v12  ;;  %v3998_v12 = vld [vmem:[%s9330_s5 + $0x158] sm:$0xff] }
 0x6ec   :  { %4744 = vmatprep.subr.mxu0 %v4675_v15  ;;  %v4013_v15 = vld [vmem:[%s9330_s5 + $0x1d0] sm:$0xff] }
 0x6ed   :  { %4745 = vmatpush1.msra.mxu0 %v4674_v53  ;;  %v3997_v53 = vld [vmem:[%s9330_s5 + $0x150] sm:$0xff] }
 0x6ee   :  { %4746 = vmatprep.subr.mxu0 %v4671_v16  ;;  %v4012_v16 = vld [vmem:[%s9330_s5 + $0x1c8] sm:$0xff] }
 0x6ef   :  { %4747 = vmatpush1.msra.mxu0 %v4670_v50  ;;  %v3996_v50 = vld [vmem:[%s9330_s5 + $0x148] sm:$0xff] }
 0x6f0   :  { %4748 = vmatprep.subr.mxu0 %v4667_v18  ;;  %v4011_v18 = vld [vmem:[%s9330_s5 + $0x1c0] sm:$0xff] }
 0x6f1   :  { %4749 = vmatpush1.msra.mxu0 %v4666_v32  ;;  %v3995_v32 = vld [vmem:[%s9330_s5 + $0x140] sm:$0xff] }
 0x6f2   :  { %4750 = vmatprep.subr.mxu0 %v4663_v28  ;;  %v4010_v28 = vld [vmem:[%s9330_s5 + $0x1b8] sm:$0xff] }
 0x6f3   :  { %4751 = vmatpush1.msra.mxu0 %v4662_v29  ;;  %v3994_v29 = vld [vmem:[%s9330_s5 + $0x138] sm:$0xff] }
 0x6f4   :  { %4752 = vmatprep.subr.mxu0 %v4659_v26  ;;  %v4009_v26 = vld [vmem:[%s9330_s5 + $0x1b0] sm:$0xff] }
 0x6f5   :  { %4753 = vmatpush1.msra.mxu0 %v4658_v27  ;;  %v3993_v27 = vld [vmem:[%s9330_s5 + $0x130] sm:$0xff] }
 0x6f6   :  { %4787 = vmatmul.mubr.f32.vlgmr.msra.gmra.mxu0 %v8899_v30 }
 0x6f7   :  { %4792 = vmatprep.mubr.f32.mxu0 %v9347_v45 }
 0x6fa   :  { %4793 = vmatmul.mubr.f32.gmra.mxu0 %v8906_v24 }
 0x6fb   :  { %4798 = vmatprep.mubr.f32.mxu0 %v9347_v45 }
 0x6fe   :  { %4799 = vmatmul.mubr.f32.gmra.mxu0 %v8913_v25 }
 0x6ff   :  { %4804 = vmatprep.mubr.f32.mxu0 %v9347_v45 }
 0x702   :  { %4805 = vmatmul.mubr.f32.gmra.mxu0 %v8920_v31 }
 0x703   :  { %4994 = vmatprep.mubr.f32.mxu0 %v9347_v45 }
 0x712   :  { %v3592_v19 = vpop.f32.mrf.mxu1  ;;  %v8928_v17 = vpop.f32.mrf.mxu0 }
 0x713   :  { %v3668_v7 = vadd.f32 %v3592_v19, %v3318_v33  ;;  %v3990_v19 = vld [vmem:[%s9330_s5 + $0x118] sm:$0xff]  ;;  %v4005_v33 = vld [vmem:[%s9330_s5 + $0x190] sm:$0xff] }
 0x714   :  { %v3594_v35 = vpop.f32.mrf.mxu1  ;;  %v3665_v37 = vpop.f32.mrf.mxu0 }
 0x715   :  { %v3669_v57 = vadd.f32 %v3594_v35, %v3320_v44  ;;  %v3671_v58 = vadd.f32 %v3665_v37, %v3391_v49  ;;  %v3670_v35 = vadd.f32 %v8928_v17, %v3389_v0  ;;  %v3989_v37 = vld [vmem:[%s9330_s5 + $0x110] sm:$0xff]  ;;  %v3988_v44 = vld [vmem:[%s9330_s5 + $0x108] sm:$0xff]  ;;  %v4003_v17 = vld [vmem:[%s9330_s5 + $0x180] sm:$0xff] }
 0x716   :  { %v3987_v49 = vld [vmem:[%s9330_s5 + $0x100] sm:$0xff]  ;;  %v4221_v0 = vld [vmem:[#allocation4 + $0x1b8] sm:$0xff] }
 0x754   :  { %v3871_v52 = vpop.f32.mrf.mxu1  ;;  %v8930_v54 = vpop.f32.mrf.mxu0 }
 0x755   :  { %v3947_v59 = vadd.f32 %v3871_v52, %v3668_v7  ;;  %v3949_v43 = vadd.f32 %v8930_v54, %v3670_v35  ;;  %v4297_v7 = vld [vmem:[#allocation4 + $0x3f8] sm:$0xff]  ;;  %v4296_v54 = vld [vmem:[#allocation4 + $0x3f0] sm:$0xff] }
 0x756   :  { %v3873_v60 = vpop.f32.mrf.mxu1  ;;  %v3944_v61 = vpop.f32.mrf.mxu0  ;;  %v4216_v35 = vld [vmem:[#allocation4 + $0x190] sm:$0xff] }
 0x757   :  { %v3948_v62 = vadd.f32 %v3873_v60, %v3669_v57  ;;  %v3950_v63 = vadd.f32 %v3944_v61, %v3671_v58  ;;  %v3951_v2 = vmax.f32 %v3947_v59, 0.0  ;;  %v3953_v52 = vmax.f32 %v3949_v43, 0.0  ;;  %v4293_v57 = vld [vmem:[#allocation4 + $0x3d8] sm:$0xff]  ;;  %v4292_v58 = vld [vmem:[#allocation4 + $0x3d0] sm:$0xff] }
 0x758   :  { %v4289_v59 = vld [vmem:[#allocation4 + $0x3b8] sm:$0xff]  ;;  %v4288_v60 = vld [vmem:[#allocation4 + $0x3b0] sm:$0xff] }
 0x759   :  { %v3952_v1 = vmax.f32 %v3948_v62, 0.0  ;;  %v3954_v4 = vmax.f32 %v3950_v63, 0.0  ;;  %v4285_v61 = vld [vmem:[#allocation4 + $0x398] sm:$0xff]  ;;  %v4284_v62 = vld [vmem:[#allocation4 + $0x390] sm:$0xff] }
 0x75a   :  { %v4281_v63 = vld [vmem:[#allocation4 + $0x378] sm:$0xff]  ;;  %v4208_v43 = vld [vmem:[#allocation4 + $0x150] sm:$0xff] }
 0x75b   :  { %4083 = vmatprep.mubr.f32.mxu1 %v3952_v1  ;;  %v4280_v1 = vld [vmem:[#allocation4 + $0x370] sm:$0xff] }
 0x75c   :  { %4084 = vmatmul.mubr.f32.vlgmr.msra.gmra.mxu1 %v3951_v2  ;;  %v4277_v2 = vld [vmem:[#allocation4 + $0x358] sm:$0xff] }
 0x75d   :  { %8287 = vmatpush3.msra.mxu1 %v4002_v3  ;;  %4153 = vmatprep.mubr.f32.mxu1 %v3954_v4  ;;  %v4276_v3 = vld [vmem:[#allocation4 + $0x350] sm:$0xff]  ;;  %v4273_v4 = vld [vmem:[#allocation4 + $0x338] sm:$0xff] }
 0x75e   :  { %8288 = vmatprep.subr.mxu1 %v4017_v5  ;;  %v4272_v5 = vld [vmem:[#allocation4 + $0x330] sm:$0xff] }
 0x75f   :  { %8289 = vmatpush3.msra.mxu1 %v4001_v22  ;;  %v4269_v22 = vld [vmem:[#allocation4 + $0x318] sm:$0xff] }
 0x760   :  { %8290 = vmatprep.subr.mxu1 %v4016_v6  ;;  %v4268_v6 = vld [vmem:[#allocation4 + $0x310] sm:$0xff] }
 0x761   :  { %8291 = vmatpush3.msra.mxu1 %v4000_v8  ;;  %v4265_v8 = vld [vmem:[#allocation4 + $0x2f8] sm:$0xff] }
 0x762   :  { %8292 = vmatprep.subr.mxu1 %v4015_v9  ;;  %v4264_v9 = vld [vmem:[#allocation4 + $0x2f0] sm:$0xff] }
 0x763   :  { %8293 = vmatpush3.msra.mxu1 %v3999_v34  ;;  %v4261_v34 = vld [vmem:[#allocation4 + $0x2d8] sm:$0xff] }
 0x764   :  { %8294 = vmatprep.subr.mxu1 %v4014_v11  ;;  %v4260_v11 = vld [vmem:[#allocation4 + $0x2d0] sm:$0xff] }
 0x765   :  { %8295 = vmatpush3.msra.mxu1 %v3998_v12  ;;  %v4257_v12 = vld [vmem:[#allocation4 + $0x2b8] sm:$0xff] }
 0x766   :  { %8296 = vmatprep.subr.mxu1 %v4013_v15  ;;  %v4256_v15 = vld [vmem:[#allocation4 + $0x2b0] sm:$0xff] }
 0x767   :  { %8297 = vmatpush3.msra.mxu1 %v3997_v53  ;;  %v4253_v53 = vld [vmem:[#allocation4 + $0x298] sm:$0xff] }
 0x768   :  { %8298 = vmatprep.subr.mxu1 %v4012_v16  ;;  %v4252_v16 = vld [vmem:[#allocation4 + $0x290] sm:$0xff] }
 0x769   :  { %8299 = vmatpush3.msra.mxu1 %v3996_v50  ;;  %v4249_v50 = vld [vmem:[#allocation4 + $0x278] sm:$0xff] }
 0x76a   :  { %8300 = vmatprep.subr.mxu1 %v4011_v18  ;;  %v4248_v18 = vld [vmem:[#allocation4 + $0x270] sm:$0xff] }
 0x76b   :  { %8301 = vmatpush3.msra.mxu1 %v3995_v32  ;;  %v4245_v32 = vld [vmem:[#allocation4 + $0x258] sm:$0xff] }
 0x76c   :  { %8302 = vmatprep.subr.mxu1 %v4010_v28  ;;  %v4244_v28 = vld [vmem:[#allocation4 + $0x250] sm:$0xff] }
 0x76d   :  { %8303 = vmatpush3.msra.mxu1 %v3994_v29  ;;  %v4241_v29 = vld [vmem:[#allocation4 + $0x238] sm:$0xff] }
 0x76e   :  { %8304 = vmatprep.subr.mxu1 %v4009_v26  ;;  %v4240_v26 = vld [vmem:[#allocation4 + $0x230] sm:$0xff] }
 0x76f   :  { %8305 = vmatpush3.msra.mxu1 %v3993_v27  ;;  %v4237_v27 = vld [vmem:[#allocation4 + $0x218] sm:$0xff] }
 0x770   :  { %8306 = vmatprep.subr.mxu1 %v4008_v38  ;;  %v4236_v38 = vld [vmem:[#allocation4 + $0x210] sm:$0xff] }
 0x771   :  { %8307 = vmatpush3.msra.mxu1 %v3992_v40  ;;  %v4229_v40 = vld [vmem:[#allocation4 + $0x1f8] sm:$0xff] }
 0x772   :  { %8308 = vmatprep.subr.mxu1 %v4007_v41  ;;  %v4228_v41 = vld [vmem:[#allocation4 + $0x1f0] sm:$0xff] }
 0x773   :  { %8309 = vmatpush3.msra.mxu1 %v3991_v13  ;;  %v4225_v13 = vld [vmem:[#allocation4 + $0x1d8] sm:$0xff] }
 0x774   :  { %8310 = vmatprep.subr.mxu1 %v4006_v20  ;;  %v4224_v20 = vld [vmem:[#allocation4 + $0x1d0] sm:$0xff] }
 0x775   :  { %8311 = vmatpush3.msra.mxu1 %v3990_v19  ;;  %v4220_v19 = vld [vmem:[#allocation4 + $0x1b0] sm:$0xff] }
 0x776   :  { %8312 = vmatprep.subr.mxu1 %v4005_v33  ;;  %v4217_v33 = vld [vmem:[#allocation4 + $0x198] sm:$0xff] }
 0x777   :  { %8313 = vmatpush3.msra.mxu1 %v3989_v37  ;;  %v4213_v37 = vld [vmem:[#allocation4 + $0x178] sm:$0xff] }
 0x778   :  { %8314 = vmatprep.subr.mxu1 %v4004_v39  ;;  %v4209_v39 = vld [vmem:[#allocation4 + $0x158] sm:$0xff] }
 0x779   :  { %8315 = vmatpush3.msra.mxu1 %v3988_v44  ;;  %v4205_v44 = vld [vmem:[#allocation4 + $0x138] sm:$0xff] }
 0x77a   :  { %8316 = vmatprep.subr.mxu1 %v4003_v17  ;;  %v4204_v17 = vld [vmem:[#allocation4 + $0x130] sm:$0xff] }
 0x77b   :  { %8317 = vmatpush3.msra.mxu1 %v3987_v49  ;;  %v4200_v49 = vld [vmem:[#allocation4 + $0x110] sm:$0xff] }
 0x77c   :  { %4154 = vmatmul.mubr.f32.vlgmr.msra.gmra.mxu1 %v3953_v52  ;;  %4387 = vmatprep.subr.mxu1 %v4297_v7  ;;  %v4197_v7 = vld [vmem:[#allocation4 + $0xf8] sm:$0xff]  ;;  %v4196_v52 = vld [vmem:[#allocation4 + $0xf0] sm:$0xff] }
 0x77d   :  { %4388 = vmatpush1.msra.mxu1 %v4296_v54  ;;  %4451 = vmatprep.mubr.f32.mxu1 %v9347_v45  ;;  %v4192_v54 = vld [vmem:[#allocation4 + $0xd0] sm:$0xff] }
 0x77e   :  { %4389 = vmatprep.subr.mxu1 %v4293_v57  ;;  %v4189_v57 = vld [vmem:[#allocation4 + $0xb8] sm:$0xff] }
 0x77f   :  { %4390 = vmatpush1.msra.mxu1 %v4292_v58  ;;  %v4188_v58 = vld [vmem:[#allocation4 + $0xb0] sm:$0xff] }
 0x780   :  { %4391 = vmatprep.subr.mxu1 %v4289_v59  ;;  %v4185_v59 = vld [vmem:[#allocation4 + $0x98] sm:$0xff] }
 0x781   :  { %4392 = vmatpush1.msra.mxu1 %v4288_v60  ;;  %v4184_v60 = vld [vmem:[#allocation4 + $0x90] sm:$0xff] }
 0x782   :  { %4393 = vmatprep.subr.mxu1 %v4285_v61  ;;  %v4180_v61 = vld [vmem:[#allocation4 + $0x70] sm:$0xff] }
 0x783   :  { %4394 = vmatpush1.msra.mxu1 %v4284_v62  ;;  %v4177_v62 = vld [vmem:[#allocation4 + $0x58] sm:$0xff] }
 0x784   :  { %4395 = vmatprep.subr.mxu1 %v4281_v63  ;;  %v4176_v63 = vld [vmem:[#allocation4 + $0x50] sm:$0xff] }
 0x785   :  { %4396 = vmatpush1.msra.mxu1 %v4280_v1  ;;  %v4173_v1 = vld [vmem:[#allocation4 + $0x38] sm:$0xff] }
 0x786   :  { %4397 = vmatprep.subr.mxu1 %v4277_v2  ;;  %v4172_v2 = vld [vmem:[#allocation4 + $0x30] sm:$0xff] }
 0x787   :  { %4398 = vmatpush1.msra.mxu1 %v4276_v3  ;;  %v4169_v3 = vld [vmem:[#allocation4 + $0x18] sm:$0xff] }
 0x788   :  { %4399 = vmatprep.subr.mxu1 %v4273_v4  ;;  %v4168_v4 = vld [vmem:[#allocation4 + $0x10] sm:$0xff] }
 0x789   :  { %4400 = vmatpush1.msra.mxu1 %v4272_v5  ;;  %v4721_v5 = vld [vmem:[#allocation4 + $0x5f8] sm:$0xff] }
 0x78a   :  { %4401 = vmatprep.subr.mxu1 %v4269_v22  ;;  %v4720_v22 = vld [vmem:[#allocation4 + $0x5f0] sm:$0xff] }
 0x78b   :  { %4402 = vmatpush1.msra.mxu1 %v4268_v6  ;;  %v4717_v6 = vld [vmem:[#allocation4 + $0x5d8] sm:$0xff] }
 0x78c   :  { %4403 = vmatprep.subr.mxu1 %v4265_v8  ;;  %v4716_v8 = vld [vmem:[#allocation4 + $0x5d0] sm:$0xff] }
 0x78d   :  { %4404 = vmatpush1.msra.mxu1 %v4264_v9  ;;  %v4713_v9 = vld [vmem:[#allocation4 + $0x5b8] sm:$0xff] }
 0x78e   :  { %4405 = vmatprep.subr.mxu1 %v4261_v34  ;;  %v4712_v34 = vld [vmem:[#allocation4 + $0x5b0] sm:$0xff] }
 0x78f   :  { %4406 = vmatpush1.msra.mxu1 %v4260_v11  ;;  %v4709_v11 = vld [vmem:[#allocation4 + $0x598] sm:$0xff] }
 0x790   :  { %4407 = vmatprep.subr.mxu1 %v4257_v12  ;;  %v4708_v12 = vld [vmem:[#allocation4 + $0x590] sm:$0xff] }
 0x791   :  { %4408 = vmatpush1.msra.mxu1 %v4256_v15  ;;  %v4705_v15 = vld [vmem:[#allocation4 + $0x578] sm:$0xff] }
 0x792   :  { %4409 = vmatprep.subr.mxu1 %v4253_v53  ;;  %v4701_v53 = vld [vmem:[#allocation4 + $0x558] sm:$0xff] }
 0x793   :  { %4410 = vmatpush1.msra.mxu1 %v4252_v16  ;;  %v4700_v16 = vld [vmem:[#allocation4 + $0x550] sm:$0xff] }
 0x794   :  { %4411 = vmatprep.subr.mxu1 %v4249_v50  ;;  %v4697_v50 = vld [vmem:[#allocation4 + $0x538] sm:$0xff] }
 0x795   :  { %4412 = vmatpush1.msra.mxu1 %v4248_v18  ;;  %v4693_v18 = vld [vmem:[#allocation4 + $0x518] sm:$0xff] }
 0x796   :  { %4413 = vmatprep.subr.mxu1 %v4245_v32  ;;  %v4692_v32 = vld [vmem:[#allocation4 + $0x510] sm:$0xff] }
 0x797   :  { %4414 = vmatpush1.msra.mxu1 %v4244_v28  ;;  %v4689_v28 = vld [vmem:[#allocation4 + $0x4f8] sm:$0xff] }
 0x798   :  { %4415 = vmatprep.subr.mxu1 %v4241_v29  ;;  %v4685_v29 = vld [vmem:[#allocation4 + $0x4d8] sm:$0xff] }
 0x799   :  { %4416 = vmatpush1.msra.mxu1 %v4240_v26  ;;  %v4684_v26 = vld [vmem:[#allocation4 + $0x4d0] sm:$0xff] }
 0x79a   :  { %4417 = vmatprep.subr.mxu1 %v4237_v27  ;;  %v4681_v27 = vld [vmem:[#allocation4 + $0x4b8] sm:$0xff] }
 0x79b   :  { %4418 = vmatpush1.msra.mxu1 %v4236_v38  ;;  %v4680_v38 = vld [vmem:[#allocation4 + $0x4b0] sm:$0xff] }
 0x79c   :  { %4452 = vmatmul.mubr.f32.vlgmr.msra.gmra.mxu1 %v8843_v14  ;;  %4565 = vmatprep.subr.mxu1 %v4229_v40  ;;  %v4212_v14 = vld [vmem:[#allocation4 + $0x170] sm:$0xff]  ;;  %v4677_v40 = vld [vmem:[#allocation4 + $0x498] sm:$0xff] }
 0x79d   :  { %4566 = vmatpush1.msra.mxu1 %v4228_v41  ;;  %4457 = vmatprep.mubr.f32.mxu1 %v9347_v45  ;;  %v4673_v41 = vld [vmem:[#allocation4 + $0x478] sm:$0xff] }
 0x79e   :  { %4567 = vmatprep.subr.mxu1 %v4225_v13  ;;  %v4672_v13 = vld [vmem:[#allocation4 + $0x470] sm:$0xff] }
 0x79f   :  { %4568 = vmatpush1.msra.mxu1 %v4224_v20  ;;  %v4669_v20 = vld [vmem:[#allocation4 + $0x458] sm:$0xff] }
 0x7a0   :  { %4569 = vmatprep.subr.mxu1 %v4221_v0  ;;  %4458 = vmatmul.mubr.f32.gmra.mxu1 %v8850_v42  ;;  %v4201_v42 = vld [vmem:[#allocation4 + $0x118] sm:$0xff]  ;;  %v4668_v0 = vld [vmem:[#allocation4 + $0x450] sm:$0xff] }
 0x7a1   :  { %4570 = vmatpush1.msra.mxu1 %v4220_v19  ;;  %4463 = vmatprep.mubr.f32.mxu1 %v9347_v45  ;;  %v4665_v19 = vld [vmem:[#allocation4 + $0x438] sm:$0xff] }
 0x7a2   :  { %4571 = vmatprep.subr.mxu1 %v4217_v33  ;;  %v4664_v33 = vld [vmem:[#allocation4 + $0x430] sm:$0xff] }
 0x7a3   :  { %4572 = vmatpush1.msra.mxu1 %v4216_v35  ;;  %v4661_v35 = vld [vmem:[#allocation4 + $0x418] sm:$0xff] }
 0x7a4   :  { %4573 = vmatprep.subr.mxu1 %v4213_v37  ;;  %4464 = vmatmul.mubr.f32.gmra.mxu1 %v8857_v21  ;;  %v4193_v21 = vld [vmem:[#allocation4 + $0xd8] sm:$0xff]  ;;  %v4660_v37 = vld [vmem:[#allocation4 + $0x410] sm:$0xff] }
 0x7a5   :  { %4574 = vmatpush1.msra.mxu1 %v4212_v14  ;;  %4469 = vmatprep.mubr.f32.mxu1 %v9347_v45 }
 0x7a6   :  { %4575 = vmatprep.subr.mxu1 %v4209_v39 }
 0x7a7   :  { %4576 = vmatpush1.msra.mxu1 %v4208_v43 }
 0x7a8   :  { %4577 = vmatprep.subr.mxu1 %v4205_v44  ;;  %4470 = vmatmul.mubr.f32.gmra.mxu1 %v8864_v36  ;;  %v4181_v36 = vld [vmem:[#allocation4 + $0x78] sm:$0xff] }
 0x7a9   :  { %4578 = vmatpush1.msra.mxu1 %v4204_v17  ;;  %4629 = vmatprep.mubr.f32.mxu1 %v9347_v45 }
 0x7aa   :  { %4579 = vmatprep.subr.mxu1 %v4201_v42 }
 0x7ab   :  { %4580 = vmatpush1.msra.mxu1 %v4200_v49 }
 0x7ac   :  { %4581 = vmatprep.subr.mxu1 %v4197_v7 }
 0x7ad   :  { %4582 = vmatpush1.msra.mxu1 %v4196_v52 }
 0x7ae   :  { %4583 = vmatprep.subr.mxu1 %v4193_v21 }
 0x7af   :  { %4584 = vmatpush1.msra.mxu1 %v4192_v54 }
 0x7b0   :  { %4585 = vmatprep.subr.mxu1 %v4189_v57 }
 0x7b1   :  { %4586 = vmatpush1.msra.mxu1 %v4188_v58 }
 0x7b2   :  { %4587 = vmatprep.subr.mxu1 %v4185_v59 }
 0x7b3   :  { %4588 = vmatpush1.msra.mxu1 %v4184_v60 }
 0x7b4   :  { %4589 = vmatprep.subr.mxu1 %v4181_v36 }
 0x7b5   :  { %4590 = vmatpush1.msra.mxu1 %v4180_v61 }
 0x7b6   :  { %4591 = vmatprep.subr.mxu1 %v4177_v62 }
 0x7b7   :  { %4592 = vmatpush1.msra.mxu1 %v4176_v63 }
 0x7b8   :  { %4593 = vmatprep.subr.mxu1 %v4173_v1 }
 0x7b9   :  { %4594 = vmatpush1.msra.mxu1 %v4172_v2 }
 0x7ba   :  { %4595 = vmatprep.subr.mxu1 %v4169_v3 }
 0x7bb   :  { %4596 = vmatpush1.msra.mxu1 %v4168_v4 }
 0x7bc   :  { %4630 = vmatmul.mubr.f32.vlgmr.msra.gmra.mxu1 %v8871_v51  ;;  %4811 = vmatprep.subr.mxu1 %v4721_v5  ;;  %v4704_v51 = vld [vmem:[#allocation4 + $0x570] sm:$0xff] }
 0x7bd   :  { %4812 = vmatpush1.msra.mxu1 %v4720_v22  ;;  %4635 = vmatprep.mubr.f32.mxu1 %v9347_v45 }
 0x7be   :  { %4813 = vmatprep.subr.mxu1 %v4717_v6 }
 0x7bf   :  { %4814 = vmatpush1.msra.mxu1 %v4716_v8 }
 0x7c0   :  { %4636 = vmatmul.mubr.f32.gmra.mxu1 %v8878_v10  ;;  %4815 = vmatprep.subr.mxu1 %v4713_v9  ;;  %v4696_v10 = vld [vmem:[#allocation4 + $0x530] sm:$0xff] }
 0x7c1   :  { %4816 = vmatpush1.msra.mxu1 %v4712_v34  ;;  %4641 = vmatprep.mubr.f32.mxu1 %v9347_v45 }
 0x7c2   :  { %4817 = vmatprep.subr.mxu1 %v4709_v11 }
 0x7c3   :  { %4818 = vmatpush1.msra.mxu1 %v4708_v12 }
 0x7c4   :  { %4642 = vmatmul.mubr.f32.gmra.mxu1 %v8885_v48  ;;  %4819 = vmatprep.subr.mxu1 %v4705_v15  ;;  %v4688_v48 = vld [vmem:[#allocation4 + $0x4f0] sm:$0xff] }
 0x7c5   :  { %4820 = vmatpush1.msra.mxu1 %v4704_v51  ;;  %4647 = vmatprep.mubr.f32.mxu1 %v9347_v45 }
 0x7c6   :  { %4821 = vmatprep.subr.mxu1 %v4701_v53 }
 0x7c7   :  { %4822 = vmatpush1.msra.mxu1 %v4700_v16 }
 0x7c8   :  { %4648 = vmatmul.mubr.f32.gmra.mxu1 %v8892_v23  ;;  %4823 = vmatprep.subr.mxu1 %v4697_v50  ;;  %v4676_v23 = vld [vmem:[#allocation4 + $0x490] sm:$0xff] }
 0x7c9   :  { %4824 = vmatpush1.msra.mxu1 %v4696_v10  ;;  %4875 = vmatprep.mubr.f32.mxu1 %v9347_v45 }
 0x7ca   :  { %4825 = vmatprep.subr.mxu1 %v4693_v18 }
 0x7cb   :  { %4826 = vmatpush1.msra.mxu1 %v4692_v32 }
 0x7cc   :  { %4827 = vmatprep.subr.mxu1 %v4689_v28 }
 0x7cd   :  { %4828 = vmatpush1.msra.mxu1 %v4688_v48 }
 0x7ce   :  { %4829 = vmatprep.subr.mxu1 %v4685_v29 }
 0x7cf   :  { %4830 = vmatpush1.msra.mxu1 %v4684_v26 }
 0x7d0   :  { %4831 = vmatprep.subr.mxu1 %v4681_v27 }
 0x7d1   :  { %4832 = vmatpush1.msra.mxu1 %v4680_v38 }
 0x7d2   :  { %4833 = vmatprep.subr.mxu1 %v4677_v40 }
 0x7d3   :  { %4834 = vmatpush1.msra.mxu1 %v4676_v23 }
 0x7d4   :  { %4835 = vmatprep.subr.mxu1 %v4673_v41 }
 0x7d5   :  { %4836 = vmatpush1.msra.mxu1 %v4672_v13 }
 0x7d6   :  { %4837 = vmatprep.subr.mxu1 %v4669_v20 }
 0x7d7   :  { %4838 = vmatpush1.msra.mxu1 %v4668_v0 }
 0x7d8   :  { %4839 = vmatprep.subr.mxu1 %v4665_v19 }
 0x7d9   :  { %4840 = vmatpush1.msra.mxu1 %v4664_v33 }
 0x7da   :  { %4841 = vmatprep.subr.mxu1 %v4661_v35 }
 0x7db   :  { %4842 = vmatpush1.msra.mxu1 %v4660_v37 }
 0x7dc   :  { %4876 = vmatmul.mubr.f32.vlgmr.msra.gmra.mxu1 %v8899_v30 }
 0x7dd   :  { %4881 = vmatprep.mubr.f32.mxu1 %v9347_v45 }
 0x7e0   :  { %4882 = vmatmul.mubr.f32.gmra.mxu1 %v8906_v24  ;;  %v4364_v24 = vpop.f32.mrf.mxu0 }
 0x7e1   :  { %4887 = vmatprep.mubr.f32.mxu1 %v9347_v45 }
 0x7e2   :  { %v4366_v49 = vpop.f32.mrf.mxu0 }
 0x7e4   :  { %4888 = vmatmul.mubr.f32.gmra.mxu1 %v8913_v25  ;;  %v4370_v7 = vpop.f32.mrf.mxu0 }
 0x7e5   :  { %4893 = vmatprep.mubr.f32.mxu1 %v9347_v45 }
 0x7e6   :  { %v4372_v25 = vpop.f32.mrf.mxu0 }
 0x7e8   :  { %4894 = vmatmul.mubr.f32.gmra.mxu1 %v8920_v31  ;;  %v4376_v52 = vpop.f32.mrf.mxu0 }
 0x7e9   :  { %5071 = vmatprep.mubr.f32.mxu1 %v9347_v45 }
 0x7ea   :  { %v4378_v31 = vpop.f32.mrf.mxu0 }
 0x7ec   :  { %v4382_v57 = vpop.f32.mrf.mxu0 }
 0x7ee   :  { %v4384_v59 = vpop.f32.mrf.mxu0 }
 0x7f0   :  { %v4542_v36 = vpop.f32.mrf.mxu0 }
 0x7f1   :  { %v4543_v20 = vadd.f32 %v4542_v36, %v4364_v24 }
 0x7f2   :  { %v4544_v62 = vpop.f32.mrf.mxu0 }
 0x7f3   :  { %v4545_v37 = vadd.f32 %v4544_v62, %v4366_v49 }
 0x7f4   :  { %v4548_v1 = vpop.f32.mrf.mxu0 }
 0x7f6   :  { %v4550_v3 = vpop.f32.mrf.mxu0 }
 0x7f8   :  { %v4554_v5 = vpop.f32.mrf.mxu0 }
 0x7fa   :  { %v4556_v6 = vpop.f32.mrf.mxu0 }
 0x7fc   :  { %v4560_v9 = vpop.f32.mrf.mxu0 }
 0x7fd   :  { %v4561_v0 = vadd.f32 %v4560_v9, %v4382_v57 }
 0x7fe   :  { %v4562_v11 = vpop.f32.mrf.mxu0 }
 0x7ff   :  { %v4563_v13 = vadd.f32 %v4562_v11, %v4384_v59  ;;  %v5289_v11 = vld [vmem:[#allocation7 + $0x5c8] sm:$0xff] }
 0x800   :  { %v4788_v15 = vpop.f32.mrf.mxu0 }
 0x802   :  { %v4790_v53 = vpop.f32.mrf.mxu0 }
 0x804   :  { %v4794_v50 = vpop.f32.mrf.mxu0 }
 0x806   :  { %v4796_v18 = vpop.f32.mrf.mxu0 }
 0x808   :  { %v4800_v28 = vpop.f32.mrf.mxu0 }
 0x80a   :  { %v4802_v26 = vpop.f32.mrf.mxu0 }
 0x80c   :  { %v4806_v40 = vpop.f32.mrf.mxu0 }
 0x80d   :  { %v4912_v59 = vadd.f32 %v4806_v40, %v4561_v0  ;;  %v5276_v40 = vld [vmem:[#allocation7 + $0x560] sm:$0xff]  ;;  %v5274_v0 = vld [vmem:[#allocation7 + $0x550] sm:$0xff] }
 0x80e   :  { %v4808_v19 = vpop.f32.mrf.mxu0 }
 0x80f   :  { %v4913_v55 = vadd.f32 %v4808_v19, %v4563_v13  ;;  %v5275_v13 = vld [vmem:[#allocation7 + $0x558] sm:$0xff]  ;;  %v5269_v19 = vld [vmem:[#allocation7 + $0x528] sm:$0xff] }
 0x81c   :  { %v8283_v14 = vpop.f32.mrf.mxu1 }
 0x81e   :  { %v8284_v39 = vpop.f32.mrf.mxu1 }
 0x81f   :  { %v8285_v17 = vadd.f32 %v8284_v39, %v8283_v14  ;;  %v4557_v14 = vadd.f32 %v4556_v6, %v4378_v31  ;;  %v5292_v6 = vld [vmem:[#allocation7 + $0x5e0] sm:$0xff] }
 0x821   :  { %v4909_v36 = vadd.f32 %v4802_v26, %v4557_v14  ;;  %v5282_v26 = vld [vmem:[#allocation7 + $0x590] sm:$0xff]  ;;  %v5265_v14 = vld [vmem:[#allocation7 + $0x508] sm:$0xff] }
 0x83c   :  { %v8318_v43 = vpop.f32.mrf.mxu1 }
 0x83e   :  { %v8319_v44 = vpop.f32.mrf.mxu1 }
 0x83f   :  { %v8320_v30 = vadd.f32 %v8319_v44, %v8318_v43  ;;  %v4551_v44 = vadd.f32 %v4550_v3, %v4372_v25 }
 0x841   :  { %v4156_v42 = vadd.f32 %v8320_v30, %v8285_v17  ;;  %v4555_v17 = vadd.f32 %v4554_v5, %v4376_v52  ;;  %v9355_v5 = vld [vmem:[#allocation17_spill] sm:$0xff] }
 0x843   :  { %4160 = vst.msk [vmem:[#allocation12] sm:$0x1] %vm4159_vm10, %v4156_v42  ;;  %v4908_v31 = vadd.f32 %v4800_v28, %v4555_v17  ;;  %v5281_v28 = vld [vmem:[#allocation7 + $0x588] sm:$0xff] }
 0x844   :  { %v5261_v17 = vld [vmem:[#allocation7 + $0x4e8] sm:$0xff] }
 0x85c   :  { %v9055_v21 = vpop.f32.mrf.mxu1 }
 0x85d   :  { %9353 = vst [vmem:[#allocation21_spill] sm:$0xff] %v9055_v21  ;;  %v4549_v21 = vadd.f32 %v4548_v1, %v4370_v7  ;;  %v5295_v1 = vld [vmem:[#allocation7 + $0x5f8] sm:$0xff] }
 0x85e   :  { %v4455_v54 = vpop.f32.mrf.mxu1 }
 0x860   :  { %v4459_v58 = vpop.f32.mrf.mxu1 }
 0x862   :  { %v4461_v60 = vpop.f32.mrf.mxu1 }
 0x864   :  { %v4465_v61 = vpop.f32.mrf.mxu1  ;;  %v9354_v62 = vld [vmem:[#allocation21_spill] sm:$0xff] }
 0x866   :  { %v4467_v63 = vpop.f32.mrf.mxu1 }
 0x868   :  { %v4471_v2 = vpop.f32.mrf.mxu1 }
 0x86a   :  { %v4473_v4 = vpop.f32.mrf.mxu1 }
 0x87c   :  { %v4631_v22 = vpop.f32.mrf.mxu1 }
 0x87e   :  { %v4633_v8 = vpop.f32.mrf.mxu1 }
 0x880   :  { %v4637_v34 = vpop.f32.mrf.mxu1 }
 0x881   :  { %v4638_v24 = vadd.f32 %v4637_v34, %v4459_v58  ;;  %v9357_v34 = vmov 0.0  }
 0x882   :  { %v4639_v12 = vpop.f32.mrf.mxu1 }
 0x883   :  { %v4640_v45 = vadd.f32 %v4639_v12, %v4461_v60  ;;  %v5291_v12 = vld [vmem:[#allocation7 + $0x5d8] sm:$0xff] }
 0x884   :  { %v4643_v51 = vpop.f32.mrf.mxu1 }
 0x885   :  { %v4644_v30 = vadd.f32 %v4643_v51, %v4465_v61  ;;  %v4905_v61 = vadd.f32 %v4796_v18, %v4551_v44  ;;  %v5290_v51 = vld [vmem:[#allocation7 + $0x5d0] sm:$0xff]  ;;  %v5284_v18 = vld [vmem:[#allocation7 + $0x5a0] sm:$0xff] }
 0x886   :  { %v4645_v16 = vpop.f32.mrf.mxu1  ;;  %v5266_v44 = vld [vmem:[#allocation7 + $0x510] sm:$0xff] }
 0x887   :  { %v4646_v39 = vadd.f32 %v4645_v16, %v4467_v63  ;;  %v4632_v63 = vadd.f32 %v4631_v22, %v9354_v62  ;;  %v9356_v22 = vld [vmem:[#allocation18_spill] sm:$0xff]  ;;  %v9359_v16 = vld [vmem:[#allocation20_spill] sm:$0xff] }
 0x888   :  { %v4649_v10 = vpop.f32.mrf.mxu1  ;;  %v5254_v62 = vld [vmem:[#allocation7 + $0x4b0] sm:$0xff] }
 0x889   :  { %v4650_v33 = vadd.f32 %v4649_v10, %v4471_v2  ;;  %v4634_v2 = vadd.f32 %v4633_v8, %v4455_v54  ;;  %v5294_v8 = vld [vmem:[#allocation7 + $0x5f0] sm:$0xff]  ;;  %v5287_v10 = vld [vmem:[#allocation7 + $0x5b8] sm:$0xff] }
 0x88a   :  { %v4651_v32 = vpop.f32.mrf.mxu1 }
 0x88b   :  { %v4652_v43 = vadd.f32 %v4651_v32, %v4473_v4  ;;  %v5286_v32 = vld [vmem:[#allocation7 + $0x5b0] sm:$0xff] }
 0x89c   :  { %v4877_v48 = vpop.f32.mrf.mxu1 }
 0x89d   :  { %v4902_v7 = vadd.f32 %v4877_v48, %v4632_v63  ;;  %v5283_v48 = vld [vmem:[#allocation7 + $0x598] sm:$0xff]  ;;  %v5249_v63 = vld [vmem:[#allocation7 + $0x488] sm:$0xff] }
 0x89e   :  { %v4879_v29 = vpop.f32.mrf.mxu1 }
 0x89f   :  { %v4903_v3 = vadd.f32 %v4879_v29, %v4634_v2  ;;  %v5280_v29 = vld [vmem:[#allocation7 + $0x580] sm:$0xff]  ;;  %v5258_v2 = vld [vmem:[#allocation7 + $0x4d0] sm:$0xff] }
 0x8a0   :  { %v4883_v27 = vpop.f32.mrf.mxu1 }
 0x8a1   :  { %v4906_v25 = vadd.f32 %v4883_v27, %v4638_v24  ;;  %v5277_v27 = vld [vmem:[#allocation7 + $0x568] sm:$0xff] }
 0x8a2   :  { %v4885_v38 = vpop.f32.mrf.mxu1  ;;  %v5257_v24 = vld [vmem:[#allocation7 + $0x4c8] sm:$0xff] }
 0x8a3   :  { %v4907_v9 = vadd.f32 %v4885_v38, %v4640_v45  ;;  %v4901_v45 = vadd.f32 %v4790_v53, %v4545_v37  ;;  %v9358_v53 = vld [vmem:[#allocation19_spill] sm:$0xff] }
 0x8a4   :  { %v4889_v23 = vpop.f32.mrf.mxu1  ;;  %v5279_v38 = vld [vmem:[#allocation7 + $0x578] sm:$0xff]  ;;  %v5270_v37 = vld [vmem:[#allocation7 + $0x530] sm:$0xff] }
 0x8a5   :  { %v4910_v57 = vadd.f32 %v4889_v23, %v4644_v30  ;;  %v5278_v23 = vld [vmem:[#allocation7 + $0x570] sm:$0xff]  ;;  %v5263_v30 = vld [vmem:[#allocation7 + $0x4f8] sm:$0xff] }
 0x8a6   :  { %v4891_v41 = vpop.f32.mrf.mxu1 }
 0x8a7   :  { %v4911_v47 = vadd.f32 %v4891_v41, %v4646_v39  ;;  %v4920_v58 = vmax.f32 %v4908_v31, %v4910_v57  ;;  %v5273_v41 = vld [vmem:[#allocation7 + $0x548] sm:$0xff]  ;;  %v5267_v39 = vld [vmem:[#allocation7 + $0x518] sm:$0xff]  ;;  %v5252_v31 = vld [vmem:[#allocation7 + $0x4a0] sm:$0xff] }
 0x8a8   :  { %v4895_v35 = vpop.f32.mrf.mxu1  ;;  %v5259_v57 = vld [vmem:[#allocation7 + $0x4d8] sm:$0xff] }
 0x8a9   :  { %v4914_v42 = vadd.f32 %v4895_v35, %v4650_v33  ;;  %v4921_v4 = vmax.f32 %v4909_v36, %v4911_v47  ;;  %v4917_v47 = vmax.f32 %v4901_v45, %v4903_v3  ;;  %v5271_v33 = vld [vmem:[#allocation7 + $0x538] sm:$0xff]  ;;  %v5268_v35 = vld [vmem:[#allocation7 + $0x520] sm:$0xff]  ;;  %v5245_v3 = vld [vmem:[#allocation7 + $0x468] sm:$0xff] }
 0x8aa   :  { %v4897_v56 = vpop.f32.mrf.mxu1  ;;  %v5256_v36 = vld [vmem:[#allocation7 + $0x4c0] sm:$0xff]  ;;  %v5243_v45 = vld [vmem:[#allocation7 + $0x458] sm:$0xff] }
 0x8ab   :  { %v4915_v46 = vadd.f32 %v4897_v56, %v4652_v43  ;;  %v4922_v52 = vmax.f32 %v4912_v59, %v4914_v42  ;;  %v4904_v56 = vadd.f32 %v4794_v50, %v4549_v21  ;;  %v5293_v21 = vld [vmem:[#allocation7 + $0x5e8] sm:$0xff]  ;;  %v5264_v43 = vld [vmem:[#allocation7 + $0x500] sm:$0xff]  ;;  %v5262_v59 = vld [vmem:[#allocation7 + $0x4f0] sm:$0xff] }
 0x8ac   :  { %v5285_v50 = vld [vmem:[#allocation7 + $0x5a8] sm:$0xff]  ;;  %v5260_v42 = vld [vmem:[#allocation7 + $0x4e0] sm:$0xff] }
 0x8ad   :  { %v4923_v49 = vmax.f32 %v4913_v55, %v4915_v46  ;;  %v4919_v46 = vmax.f32 %v4905_v61, %v4907_v9  ;;  %v4900_v55 = vadd.f32 %v4788_v15, %v4543_v20  ;;  %v4918_v54 = vmax.f32 %v4904_v56, %v4906_v25  ;;  %v5288_v15 = vld [vmem:[#allocation7 + $0x5c0] sm:$0xff]  ;;  %v5253_v9 = vld [vmem:[#allocation7 + $0x4a8] sm:$0xff]  ;;  %v5251_v25 = vld [vmem:[#allocation7 + $0x498] sm:$0xff] }
 0x8ae   :  { %v5272_v20 = vld [vmem:[#allocation7 + $0x540] sm:$0xff]  ;;  %v5250_v61 = vld [vmem:[#allocation7 + $0x490] sm:$0xff] }
 0x8af   :  { %8237 = vmatprep.subr.msk.mxu0 %vm867_vm0, %v4923_v49  ;;  %8241 = vmatprep.subr.msk.mxu1 %vm867_vm0, %v4923_v49  ;;  %v4916_v60 = vmax.f32 %v4900_v55, %v4902_v7  ;;  %v5255_v49 = vld [vmem:[#allocation7 + $0x4b8] sm:$0xff]  ;;  %v5244_v56 = vld [vmem:[#allocation7 + $0x460] sm:$0xff]  ;;  %v5246_v7 = vld [vmem:[#allocation7 + $0x470] sm:$0xff] }
 0x8b0   :  { %8238 = vmatpush1.msk.msra.mxu0 %vm867_vm0, %v4922_v52  ;;  %8242 = vmatpush1.msk.msra.mxu1 %vm867_vm0, %v4922_v52  ;;  %v5248_v52 = vld [vmem:[#allocation7 + $0x480] sm:$0xff]  ;;  %v5242_v55 = vld [vmem:[#allocation7 + $0x450] sm:$0xff] }
 0x8b1   :  { %4956 = vmatprep.subr.mxu0 %v4921_v4  ;;  %5033 = vmatprep.subr.mxu1 %v4921_v4  ;;  %v5247_v4 = vld [vmem:[#allocation7 + $0x478] sm:$0xff] }
 0x8b2   :  { %4957 = vmatpush1.msra.mxu0 %v4920_v58  ;;  %5034 = vmatpush1.msra.mxu1 %v4920_v58  ;;  %v5241_v58 = vld [vmem:[#allocation7 + $0x448] sm:$0xff] }
 0x8b3   :  { %4958 = vmatprep.subr.mxu0 %v4919_v46  ;;  %5035 = vmatprep.subr.mxu1 %v4919_v46  ;;  %v5240_v46 = vld [vmem:[#allocation7 + $0x440] sm:$0xff] }
 0x8b4   :  { %4959 = vmatpush1.msra.mxu0 %v4918_v54  ;;  %5036 = vmatpush1.msra.mxu1 %v4918_v54  ;;  %v5237_v54 = vld [vmem:[#allocation7 + $0x428] sm:$0xff] }
 0x8b5   :  { %4960 = vmatprep.subr.mxu0 %v4917_v47  ;;  %5037 = vmatprep.subr.mxu1 %v4917_v47  ;;  %v5239_v47 = vld [vmem:[#allocation7 + $0x438] sm:$0xff] }
 0x8b6   :  { %4961 = vmatpush1.msra.mxu0 %v4916_v60  ;;  %5038 = vmatpush1.msra.mxu1 %v4916_v60  ;;  %v5236_v60 = vld [vmem:[#allocation7 + $0x420] sm:$0xff] }
 0x8b7   :  { %8239 = vmatmul.mubr.msk.f32.vlgmr.msra.gmra.mxu0 %vm860_vm3, %v9355_v5  ;;  %8243 = vmatmul.mubr.msk.f32.vlgmr.msra.gmra.mxu1 %vm860_vm3, %v9356_v22 }
 0x8b8   :  { %5000 = vmatprep.mubr.f32.mxu0 %v9357_v34  ;;  %5077 = vmatprep.mubr.f32.mxu1 %v9357_v34 }
 0x8b9   :  { %5374 = vmatprep.subr.mxu0 %v5293_v21  ;;  %5451 = vmatprep.subr.mxu1 %v5295_v1  ;;  %v5238_v21 = vld [vmem:[#allocation7 + $0x430] sm:$0xff]  ;;  %v5233_v1 = vld [vmem:[#allocation7 + $0x408] sm:$0xff] }
 0x8ba   :  { %5375 = vmatpush1.msra.mxu0 %v5292_v6  ;;  %5452 = vmatpush1.msra.mxu1 %v5294_v8  ;;  %v5235_v6 = vld [vmem:[#allocation7 + $0x418] sm:$0xff]  ;;  %v5232_v8 = vld [vmem:[#allocation7 + $0x400] sm:$0xff] }
 0x8bb   :  { %8240 = vmatmul.mubr.msk.f32.gmra.mxu0 %vm860_vm3, %v9358_v53  ;;  %8244 = vmatmul.mubr.msk.f32.gmra.mxu1 %vm860_vm3, %v9359_v16  ;;  %v5358_v53 = vld [vmem:[#allocation7 + $0x7f0] sm:$0xff]  ;;  %v5353_v16 = vld [vmem:[#allocation7 + $0x7c8] sm:$0xff] }
 0x8bc   :  { %5376 = vmatprep.subr.mxu0 %v5289_v11  ;;  %5453 = vmatprep.subr.mxu1 %v5291_v12  ;;  %v5234_v11 = vld [vmem:[#allocation7 + $0x410] sm:$0xff]  ;;  %v5357_v12 = vld [vmem:[#allocation7 + $0x7e8] sm:$0xff] }
 0x8bd   :  { %5377 = vmatpush1.msra.mxu0 %v5288_v15  ;;  %5454 = vmatpush1.msra.mxu1 %v5290_v51  ;;  %v5359_v15 = vld [vmem:[#allocation7 + $0x7f8] sm:$0xff]  ;;  %v5356_v51 = vld [vmem:[#allocation7 + $0x7e0] sm:$0xff] }
 0x8be   :  { %5378 = vmatprep.subr.mxu0 %v5285_v50  ;;  %5455 = vmatprep.subr.mxu1 %v5287_v10  ;;  %v5355_v50 = vld [vmem:[#allocation7 + $0x7d8] sm:$0xff]  ;;  %v5352_v10 = vld [vmem:[#allocation7 + $0x7c0] sm:$0xff] }
 0x8bf   :  { %5379 = vmatpush1.msra.mxu0 %v5284_v18  ;;  %5456 = vmatpush1.msra.mxu1 %v5286_v32  ;;  %v5354_v18 = vld [vmem:[#allocation7 + $0x7d0] sm:$0xff]  ;;  %v5349_v32 = vld [vmem:[#allocation7 + $0x7a8] sm:$0xff] }
 0x8c0   :  { %5380 = vmatprep.subr.mxu0 %v5281_v28  ;;  %5457 = vmatprep.subr.mxu1 %v5283_v48  ;;  %v5351_v28 = vld [vmem:[#allocation7 + $0x7b8] sm:$0xff]  ;;  %v5348_v48 = vld [vmem:[#allocation7 + $0x7a0] sm:$0xff] }
 0x8c1   :  { %5381 = vmatpush1.msra.mxu0 %v5280_v29  ;;  %5458 = vmatpush1.msra.mxu1 %v5282_v26  ;;  %v5350_v29 = vld [vmem:[#allocation7 + $0x7b0] sm:$0xff]  ;;  %v5345_v26 = vld [vmem:[#allocation7 + $0x788] sm:$0xff] }
 0x8c2   :  { %5382 = vmatprep.subr.mxu0 %v5277_v27  ;;  %5459 = vmatprep.subr.mxu1 %v5279_v38  ;;  %v5347_v27 = vld [vmem:[#allocation7 + $0x798] sm:$0xff]  ;;  %v5344_v38 = vld [vmem:[#allocation7 + $0x780] sm:$0xff] }
 0x8c3   :  { %5383 = vmatpush1.msra.mxu0 %v5276_v40  ;;  %5460 = vmatpush1.msra.mxu1 %v5278_v23  ;;  %v5346_v40 = vld [vmem:[#allocation7 + $0x790] sm:$0xff]  ;;  %v5341_v23 = vld [vmem:[#allocation7 + $0x768] sm:$0xff] }
 0x8c4   :  { %5384 = vmatprep.subr.mxu0 %v5273_v41  ;;  %5461 = vmatprep.subr.mxu1 %v5275_v13  ;;  %v5343_v41 = vld [vmem:[#allocation7 + $0x778] sm:$0xff]  ;;  %v5340_v13 = vld [vmem:[#allocation7 + $0x760] sm:$0xff] }
 0x8c5   :  { %5385 = vmatpush1.msra.mxu0 %v5272_v20  ;;  %5462 = vmatpush1.msra.mxu1 %v5274_v0  ;;  %v5342_v20 = vld [vmem:[#allocation7 + $0x770] sm:$0xff]  ;;  %v5337_v0 = vld [vmem:[#allocation7 + $0x748] sm:$0xff] }
 0x8c6   :  { %5386 = vmatprep.subr.mxu0 %v5269_v19  ;;  %5463 = vmatprep.subr.mxu1 %v5271_v33  ;;  %v5339_v19 = vld [vmem:[#allocation7 + $0x758] sm:$0xff]  ;;  %v5336_v33 = vld [vmem:[#allocation7 + $0x740] sm:$0xff] }
 0x8c7   :  { %5387 = vmatpush1.msra.mxu0 %v5268_v35  ;;  %5464 = vmatpush1.msra.mxu1 %v5270_v37  ;;  %v5338_v35 = vld [vmem:[#allocation7 + $0x750] sm:$0xff]  ;;  %v5333_v37 = vld [vmem:[#allocation7 + $0x728] sm:$0xff] }
 0x8c8   :  { %5388 = vmatprep.subr.mxu0 %v5265_v14  ;;  %5465 = vmatprep.subr.mxu1 %v5267_v39  ;;  %v5335_v14 = vld [vmem:[#allocation7 + $0x738] sm:$0xff]  ;;  %v5332_v39 = vld [vmem:[#allocation7 + $0x720] sm:$0xff] }
 0x8c9   :  { %5389 = vmatpush1.msra.mxu0 %v5264_v43  ;;  %5466 = vmatpush1.msra.mxu1 %v5266_v44  ;;  %v5334_v43 = vld [vmem:[#allocation7 + $0x730] sm:$0xff]  ;;  %v5329_v44 = vld [vmem:[#allocation7 + $0x708] sm:$0xff] }
 0x8ca   :  { %5390 = vmatprep.subr.mxu0 %v5261_v17  ;;  %5467 = vmatprep.subr.mxu1 %v5263_v30  ;;  %v5331_v17 = vld [vmem:[#allocation7 + $0x718] sm:$0xff]  ;;  %v5328_v30 = vld [vmem:[#allocation7 + $0x700] sm:$0xff] }
 0x8cb   :  { %5391 = vmatpush1.msra.mxu0 %v5260_v42  ;;  %5468 = vmatpush1.msra.mxu1 %v5262_v59  ;;  %v5330_v42 = vld [vmem:[#allocation7 + $0x710] sm:$0xff]  ;;  %v5325_v59 = vld [vmem:[#allocation7 + $0x6e8] sm:$0xff] }
 0x8cc   :  { %5392 = vmatprep.subr.mxu0 %v5257_v24  ;;  %5469 = vmatprep.subr.mxu1 %v5259_v57  ;;  %v5327_v24 = vld [vmem:[#allocation7 + $0x6f8] sm:$0xff]  ;;  %v5324_v57 = vld [vmem:[#allocation7 + $0x6e0] sm:$0xff] }
 0x8cd   :  { %5393 = vmatpush1.msra.mxu0 %v5256_v36  ;;  %5470 = vmatpush1.msra.mxu1 %v5258_v2  ;;  %v5326_v36 = vld [vmem:[#allocation7 + $0x6f0] sm:$0xff]  ;;  %v5321_v2 = vld [vmem:[#allocation7 + $0x6c8] sm:$0xff] }
 0x8ce   :  { %5394 = vmatprep.subr.mxu0 %v5253_v9  ;;  %5471 = vmatprep.subr.mxu1 %v5255_v49  ;;  %v5323_v9 = vld [vmem:[#allocation7 + $0x6d8] sm:$0xff]  ;;  %v5320_v49 = vld [vmem:[#allocation7 + $0x6c0] sm:$0xff] }
 0x8cf   :  { %5395 = vmatpush1.msra.mxu0 %v5252_v31  ;;  %5472 = vmatpush1.msra.mxu1 %v5254_v62  ;;  %v5322_v31 = vld [vmem:[#allocation7 + $0x6d0] sm:$0xff]  ;;  %v5317_v62 = vld [vmem:[#allocation7 + $0x6a8] sm:$0xff] }
 0x8d0   :  { %5396 = vmatprep.subr.mxu0 %v5249_v63  ;;  %5473 = vmatprep.subr.mxu1 %v5251_v25  ;;  %v5319_v63 = vld [vmem:[#allocation7 + $0x6b8] sm:$0xff]  ;;  %v5316_v25 = vld [vmem:[#allocation7 + $0x6a0] sm:$0xff] }
 0x8d1   :  { %5397 = vmatpush1.msra.mxu0 %v5248_v52  ;;  %5474 = vmatpush1.msra.mxu1 %v5250_v61  ;;  %v5318_v52 = vld [vmem:[#allocation7 + $0x6b0] sm:$0xff]  ;;  %v5313_v61 = vld [vmem:[#allocation7 + $0x688] sm:$0xff] }
 0x8d2   :  { %5398 = vmatprep.subr.mxu0 %v5245_v3  ;;  %5475 = vmatprep.subr.mxu1 %v5247_v4  ;;  %v5315_v3 = vld [vmem:[#allocation7 + $0x698] sm:$0xff]  ;;  %v5312_v4 = vld [vmem:[#allocation7 + $0x680] sm:$0xff] }
 0x8d3   :  { %5399 = vmatpush1.msra.mxu0 %v5244_v56  ;;  %5476 = vmatpush1.msra.mxu1 %v5246_v7  ;;  %v5314_v56 = vld [vmem:[#allocation7 + $0x690] sm:$0xff]  ;;  %v5309_v7 = vld [vmem:[#allocation7 + $0x668] sm:$0xff] }
 0x8d4   :  { %5400 = vmatprep.subr.mxu0 %v5241_v58  ;;  %5477 = vmatprep.subr.mxu1 %v5243_v45  ;;  %v5311_v58 = vld [vmem:[#allocation7 + $0x678] sm:$0xff]  ;;  %v5308_v45 = vld [vmem:[#allocation7 + $0x660] sm:$0xff] }
 0x8d5   :  { %5401 = vmatpush1.msra.mxu0 %v5240_v46  ;;  %5478 = vmatpush1.msra.mxu1 %v5242_v55  ;;  %v5310_v46 = vld [vmem:[#allocation7 + $0x670] sm:$0xff]  ;;  %v5305_v55 = vld [vmem:[#allocation7 + $0x648] sm:$0xff] }
 0x8d6   :  { %5402 = vmatprep.subr.mxu0 %v5237_v54  ;;  %5479 = vmatprep.subr.mxu1 %v5239_v47  ;;  %v5307_v54 = vld [vmem:[#allocation7 + $0x658] sm:$0xff]  ;;  %v5304_v47 = vld [vmem:[#allocation7 + $0x640] sm:$0xff] }
 0x8d7   :  { %5403 = vmatpush1.msra.mxu0 %v5236_v60  ;;  %5480 = vmatpush1.msra.mxu1 %v5238_v21  ;;  %v5306_v60 = vld [vmem:[#allocation7 + $0x650] sm:$0xff]  ;;  %v5301_v21 = vld [vmem:[#allocation7 + $0x628] sm:$0xff] }
 0x8d8   :  { %5404 = vmatprep.subr.mxu0 %v5233_v1  ;;  %5481 = vmatprep.subr.mxu1 %v5235_v6  ;;  %v5303_v1 = vld [vmem:[#allocation7 + $0x638] sm:$0xff]  ;;  %v5300_v6 = vld [vmem:[#allocation7 + $0x620] sm:$0xff] }
 0x8d9   :  { %5405 = vmatpush1.msra.mxu0 %v5232_v8  ;;  %5482 = vmatpush1.msra.mxu1 %v5234_v11  ;;  %v5302_v8 = vld [vmem:[#allocation7 + $0x630] sm:$0xff]  ;;  %v5297_v11 = vld [vmem:[#allocation7 + $0x608] sm:$0xff] }
 0x8da   :  { %5406 = vmatprep.subr.mxu0 %v5357_v12  ;;  %5483 = vmatprep.subr.mxu1 %v5359_v15  ;;  %v5299_v12 = vld [vmem:[#allocation7 + $0x618] sm:$0xff]  ;;  %v5296_v15 = vld [vmem:[#allocation7 + $0x600] sm:$0xff] }
 0x8db   :  { %5407 = vmatpush2.msra.mxu0 %v5356_v51  ;;  %5484 = vmatpush2.msra.mxu1 %v5358_v53  ;;  %v5298_v51 = vld [vmem:[#allocation7 + $0x610] sm:$0xff]  ;;  %v5161_v53 = vld [vmem:[#allocation7 + $0x1e8] sm:$0xff] }
 0x8dc   :  { %5408 = vmatprep.subr.mxu0 %v5353_v16  ;;  %5485 = vmatprep.subr.mxu1 %v5355_v50  ;;  %v5163_v16 = vld [vmem:[#allocation7 + $0x1f8] sm:$0xff] }
 0x8dd   :  { %5409 = vmatpush2.msra.mxu0 %v5352_v10  ;;  %5486 = vmatpush2.msra.mxu1 %v5354_v18 }
 0x8de   :  { %5410 = vmatprep.subr.mxu0 %v5349_v32  ;;  %5487 = vmatprep.subr.mxu1 %v5351_v28 }
 0x8df   :  { %5411 = vmatpush2.msra.mxu0 %v5348_v48  ;;  %5488 = vmatpush2.msra.mxu1 %v5350_v29 }
 0x8e0   :  { %5412 = vmatprep.subr.mxu0 %v5345_v26  ;;  %5489 = vmatprep.subr.mxu1 %v5347_v27 }
 0x8e1   :  { %5413 = vmatpush2.msra.mxu0 %v5344_v38  ;;  %5490 = vmatpush2.msra.mxu1 %v5346_v40 }
 0x8e2   :  { %5414 = vmatprep.subr.mxu0 %v5341_v23  ;;  %5491 = vmatprep.subr.mxu1 %v5343_v41 }
 0x8e3   :  { %5415 = vmatpush2.msra.mxu0 %v5340_v13  ;;  %5492 = vmatpush2.msra.mxu1 %v5342_v20 }
 0x8e4   :  { %5416 = vmatprep.subr.mxu0 %v5337_v0  ;;  %5493 = vmatprep.subr.mxu1 %v5339_v19 }
 0x8e5   :  { %5417 = vmatpush2.msra.mxu0 %v5336_v33  ;;  %5494 = vmatpush2.msra.mxu1 %v5338_v35 }
 0x8e6   :  { %5418 = vmatprep.subr.mxu0 %v5333_v37  ;;  %5495 = vmatprep.subr.mxu1 %v5335_v14 }
 0x8e7   :  { %5419 = vmatpush2.msra.mxu0 %v5332_v39  ;;  %5496 = vmatpush2.msra.mxu1 %v5334_v43 }
 0x8e8   :  { %5420 = vmatprep.subr.mxu0 %v5329_v44  ;;  %5497 = vmatprep.subr.mxu1 %v5331_v17 }
 0x8e9   :  { %5421 = vmatpush2.msra.mxu0 %v5328_v30  ;;  %5498 = vmatpush2.msra.mxu1 %v5330_v42  ;;  %v5160_v30 = vld [vmem:[#allocation7 + $0x1e0] sm:$0xff]  ;;  %v5162_v42 = vld [vmem:[#allocation7 + $0x1f0] sm:$0xff] }
 0x8ea   :  { %5422 = vmatprep.subr.mxu0 %v5325_v59  ;;  %5499 = vmatprep.subr.mxu1 %v5327_v24  ;;  %v5157_v24 = vld [vmem:[#allocation7 + $0x1c8] sm:$0xff] }
 0x8eb   :  { %5423 = vmatpush2.msra.mxu0 %v5324_v57  ;;  %5500 = vmatpush2.msra.mxu1 %v5326_v36  ;;  %v5159_v57 = vld [vmem:[#allocation7 + $0x1d8] sm:$0xff]  ;;  %v5156_v36 = vld [vmem:[#allocation7 + $0x1c0] sm:$0xff] }
 0x8ec   :  { %5424 = vmatprep.subr.mxu0 %v5321_v2  ;;  %5501 = vmatprep.subr.mxu1 %v5323_v9  ;;  %v5158_v2 = vld [vmem:[#allocation7 + $0x1d0] sm:$0xff]  ;;  %v5153_v9 = vld [vmem:[#allocation7 + $0x1a8] sm:$0xff] }
 0x8ed   :  { %5425 = vmatpush2.msra.mxu0 %v5320_v49  ;;  %5502 = vmatpush2.msra.mxu1 %v5322_v31  ;;  %v5155_v49 = vld [vmem:[#allocation7 + $0x1b8] sm:$0xff]  ;;  %v5152_v31 = vld [vmem:[#allocation7 + $0x1a0] sm:$0xff] }
 0x8ee   :  { %5426 = vmatprep.subr.mxu0 %v5317_v62  ;;  %5503 = vmatprep.subr.mxu1 %v5319_v63  ;;  %v5154_v62 = vld [vmem:[#allocation7 + $0x1b0] sm:$0xff]  ;;  %v5149_v63 = vld [vmem:[#allocation7 + $0x188] sm:$0xff] }
 0x8ef   :  { %5427 = vmatpush2.msra.mxu0 %v5316_v25  ;;  %5504 = vmatpush2.msra.mxu1 %v5318_v52  ;;  %v5151_v25 = vld [vmem:[#allocation7 + $0x198] sm:$0xff]  ;;  %v5148_v52 = vld [vmem:[#allocation7 + $0x180] sm:$0xff] }
 0x8f0   :  { %5428 = vmatprep.subr.mxu0 %v5313_v61  ;;  %5505 = vmatprep.subr.mxu1 %v5315_v3  ;;  %v5150_v61 = vld [vmem:[#allocation7 + $0x190] sm:$0xff]  ;;  %v5145_v3 = vld [vmem:[#allocation7 + $0x168] sm:$0xff] }
 0x8f1   :  { %5429 = vmatpush2.msra.mxu0 %v5312_v4  ;;  %5506 = vmatpush2.msra.mxu1 %v5314_v56  ;;  %v5147_v4 = vld [vmem:[#allocation7 + $0x178] sm:$0xff]  ;;  %v5144_v56 = vld [vmem:[#allocation7 + $0x160] sm:$0xff] }
 0x8f2   :  { %5430 = vmatprep.subr.mxu0 %v5309_v7  ;;  %5507 = vmatprep.subr.mxu1 %v5311_v58  ;;  %v5146_v7 = vld [vmem:[#allocation7 + $0x170] sm:$0xff]  ;;  %v5141_v58 = vld [vmem:[#allocation7 + $0x148] sm:$0xff] }
 0x8f3   :  { %5431 = vmatpush2.msra.mxu0 %v5308_v45  ;;  %5508 = vmatpush2.msra.mxu1 %v5310_v46  ;;  %v5143_v45 = vld [vmem:[#allocation7 + $0x158] sm:$0xff]  ;;  %v5140_v46 = vld [vmem:[#allocation7 + $0x140] sm:$0xff] }
 0x8f4   :  { %5432 = vmatprep.subr.mxu0 %v5305_v55  ;;  %5509 = vmatprep.subr.mxu1 %v5307_v54  ;;  %v5142_v55 = vld [vmem:[#allocation7 + $0x150] sm:$0xff]  ;;  %v5137_v54 = vld [vmem:[#allocation7 + $0x128] sm:$0xff] }
 0x8f5   :  { %5433 = vmatpush2.msra.mxu0 %v5304_v47  ;;  %5510 = vmatpush2.msra.mxu1 %v5306_v60  ;;  %v5139_v47 = vld [vmem:[#allocation7 + $0x138] sm:$0xff]  ;;  %v5136_v60 = vld [vmem:[#allocation7 + $0x120] sm:$0xff] }
 0x8f6   :  { %5434 = vmatprep.subr.mxu0 %v5301_v21  ;;  %5511 = vmatprep.subr.mxu1 %v5303_v1  ;;  %v5138_v21 = vld [vmem:[#allocation7 + $0x130] sm:$0xff]  ;;  %v5133_v1 = vld [vmem:[#allocation7 + $0x108] sm:$0xff] }
 0x8f7   :  { %5435 = vmatpush2.msra.mxu0 %v5300_v6  ;;  %5512 = vmatpush2.msra.mxu1 %v5302_v8  ;;  %v5135_v6 = vld [vmem:[#allocation7 + $0x118] sm:$0xff]  ;;  %v5132_v8 = vld [vmem:[#allocation7 + $0x100] sm:$0xff] }
 0x8f8   :  { %5436 = vmatprep.subr.mxu0 %v5297_v11  ;;  %5513 = vmatprep.subr.mxu1 %v5299_v12  ;;  %v5134_v11 = vld [vmem:[#allocation7 + $0x110] sm:$0xff]  ;;  %v5129_v12 = vld [vmem:[#allocation7 + $0xe8] sm:$0xff] }
 0x8f9   :  { %5437 = vmatpush2.msra.mxu0 %v5296_v15  ;;  %5514 = vmatpush2.msra.mxu1 %v5298_v51  ;;  %v5131_v15 = vld [vmem:[#allocation7 + $0xf8] sm:$0xff]  ;;  %v5128_v51 = vld [vmem:[#allocation7 + $0xe0] sm:$0xff] }
 0x8fa   :  { %5528 = vmatprep.subr.mxu0 %v5161_v53  ;;  %5605 = vmatprep.subr.mxu1 %v5163_v16  ;;  %v5130_v53 = vld [vmem:[#allocation7 + $0xf0] sm:$0xff]  ;;  %v5125_v16 = vld [vmem:[#allocation7 + $0xc8] sm:$0xff] }
 0x977   :  { %v4996_v50 = vpop.f32.mrf.mxu0  ;;  %v5073_v10 = vpop.f32.mrf.mxu1 }
 0x978   :  { %v5084_v18 = vmax.f32 %v4996_v50, %v5073_v10  ;;  %v5127_v50 = vld [vmem:[#allocation7 + $0xd8] sm:$0xff]  ;;  %v5124_v10 = vld [vmem:[#allocation7 + $0xc0] sm:$0xff] }
 0x979   :  { %v4998_v32 = vpop.f32.mrf.mxu0  ;;  %v5075_v28 = vpop.f32.mrf.mxu1 }
 0x97a   :  { %v9072_v48 = vmax.f32 %v5084_v18, 0.0  ;;  %v5085_v29 = vmax.f32 %v4998_v32, %v5075_v28  ;;  %v5126_v18 = vld [vmem:[#allocation7 + $0xd0] sm:$0xff]  ;;  %v5121_v32 = vld [vmem:[#allocation7 + $0xa8] sm:$0xff]  ;;  %v5123_v28 = vld [vmem:[#allocation7 + $0xb8] sm:$0xff] }
 0x97b   :  { %v5002_v26 = vpop.f32.mrf.mxu0  ;;  %v5079_v27 = vpop.f32.mrf.mxu1 }
 0x97c   :  { %5092 = vst [vmem:[#allocation2 + $0x10] sm:$0xff] %v9072_v48  ;;  %v5089_v38 = vmax.f32 %v5085_v29, 0.0  ;;  %v5086_v40 = vmax.f32 %v5002_v26, %v5079_v27  ;;  %v5120_v29 = vld [vmem:[#allocation7 + $0xa0] sm:$0xff]  ;;  %v5122_v26 = vld [vmem:[#allocation7 + $0xb0] sm:$0xff]  ;;  %v5117_v27 = vld [vmem:[#allocation7 + $0x88] sm:$0xff] }
 0x97d   :  { %v5004_v23 = vpop.f32.mrf.mxu0  ;;  %v5081_v41 = vpop.f32.mrf.mxu1 }
 0x97e   :  { %5093 = vst [vmem:[#allocation2] sm:$0xff] %v5089_v38  ;;  %v5090_v13 = vmax.f32 %v5086_v40, 0.0  ;;  %v5087_v20 = vmax.f32 %v5004_v23, %v5081_v41  ;;  %v5116_v40 = vld [vmem:[#allocation7 + $0x80] sm:$0xff]  ;;  %v5118_v23 = vld [vmem:[#allocation7 + $0x90] sm:$0xff]  ;;  %v5113_v41 = vld [vmem:[#allocation7 + $0x68] sm:$0xff] }
 0x980   :  { %5094 = vst [vmem:[#allocation2 + $0x18] sm:$0x7f] %v5090_v13  ;;  %v5091_v0 = vmax.f32 %v5087_v20, 0.0  ;;  %v5115_v13 = vld [vmem:[#allocation7 + $0x78] sm:$0xff]  ;;  %v5112_v20 = vld [vmem:[#allocation7 + $0x60] sm:$0xff] }
 0x982   :  { %5095 = vst [vmem:[#allocation2 + $0x8] sm:$0x7f] %v5091_v0  ;;  %v5114_v0 = vld [vmem:[#allocation7 + $0x70] sm:$0xff] }
 0x983   :  { %v5228_v35 = vld [vmem:[#allocation2 + $0x10] sm:$0xfe] }
 0x984   :  { %v5364_v44 = vrot.slane %v5228_v35, 1  ;;  %v5108_v35 = vld [vmem:[#allocation7 + $0x40] sm:$0xff] }
 0x985   :  { %v5229_v19 = vld [vmem:[#allocation2] sm:$0xfe] }
 0x986   :  { %v5367_v39 = vrot.slane %v5229_v19, 1  ;;  %v5109_v19 = vld [vmem:[#allocation7 + $0x48] sm:$0xff] }
 0x987   :  { %v5230_v33 = vld [vmem:[#allocation2 + $0x18] sm:$0x1f] }
 0x988   :  { %v5365_v14 = vrot.slane %v5230_v33, 1  ;;  %v5111_v33 = vld [vmem:[#allocation7 + $0x58] sm:$0xff] }
 0x989   :  { %v5231_v37 = vld [vmem:[#allocation2 + $0x8] sm:$0x1f] }
 0x98a   :  { %v5368_v43 = vrot.slane %v5231_v37, 1  ;;  %v5366_v59 = vsel %vm1315_vm6, %v5364_v44, %v5365_v14  ;;  %v5110_v37 = vld [vmem:[#allocation7 + $0x50] sm:$0xff] }
 0x98b   :  { %v5106_v44 = vld [vmem:[#allocation7 + $0x30] sm:$0xff] }
 0x98c   :  { %v5369_v17 = vsel %vm1315_vm6, %v5367_v39, %v5368_v43  ;;  %v5107_v39 = vld [vmem:[#allocation7 + $0x38] sm:$0xff] }
 0x98d   :  { %5438 = vmatprep.mubr.f32.mxu0 %v5369_v17  ;;  %5515 = vmatprep.mubr.f32.mxu1 %v5369_v17  ;;  %v5101_v17 = vld [vmem:[#allocation7 + $0x8] sm:$0xff] }
 0x98e   :  { %5439 = vmatmul.mubr.f32.vlgmr.msra.gmra.mxu0 %v5366_v59  ;;  %5516 = vmatmul.mubr.f32.vlgmr.msra.gmra.mxu1 %v5366_v59  ;;  %v5102_v59 = vld [vmem:[#allocation7 + $0x10] sm:$0xff] }
 0x98f   :  { %5529 = vmatpush1.msra.mxu0 %v5160_v30  ;;  %5606 = vmatpush1.msra.mxu1 %v5162_v42  ;;  %v5103_v30 = vld [vmem:[#allocation7 + $0x18] sm:$0xff]  ;;  %v5100_v42 = vld [vmem:[#allocation7] sm:$0xff] }
 0x990   :  { %5444 = vmatprep.mubr.f32.mxu0 %v5368_v43  ;;  %5521 = vmatprep.mubr.f32.mxu1 %v5368_v43  ;;  %v5104_v43 = vld [vmem:[#allocation7 + $0x20] sm:$0xff] }
 0x991   :  { %5530 = vmatprep.subr.mxu0 %v5157_v24  ;;  %5607 = vmatprep.subr.mxu1 %v5159_v57  ;;  %v5225_v24 = vld [vmem:[#allocation7 + $0x3e8] sm:$0xff]  ;;  %v5227_v57 = vld [vmem:[#allocation7 + $0x3f8] sm:$0xff] }
 0x992   :  { %5531 = vmatpush1.msra.mxu0 %v5156_v36  ;;  %5608 = vmatpush1.msra.mxu1 %v5158_v2  ;;  %v5224_v36 = vld [vmem:[#allocation7 + $0x3e0] sm:$0xff]  ;;  %v5226_v2 = vld [vmem:[#allocation7 + $0x3f0] sm:$0xff] }
 0x993   :  { %5532 = vmatprep.subr.mxu0 %v5153_v9  ;;  %5609 = vmatprep.subr.mxu1 %v5155_v49  ;;  %v5221_v9 = vld [vmem:[#allocation7 + $0x3c8] sm:$0xff]  ;;  %v5223_v49 = vld [vmem:[#allocation7 + $0x3d8] sm:$0xff] }
 0x994   :  { %5445 = vmatmul.mubr.f32.gmra.mxu0 %v5365_v14  ;;  %5522 = vmatmul.mubr.f32.gmra.mxu1 %v5365_v14  ;;  %v5105_v14 = vld [vmem:[#allocation7 + $0x28] sm:$0xff] }
 0x995   :  { %5533 = vmatpush1.msra.mxu0 %v5152_v31  ;;  %5610 = vmatpush1.msra.mxu1 %v5154_v62  ;;  %v5220_v31 = vld [vmem:[#allocation7 + $0x3c0] sm:$0xff]  ;;  %v5222_v62 = vld [vmem:[#allocation7 + $0x3d0] sm:$0xff] }
 0x996   :  { %5534 = vmatprep.subr.mxu0 %v5149_v63  ;;  %5592 = vmatprep.mubr.f32.mxu0 %v5089_v38  ;;  %v5217_v63 = vld [vmem:[#allocation7 + $0x3a8] sm:$0xff] }
 0x997   :  { %5611 = vmatprep.subr.mxu1 %v5151_v25  ;;  %5669 = vmatprep.mubr.f32.mxu1 %v5089_v38  ;;  %v5119_v38 = vld [vmem:[#allocation7 + $0x98] sm:$0xff] }
 0x998   :  { %5535 = vmatpush1.msra.mxu0 %v5148_v52  ;;  %5612 = vmatpush1.msra.mxu1 %v5150_v61  ;;  %v5219_v25 = vld [vmem:[#allocation7 + $0x3b8] sm:$0xff]  ;;  %v5216_v52 = vld [vmem:[#allocation7 + $0x3a0] sm:$0xff]  ;;  %v5218_v61 = vld [vmem:[#allocation7 + $0x3b0] sm:$0xff] }
 0x999   :  { %5536 = vmatprep.subr.mxu0 %v5145_v3  ;;  %5613 = vmatprep.subr.mxu1 %v5147_v4  ;;  %v5213_v3 = vld [vmem:[#allocation7 + $0x388] sm:$0xff]  ;;  %v5215_v4 = vld [vmem:[#allocation7 + $0x398] sm:$0xff] }
 0x99a   :  { %5537 = vmatpush1.msra.mxu0 %v5144_v56  ;;  %5614 = vmatpush1.msra.mxu1 %v5146_v7  ;;  %v5212_v56 = vld [vmem:[#allocation7 + $0x380] sm:$0xff]  ;;  %v5214_v7 = vld [vmem:[#allocation7 + $0x390] sm:$0xff] }
 0x99b   :  { %5538 = vmatprep.subr.mxu0 %v5141_v58  ;;  %5615 = vmatprep.subr.mxu1 %v5143_v45  ;;  %v5209_v58 = vld [vmem:[#allocation7 + $0x368] sm:$0xff]  ;;  %v5211_v45 = vld [vmem:[#allocation7 + $0x378] sm:$0xff] }
 0x99c   :  { %5539 = vmatpush1.msra.mxu0 %v5140_v46  ;;  %5616 = vmatpush1.msra.mxu1 %v5142_v55  ;;  %v5208_v46 = vld [vmem:[#allocation7 + $0x360] sm:$0xff]  ;;  %v5210_v55 = vld [vmem:[#allocation7 + $0x370] sm:$0xff] }
 0x99d   :  { %5540 = vmatprep.subr.mxu0 %v5137_v54  ;;  %5617 = vmatprep.subr.mxu1 %v5139_v47  ;;  %v5205_v54 = vld [vmem:[#allocation7 + $0x348] sm:$0xff]  ;;  %v5207_v47 = vld [vmem:[#allocation7 + $0x358] sm:$0xff] }
 0x99e   :  { %5541 = vmatpush1.msra.mxu0 %v5136_v60  ;;  %5618 = vmatpush1.msra.mxu1 %v5138_v21  ;;  %v5204_v60 = vld [vmem:[#allocation7 + $0x340] sm:$0xff]  ;;  %v5206_v21 = vld [vmem:[#allocation7 + $0x350] sm:$0xff] }
 0x99f   :  { %5542 = vmatprep.subr.mxu0 %v5133_v1  ;;  %5619 = vmatprep.subr.mxu1 %v5135_v6  ;;  %v5201_v1 = vld [vmem:[#allocation7 + $0x328] sm:$0xff]  ;;  %v5203_v6 = vld [vmem:[#allocation7 + $0x338] sm:$0xff] }
 0x9a0   :  { %5543 = vmatpush1.msra.mxu0 %v5132_v8  ;;  %5620 = vmatpush1.msra.mxu1 %v5134_v11  ;;  %v5200_v8 = vld [vmem:[#allocation7 + $0x320] sm:$0xff]  ;;  %v5202_v11 = vld [vmem:[#allocation7 + $0x330] sm:$0xff] }
 0x9a1   :  { %5544 = vmatprep.subr.mxu0 %v5129_v12  ;;  %5621 = vmatprep.subr.mxu1 %v5131_v15  ;;  %v5197_v12 = vld [vmem:[#allocation7 + $0x308] sm:$0xff]  ;;  %v5199_v15 = vld [vmem:[#allocation7 + $0x318] sm:$0xff] }
 0x9a2   :  { %5545 = vmatpush1.msra.mxu0 %v5128_v51  ;;  %5622 = vmatpush1.msra.mxu1 %v5130_v53  ;;  %v5196_v51 = vld [vmem:[#allocation7 + $0x300] sm:$0xff]  ;;  %v5198_v53 = vld [vmem:[#allocation7 + $0x310] sm:$0xff] }
 0x9a3   :  { %5546 = vmatprep.subr.mxu0 %v5125_v16  ;;  %5623 = vmatprep.subr.mxu1 %v5127_v50  ;;  %v5193_v16 = vld [vmem:[#allocation7 + $0x2e8] sm:$0xff]  ;;  %v5195_v50 = vld [vmem:[#allocation7 + $0x2f8] sm:$0xff] }
 0x9a4   :  { %5547 = vmatpush1.msra.mxu0 %v5124_v10  ;;  %5624 = vmatpush1.msra.mxu1 %v5126_v18  ;;  %v5192_v10 = vld [vmem:[#allocation7 + $0x2e0] sm:$0xff]  ;;  %v5194_v18 = vld [vmem:[#allocation7 + $0x2f0] sm:$0xff] }
 0x9a5   :  { %5548 = vmatprep.subr.mxu0 %v5121_v32  ;;  %5625 = vmatprep.subr.mxu1 %v5123_v28  ;;  %v5189_v32 = vld [vmem:[#allocation7 + $0x2c8] sm:$0xff]  ;;  %v5191_v28 = vld [vmem:[#allocation7 + $0x2d8] sm:$0xff] }
 0x9a6   :  { %5549 = vmatpush1.msra.mxu0 %v5120_v29  ;;  %5626 = vmatpush1.msra.mxu1 %v5122_v26  ;;  %v5188_v29 = vld [vmem:[#allocation7 + $0x2c0] sm:$0xff]  ;;  %v5190_v26 = vld [vmem:[#allocation7 + $0x2d0] sm:$0xff] }
 0x9a7   :  { %5550 = vmatprep.subr.mxu0 %v5117_v27  ;;  %5627 = vmatprep.subr.mxu1 %v5119_v38  ;;  %v5185_v27 = vld [vmem:[#allocation7 + $0x2a8] sm:$0xff]  ;;  %v5187_v38 = vld [vmem:[#allocation7 + $0x2b8] sm:$0xff] }
 0x9a8   :  { %5551 = vmatpush1.msra.mxu0 %v5116_v40  ;;  %5628 = vmatpush1.msra.mxu1 %v5118_v23  ;;  %v5184_v40 = vld [vmem:[#allocation7 + $0x2a0] sm:$0xff]  ;;  %v5186_v23 = vld [vmem:[#allocation7 + $0x2b0] sm:$0xff] }
 0x9a9   :  { %5552 = vmatprep.subr.mxu0 %v5113_v41  ;;  %5629 = vmatprep.subr.mxu1 %v5115_v13  ;;  %v5181_v41 = vld [vmem:[#allocation7 + $0x288] sm:$0xff]  ;;  %v5183_v13 = vld [vmem:[#allocation7 + $0x298] sm:$0xff] }
 0x9aa   :  { %5553 = vmatpush1.msra.mxu0 %v5112_v20  ;;  %5630 = vmatpush1.msra.mxu1 %v5114_v0  ;;  %v5180_v20 = vld [vmem:[#allocation7 + $0x280] sm:$0xff]  ;;  %v5182_v0 = vld [vmem:[#allocation7 + $0x290] sm:$0xff] }
 0x9ab   :  { %5554 = vmatprep.subr.mxu0 %v5109_v19  ;;  %5631 = vmatprep.subr.mxu1 %v5111_v33  ;;  %v5177_v19 = vld [vmem:[#allocation7 + $0x268] sm:$0xff]  ;;  %v5179_v33 = vld [vmem:[#allocation7 + $0x278] sm:$0xff] }
 0x9ac   :  { %5555 = vmatpush1.msra.mxu0 %v5108_v35  ;;  %5632 = vmatpush1.msra.mxu1 %v5110_v37  ;;  %v5176_v35 = vld [vmem:[#allocation7 + $0x260] sm:$0xff]  ;;  %v5178_v37 = vld [vmem:[#allocation7 + $0x270] sm:$0xff] }
 0x9ad   :  { %5556 = vmatprep.subr.mxu0 %v5105_v14  ;;  %5633 = vmatprep.subr.mxu1 %v5107_v39  ;;  %v5173_v14 = vld [vmem:[#allocation7 + $0x248] sm:$0xff]  ;;  %v5175_v39 = vld [vmem:[#allocation7 + $0x258] sm:$0xff] }
 0x9ae   :  { %5557 = vmatpush1.msra.mxu0 %v5104_v43  ;;  %5634 = vmatpush1.msra.mxu1 %v5106_v44  ;;  %v5172_v43 = vld [vmem:[#allocation7 + $0x240] sm:$0xff]  ;;  %v5174_v44 = vld [vmem:[#allocation7 + $0x250] sm:$0xff] }
 0x9af   :  { %5558 = vmatprep.subr.mxu0 %v5101_v17  ;;  %5635 = vmatprep.subr.mxu1 %v5103_v30  ;;  %v5169_v17 = vld [vmem:[#allocation7 + $0x228] sm:$0xff]  ;;  %v5171_v30 = vld [vmem:[#allocation7 + $0x238] sm:$0xff] }
 0x9b0   :  { %5559 = vmatpush1.msra.mxu0 %v5100_v42  ;;  %5636 = vmatpush1.msra.mxu1 %v5102_v59  ;;  %v5168_v42 = vld [vmem:[#allocation7 + $0x220] sm:$0xff]  ;;  %v5170_v59 = vld [vmem:[#allocation7 + $0x230] sm:$0xff] }
 0x9b1   :  { %5560 = vmatprep.subr.mxu0 %v5225_v24  ;;  %5637 = vmatprep.subr.mxu1 %v5227_v57  ;;  %v5165_v24 = vld [vmem:[#allocation7 + $0x208] sm:$0xff]  ;;  %v5167_v57 = vld [vmem:[#allocation7 + $0x218] sm:$0xff] }
 0x9b2   :  { %5561 = vmatpush2.msra.mxu0 %v5224_v36  ;;  %5638 = vmatpush2.msra.mxu1 %v5226_v2  ;;  %v5164_v36 = vld [vmem:[#allocation7 + $0x200] sm:$0xff]  ;;  %v5166_v2 = vld [vmem:[#allocation7 + $0x210] sm:$0xff] }
 0x9b3   :  { %5562 = vmatprep.subr.mxu0 %v5221_v9  ;;  %5639 = vmatprep.subr.mxu1 %v5223_v49  ;;  %v5747_v9 = vld [vmem:[#allocation7 + $0x9e8] sm:$0xff]  ;;  %v5749_v49 = vld [vmem:[#allocation7 + $0x9f8] sm:$0xff] }
 0x9b4   :  { %5563 = vmatpush2.msra.mxu0 %v5220_v31  ;;  %5640 = vmatpush2.msra.mxu1 %v5222_v62  ;;  %v5746_v31 = vld [vmem:[#allocation7 + $0x9e0] sm:$0xff]  ;;  %v5748_v62 = vld [vmem:[#allocation7 + $0x9f0] sm:$0xff] }
 0x9b5   :  { %5564 = vmatprep.subr.mxu0 %v5217_v63  ;;  %5641 = vmatprep.subr.mxu1 %v5219_v25  ;;  %v5685_v63 = vld [vmem:[#allocation2 + $0x8] sm:$0x3f] }
 0x9b6   :  { %5565 = vmatpush2.msra.mxu0 %v5216_v52  ;;  %5642 = vmatpush2.msra.mxu1 %v5218_v61  ;;  %v5099_v25 = vld [vmem:[#allocation2 + $0x8] sm:$0xf]  ;;  %v5743_v52 = vld [vmem:[#allocation7 + $0x9c8] sm:$0xff] }
 0x9b7   :  { %5566 = vmatprep.subr.mxu0 %v5213_v3  ;;  %5643 = vmatprep.subr.mxu1 %v5215_v4  ;;  %v5745_v61 = vld [vmem:[#allocation7 + $0x9d8] sm:$0xff]  ;;  %v5742_v3 = vld [vmem:[#allocation7 + $0x9c0] sm:$0xff]  ;;  %v5744_v4 = vld [vmem:[#allocation7 + $0x9d0] sm:$0xff] }
 0x9b8   :  { %5567 = vmatpush2.msra.mxu0 %v5212_v56  ;;  %5644 = vmatpush2.msra.mxu1 %v5214_v7  ;;  %v5683_v56 = vld [vmem:[#allocation2] sm:$0xfc]  ;;  %v9079_v7 = vrot.slane %v5685_v63, 2  ;;  %v5690_v63 = vld [vmem:[#allocation7 + $0x820] sm:$0xff] }
 0x9b9   :  { %5568 = vmatprep.subr.mxu0 %v5209_v58  ;;  %5645 = vmatprep.subr.mxu1 %v5211_v45  ;;  %v5741_v58 = vld [vmem:[#allocation7 + $0x9b8] sm:$0xff]  ;;  %v5098_v45 = vld [vmem:[#allocation2 + $0x18] sm:$0xf] }
 0x9ba   :  { %5569 = vmatpush2.msra.mxu0 %v5208_v46  ;;  %5646 = vmatpush2.msra.mxu1 %v5210_v55  ;;  %v5738_v46 = vld [vmem:[#allocation7 + $0x9a0] sm:$0xff]  ;;  %v5821_v55 = vrot.slane %v5683_v56, 2  ;;  %v5811_v56 = vld [vmem:[#allocation7 + $0xbe8] sm:$0xff] }
 0x9bb   :  { %5570 = vmatprep.subr.mxu0 %v5205_v54  ;;  %5647 = vmatprep.subr.mxu1 %v5207_v47  ;;  %v5740_v54 = vld [vmem:[#allocation7 + $0x9b0] sm:$0xff] }
 0x9bc   :  { %5571 = vmatpush2.msra.mxu0 %v5204_v60  ;;  %5648 = vmatpush2.msra.mxu1 %v5206_v21  ;;  %v5823_v47 = vsel %vm867_vm0, %v5821_v55, %v9079_v7  ;;  %v5735_v60 = vld [vmem:[#allocation7 + $0x988] sm:$0xff]  ;;  %v5737_v21 = vld [vmem:[#allocation7 + $0x998] sm:$0xff] }
 0x9bd   :  { %5572 = vmatprep.subr.mxu0 %v5201_v1  ;;  %5649 = vmatprep.subr.mxu1 %v5203_v6  ;;  %v5734_v1 = vld [vmem:[#allocation7 + $0x980] sm:$0xff]  ;;  %v5736_v6 = vld [vmem:[#allocation7 + $0x990] sm:$0xff]  ;;  %v5809_v55 = vld [vmem:[#allocation7 + $0xbd8] sm:$0xff] }
 0x9be   :  { %5573 = vmatpush2.msra.mxu0 %v5200_v8  ;;  %5650 = vmatpush2.msra.mxu1 %v5202_v11  ;;  %v5731_v8 = vld [vmem:[#allocation7 + $0x968] sm:$0xff]  ;;  %v5733_v11 = vld [vmem:[#allocation7 + $0x978] sm:$0xff] }
 0x9bf   :  { %5574 = vmatprep.subr.mxu0 %v5197_v12  ;;  %5651 = vmatprep.subr.mxu1 %v5199_v15  ;;  %v5730_v12 = vld [vmem:[#allocation7 + $0x960] sm:$0xff]  ;;  %v5732_v15 = vld [vmem:[#allocation7 + $0x970] sm:$0xff] }
 0x9c0   :  { %5575 = vmatpush2.msra.mxu0 %v5196_v51  ;;  %5652 = vmatpush2.msra.mxu1 %v5198_v53  ;;  %v5727_v51 = vld [vmem:[#allocation7 + $0x948] sm:$0xff]  ;;  %v5729_v53 = vld [vmem:[#allocation7 + $0x958] sm:$0xff] }
 0x9c1   :  { %5576 = vmatprep.subr.mxu0 %v5193_v16  ;;  %5653 = vmatprep.subr.mxu1 %v5195_v50  ;;  %v5726_v16 = vld [vmem:[#allocation7 + $0x940] sm:$0xff]  ;;  %v5728_v50 = vld [vmem:[#allocation7 + $0x950] sm:$0xff] }
 0x9c2   :  { %5577 = vmatpush2.msra.mxu0 %v5192_v10  ;;  %5654 = vmatpush2.msra.mxu1 %v5194_v18  ;;  %v5723_v10 = vld [vmem:[#allocation7 + $0x928] sm:$0xff]  ;;  %v5725_v18 = vld [vmem:[#allocation7 + $0x938] sm:$0xff] }
 0x9c3   :  { %5578 = vmatprep.subr.mxu0 %v5189_v32  ;;  %5655 = vmatprep.subr.mxu1 %v5191_v28  ;;  %v5722_v32 = vld [vmem:[#allocation7 + $0x920] sm:$0xff]  ;;  %v5724_v28 = vld [vmem:[#allocation7 + $0x930] sm:$0xff] }
 0x9c4   :  { %5579 = vmatpush2.msra.mxu0 %v5188_v29  ;;  %5656 = vmatpush2.msra.mxu1 %v5190_v26  ;;  %v5719_v29 = vld [vmem:[#allocation7 + $0x908] sm:$0xff]  ;;  %v5721_v26 = vld [vmem:[#allocation7 + $0x918] sm:$0xff] }
 0x9c5   :  { %5580 = vmatprep.subr.mxu0 %v5185_v27  ;;  %5657 = vmatprep.subr.mxu1 %v5187_v38  ;;  %v5718_v27 = vld [vmem:[#allocation7 + $0x900] sm:$0xff]  ;;  %v5720_v38 = vld [vmem:[#allocation7 + $0x910] sm:$0xff] }
 0x9c6   :  { %5581 = vmatpush2.msra.mxu0 %v5184_v40  ;;  %5658 = vmatpush2.msra.mxu1 %v5186_v23  ;;  %v5715_v40 = vld [vmem:[#allocation7 + $0x8e8] sm:$0xff]  ;;  %v5717_v23 = vld [vmem:[#allocation7 + $0x8f8] sm:$0xff] }
 0x9c7   :  { %5582 = vmatprep.subr.mxu0 %v5181_v41  ;;  %5659 = vmatprep.subr.mxu1 %v5183_v13  ;;  %v5714_v41 = vld [vmem:[#allocation7 + $0x8e0] sm:$0xff]  ;;  %v5716_v13 = vld [vmem:[#allocation7 + $0x8f0] sm:$0xff] }
 0x9c8   :  { %5583 = vmatpush2.msra.mxu0 %v5180_v20  ;;  %5660 = vmatpush2.msra.mxu1 %v5182_v0  ;;  %v5711_v20 = vld [vmem:[#allocation7 + $0x8c8] sm:$0xff]  ;;  %v5713_v0 = vld [vmem:[#allocation7 + $0x8d8] sm:$0xff] }
 0x9c9   :  { %5584 = vmatprep.subr.mxu0 %v5177_v19  ;;  %5661 = vmatprep.subr.mxu1 %v5179_v33  ;;  %v5710_v19 = vld [vmem:[#allocation7 + $0x8c0] sm:$0xff]  ;;  %v5712_v33 = vld [vmem:[#allocation7 + $0x8d0] sm:$0xff] }
 0x9ca   :  { %5585 = vmatpush2.msra.mxu0 %v5176_v35  ;;  %5662 = vmatpush2.msra.mxu1 %v5178_v37  ;;  %v5707_v35 = vld [vmem:[#allocation7 + $0x8a8] sm:$0xff]  ;;  %v5709_v37 = vld [vmem:[#allocation7 + $0x8b8] sm:$0xff] }
 0x9cb   :  { %5586 = vmatprep.subr.mxu0 %v5173_v14  ;;  %5663 = vmatprep.subr.mxu1 %v5175_v39  ;;  %v5706_v14 = vld [vmem:[#allocation7 + $0x8a0] sm:$0xff]  ;;  %v5708_v39 = vld [vmem:[#allocation7 + $0x8b0] sm:$0xff] }
 0x9cc   :  { %5587 = vmatpush2.msra.mxu0 %v5172_v43  ;;  %5664 = vmatpush2.msra.mxu1 %v5174_v44  ;;  %v5703_v43 = vld [vmem:[#allocation7 + $0x888] sm:$0xff]  ;;  %v5705_v44 = vld [vmem:[#allocation7 + $0x898] sm:$0xff] }
 0x9cd   :  { %5588 = vmatprep.subr.mxu0 %v5169_v17  ;;  %5665 = vmatprep.subr.mxu1 %v5171_v30  ;;  %v5702_v17 = vld [vmem:[#allocation7 + $0x880] sm:$0xff]  ;;  %v5704_v30 = vld [vmem:[#allocation7 + $0x890] sm:$0xff] }
 0x9ce   :  { %5589 = vmatpush2.msra.mxu0 %v5168_v42  ;;  %5666 = vmatpush2.msra.mxu1 %v5170_v59  ;;  %v5699_v42 = vld [vmem:[#allocation7 + $0x868] sm:$0xff]  ;;  %v5701_v59 = vld [vmem:[#allocation7 + $0x878] sm:$0xff] }
 0x9cf   :  { %5590 = vmatprep.subr.mxu0 %v5165_v24  ;;  %5667 = vmatprep.subr.mxu1 %v5167_v57  ;;  %v5698_v24 = vld [vmem:[#allocation7 + $0x860] sm:$0xff]  ;;  %v5700_v57 = vld [vmem:[#allocation7 + $0x870] sm:$0xff] }
 0x9d0   :  { %5591 = vmatpush2.msra.mxu0 %v5164_v36  ;;  %5668 = vmatpush2.msra.mxu1 %v5166_v2  ;;  %v5695_v36 = vld [vmem:[#allocation7 + $0x848] sm:$0xff]  ;;  %v5697_v2 = vld [vmem:[#allocation7 + $0x858] sm:$0xff] }
 0x9d1   :  { %5593 = vmatmul.mubr.f32.vlgmr.msra.gmra.mxu0 %v9072_v48  ;;  %5670 = vmatmul.mubr.f32.vlgmr.msra.gmra.mxu1 %v9072_v48  ;;  %v5739_v48 = vld [vmem:[#allocation7 + $0x9a8] sm:$0xff] }
 0x9d2   :  { %5828 = vmatprep.subr.mxu0 %v5747_v9  ;;  %5905 = vmatprep.subr.mxu1 %v5749_v49  ;;  %v5694_v9 = vld [vmem:[#allocation7 + $0x840] sm:$0xff]  ;;  %v5696_v49 = vld [vmem:[#allocation7 + $0x850] sm:$0xff] }
 0x9d3   :  { %5598 = vmatprep.mubr.f32.mxu0 %v5099_v25  ;;  %5675 = vmatprep.mubr.f32.mxu1 %v5099_v25  ;;  %v5692_v25 = vld [vmem:[#allocation7 + $0x830] sm:$0xff] }
 0x9d4   :  { %5829 = vmatpush1.msra.mxu0 %v5746_v31  ;;  %5906 = vmatpush1.msra.mxu1 %v5748_v62  ;;  %v5691_v31 = vld [vmem:[#allocation7 + $0x828] sm:$0xff]  ;;  %v5693_v62 = vld [vmem:[#allocation7 + $0x838] sm:$0xff] }
 0x9d5   :  { %5830 = vmatprep.subr.mxu0 %v5743_v52  ;;  %5907 = vmatprep.subr.mxu1 %v5745_v61  ;;  %v5687_v52 = vld [vmem:[#allocation7 + $0x808] sm:$0xff]  ;;  %v5689_v61 = vld [vmem:[#allocation7 + $0x818] sm:$0xff] }
 0x9d6   :  { %5831 = vmatpush1.msra.mxu0 %v5742_v3  ;;  %5908 = vmatpush1.msra.mxu1 %v5744_v4  ;;  %v5686_v3 = vld [vmem:[#allocation7 + $0x800] sm:$0xff]  ;;  %v5688_v4 = vld [vmem:[#allocation7 + $0x810] sm:$0xff] }
 0x9d7   :  { %5599 = vmatmul.mubr.f32.gmra.mxu0 %v5098_v45  ;;  %5676 = vmatmul.mubr.f32.gmra.mxu1 %v5098_v45  ;;  %v5812_v45 = vld [vmem:[#allocation7 + $0xbf0] sm:$0xff] }
 0x9d8   :  { %5832 = vmatprep.subr.mxu0 %v5739_v48  ;;  %5909 = vmatprep.subr.mxu1 %v5741_v58  ;;  %v5813_v48 = vld [vmem:[#allocation7 + $0xbf8] sm:$0xff]  ;;  %v5810_v58 = vld [vmem:[#allocation7 + $0xbe0] sm:$0xff] }
 0x9d9   :  { %5833 = vmatpush1.msra.mxu0 %v5738_v46  ;;  %5892 = vmatprep.mubr.f32.mxu0 %v5823_v47  ;;  %v5807_v46 = vld [vmem:[#allocation7 + $0xbc8] sm:$0xff] }
 0x9da   :  { %5910 = vmatpush1.msra.mxu1 %v5740_v54  ;;  %5969 = vmatprep.mubr.f32.mxu1 %v5823_v47  ;;  %v5806_v54 = vld [vmem:[#allocation7 + $0xbc0] sm:$0xff]  ;;  %v5808_v47 = vld [vmem:[#allocation7 + $0xbd0] sm:$0xff] }
 0x9db   :  { %5834 = vmatprep.subr.mxu0 %v5735_v60  ;;  %5911 = vmatprep.subr.mxu1 %v5737_v21  ;;  %v5803_v60 = vld [vmem:[#allocation7 + $0xba8] sm:$0xff]  ;;  %v5805_v21 = vld [vmem:[#allocation7 + $0xbb8] sm:$0xff] }
 0x9dc   :  { %5835 = vmatpush1.msra.mxu0 %v5734_v1  ;;  %5912 = vmatpush1.msra.mxu1 %v5736_v6  ;;  %v5802_v1 = vld [vmem:[#allocation7 + $0xba0] sm:$0xff]  ;;  %v5804_v6 = vld [vmem:[#allocation7 + $0xbb0] sm:$0xff] }
 0x9dd   :  { %5836 = vmatprep.subr.mxu0 %v5731_v8  ;;  %5913 = vmatprep.subr.mxu1 %v5733_v11  ;;  %v5799_v8 = vld [vmem:[#allocation7 + $0xb88] sm:$0xff]  ;;  %v5801_v11 = vld [vmem:[#allocation7 + $0xb98] sm:$0xff] }
 0x9de   :  { %5837 = vmatpush1.msra.mxu0 %v5730_v12  ;;  %5914 = vmatpush1.msra.mxu1 %v5732_v15  ;;  %v5798_v12 = vld [vmem:[#allocation7 + $0xb80] sm:$0xff]  ;;  %v5800_v15 = vld [vmem:[#allocation7 + $0xb90] sm:$0xff] }
 0x9df   :  { %5838 = vmatprep.subr.mxu0 %v5727_v51  ;;  %5915 = vmatprep.subr.mxu1 %v5729_v53  ;;  %v5795_v51 = vld [vmem:[#allocation7 + $0xb68] sm:$0xff]  ;;  %v5797_v53 = vld [vmem:[#allocation7 + $0xb78] sm:$0xff] }
 0x9e0   :  { %5839 = vmatpush1.msra.mxu0 %v5726_v16  ;;  %5916 = vmatpush1.msra.mxu1 %v5728_v50  ;;  %v5794_v16 = vld [vmem:[#allocation7 + $0xb60] sm:$0xff]  ;;  %v5796_v50 = vld [vmem:[#allocation7 + $0xb70] sm:$0xff] }
 0x9e1   :  { %5840 = vmatprep.subr.mxu0 %v5723_v10  ;;  %5917 = vmatprep.subr.mxu1 %v5725_v18  ;;  %v5791_v10 = vld [vmem:[#allocation7 + $0xb48] sm:$0xff]  ;;  %v5793_v18 = vld [vmem:[#allocation7 + $0xb58] sm:$0xff] }
 0x9e2   :  { %5841 = vmatpush1.msra.mxu0 %v5722_v32  ;;  %5918 = vmatpush1.msra.mxu1 %v5724_v28  ;;  %v5790_v32 = vld [vmem:[#allocation7 + $0xb40] sm:$0xff]  ;;  %v5792_v28 = vld [vmem:[#allocation7 + $0xb50] sm:$0xff] }
 0x9e3   :  { %5842 = vmatprep.subr.mxu0 %v5719_v29  ;;  %5919 = vmatprep.subr.mxu1 %v5721_v26  ;;  %v5787_v29 = vld [vmem:[#allocation7 + $0xb28] sm:$0xff]  ;;  %v5789_v26 = vld [vmem:[#allocation7 + $0xb38] sm:$0xff] }
 0x9e4   :  { %5843 = vmatpush1.msra.mxu0 %v5718_v27  ;;  %5920 = vmatpush1.msra.mxu1 %v5720_v38  ;;  %v5786_v27 = vld [vmem:[#allocation7 + $0xb20] sm:$0xff]  ;;  %v5788_v38 = vld [vmem:[#allocation7 + $0xb30] sm:$0xff] }
 0x9e5   :  { %5844 = vmatprep.subr.mxu0 %v5715_v40  ;;  %5921 = vmatprep.subr.mxu1 %v5717_v23  ;;  %v5783_v40 = vld [vmem:[#allocation7 + $0xb08] sm:$0xff]  ;;  %v5785_v23 = vld [vmem:[#allocation7 + $0xb18] sm:$0xff] }
 0x9e6   :  { %5845 = vmatpush1.msra.mxu0 %v5714_v41  ;;  %5922 = vmatpush1.msra.mxu1 %v5716_v13  ;;  %v5782_v41 = vld [vmem:[#allocation7 + $0xb00] sm:$0xff]  ;;  %v5784_v13 = vld [vmem:[#allocation7 + $0xb10] sm:$0xff] }
 0x9e7   :  { %5846 = vmatprep.subr.mxu0 %v5711_v20  ;;  %5923 = vmatprep.subr.mxu1 %v5713_v0  ;;  %v5779_v20 = vld [vmem:[#allocation7 + $0xae8] sm:$0xff]  ;;  %v5781_v0 = vld [vmem:[#allocation7 + $0xaf8] sm:$0xff] }
 0x9e8   :  { %5847 = vmatpush1.msra.mxu0 %v5710_v19  ;;  %5924 = vmatpush1.msra.mxu1 %v5712_v33  ;;  %v5778_v19 = vld [vmem:[#allocation7 + $0xae0] sm:$0xff]  ;;  %v5780_v33 = vld [vmem:[#allocation7 + $0xaf0] sm:$0xff] }
 0x9e9   :  { %5848 = vmatprep.subr.mxu0 %v5707_v35  ;;  %5925 = vmatprep.subr.mxu1 %v5709_v37  ;;  %v5775_v35 = vld [vmem:[#allocation7 + $0xac8] sm:$0xff]  ;;  %v5777_v37 = vld [vmem:[#allocation7 + $0xad8] sm:$0xff] }
 0x9ea   :  { %5849 = vmatpush1.msra.mxu0 %v5706_v14  ;;  %5926 = vmatpush1.msra.mxu1 %v5708_v39  ;;  %v5774_v14 = vld [vmem:[#allocation7 + $0xac0] sm:$0xff]  ;;  %v5776_v39 = vld [vmem:[#allocation7 + $0xad0] sm:$0xff] }
 0x9eb   :  { %5850 = vmatprep.subr.mxu0 %v5703_v43  ;;  %5927 = vmatprep.subr.mxu1 %v5705_v44  ;;  %v5771_v43 = vld [vmem:[#allocation7 + $0xaa8] sm:$0xff]  ;;  %v5773_v44 = vld [vmem:[#allocation7 + $0xab8] sm:$0xff] }
 0x9ec   :  { %5851 = vmatpush1.msra.mxu0 %v5702_v17  ;;  %5928 = vmatpush1.msra.mxu1 %v5704_v30  ;;  %v5770_v17 = vld [vmem:[#allocation7 + $0xaa0] sm:$0xff]  ;;  %v5772_v30 = vld [vmem:[#allocation7 + $0xab0] sm:$0xff] }
 0x9ed   :  { %5852 = vmatprep.subr.mxu0 %v5699_v42  ;;  %5929 = vmatprep.subr.mxu1 %v5701_v59  ;;  %v5767_v42 = vld [vmem:[#allocation7 + $0xa88] sm:$0xff]  ;;  %v5769_v59 = vld [vmem:[#allocation7 + $0xa98] sm:$0xff] }
 0x9ee   :  { %5853 = vmatpush1.msra.mxu0 %v5698_v24  ;;  %5930 = vmatpush1.msra.mxu1 %v5700_v57  ;;  %v5766_v24 = vld [vmem:[#allocation7 + $0xa80] sm:$0xff]  ;;  %v5768_v57 = vld [vmem:[#allocation7 + $0xa90] sm:$0xff] }
 0x9ef   :  { %5854 = vmatprep.subr.mxu0 %v5695_v36  ;;  %5931 = vmatprep.subr.mxu1 %v5697_v2  ;;  %v5763_v36 = vld [vmem:[#allocation7 + $0xa68] sm:$0xff]  ;;  %v5765_v2 = vld [vmem:[#allocation7 + $0xa78] sm:$0xff] }
 0x9f0   :  { %5855 = vmatpush1.msra.mxu0 %v5694_v9  ;;  %5932 = vmatpush1.msra.mxu1 %v5696_v49  ;;  %v5762_v9 = vld [vmem:[#allocation7 + $0xa60] sm:$0xff]  ;;  %v5764_v49 = vld [vmem:[#allocation7 + $0xa70] sm:$0xff] }
 0x9f1   :  { %5856 = vmatprep.subr.mxu0 %v5691_v31  ;;  %5933 = vmatprep.subr.mxu1 %v5693_v62  ;;  %v5759_v31 = vld [vmem:[#allocation7 + $0xa48] sm:$0xff]  ;;  %v5761_v62 = vld [vmem:[#allocation7 + $0xa58] sm:$0xff] }
 0x9f2   :  { %5857 = vmatpush1.msra.mxu0 %v5690_v63  ;;  %5934 = vmatpush1.msra.mxu1 %v5692_v25  ;;  %v5758_v63 = vld [vmem:[#allocation7 + $0xa40] sm:$0xff]  ;;  %v5760_v25 = vld [vmem:[#allocation7 + $0xa50] sm:$0xff] }
 0x9f3   :  { %5858 = vmatprep.subr.mxu0 %v5687_v52  ;;  %5935 = vmatprep.subr.mxu1 %v5689_v61  ;;  %v5684_v52 = vld [vmem:[#allocation2 + $0x18] sm:$0x3f] }
 0x9f4   :  { %5859 = vmatpush1.msra.mxu0 %v5686_v3  ;;  %5936 = vmatpush1.msra.mxu1 %v5688_v4  ;;  %v5755_v61 = vld [vmem:[#allocation7 + $0xa28] sm:$0xff]  ;;  %v5757_v3 = vld [vmem:[#allocation7 + $0xa38] sm:$0xff]  ;;  %v5754_v4 = vld [vmem:[#allocation7 + $0xa20] sm:$0xff] }
 0x9f5   :  { %5860 = vmatprep.subr.mxu0 %v5811_v56  ;;  %5937 = vmatprep.subr.mxu1 %v5813_v48  ;;  %v5756_v56 = vld [vmem:[#allocation7 + $0xa30] sm:$0xff]  ;;  %v5682_v48 = vld [vmem:[#allocation2 + $0x10] sm:$0xfc] }
 0x9f6   :  { %5861 = vmatpush2.msra.mxu0 %v5810_v58  ;;  %5938 = vmatpush2.msra.mxu1 %v5812_v45  ;;  %v5751_v58 = vld [vmem:[#allocation7 + $0xa08] sm:$0xff]  ;;  %v5753_v45 = vld [vmem:[#allocation7 + $0xa18] sm:$0xff] }
 0x9f7   :  { %5862 = vmatprep.subr.mxu0 %v5807_v46  ;;  %5939 = vmatprep.subr.mxu1 %v5809_v55  ;;  %v5819_v46 = vrot.slane %v5684_v52, 2  ;;  %v5750_v55 = vld [vmem:[#allocation7 + $0xa00] sm:$0xff]  ;;  %v6016_v52 = vld [vmem:[#allocation7 + $0xcb0] sm:$0xff] }
 0x9f8   :  { %5863 = vmatpush2.msra.mxu0 %v5806_v54  ;;  %5940 = vmatpush2.msra.mxu1 %v5808_v47  ;;  %v5752_v54 = vld [vmem:[#allocation7 + $0xa10] sm:$0xff]  ;;  %v5818_v47 = vrot.slane %v5682_v48, 2  ;;  %v6007_v48 = vld [vmem:[#allocation7 + $0xc68] sm:$0xff] }
 0x9f9   :  { %5864 = vmatprep.subr.mxu0 %v5803_v60  ;;  %5941 = vmatprep.subr.mxu1 %v5805_v21  ;;  %v6055_v60 = vld [vmem:[#allocation7 + $0xde8] sm:$0xff]  ;;  %v6057_v21 = vld [vmem:[#allocation7 + $0xdf8] sm:$0xff] }
 0x9fa   :  { %5865 = vmatpush2.msra.mxu0 %v5802_v1  ;;  %5942 = vmatpush2.msra.mxu1 %v5804_v6  ;;  %v5820_v1 = vsel %vm867_vm0, %v5818_v47, %v5819_v46  ;;  %v6054_v6 = vld [vmem:[#allocation7 + $0xde0] sm:$0xff] }
 0x9fb   :  { %5866 = vmatprep.subr.mxu0 %v5799_v8  ;;  %5943 = vmatprep.subr.mxu1 %v5801_v11  ;;  %v6056_v8 = vld [vmem:[#allocation7 + $0xdf0] sm:$0xff]  ;;  %v5993_v11 = vld [vmem:[#allocation2 + $0x8] sm:$0x7f]  ;;  %v6002_v47 = vld [vmem:[#allocation7 + $0xc40] sm:$0xff] }
 0x9fc   :  { %5867 = vmatpush2.msra.mxu0 %v5798_v12  ;;  %5944 = vmatpush2.msra.mxu1 %v5800_v15  ;;  %v6051_v12 = vld [vmem:[#allocation7 + $0xdc8] sm:$0xff]  ;;  %v6053_v15 = vld [vmem:[#allocation7 + $0xdd8] sm:$0xff] }
 0x9fd   :  { %5868 = vmatprep.subr.mxu0 %v5795_v51  ;;  %5945 = vmatprep.subr.mxu1 %v5797_v53  ;;  %v6050_v51 = vld [vmem:[#allocation7 + $0xdc0] sm:$0xff]  ;;  %v6052_v53 = vld [vmem:[#allocation7 + $0xdd0] sm:$0xff] }
 0x9fe   :  { %5869 = vmatpush2.msra.mxu0 %v5794_v16  ;;  %5946 = vmatpush2.msra.mxu1 %v5796_v50  ;;  %v5991_v16 = vld [vmem:[#allocation2] sm:$0xf8]  ;;  %v9086_v50 = vrot.slane %v5993_v11, 3  ;;  %v5995_v11 = vld [vmem:[#allocation7 + $0xc08] sm:$0xff] }
 0x9ff   :  { %5870 = vmatprep.subr.mxu0 %v5791_v10  ;;  %5947 = vmatprep.subr.mxu1 %v5793_v18  ;;  %v6047_v10 = vld [vmem:[#allocation7 + $0xda8] sm:$0xff]  ;;  %v6049_v18 = vld [vmem:[#allocation7 + $0xdb8] sm:$0xff] }
 0xa00   :  { %5871 = vmatpush2.msra.mxu0 %v5790_v32  ;;  %5948 = vmatpush2.msra.mxu1 %v5792_v28  ;;  %v6046_v32 = vld [vmem:[#allocation7 + $0xda0] sm:$0xff]  ;;  %v6129_v28 = vrot.slane %v5991_v16, 3  ;;  %v6121_v16 = vld [vmem:[#allocation7 + $0xff8] sm:$0xff] }
 0xa01   :  { %5872 = vmatprep.subr.mxu0 %v5787_v29  ;;  %5949 = vmatprep.subr.mxu1 %v5789_v26  ;;  %v6048_v29 = vld [vmem:[#allocation7 + $0xdb0] sm:$0xff]  ;;  %v6043_v26 = vld [vmem:[#allocation7 + $0xd88] sm:$0xff] }
 0xa02   :  { %5873 = vmatpush2.msra.mxu0 %v5786_v27  ;;  %5950 = vmatpush2.msra.mxu1 %v5788_v38  ;;  %v6045_v27 = vld [vmem:[#allocation7 + $0xd98] sm:$0xff]  ;;  %v6042_v38 = vld [vmem:[#allocation7 + $0xd80] sm:$0xff] }
 0xa03   :  { %5874 = vmatprep.subr.mxu0 %v5783_v40  ;;  %5951 = vmatprep.subr.mxu1 %v5785_v23  ;;  %v6044_v40 = vld [vmem:[#allocation7 + $0xd90] sm:$0xff]  ;;  %v6039_v23 = vld [vmem:[#allocation7 + $0xd68] sm:$0xff] }
 0xa04   :  { %5875 = vmatpush2.msra.mxu0 %v5782_v41  ;;  %5952 = vmatpush2.msra.mxu1 %v5784_v13  ;;  %v6041_v41 = vld [vmem:[#allocation7 + $0xd78] sm:$0xff]  ;;  %v6038_v13 = vld [vmem:[#allocation7 + $0xd60] sm:$0xff] }
 0xa05   :  { %5876 = vmatprep.subr.mxu0 %v5779_v20  ;;  %5953 = vmatprep.subr.mxu1 %v5781_v0  ;;  %v6040_v20 = vld [vmem:[#allocation7 + $0xd70] sm:$0xff]  ;;  %v6035_v0 = vld [vmem:[#allocation7 + $0xd48] sm:$0xff] }
 0xa06   :  { %5877 = vmatpush2.msra.mxu0 %v5778_v19  ;;  %5954 = vmatpush2.msra.mxu1 %v5780_v33  ;;  %v6037_v19 = vld [vmem:[#allocation7 + $0xd58] sm:$0xff]  ;;  %v6034_v33 = vld [vmem:[#allocation7 + $0xd40] sm:$0xff] }
 0xa07   :  { %5878 = vmatprep.subr.mxu0 %v5775_v35  ;;  %5955 = vmatprep.subr.mxu1 %v5777_v37  ;;  %v6036_v35 = vld [vmem:[#allocation7 + $0xd50] sm:$0xff]  ;;  %v6031_v37 = vld [vmem:[#allocation7 + $0xd28] sm:$0xff] }
 0xa08   :  { %5879 = vmatpush2.msra.mxu0 %v5774_v14  ;;  %5956 = vmatpush2.msra.mxu1 %v5776_v39  ;;  %v6033_v14 = vld [vmem:[#allocation7 + $0xd38] sm:$0xff]  ;;  %v6030_v39 = vld [vmem:[#allocation7 + $0xd20] sm:$0xff] }
 0xa09   :  { %5880 = vmatprep.subr.mxu0 %v5771_v43  ;;  %5957 = vmatprep.subr.mxu1 %v5773_v44  ;;  %v6032_v43 = vld [vmem:[#allocation7 + $0xd30] sm:$0xff]  ;;  %v6027_v44 = vld [vmem:[#allocation7 + $0xd08] sm:$0xff] }
 0xa0a   :  { %5881 = vmatpush2.msra.mxu0 %v5770_v17  ;;  %5958 = vmatpush2.msra.mxu1 %v5772_v30  ;;  %v6029_v17 = vld [vmem:[#allocation7 + $0xd18] sm:$0xff]  ;;  %v6026_v30 = vld [vmem:[#allocation7 + $0xd00] sm:$0xff] }
 0xa0b   :  { %5882 = vmatprep.subr.mxu0 %v5767_v42  ;;  %5959 = vmatprep.subr.mxu1 %v5769_v59  ;;  %v6028_v42 = vld [vmem:[#allocation7 + $0xd10] sm:$0xff]  ;;  %v6023_v59 = vld [vmem:[#allocation7 + $0xce8] sm:$0xff] }
 0xa0c   :  { %5883 = vmatpush2.msra.mxu0 %v5766_v24  ;;  %5960 = vmatpush2.msra.mxu1 %v5768_v57  ;;  %v6025_v24 = vld [vmem:[#allocation7 + $0xcf8] sm:$0xff]  ;;  %v6022_v57 = vld [vmem:[#allocation7 + $0xce0] sm:$0xff] }
 0xa0d   :  { %5884 = vmatprep.subr.mxu0 %v5763_v36  ;;  %5961 = vmatprep.subr.mxu1 %v5765_v2  ;;  %v6024_v36 = vld [vmem:[#allocation7 + $0xcf0] sm:$0xff]  ;;  %v6019_v2 = vld [vmem:[#allocation7 + $0xcc8] sm:$0xff] }
 0xa0e   :  { %5885 = vmatpush2.msra.mxu0 %v5762_v9  ;;  %5962 = vmatpush2.msra.mxu1 %v5764_v49  ;;  %v6021_v9 = vld [vmem:[#allocation7 + $0xcd8] sm:$0xff]  ;;  %v6018_v49 = vld [vmem:[#allocation7 + $0xcc0] sm:$0xff] }
 0xa0f   :  { %5886 = vmatprep.subr.mxu0 %v5759_v31  ;;  %5963 = vmatprep.subr.mxu1 %v5761_v62  ;;  %v6020_v31 = vld [vmem:[#allocation7 + $0xcd0] sm:$0xff]  ;;  %v6015_v62 = vld [vmem:[#allocation7 + $0xca8] sm:$0xff] }
 0xa10   :  { %5887 = vmatpush2.msra.mxu0 %v5758_v63  ;;  %5964 = vmatpush2.msra.mxu1 %v5760_v25  ;;  %v6017_v63 = vld [vmem:[#allocation7 + $0xcb8] sm:$0xff]  ;;  %v6014_v25 = vld [vmem:[#allocation7 + $0xca0] sm:$0xff] }
 0xa11   :  { %5888 = vmatprep.subr.mxu0 %v5755_v61  ;;  %5965 = vmatprep.subr.mxu1 %v5757_v3  ;;  %v6011_v61 = vld [vmem:[#allocation7 + $0xc88] sm:$0xff]  ;;  %v6013_v3 = vld [vmem:[#allocation7 + $0xc98] sm:$0xff] }
 0xa12   :  { %5889 = vmatpush2.msra.mxu0 %v5754_v4  ;;  %5966 = vmatpush2.msra.mxu1 %v5756_v56  ;;  %v6010_v4 = vld [vmem:[#allocation7 + $0xc80] sm:$0xff]  ;;  %v6012_v56 = vld [vmem:[#allocation7 + $0xc90] sm:$0xff] }
 0xa13   :  { %5890 = vmatprep.subr.mxu0 %v5751_v58  ;;  %5967 = vmatprep.subr.mxu1 %v5753_v45  ;;  %v6009_v58 = vld [vmem:[#allocation7 + $0xc78] sm:$0xff]  ;;  %v6006_v45 = vld [vmem:[#allocation7 + $0xc60] sm:$0xff] }
 0xa14   :  { %5891 = vmatpush2.msra.mxu0 %v5750_v55  ;;  %5968 = vmatpush2.msra.mxu1 %v5752_v54  ;;  %v6003_v55 = vld [vmem:[#allocation7 + $0xc48] sm:$0xff]  ;;  %v6005_v54 = vld [vmem:[#allocation7 + $0xc58] sm:$0xff] }
 0xa15   :  { %5893 = vmatmul.mubr.f32.vlgmr.msra.gmra.mxu0 %v5820_v1  ;;  %5970 = vmatmul.mubr.f32.vlgmr.msra.gmra.mxu1 %v5820_v1  ;;  %v6001_v1 = vld [vmem:[#allocation7 + $0xc38] sm:$0xff] }
 0xa16   :  { %6136 = vmatprep.subr.mxu0 %v6055_v60  ;;  %6213 = vmatprep.subr.mxu1 %v6057_v21  ;;  %v6004_v60 = vld [vmem:[#allocation7 + $0xc50] sm:$0xff]  ;;  %v5999_v21 = vld [vmem:[#allocation7 + $0xc28] sm:$0xff] }
 0xa17   :  { %5898 = vmatprep.mubr.f32.mxu0 %v9079_v7  ;;  %5975 = vmatprep.mubr.f32.mxu1 %v9079_v7  ;;  %v6131_v7 = vsel %vm2080_vm7, %v6129_v28, %v9086_v50  ;;  %v6117_v28 = vld [vmem:[#allocation7 + $0xfd8] sm:$0xff] }
 0xa18   :  { %6137 = vmatpush1.msra.mxu0 %v6054_v6  ;;  %6214 = vmatpush1.msra.mxu1 %v6056_v8  ;;  %v5998_v6 = vld [vmem:[#allocation7 + $0xc20] sm:$0xff]  ;;  %v6000_v8 = vld [vmem:[#allocation7 + $0xc30] sm:$0xff] }
 0xa19   :  { %6138 = vmatprep.subr.mxu0 %v6051_v12  ;;  %6215 = vmatprep.subr.mxu1 %v6053_v15  ;;  %v5997_v12 = vld [vmem:[#allocation7 + $0xc18] sm:$0xff]  ;;  %v5994_v15 = vld [vmem:[#allocation7 + $0xc00] sm:$0xff] }
 0xa1a   :  { %6139 = vmatpush1.msra.mxu0 %v6050_v51  ;;  %6216 = vmatpush1.msra.mxu1 %v6052_v53  ;;  %v5996_v51 = vld [vmem:[#allocation7 + $0xc10] sm:$0xff]  ;;  %v6119_v53 = vld [vmem:[#allocation7 + $0xfe8] sm:$0xff] }
 0xa1b   :  { %5899 = vmatmul.mubr.f32.gmra.mxu0 %v5819_v46  ;;  %5976 = vmatmul.mubr.f32.gmra.mxu1 %v5819_v46  ;;  %v6008_v46 = vld [vmem:[#allocation7 + $0xc70] sm:$0xff] }
 0xa1c   :  { %6140 = vmatprep.subr.mxu0 %v6047_v10  ;;  %6217 = vmatprep.subr.mxu1 %v6049_v18  ;;  %v6118_v10 = vld [vmem:[#allocation7 + $0xfe0] sm:$0xff]  ;;  %v6120_v18 = vld [vmem:[#allocation7 + $0xff0] sm:$0xff] }
 0xa1d   :  { %6141 = vmatpush1.msra.mxu0 %v6046_v32  ;;  %6200 = vmatprep.mubr.f32.mxu0 %v6131_v7  ;;  %v6115_v32 = vld [vmem:[#allocation7 + $0xfc8] sm:$0xff] }
 0xa1e   :  { %6218 = vmatpush1.msra.mxu1 %v6048_v29  ;;  %6277 = vmatprep.mubr.f32.mxu1 %v6131_v7  ;;  %v6114_v29 = vld [vmem:[#allocation7 + $0xfc0] sm:$0xff]  ;;  %v6116_v7 = vld [vmem:[#allocation7 + $0xfd0] sm:$0xff] }
 0xa1f   :  { %6142 = vmatprep.subr.mxu0 %v6043_v26  ;;  %6219 = vmatprep.subr.mxu1 %v6045_v27  ;;  %v6111_v26 = vld [vmem:[#allocation7 + $0xfa8] sm:$0xff]  ;;  %v6113_v27 = vld [vmem:[#allocation7 + $0xfb8] sm:$0xff] }
 0xa20   :  { %6143 = vmatpush1.msra.mxu0 %v6042_v38  ;;  %6220 = vmatpush1.msra.mxu1 %v6044_v40  ;;  %v6110_v38 = vld [vmem:[#allocation7 + $0xfa0] sm:$0xff]  ;;  %v6112_v40 = vld [vmem:[#allocation7 + $0xfb0] sm:$0xff] }
 0xa21   :  { %6144 = vmatprep.subr.mxu0 %v6039_v23  ;;  %6221 = vmatprep.subr.mxu1 %v6041_v41  ;;  %v6107_v23 = vld [vmem:[#allocation7 + $0xf88] sm:$0xff]  ;;  %v6109_v41 = vld [vmem:[#allocation7 + $0xf98] sm:$0xff] }
 0xa22   :  { %6145 = vmatpush1.msra.mxu0 %v6038_v13  ;;  %6222 = vmatpush1.msra.mxu1 %v6040_v20  ;;  %v6106_v13 = vld [vmem:[#allocation7 + $0xf80] sm:$0xff]  ;;  %v6108_v20 = vld [vmem:[#allocation7 + $0xf90] sm:$0xff] }
 0xa23   :  { %6146 = vmatprep.subr.mxu0 %v6035_v0  ;;  %6223 = vmatprep.subr.mxu1 %v6037_v19  ;;  %v6103_v0 = vld [vmem:[#allocation7 + $0xf68] sm:$0xff]  ;;  %v6105_v19 = vld [vmem:[#allocation7 + $0xf78] sm:$0xff] }
 0xa24   :  { %6147 = vmatpush1.msra.mxu0 %v6034_v33  ;;  %6224 = vmatpush1.msra.mxu1 %v6036_v35  ;;  %v6102_v33 = vld [vmem:[#allocation7 + $0xf60] sm:$0xff]  ;;  %v6104_v35 = vld [vmem:[#allocation7 + $0xf70] sm:$0xff] }
 0xa25   :  { %6148 = vmatprep.subr.mxu0 %v6031_v37  ;;  %6225 = vmatprep.subr.mxu1 %v6033_v14  ;;  %v6099_v37 = vld [vmem:[#allocation7 + $0xf48] sm:$0xff]  ;;  %v6101_v14 = vld [vmem:[#allocation7 + $0xf58] sm:$0xff] }
 0xa26   :  { %6149 = vmatpush1.msra.mxu0 %v6030_v39  ;;  %6226 = vmatpush1.msra.mxu1 %v6032_v43  ;;  %v6098_v39 = vld [vmem:[#allocation7 + $0xf40] sm:$0xff]  ;;  %v6100_v43 = vld [vmem:[#allocation7 + $0xf50] sm:$0xff] }
 0xa27   :  { %6150 = vmatprep.subr.mxu0 %v6027_v44  ;;  %6227 = vmatprep.subr.mxu1 %v6029_v17  ;;  %v6095_v44 = vld [vmem:[#allocation7 + $0xf28] sm:$0xff]  ;;  %v6097_v17 = vld [vmem:[#allocation7 + $0xf38] sm:$0xff] }
 0xa28   :  { %6151 = vmatpush1.msra.mxu0 %v6026_v30  ;;  %6228 = vmatpush1.msra.mxu1 %v6028_v42  ;;  %v6094_v30 = vld [vmem:[#allocation7 + $0xf20] sm:$0xff]  ;;  %v6096_v42 = vld [vmem:[#allocation7 + $0xf30] sm:$0xff] }
 0xa29   :  { %6152 = vmatprep.subr.mxu0 %v6023_v59  ;;  %6229 = vmatprep.subr.mxu1 %v6025_v24  ;;  %v6091_v59 = vld [vmem:[#allocation7 + $0xf08] sm:$0xff]  ;;  %v6093_v24 = vld [vmem:[#allocation7 + $0xf18] sm:$0xff] }
 0xa2a   :  { %6153 = vmatpush1.msra.mxu0 %v6022_v57  ;;  %6230 = vmatpush1.msra.mxu1 %v6024_v36  ;;  %v6090_v57 = vld [vmem:[#allocation7 + $0xf00] sm:$0xff]  ;;  %v6092_v36 = vld [vmem:[#allocation7 + $0xf10] sm:$0xff] }
 0xa2b   :  { %6154 = vmatprep.subr.mxu0 %v6019_v2  ;;  %6231 = vmatprep.subr.mxu1 %v6021_v9  ;;  %v6087_v2 = vld [vmem:[#allocation7 + $0xee8] sm:$0xff]  ;;  %v6089_v9 = vld [vmem:[#allocation7 + $0xef8] sm:$0xff] }
 0xa2c   :  { %6155 = vmatpush1.msra.mxu0 %v6018_v49  ;;  %6232 = vmatpush1.msra.mxu1 %v6020_v31  ;;  %v6086_v49 = vld [vmem:[#allocation7 + $0xee0] sm:$0xff]  ;;  %v6088_v31 = vld [vmem:[#allocation7 + $0xef0] sm:$0xff] }
 0xa2d   :  { %6156 = vmatprep.subr.mxu0 %v6015_v62  ;;  %6233 = vmatprep.subr.mxu1 %v6017_v63  ;;  %v6083_v62 = vld [vmem:[#allocation7 + $0xec8] sm:$0xff]  ;;  %v6085_v63 = vld [vmem:[#allocation7 + $0xed8] sm:$0xff] }
 0xa2e   :  { %6157 = vmatpush1.msra.mxu0 %v6014_v25  ;;  %6234 = vmatpush1.msra.mxu1 %v6016_v52  ;;  %v6082_v25 = vld [vmem:[#allocation7 + $0xec0] sm:$0xff]  ;;  %v6084_v52 = vld [vmem:[#allocation7 + $0xed0] sm:$0xff] }
 0xa2f   :  { %6158 = vmatprep.subr.mxu0 %v6011_v61  ;;  %6235 = vmatprep.subr.mxu1 %v6013_v3  ;;  %v6079_v61 = vld [vmem:[#allocation7 + $0xea8] sm:$0xff]  ;;  %v6081_v3 = vld [vmem:[#allocation7 + $0xeb8] sm:$0xff] }
 0xa30   :  { %6159 = vmatpush1.msra.mxu0 %v6010_v4  ;;  %6236 = vmatpush1.msra.mxu1 %v6012_v56  ;;  %v6078_v4 = vld [vmem:[#allocation7 + $0xea0] sm:$0xff]  ;;  %v6080_v56 = vld [vmem:[#allocation7 + $0xeb0] sm:$0xff] }
 0xa31   :  { %6160 = vmatprep.subr.mxu0 %v6007_v48  ;;  %6237 = vmatprep.subr.mxu1 %v6009_v58  ;;  %v6075_v48 = vld [vmem:[#allocation7 + $0xe88] sm:$0xff]  ;;  %v6077_v58 = vld [vmem:[#allocation7 + $0xe98] sm:$0xff] }
 0xa32   :  { %6161 = vmatpush1.msra.mxu0 %v6006_v45  ;;  %6238 = vmatpush1.msra.mxu1 %v6008_v46  ;;  %v6074_v45 = vld [vmem:[#allocation7 + $0xe80] sm:$0xff]  ;;  %v6076_v46 = vld [vmem:[#allocation7 + $0xe90] sm:$0xff] }
 0xa33   :  { %6162 = vmatprep.subr.mxu0 %v6003_v55  ;;  %6239 = vmatprep.subr.mxu1 %v6005_v54  ;;  %v6071_v55 = vld [vmem:[#allocation7 + $0xe68] sm:$0xff]  ;;  %v6073_v54 = vld [vmem:[#allocation7 + $0xe78] sm:$0xff] }
 0xa34   :  { %6163 = vmatpush1.msra.mxu0 %v6002_v47  ;;  %6240 = vmatpush1.msra.mxu1 %v6004_v60  ;;  %v6070_v47 = vld [vmem:[#allocation7 + $0xe60] sm:$0xff]  ;;  %v6072_v60 = vld [vmem:[#allocation7 + $0xe70] sm:$0xff] }
 0xa35   :  { %6164 = vmatprep.subr.mxu0 %v5999_v21  ;;  %6241 = vmatprep.subr.mxu1 %v6001_v1  ;;  %v6067_v21 = vld [vmem:[#allocation7 + $0xe48] sm:$0xff]  ;;  %v6069_v1 = vld [vmem:[#allocation7 + $0xe58] sm:$0xff] }
 0xa36   :  { %6165 = vmatpush1.msra.mxu0 %v5998_v6  ;;  %6242 = vmatpush1.msra.mxu1 %v6000_v8  ;;  %v6066_v6 = vld [vmem:[#allocation7 + $0xe40] sm:$0xff]  ;;  %v6068_v8 = vld [vmem:[#allocation7 + $0xe50] sm:$0xff] }
 0xa37   :  { %6166 = vmatprep.subr.mxu0 %v5995_v11  ;;  %6243 = vmatprep.subr.mxu1 %v5997_v12  ;;  %v5992_v11 = vld [vmem:[#allocation2 + $0x18] sm:$0x7f] }
 0xa38   :  { %6167 = vmatpush1.msra.mxu0 %v5994_v15  ;;  %6244 = vmatpush1.msra.mxu1 %v5996_v51  ;;  %v6063_v12 = vld [vmem:[#allocation7 + $0xe28] sm:$0xff]  ;;  %v6065_v15 = vld [vmem:[#allocation7 + $0xe38] sm:$0xff]  ;;  %v6062_v51 = vld [vmem:[#allocation7 + $0xe20] sm:$0xff] }
 0xa39   :  { %6168 = vmatprep.subr.mxu0 %v6119_v53  ;;  %6245 = vmatprep.subr.mxu1 %v6121_v16  ;;  %v6064_v53 = vld [vmem:[#allocation7 + $0xe30] sm:$0xff]  ;;  %v5990_v16 = vld [vmem:[#allocation2 + $0x10] sm:$0xf8] }
 0xa3a   :  { %6169 = vmatpush2.msra.mxu0 %v6118_v10  ;;  %6246 = vmatpush2.msra.mxu1 %v6120_v18  ;;  %v6059_v10 = vld [vmem:[#allocation7 + $0xe08] sm:$0xff]  ;;  %v6061_v18 = vld [vmem:[#allocation7 + $0xe18] sm:$0xff] }
 0xa3b   :  { %6170 = vmatprep.subr.mxu0 %v6115_v32  ;;  %6247 = vmatprep.subr.mxu1 %v6117_v28  ;;  %v6127_v32 = vrot.slane %v5992_v11, 3  ;;  %v6058_v28 = vld [vmem:[#allocation7 + $0xe00] sm:$0xff] }
 0xa3c   :  { %6171 = vmatpush2.msra.mxu0 %v6114_v29  ;;  %6248 = vmatpush2.msra.mxu1 %v6116_v7  ;;  %v6060_v29 = vld [vmem:[#allocation7 + $0xe10] sm:$0xff]  ;;  %v6126_v7 = vrot.slane %v5990_v16, 3 }
 0xa3d   :  { %6172 = vmatprep.subr.mxu0 %v6111_v26  ;;  %6249 = vmatprep.subr.mxu1 %v6113_v27 }
 0xa3e   :  { %6173 = vmatpush2.msra.mxu0 %v6110_v38  ;;  %6250 = vmatpush2.msra.mxu1 %v6112_v40  ;;  %v6128_v26 = vsel %vm2080_vm7, %v6126_v7, %v6127_v32  ;;  %v6555_v7 = vld [vmem:[#allocation9 + $0x2f8] sm:$0xff] }
 0xa3f   :  { %6174 = vmatprep.subr.mxu0 %v6107_v23  ;;  %6251 = vmatprep.subr.mxu1 %v6109_v41 }
 0xa40   :  { %6175 = vmatpush2.msra.mxu0 %v6106_v13  ;;  %6252 = vmatpush2.msra.mxu1 %v6108_v20 }
 0xa41   :  { %6176 = vmatprep.subr.mxu0 %v6103_v0  ;;  %6253 = vmatprep.subr.mxu1 %v6105_v19 }
 0xa42   :  { %6177 = vmatpush2.msra.mxu0 %v6102_v33  ;;  %6254 = vmatpush2.msra.mxu1 %v6104_v35 }
 0xa43   :  { %6178 = vmatprep.subr.mxu0 %v6099_v37  ;;  %6255 = vmatprep.subr.mxu1 %v6101_v14 }
 0xa44   :  { %6179 = vmatpush2.msra.mxu0 %v6098_v39  ;;  %6256 = vmatpush2.msra.mxu1 %v6100_v43 }
 0xa45   :  { %6180 = vmatprep.subr.mxu0 %v6095_v44  ;;  %6257 = vmatprep.subr.mxu1 %v6097_v17 }
 0xa46   :  { %6181 = vmatpush2.msra.mxu0 %v6094_v30  ;;  %6258 = vmatpush2.msra.mxu1 %v6096_v42 }
 0xa47   :  { %6182 = vmatprep.subr.mxu0 %v6091_v59  ;;  %6259 = vmatprep.subr.mxu1 %v6093_v24 }
 0xa48   :  { %6183 = vmatpush2.msra.mxu0 %v6090_v57  ;;  %6260 = vmatpush2.msra.mxu1 %v6092_v36 }
 0xa49   :  { %6184 = vmatprep.subr.mxu0 %v6087_v2  ;;  %6261 = vmatprep.subr.mxu1 %v6089_v9 }
 0xa4a   :  { %6185 = vmatpush2.msra.mxu0 %v6086_v49  ;;  %6262 = vmatpush2.msra.mxu1 %v6088_v31 }
 0xa4b   :  { %6186 = vmatprep.subr.mxu0 %v6083_v62  ;;  %6263 = vmatprep.subr.mxu1 %v6085_v63 }
 0xa4c   :  { %6187 = vmatpush2.msra.mxu0 %v6082_v25  ;;  %6264 = vmatpush2.msra.mxu1 %v6084_v52 }
 0xa4d   :  { %6188 = vmatprep.subr.mxu0 %v6079_v61  ;;  %6265 = vmatprep.subr.mxu1 %v6081_v3 }
 0xa4e   :  { %6189 = vmatpush2.msra.mxu0 %v6078_v4  ;;  %6266 = vmatpush2.msra.mxu1 %v6080_v56  ;;  %v5440_v27 = vpop.f32.mrf.mxu0  ;;  %v5517_v38 = vpop.f32.mrf.mxu1 }
 0xa4f   :  { %6190 = vmatprep.subr.mxu0 %v6075_v48  ;;  %6267 = vmatprep.subr.mxu1 %v6077_v58 }
 0xa50   :  { %6191 = vmatpush2.msra.mxu0 %v6074_v45  ;;  %6268 = vmatpush2.msra.mxu1 %v6076_v46  ;;  %v5442_v40 = vpop.f32.mrf.mxu0  ;;  %v5519_v23 = vpop.f32.mrf.mxu1 }
 0xa51   :  { %6192 = vmatprep.subr.mxu0 %v6071_v55  ;;  %6269 = vmatprep.subr.mxu1 %v6073_v54 }
 0xa52   :  { %6193 = vmatpush2.msra.mxu0 %v6070_v47  ;;  %6270 = vmatpush2.msra.mxu1 %v6072_v60 }
 0xa53   :  { %6194 = vmatprep.subr.mxu0 %v6067_v21  ;;  %6271 = vmatprep.subr.mxu1 %v6069_v1 }
 0xa54   :  { %6195 = vmatpush2.msra.mxu0 %v6066_v6  ;;  %6272 = vmatpush2.msra.mxu1 %v6068_v8  ;;  %v5446_v41 = vpop.f32.mrf.mxu0  ;;  %v5523_v13 = vpop.f32.mrf.mxu1 }
 0xa55   :  { %6196 = vmatprep.subr.mxu0 %v6063_v12  ;;  %6273 = vmatprep.subr.mxu1 %v6065_v15 }
 0xa56   :  { %6197 = vmatpush2.msra.mxu0 %v6062_v51  ;;  %6274 = vmatpush2.msra.mxu1 %v6064_v53  ;;  %v5448_v20 = vpop.f32.mrf.mxu0  ;;  %v5525_v0 = vpop.f32.mrf.mxu1 }
 0xa57   :  { %6198 = vmatprep.subr.mxu0 %v6059_v10  ;;  %6275 = vmatprep.subr.mxu1 %v6061_v18 }
 0xa58   :  { %6199 = vmatpush2.msra.mxu0 %v6058_v28  ;;  %6276 = vmatpush2.msra.mxu1 %v6060_v29 }
 0xa59   :  { %6201 = vmatmul.mubr.f32.vlgmr.msra.gmra.mxu0 %v6128_v26  ;;  %6278 = vmatmul.mubr.f32.vlgmr.msra.gmra.mxu1 %v6128_v26  ;;  %v6489_v26 = vld [vmem:[#allocation9 + $0xf8] sm:$0xff] }
 0xa5a   :  { %6206 = vmatprep.mubr.f32.mxu0 %v9086_v50  ;;  %6283 = vmatprep.mubr.f32.mxu1 %v9086_v50 }
 0xa5d   :  { %6207 = vmatmul.mubr.f32.gmra.mxu0 %v6127_v32  ;;  %6284 = vmatmul.mubr.f32.gmra.mxu1 %v6127_v32 }
 0xa5e   :  { %6372 = vmatprep.mubr.f32.mxu0 %v9357_v34  ;;  %6443 = vmatprep.mubr.f32.mxu1 %v9357_v34 }
 0xa91   :  { %v5594_v19 = vpop.f32.mrf.mxu0  ;;  %v5671_v33 = vpop.f32.mrf.mxu1 }
 0xa92   :  { %v5595_v3 = vadd.f32 %v5594_v19, %v5440_v27  ;;  %v5672_v4 = vadd.f32 %v5671_v33, %v5517_v38  ;;  %v6554_v27 = vld [vmem:[#allocation9 + $0x2f0] sm:$0xff] }
 0xa93   :  { %v5596_v35 = vpop.f32.mrf.mxu0  ;;  %v5673_v37 = vpop.f32.mrf.mxu1  ;;  %v6488_v38 = vld [vmem:[#allocation9 + $0xf0] sm:$0xff] }
 0xa94   :  { %v5597_v63 = vadd.f32 %v5596_v35, %v5442_v40  ;;  %v5674_v25 = vadd.f32 %v5673_v37, %v5519_v23  ;;  %v6553_v40 = vld [vmem:[#allocation9 + $0x2e8] sm:$0xff]  ;;  %v6550_v19 = vld [vmem:[#allocation9 + $0x2d0] sm:$0xff]  ;;  %v6482_v37 = vld [vmem:[#allocation9 + $0xc0] sm:$0xff] }
 0xa95   :  { %v6487_v23 = vld [vmem:[#allocation9 + $0xe8] sm:$0xff]  ;;  %v6484_v33 = vld [vmem:[#allocation9 + $0xd0] sm:$0xff] }
 0xa96   :  { %v6549_v35 = vld [vmem:[#allocation9 + $0x2c8] sm:$0xff] }
 0xa97   :  { %v5600_v14 = vpop.f32.mrf.mxu0  ;;  %v5677_v50 = vpop.f32.mrf.mxu1 }
 0xa98   :  { %v5601_v9 = vadd.f32 %v5600_v14, %v5446_v41  ;;  %v5678_v49 = vadd.f32 %v5677_v50, %v5523_v13  ;;  %v6552_v41 = vld [vmem:[#allocation9 + $0x2e0] sm:$0xff]  ;;  %v6547_v14 = vld [vmem:[#allocation9 + $0x2b8] sm:$0xff] }
 0xa99   :  { %v5602_v39 = vpop.f32.mrf.mxu0  ;;  %v5679_v43 = vpop.f32.mrf.mxu1  ;;  %v6486_v13 = vld [vmem:[#allocation9 + $0xe0] sm:$0xff]  ;;  %v6481_v50 = vld [vmem:[#allocation9 + $0xb8] sm:$0xff] }
 0xa9a   :  { %v5603_v52 = vadd.f32 %v5602_v39, %v5448_v20  ;;  %v5680_v61 = vadd.f32 %v5679_v43, %v5525_v0  ;;  %v6551_v20 = vld [vmem:[#allocation9 + $0x2d8] sm:$0xff]  ;;  %v6546_v39 = vld [vmem:[#allocation9 + $0x2b0] sm:$0xff] }
 0xa9b   :  { %v6485_v0 = vld [vmem:[#allocation9 + $0xd8] sm:$0xff]  ;;  %v6480_v43 = vld [vmem:[#allocation9 + $0xb0] sm:$0xff] }
 0xad5   :  { %v5894_v44 = vpop.f32.mrf.mxu0  ;;  %v5971_v17 = vpop.f32.mrf.mxu1 }
 0xad6   :  { %v5982_v60 = vadd.f32 %v5894_v44, %v5595_v3  ;;  %v5984_v21 = vadd.f32 %v5971_v17, %v5672_v4  ;;  %v6545_v44 = vld [vmem:[#allocation9 + $0x2a8] sm:$0xff]  ;;  %v6536_v3 = vld [vmem:[#allocation9 + $0x260] sm:$0xff] }
 0xad7   :  { %v5896_v30 = vpop.f32.mrf.mxu0  ;;  %v5973_v34 = vpop.f32.mrf.mxu1  ;;  %v6479_v17 = vld [vmem:[#allocation9 + $0xa8] sm:$0xff]  ;;  %v6470_v4 = vld [vmem:[#allocation9 + $0x60] sm:$0xff] }
 0xad8   :  { %v5983_v46 = vadd.f32 %v5896_v30, %v5597_v63  ;;  %v5985_v55 = vadd.f32 %v5973_v34, %v5674_v25  ;;  %v6544_v30 = vld [vmem:[#allocation9 + $0x2a0] sm:$0xff]  ;;  %v6538_v63 = vld [vmem:[#allocation9 + $0x270] sm:$0xff] }
 0xad9   :  { %v6478_v34 = vld [vmem:[#allocation9 + $0xa0] sm:$0xff]  ;;  %v6472_v25 = vld [vmem:[#allocation9 + $0x70] sm:$0xff] }
 0xadb   :  { %v5900_v42 = vpop.f32.mrf.mxu0  ;;  %v5977_v59 = vpop.f32.mrf.mxu1 }
 0xadc   :  { %v5986_v56 = vadd.f32 %v5900_v42, %v5601_v9  ;;  %v5988_v48 = vadd.f32 %v5977_v59, %v5678_v49  ;;  %v6543_v42 = vld [vmem:[#allocation9 + $0x298] sm:$0xff]  ;;  %v6540_v9 = vld [vmem:[#allocation9 + $0x280] sm:$0xff] }
 0xadd   :  { %v5902_v24 = vpop.f32.mrf.mxu0  ;;  %v5979_v57 = vpop.f32.mrf.mxu1  ;;  %v6477_v59 = vld [vmem:[#allocation9 + $0x98] sm:$0xff]  ;;  %v6474_v49 = vld [vmem:[#allocation9 + $0x80] sm:$0xff] }
 0xade   :  { %v5987_v54 = vadd.f32 %v5902_v24, %v5603_v52  ;;  %v5989_v47 = vadd.f32 %v5979_v57, %v5680_v61  ;;  %v6542_v24 = vld [vmem:[#allocation9 + $0x290] sm:$0xff]  ;;  %v6537_v52 = vld [vmem:[#allocation9 + $0x268] sm:$0xff] }
 0xadf   :  { %v6476_v57 = vld [vmem:[#allocation9 + $0x90] sm:$0xff]  ;;  %v6471_v61 = vld [vmem:[#allocation9 + $0x68] sm:$0xff] }
 0xb19   :  { %v6202_v36 = vpop.f32.mrf.mxu0  ;;  %v6279_v2 = vpop.f32.mrf.mxu1 }
 0xb1a   :  { %v6290_v16 = vadd.f32 %v6202_v36, %v5982_v60  ;;  %v6292_v10 = vadd.f32 %v6279_v2, %v5984_v21  ;;  %v6541_v36 = vld [vmem:[#allocation9 + $0x288] sm:$0xff]  ;;  %v6531_v60 = vld [vmem:[#allocation9 + $0x238] sm:$0xff] }
 0xb1b   :  { %v6204_v31 = vpop.f32.mrf.mxu0  ;;  %v6281_v62 = vpop.f32.mrf.mxu1  ;;  %v6475_v2 = vld [vmem:[#allocation9 + $0x88] sm:$0xff]  ;;  %v6465_v21 = vld [vmem:[#allocation9 + $0x38] sm:$0xff] }
 0xb1c   :  { %v6291_v12 = vadd.f32 %v6204_v31, %v5983_v46  ;;  %v6293_v15 = vadd.f32 %v6281_v62, %v5985_v55  ;;  %v6298_v29 = vmax.f32 %v6290_v16, %v6292_v10  ;;  %v6539_v31 = vld [vmem:[#allocation9 + $0x278] sm:$0xff]  ;;  %v6533_v46 = vld [vmem:[#allocation9 + $0x248] sm:$0xff]  ;;  %v6526_v16 = vld [vmem:[#allocation9 + $0x210] sm:$0xff] }
 0xb1d   :  { %v6208_v58 = vpop.f32.mrf.mxu0  ;;  %v6285_v45 = vpop.f32.mrf.mxu1  ;;  %v6473_v62 = vld [vmem:[#allocation9 + $0x78] sm:$0xff]  ;;  %v6467_v55 = vld [vmem:[#allocation9 + $0x48] sm:$0xff]  ;;  %v6460_v10 = vld [vmem:[#allocation9 + $0x10] sm:$0xff] }
 0xb1e   :  { %v6294_v1 = vadd.f32 %v6208_v58, %v5986_v56  ;;  %v6296_v6 = vadd.f32 %v6285_v45, %v5988_v48  ;;  %v6299_v28 = vmax.f32 %v6291_v12, %v6293_v15  ;;  %v6535_v56 = vld [vmem:[#allocation9 + $0x258] sm:$0xff]  ;;  %v6534_v58 = vld [vmem:[#allocation9 + $0x250] sm:$0xff]  ;;  %v6528_v12 = vld [vmem:[#allocation9 + $0x220] sm:$0xff] }
 0xb1f   :  { %v6210_v8 = vpop.f32.mrf.mxu0  ;;  %v6287_v11 = vpop.f32.mrf.mxu1  ;;  %v6469_v48 = vld [vmem:[#allocation9 + $0x58] sm:$0xff]  ;;  %v6468_v45 = vld [vmem:[#allocation9 + $0x50] sm:$0xff]  ;;  %v6462_v15 = vld [vmem:[#allocation9 + $0x20] sm:$0xff] }
 0xb20   :  { %v6295_v51 = vadd.f32 %v6210_v8, %v5987_v54  ;;  %v6297_v53 = vadd.f32 %v6287_v11, %v5989_v47  ;;  %v6300_v32 = vmax.f32 %v6294_v1, %v6296_v6  ;;  %v6532_v54 = vld [vmem:[#allocation9 + $0x240] sm:$0xff]  ;;  %v6530_v1 = vld [vmem:[#allocation9 + $0x230] sm:$0xff]  ;;  %v6529_v8 = vld [vmem:[#allocation9 + $0x228] sm:$0xff] }
 0xb21   :  { %v6466_v47 = vld [vmem:[#allocation9 + $0x40] sm:$0xff]  ;;  %v6464_v6 = vld [vmem:[#allocation9 + $0x30] sm:$0xff]  ;;  %v6463_v11 = vld [vmem:[#allocation9 + $0x28] sm:$0xff] }
 0xb22   :  { %v6301_v18 = vmax.f32 %v6295_v51, %v6297_v53  ;;  %v6527_v51 = vld [vmem:[#allocation9 + $0x218] sm:$0xff] }
 0xb23   :  { %v6461_v53 = vld [vmem:[#allocation9 + $0x18] sm:$0xff] }
 0xb24   :  { %8245 = vmatprep.subr.msk.mxu0 %vm2260_vm8, %v6301_v18  ;;  %8248 = vmatprep.subr.msk.mxu1 %vm2260_vm8, %v6301_v18  ;;  %v6525_v18 = vld [vmem:[#allocation9 + $0x208] sm:$0xff] }
 0xb25   :  { %8246 = vmatpush1.msk.msra.mxu0 %vm2260_vm8, %v6300_v32  ;;  %8249 = vmatpush1.msk.msra.mxu1 %vm2260_vm8, %v6300_v32  ;;  %v6459_v32 = vld [vmem:[#allocation9 + $0x8] sm:$0xff] }
 0xb26   :  { %6338 = vmatprep.subr.mxu0 %v6299_v28  ;;  %6409 = vmatprep.subr.mxu1 %v6299_v28  ;;  %v6524_v28 = vld [vmem:[#allocation9 + $0x200] sm:$0xff] }
 0xb27   :  { %6339 = vmatpush1.msra.mxu0 %v6298_v29  ;;  %6410 = vmatpush1.msra.mxu1 %v6298_v29  ;;  %v6458_v29 = vld [vmem:[#allocation9] sm:$0xff] }
 0xb28   :  { %8247 = vmatmul.mubr.msk.f32.vlgmr.msra.gmra.mxu0 %vm2257_vm9, %v9355_v5  ;;  %8250 = vmatmul.mubr.msk.f32.vlgmr.msra.gmra.mxu1 %vm2257_vm9, %v9356_v22  ;;  %v6483_v5 = vld [vmem:[#allocation9 + $0xc8] sm:$0xff]  ;;  %v6548_v22 = vld [vmem:[#allocation9 + $0x2c0] sm:$0xff] }
 0xb29   :  { %6594 = vmatprep.subr.mxu0 %v6555_v7  ;;  %6665 = vmatprep.subr.mxu1 %v6489_v26  ;;  %v6587_v7 = vld [vmem:[#allocation9 + $0x3f8] sm:$0xff] }
 0xb2a   :  { %6595 = vmatpush1.msra.mxu0 %v6554_v27  ;;  %6666 = vmatpush1.msra.mxu1 %v6488_v38  ;;  %v6521_v26 = vld [vmem:[#allocation9 + $0x1f8] sm:$0xff]  ;;  %v6586_v27 = vld [vmem:[#allocation9 + $0x3f0] sm:$0xff] }
 0xb2b   :  { %6596 = vmatprep.subr.mxu0 %v6553_v40  ;;  %6667 = vmatprep.subr.mxu1 %v6487_v23  ;;  %v6520_v38 = vld [vmem:[#allocation9 + $0x1f0] sm:$0xff]  ;;  %v6585_v40 = vld [vmem:[#allocation9 + $0x3e8] sm:$0xff] }
 0xb2c   :  { %6597 = vmatpush1.msra.mxu0 %v6552_v41  ;;  %6668 = vmatpush1.msra.mxu1 %v6486_v13  ;;  %v6519_v23 = vld [vmem:[#allocation9 + $0x1e8] sm:$0xff]  ;;  %v6584_v41 = vld [vmem:[#allocation9 + $0x3e0] sm:$0xff] }
 0xb2d   :  { %6598 = vmatprep.subr.mxu0 %v6551_v20  ;;  %6669 = vmatprep.subr.mxu1 %v6485_v0  ;;  %v6518_v13 = vld [vmem:[#allocation9 + $0x1e0] sm:$0xff]  ;;  %v6583_v20 = vld [vmem:[#allocation9 + $0x3d8] sm:$0xff] }
 0xb2e   :  { %6599 = vmatpush1.msra.mxu0 %v6550_v19  ;;  %6670 = vmatpush1.msra.mxu1 %v6484_v33  ;;  %v6517_v0 = vld [vmem:[#allocation9 + $0x1d8] sm:$0xff]  ;;  %v6582_v19 = vld [vmem:[#allocation9 + $0x3d0] sm:$0xff] }
 0xb2f   :  { %6600 = vmatprep.subr.mxu0 %v6549_v35  ;;  %6671 = vmatprep.subr.mxu1 %v6483_v5  ;;  %v6516_v33 = vld [vmem:[#allocation9 + $0x1d0] sm:$0xff]  ;;  %v6581_v35 = vld [vmem:[#allocation9 + $0x3c8] sm:$0xff] }
 0xb30   :  { %6601 = vmatpush1.msra.mxu0 %v6548_v22  ;;  %6672 = vmatpush1.msra.mxu1 %v6482_v37  ;;  %v6515_v5 = vld [vmem:[#allocation9 + $0x1c8] sm:$0xff]  ;;  %v6580_v22 = vld [vmem:[#allocation9 + $0x3c0] sm:$0xff] }
 0xb31   :  { %6602 = vmatprep.subr.mxu0 %v6547_v14  ;;  %6673 = vmatprep.subr.mxu1 %v6481_v50  ;;  %v6514_v37 = vld [vmem:[#allocation9 + $0x1c0] sm:$0xff]  ;;  %v6579_v14 = vld [vmem:[#allocation9 + $0x3b8] sm:$0xff] }
 0xb32   :  { %6603 = vmatpush1.msra.mxu0 %v6546_v39  ;;  %6674 = vmatpush1.msra.mxu1 %v6480_v43  ;;  %v6513_v50 = vld [vmem:[#allocation9 + $0x1b8] sm:$0xff]  ;;  %v6578_v39 = vld [vmem:[#allocation9 + $0x3b0] sm:$0xff] }
 0xb33   :  { %6604 = vmatprep.subr.mxu0 %v6545_v44  ;;  %6675 = vmatprep.subr.mxu1 %v6479_v17  ;;  %v6512_v43 = vld [vmem:[#allocation9 + $0x1b0] sm:$0xff]  ;;  %v6577_v44 = vld [vmem:[#allocation9 + $0x3a8] sm:$0xff] }
 0xb34   :  { %6605 = vmatpush1.msra.mxu0 %v6544_v30  ;;  %6676 = vmatpush1.msra.mxu1 %v6478_v34  ;;  %v6511_v17 = vld [vmem:[#allocation9 + $0x1a8] sm:$0xff]  ;;  %v6576_v30 = vld [vmem:[#allocation9 + $0x3a0] sm:$0xff] }
 0xb35   :  { %6606 = vmatprep.subr.mxu0 %v6543_v42  ;;  %6677 = vmatprep.subr.mxu1 %v6477_v59  ;;  %v6510_v34 = vld [vmem:[#allocation9 + $0x1a0] sm:$0xff]  ;;  %v6575_v42 = vld [vmem:[#allocation9 + $0x398] sm:$0xff]  ;;  %v6574_v59 = vld [vmem:[#allocation9 + $0x390] sm:$0xff] }
 0xb36   :  { %6607 = vmatpush1.msra.mxu0 %v6542_v24  ;;  %6678 = vmatpush1.msra.mxu1 %v6476_v57  ;;  %v6573_v24 = vld [vmem:[#allocation9 + $0x388] sm:$0xff]  ;;  %v6509_v57 = vld [vmem:[#allocation9 + $0x198] sm:$0xff] }
 0xb37   :  { %6608 = vmatprep.subr.mxu0 %v6541_v36  ;;  %6679 = vmatprep.subr.mxu1 %v6475_v2  ;;  %v6508_v36 = vld [vmem:[#allocation9 + $0x190] sm:$0xff]  ;;  %v6507_v2 = vld [vmem:[#allocation9 + $0x188] sm:$0xff] }
 0xb38   :  { %6609 = vmatpush1.msra.mxu0 %v6540_v9  ;;  %6680 = vmatpush1.msra.mxu1 %v6474_v49  ;;  %v6506_v9 = vld [vmem:[#allocation9 + $0x180] sm:$0xff] }
 0xb39   :  { %6610 = vmatprep.subr.mxu0 %v6539_v31  ;;  %6681 = vmatprep.subr.mxu1 %v6473_v62  ;;  %v6572_v49 = vld [vmem:[#allocation9 + $0x380] sm:$0xff]  ;;  %v6505_v31 = vld [vmem:[#allocation9 + $0x178] sm:$0xff] }
 0xb3a   :  { %6611 = vmatpush1.msra.mxu0 %v6538_v63  ;;  %6682 = vmatpush1.msra.mxu1 %v6472_v25  ;;  %v6571_v62 = vld [vmem:[#allocation9 + $0x378] sm:$0xff]  ;;  %v6504_v63 = vld [vmem:[#allocation9 + $0x170] sm:$0xff] }
 0xb3b   :  { %6612 = vmatprep.subr.mxu0 %v6537_v52  ;;  %6683 = vmatprep.subr.mxu1 %v6471_v61  ;;  %v6570_v25 = vld [vmem:[#allocation9 + $0x370] sm:$0xff]  ;;  %v6503_v52 = vld [vmem:[#allocation9 + $0x168] sm:$0xff] }
 0xb3c   :  { %6613 = vmatpush1.msra.mxu0 %v6536_v3  ;;  %6684 = vmatpush1.msra.mxu1 %v6470_v4  ;;  %v6569_v61 = vld [vmem:[#allocation9 + $0x368] sm:$0xff]  ;;  %v6502_v3 = vld [vmem:[#allocation9 + $0x160] sm:$0xff] }
 0xb3d   :  { %6614 = vmatprep.subr.mxu0 %v6535_v56  ;;  %6685 = vmatprep.subr.mxu1 %v6469_v48  ;;  %v6568_v4 = vld [vmem:[#allocation9 + $0x360] sm:$0xff]  ;;  %v6501_v56 = vld [vmem:[#allocation9 + $0x158] sm:$0xff] }
 0xb3e   :  { %6615 = vmatpush1.msra.mxu0 %v6534_v58  ;;  %6686 = vmatpush1.msra.mxu1 %v6468_v45  ;;  %v6567_v48 = vld [vmem:[#allocation9 + $0x358] sm:$0xff]  ;;  %v6500_v58 = vld [vmem:[#allocation9 + $0x150] sm:$0xff] }
 0xb3f   :  { %6616 = vmatprep.subr.mxu0 %v6533_v46  ;;  %6687 = vmatprep.subr.mxu1 %v6467_v55  ;;  %v6566_v45 = vld [vmem:[#allocation9 + $0x350] sm:$0xff]  ;;  %v6499_v46 = vld [vmem:[#allocation9 + $0x148] sm:$0xff] }
 0xb40   :  { %6617 = vmatpush1.msra.mxu0 %v6532_v54  ;;  %6688 = vmatpush1.msra.mxu1 %v6466_v47  ;;  %v6565_v55 = vld [vmem:[#allocation9 + $0x348] sm:$0xff]  ;;  %v6498_v54 = vld [vmem:[#allocation9 + $0x140] sm:$0xff] }
 0xb41   :  { %6618 = vmatprep.subr.mxu0 %v6531_v60  ;;  %6689 = vmatprep.subr.mxu1 %v6465_v21  ;;  %v6564_v47 = vld [vmem:[#allocation9 + $0x340] sm:$0xff]  ;;  %v6563_v60 = vld [vmem:[#allocation9 + $0x338] sm:$0xff]  ;;  %v6562_v21 = vld [vmem:[#allocation9 + $0x330] sm:$0xff] }
 0xb42   :  { %6619 = vmatpush1.msra.mxu0 %v6530_v1  ;;  %6690 = vmatpush1.msra.mxu1 %v6464_v6  ;;  %v6561_v1 = vld [vmem:[#allocation9 + $0x328] sm:$0xff]  ;;  %v6497_v6 = vld [vmem:[#allocation9 + $0x138] sm:$0xff] }
 0xb43   :  { %6620 = vmatprep.subr.mxu0 %v6529_v8  ;;  %6691 = vmatprep.subr.mxu1 %v6463_v11  ;;  %v6560_v8 = vld [vmem:[#allocation9 + $0x320] sm:$0xff]  ;;  %v6496_v11 = vld [vmem:[#allocation9 + $0x130] sm:$0xff] }
 0xb44   :  { %6621 = vmatpush1.msra.mxu0 %v6528_v12  ;;  %6692 = vmatpush1.msra.mxu1 %v6462_v15  ;;  %v6559_v12 = vld [vmem:[#allocation9 + $0x318] sm:$0xff]  ;;  %v6495_v15 = vld [vmem:[#allocation9 + $0x128] sm:$0xff] }
 0xb45   :  { %6622 = vmatprep.subr.mxu0 %v6527_v51  ;;  %6693 = vmatprep.subr.mxu1 %v6461_v53  ;;  %v6494_v51 = vld [vmem:[#allocation9 + $0x120] sm:$0xff]  ;;  %v6558_v53 = vld [vmem:[#allocation9 + $0x310] sm:$0xff] }
 0xb46   :  { %6623 = vmatpush1.msra.mxu0 %v6526_v16  ;;  %6694 = vmatpush1.msra.mxu1 %v6460_v10  ;;  %v6493_v16 = vld [vmem:[#allocation9 + $0x118] sm:$0xff]  ;;  %v6557_v10 = vld [vmem:[#allocation9 + $0x308] sm:$0xff] }
 0xb47   :  { %6624 = vmatprep.subr.mxu0 %v6525_v18  ;;  %6695 = vmatprep.subr.mxu1 %v6459_v32  ;;  %v6492_v18 = vld [vmem:[#allocation9 + $0x110] sm:$0xff]  ;;  %v6556_v32 = vld [vmem:[#allocation9 + $0x300] sm:$0xff] }
 0xb48   :  { %6625 = vmatpush1.msra.mxu0 %v6524_v28  ;;  %6696 = vmatpush1.msra.mxu1 %v6458_v29  ;;  %v6491_v28 = vld [vmem:[#allocation9 + $0x108] sm:$0xff]  ;;  %v6490_v29 = vld [vmem:[#allocation9 + $0x100] sm:$0xff] }
 0xb49   :  { %6626 = vmatprep.subr.mxu0 %v6587_v7  ;;  %6697 = vmatprep.subr.mxu1 %v6521_v26  ;;  %v6769_v7 = vld [vmem:[#allocation9 + $0x4f8] sm:$0xff] }
 0xb4a   :  { %6627 = vmatpush2.msra.mxu0 %v6586_v27  ;;  %6698 = vmatpush2.msra.mxu1 %v6520_v38 }
 0xb4b   :  { %6628 = vmatprep.subr.mxu0 %v6585_v40  ;;  %6699 = vmatprep.subr.mxu1 %v6519_v23 }
 0xb4c   :  { %6629 = vmatpush2.msra.mxu0 %v6584_v41  ;;  %6700 = vmatpush2.msra.mxu1 %v6518_v13 }
 0xb4d   :  { %6630 = vmatprep.subr.mxu0 %v6583_v20  ;;  %6701 = vmatprep.subr.mxu1 %v6517_v0 }
 0xb4e   :  { %6631 = vmatpush2.msra.mxu0 %v6582_v19  ;;  %6702 = vmatpush2.msra.mxu1 %v6516_v33 }
 0xb4f   :  { %6632 = vmatprep.subr.mxu0 %v6581_v35  ;;  %6703 = vmatprep.subr.mxu1 %v6515_v5 }
 0xb50   :  { %6633 = vmatpush2.msra.mxu0 %v6580_v22  ;;  %6704 = vmatpush2.msra.mxu1 %v6514_v37 }
 0xb51   :  { %6634 = vmatprep.subr.mxu0 %v6579_v14  ;;  %6705 = vmatprep.subr.mxu1 %v6513_v50  ;;  %v6768_v14 = vld [vmem:[#allocation9 + $0x4f0] sm:$0xff]  ;;  %v6767_v50 = vld [vmem:[#allocation9 + $0x4e8] sm:$0xff] }
 0xb52   :  { %6635 = vmatpush2.msra.mxu0 %v6578_v39  ;;  %6706 = vmatpush2.msra.mxu1 %v6512_v43  ;;  %v6766_v43 = vld [vmem:[#allocation9 + $0x4e0] sm:$0xff] }
 0xb53   :  { %6636 = vmatprep.subr.mxu0 %v6577_v44  ;;  %6707 = vmatprep.subr.mxu1 %v6511_v17  ;;  %v6765_v44 = vld [vmem:[#allocation9 + $0x4d8] sm:$0xff]  ;;  %v6764_v17 = vld [vmem:[#allocation9 + $0x4d0] sm:$0xff] }
 0xb54   :  { %6637 = vmatpush2.msra.mxu0 %v6576_v30  ;;  %6708 = vmatpush2.msra.mxu1 %v6510_v34  ;;  %v6763_v30 = vld [vmem:[#allocation9 + $0x4c8] sm:$0xff]  ;;  %v6762_v34 = vld [vmem:[#allocation9 + $0x4c0] sm:$0xff] }
 0xb55   :  { %6638 = vmatprep.subr.mxu0 %v6575_v42  ;;  %6709 = vmatprep.subr.mxu1 %v6509_v57  ;;  %v6761_v42 = vld [vmem:[#allocation9 + $0x4b8] sm:$0xff]  ;;  %v6758_v57 = vld [vmem:[#allocation9 + $0x4a0] sm:$0xff] }
 0xb56   :  { %6639 = vmatpush2.msra.mxu0 %v6574_v59  ;;  %6710 = vmatpush2.msra.mxu1 %v6508_v36  ;;  %v6760_v59 = vld [vmem:[#allocation9 + $0x4b0] sm:$0xff]  ;;  %v6757_v36 = vld [vmem:[#allocation9 + $0x498] sm:$0xff] }
 0xb57   :  { %6640 = vmatprep.subr.mxu0 %v6573_v24  ;;  %6711 = vmatprep.subr.mxu1 %v6507_v2  ;;  %v6759_v24 = vld [vmem:[#allocation9 + $0x4a8] sm:$0xff]  ;;  %v6756_v2 = vld [vmem:[#allocation9 + $0x490] sm:$0xff] }
 0xb58   :  { %6712 = vmatpush2.msra.mxu1 %v6506_v9  ;;  %6641 = vmatpush2.msra.mxu0 %v6572_v49  ;;  %v6755_v9 = vld [vmem:[#allocation9 + $0x488] sm:$0xff]  ;;  %v6754_v49 = vld [vmem:[#allocation9 + $0x480] sm:$0xff] }
 0xb59   :  { %6713 = vmatprep.subr.mxu1 %v6505_v31  ;;  %6642 = vmatprep.subr.mxu0 %v6571_v62  ;;  %v6753_v31 = vld [vmem:[#allocation9 + $0x478] sm:$0xff]  ;;  %v6752_v62 = vld [vmem:[#allocation9 + $0x470] sm:$0xff] }
 0xb5a   :  { %6714 = vmatpush2.msra.mxu1 %v6504_v63  ;;  %6643 = vmatpush2.msra.mxu0 %v6570_v25  ;;  %v6751_v63 = vld [vmem:[#allocation9 + $0x468] sm:$0xff]  ;;  %v6750_v25 = vld [vmem:[#allocation9 + $0x460] sm:$0xff] }
 0xb5b   :  { %6715 = vmatprep.subr.mxu1 %v6503_v52  ;;  %6644 = vmatprep.subr.mxu0 %v6569_v61  ;;  %v6749_v52 = vld [vmem:[#allocation9 + $0x458] sm:$0xff]  ;;  %v6748_v61 = vld [vmem:[#allocation9 + $0x450] sm:$0xff] }
 0xb5c   :  { %6716 = vmatpush2.msra.mxu1 %v6502_v3  ;;  %6645 = vmatpush2.msra.mxu0 %v6568_v4  ;;  %v6747_v3 = vld [vmem:[#allocation9 + $0x448] sm:$0xff]  ;;  %v6746_v4 = vld [vmem:[#allocation9 + $0x440] sm:$0xff] }
 0xb5d   :  { %6717 = vmatprep.subr.mxu1 %v6501_v56  ;;  %6646 = vmatprep.subr.mxu0 %v6567_v48  ;;  %v6745_v56 = vld [vmem:[#allocation9 + $0x438] sm:$0xff]  ;;  %v6744_v48 = vld [vmem:[#allocation9 + $0x430] sm:$0xff] }
 0xb5e   :  { %6718 = vmatpush2.msra.mxu1 %v6500_v58  ;;  %6647 = vmatpush2.msra.mxu0 %v6566_v45  ;;  %v6743_v58 = vld [vmem:[#allocation9 + $0x428] sm:$0xff]  ;;  %v6742_v45 = vld [vmem:[#allocation9 + $0x420] sm:$0xff] }
 0xb5f   :  { %6719 = vmatprep.subr.mxu1 %v6499_v46  ;;  %6648 = vmatprep.subr.mxu0 %v6565_v55  ;;  %v6741_v46 = vld [vmem:[#allocation9 + $0x418] sm:$0xff]  ;;  %v6740_v55 = vld [vmem:[#allocation9 + $0x410] sm:$0xff] }
 0xb60   :  { %6720 = vmatpush2.msra.mxu1 %v6498_v54  ;;  %6649 = vmatpush2.msra.mxu0 %v6564_v47  ;;  %v6739_v54 = vld [vmem:[#allocation9 + $0x408] sm:$0xff]  ;;  %v6738_v47 = vld [vmem:[#allocation9 + $0x400] sm:$0xff] }
 0xb61   :  { %6650 = vmatprep.subr.mxu0 %v6563_v60  ;;  %6721 = vmatprep.subr.mxu1 %v6497_v6  ;;  %v6801_v60 = vld [vmem:[#allocation9 + $0x5f8] sm:$0xff]  ;;  %v6798_v6 = vld [vmem:[#allocation9 + $0x5e0] sm:$0xff] }
 0xb62   :  { %6651 = vmatpush2.msra.mxu0 %v6562_v21  ;;  %6722 = vmatpush2.msra.mxu1 %v6496_v11  ;;  %v6800_v21 = vld [vmem:[#allocation9 + $0x5f0] sm:$0xff] }
 0xb63   :  { %6652 = vmatprep.subr.mxu0 %v6561_v1  ;;  %6723 = vmatprep.subr.mxu1 %v6495_v15  ;;  %v6799_v1 = vld [vmem:[#allocation9 + $0x5e8] sm:$0xff]  ;;  %v6796_v11 = vld [vmem:[#allocation9 + $0x5d0] sm:$0xff]  ;;  %v6794_v15 = vld [vmem:[#allocation9 + $0x5c0] sm:$0xff] }
 0xb64   :  { %6653 = vmatpush2.msra.mxu0 %v6560_v8  ;;  %6724 = vmatpush2.msra.mxu1 %v6494_v51  ;;  %v6797_v8 = vld [vmem:[#allocation9 + $0x5d8] sm:$0xff] }
 0xb65   :  { %6654 = vmatprep.subr.mxu0 %v6559_v12  ;;  %6725 = vmatprep.subr.mxu1 %v6493_v16  ;;  %v6795_v12 = vld [vmem:[#allocation9 + $0x5c8] sm:$0xff]  ;;  %v6793_v51 = vld [vmem:[#allocation9 + $0x5b8] sm:$0xff] }
 0xb66   :  { %6655 = vmatpush2.msra.mxu0 %v6558_v53  ;;  %6726 = vmatpush2.msra.mxu1 %v6492_v18  ;;  %v6792_v53 = vld [vmem:[#allocation9 + $0x5b0] sm:$0xff]  ;;  %v6791_v16 = vld [vmem:[#allocation9 + $0x5a8] sm:$0xff]  ;;  %v6789_v18 = vld [vmem:[#allocation9 + $0x598] sm:$0xff] }
 0xb67   :  { %6656 = vmatprep.subr.mxu0 %v6557_v10  ;;  %6727 = vmatprep.subr.mxu1 %v6491_v28  ;;  %v6790_v10 = vld [vmem:[#allocation9 + $0x5a0] sm:$0xff]  ;;  %v6787_v28 = vld [vmem:[#allocation9 + $0x588] sm:$0xff] }
 0xb68   :  { %6657 = vmatpush2.msra.mxu0 %v6556_v32  ;;  %6728 = vmatpush2.msra.mxu1 %v6490_v29  ;;  %v6788_v32 = vld [vmem:[#allocation9 + $0x590] sm:$0xff]  ;;  %v6786_v29 = vld [vmem:[#allocation9 + $0x580] sm:$0xff] }
 0xb69   :  { %6808 = vmatprep.subr.mxu0 %v6769_v7  ;;  %v6785_v7 = vld [vmem:[#allocation9 + $0x578] sm:$0xff] }
 0xbe8   :  { %v6374_v26 = vpop.f32.mrf.mxu0  ;;  %v6445_v27 = vpop.f32.mrf.mxu1 }
 0xbe9   :  { %v6450_v38 = vmax.f32 %v6374_v26, %v6445_v27  ;;  %v6784_v26 = vld [vmem:[#allocation9 + $0x570] sm:$0xff]  ;;  %v6783_v27 = vld [vmem:[#allocation9 + $0x568] sm:$0xff] }
 0xbea   :  { %v6376_v40 = vpop.f32.mrf.mxu0  ;;  %v6447_v23 = vpop.f32.mrf.mxu1 }
 0xbeb   :  { %v6452_v41 = vmax.f32 %v6450_v38, 0.0  ;;  %v6451_v13 = vmax.f32 %v6376_v40, %v6447_v23  ;;  %v6782_v38 = vld [vmem:[#allocation9 + $0x560] sm:$0xff]  ;;  %v6781_v40 = vld [vmem:[#allocation9 + $0x558] sm:$0xff]  ;;  %v6780_v23 = vld [vmem:[#allocation9 + $0x550] sm:$0xff] }
 0xbed   :  { %6454 = vst [vmem:[#allocation3] sm:$0x3f] %v6452_v41  ;;  %v6453_v20 = vmax.f32 %v6451_v13, 0.0  ;;  %v6779_v41 = vld [vmem:[#allocation9 + $0x548] sm:$0xff]  ;;  %v6778_v13 = vld [vmem:[#allocation9 + $0x540] sm:$0xff] }
 0xbef   :  { %6455 = vst [vmem:[#allocation3 + $0x8] sm:$0x3f] %v6453_v20  ;;  %v6777_v20 = vld [vmem:[#allocation9 + $0x538] sm:$0xff] }
 0xbf4   :  { %v6522_v0 = vld [vmem:[#allocation3] sm:$0x1e] }
 0xbf5   :  { %v6456_v22 = vld [vmem:[#allocation3] sm:$0xf]  ;;  %v6590_v37 = vrot.slane %v6522_v0, 1 }
 0xbf6   :  { %v6523_v19 = vld [vmem:[#allocation3 + $0x8] sm:$0x1e]  ;;  %v6776_v0 = vld [vmem:[#allocation9 + $0x530] sm:$0xff] }
 0xbf7   :  { %v6457_v33 = vld [vmem:[#allocation3 + $0x8] sm:$0xf]  ;;  %v6591_v5 = vrot.slane %v6523_v19, 1  ;;  %v6775_v19 = vld [vmem:[#allocation9 + $0x528] sm:$0xff] }
 0xbf8   :  { %v6737_v35 = vld [vmem:[#allocation3 + $0x8] sm:$0x3c]  ;;  %6729 = vmatprep.mubr.f32.mxu1 %v6457_v33  ;;  %v6774_v33 = vld [vmem:[#allocation9 + $0x520] sm:$0xff] }
 0xbf9   :  { %6730 = vmatmul.mubr.f32.vlgmr.msra.gmra.mxu1 %v6456_v22  ;;  %6658 = vmatprep.mubr.f32.mxu0 %v6591_v5  ;;  %v6805_v39 = vrot.slane %v6737_v35, 2  ;;  %v6773_v35 = vld [vmem:[#allocation9 + $0x518] sm:$0xff]  ;;  %v6772_v5 = vld [vmem:[#allocation9 + $0x510] sm:$0xff]  ;;  %v6771_v22 = vld [vmem:[#allocation9 + $0x508] sm:$0xff] }
 0xbfa   :  { %6659 = vmatmul.mubr.f32.vlgmr.msra.gmra.mxu0 %v6590_v37  ;;  %v6736_v37 = vld [vmem:[#allocation3] sm:$0x3c] }
 0xbfb   :  { %6809 = vmatpush1.msra.mxu0 %v6768_v14  ;;  %6872 = vmatprep.mubr.f32.mxu0 %v6805_v39  ;;  %v6770_v14 = vld [vmem:[#allocation9 + $0x500] sm:$0xff]  ;;  %v7072_v39 = vld [vmem:[#allocation10 + $0x5e8] sm:$0xff] }
 0xbfc   :  { %6810 = vmatprep.subr.mxu0 %v6767_v50  ;;  %v6804_v50 = vrot.slane %v6736_v37, 2  ;;  %7145 = vmatprep.subr.mxu1 %v7072_v39  ;;  %v7014_v37 = vld [vmem:[#allocation10 + $0x418] sm:$0xff]  ;;  %v7136_v39 = vld [vmem:[#allocation10 + $0x7e8] sm:$0xff] }
 0xbfd   :  { %6811 = vmatpush1.msra.mxu0 %v6766_v43  ;;  %v7074_v43 = vld [vmem:[#allocation10 + $0x5f8] sm:$0xff] }
 0xbfe   :  { %6812 = vmatprep.subr.mxu0 %v6765_v44  ;;  %v7071_v44 = vld [vmem:[#allocation10 + $0x5e0] sm:$0xff] }
 0xbff   :  { %6813 = vmatpush1.msra.mxu0 %v6764_v17  ;;  %v7073_v17 = vld [vmem:[#allocation10 + $0x5f0] sm:$0xff]  ;;  %7146 = vmatpush1.msra.mxu1 %v7071_v44  ;;  %v7135_v44 = vld [vmem:[#allocation10 + $0x7e0] sm:$0xff] }
 0xc00   :  { %6814 = vmatprep.subr.mxu0 %v6763_v30  ;;  %v7068_v30 = vld [vmem:[#allocation10 + $0x5c8] sm:$0xff] }
 0xc01   :  { %6815 = vmatpush1.msra.mxu0 %v6762_v34  ;;  %v7070_v34 = vld [vmem:[#allocation10 + $0x5d8] sm:$0xff]  ;;  %7147 = vmatprep.subr.mxu1 %v7068_v30  ;;  %v7132_v30 = vld [vmem:[#allocation10 + $0x7c8] sm:$0xff] }
 0xc02   :  { %6816 = vmatprep.subr.mxu0 %v6761_v42  ;;  %v7067_v42 = vld [vmem:[#allocation10 + $0x5c0] sm:$0xff] }
 0xc03   :  { %6817 = vmatpush1.msra.mxu0 %v6760_v59  ;;  %v7069_v59 = vld [vmem:[#allocation10 + $0x5d0] sm:$0xff]  ;;  %7148 = vmatpush1.msra.mxu1 %v7067_v42  ;;  %v7131_v42 = vld [vmem:[#allocation10 + $0x7c0] sm:$0xff] }
 0xc04   :  { %6818 = vmatprep.subr.mxu0 %v6759_v24  ;;  %v7064_v24 = vld [vmem:[#allocation10 + $0x5a8] sm:$0xff] }
 0xc05   :  { %6819 = vmatpush1.msra.mxu0 %v6758_v57  ;;  %v7066_v57 = vld [vmem:[#allocation10 + $0x5b8] sm:$0xff]  ;;  %7149 = vmatprep.subr.mxu1 %v7064_v24  ;;  %v7128_v24 = vld [vmem:[#allocation10 + $0x7a8] sm:$0xff] }
 0xc06   :  { %6820 = vmatprep.subr.mxu0 %v6757_v36  ;;  %v7063_v36 = vld [vmem:[#allocation10 + $0x5a0] sm:$0xff] }
 0xc07   :  { %6821 = vmatpush1.msra.mxu0 %v6756_v2  ;;  %v7065_v2 = vld [vmem:[#allocation10 + $0x5b0] sm:$0xff]  ;;  %7150 = vmatpush1.msra.mxu1 %v7063_v36  ;;  %v7127_v36 = vld [vmem:[#allocation10 + $0x7a0] sm:$0xff] }
 0xc08   :  { %6822 = vmatprep.subr.mxu0 %v6755_v9  ;;  %v7060_v9 = vld [vmem:[#allocation10 + $0x588] sm:$0xff] }
 0xc09   :  { %6823 = vmatpush1.msra.mxu0 %v6754_v49  ;;  %v7062_v49 = vld [vmem:[#allocation10 + $0x598] sm:$0xff]  ;;  %7151 = vmatprep.subr.mxu1 %v7060_v9  ;;  %v7124_v9 = vld [vmem:[#allocation10 + $0x788] sm:$0xff] }
 0xc0a   :  { %6824 = vmatprep.subr.mxu0 %v6753_v31  ;;  %v7059_v31 = vld [vmem:[#allocation10 + $0x580] sm:$0xff] }
 0xc0b   :  { %6825 = vmatpush1.msra.mxu0 %v6752_v62  ;;  %v7061_v62 = vld [vmem:[#allocation10 + $0x590] sm:$0xff]  ;;  %7152 = vmatpush1.msra.mxu1 %v7059_v31  ;;  %v7123_v31 = vld [vmem:[#allocation10 + $0x780] sm:$0xff] }
 0xc0c   :  { %6826 = vmatprep.subr.mxu0 %v6751_v63  ;;  %v7056_v63 = vld [vmem:[#allocation10 + $0x568] sm:$0xff] }
 0xc0d   :  { %6827 = vmatpush1.msra.mxu0 %v6750_v25  ;;  %v7058_v25 = vld [vmem:[#allocation10 + $0x578] sm:$0xff]  ;;  %7153 = vmatprep.subr.mxu1 %v7056_v63  ;;  %v7120_v63 = vld [vmem:[#allocation10 + $0x768] sm:$0xff] }
 0xc0e   :  { %6828 = vmatprep.subr.mxu0 %v6749_v52  ;;  %v7055_v52 = vld [vmem:[#allocation10 + $0x560] sm:$0xff] }
 0xc0f   :  { %6829 = vmatpush1.msra.mxu0 %v6748_v61  ;;  %v7057_v61 = vld [vmem:[#allocation10 + $0x570] sm:$0xff]  ;;  %7154 = vmatpush1.msra.mxu1 %v7055_v52  ;;  %v7119_v52 = vld [vmem:[#allocation10 + $0x760] sm:$0xff] }
 0xc10   :  { %6830 = vmatprep.subr.mxu0 %v6747_v3  ;;  %v7052_v3 = vld [vmem:[#allocation10 + $0x548] sm:$0xff] }
 0xc11   :  { %6831 = vmatpush1.msra.mxu0 %v6746_v4  ;;  %v7054_v4 = vld [vmem:[#allocation10 + $0x558] sm:$0xff]  ;;  %7155 = vmatprep.subr.mxu1 %v7052_v3  ;;  %v7116_v3 = vld [vmem:[#allocation10 + $0x748] sm:$0xff] }
 0xc12   :  { %6832 = vmatprep.subr.mxu0 %v6745_v56  ;;  %v7051_v56 = vld [vmem:[#allocation10 + $0x540] sm:$0xff] }
 0xc13   :  { %6833 = vmatpush1.msra.mxu0 %v6744_v48  ;;  %v7053_v48 = vld [vmem:[#allocation10 + $0x550] sm:$0xff]  ;;  %7156 = vmatpush1.msra.mxu1 %v7051_v56  ;;  %v7115_v56 = vld [vmem:[#allocation10 + $0x740] sm:$0xff] }
 0xc14   :  { %6834 = vmatprep.subr.mxu0 %v6743_v58  ;;  %v7048_v58 = vld [vmem:[#allocation10 + $0x528] sm:$0xff] }
 0xc15   :  { %6835 = vmatpush1.msra.mxu0 %v6742_v45  ;;  %v7050_v45 = vld [vmem:[#allocation10 + $0x538] sm:$0xff]  ;;  %7157 = vmatprep.subr.mxu1 %v7048_v58  ;;  %v7112_v58 = vld [vmem:[#allocation10 + $0x728] sm:$0xff] }
 0xc16   :  { %6836 = vmatprep.subr.mxu0 %v6741_v46  ;;  %v7047_v46 = vld [vmem:[#allocation10 + $0x520] sm:$0xff] }
 0xc17   :  { %6837 = vmatpush1.msra.mxu0 %v6740_v55  ;;  %v7049_v55 = vld [vmem:[#allocation10 + $0x530] sm:$0xff]  ;;  %7158 = vmatpush1.msra.mxu1 %v7047_v46  ;;  %v7111_v46 = vld [vmem:[#allocation10 + $0x720] sm:$0xff] }
 0xc18   :  { %6838 = vmatprep.subr.mxu0 %v6739_v54  ;;  %v7044_v54 = vld [vmem:[#allocation10 + $0x508] sm:$0xff] }
 0xc19   :  { %6839 = vmatpush1.msra.mxu0 %v6738_v47  ;;  %v7046_v47 = vld [vmem:[#allocation10 + $0x518] sm:$0xff]  ;;  %7159 = vmatprep.subr.mxu1 %v7044_v54  ;;  %v7108_v54 = vld [vmem:[#allocation10 + $0x708] sm:$0xff] }
 0xc1a   :  { %6840 = vmatprep.subr.mxu0 %v6801_v60  ;;  %v7043_v60 = vld [vmem:[#allocation10 + $0x500] sm:$0xff] }
 0xc1b   :  { %6841 = vmatpush2.msra.mxu0 %v6800_v21  ;;  %v7045_v21 = vld [vmem:[#allocation10 + $0x510] sm:$0xff]  ;;  %7160 = vmatpush1.msra.mxu1 %v7043_v60  ;;  %v7107_v60 = vld [vmem:[#allocation10 + $0x700] sm:$0xff] }
 0xc1c   :  { %6842 = vmatprep.subr.mxu0 %v6799_v1  ;;  %v7040_v1 = vld [vmem:[#allocation10 + $0x4e8] sm:$0xff] }
 0xc1d   :  { %6843 = vmatpush2.msra.mxu0 %v6798_v6  ;;  %v7042_v6 = vld [vmem:[#allocation10 + $0x4f8] sm:$0xff]  ;;  %7161 = vmatprep.subr.mxu1 %v7040_v1  ;;  %v7104_v1 = vld [vmem:[#allocation10 + $0x6e8] sm:$0xff] }
 0xc1e   :  { %6844 = vmatprep.subr.mxu0 %v6797_v8  ;;  %v7039_v8 = vld [vmem:[#allocation10 + $0x4e0] sm:$0xff] }
 0xc1f   :  { %6845 = vmatpush2.msra.mxu0 %v6796_v11  ;;  %v7041_v11 = vld [vmem:[#allocation10 + $0x4f0] sm:$0xff]  ;;  %7162 = vmatpush1.msra.mxu1 %v7039_v8  ;;  %v7103_v8 = vld [vmem:[#allocation10 + $0x6e0] sm:$0xff] }
 0xc20   :  { %6846 = vmatprep.subr.mxu0 %v6795_v12  ;;  %v7036_v12 = vld [vmem:[#allocation10 + $0x4c8] sm:$0xff] }
 0xc21   :  { %6847 = vmatpush2.msra.mxu0 %v6794_v15  ;;  %v7038_v15 = vld [vmem:[#allocation10 + $0x4d8] sm:$0xff]  ;;  %7163 = vmatprep.subr.mxu1 %v7036_v12  ;;  %v7100_v12 = vld [vmem:[#allocation10 + $0x6c8] sm:$0xff] }
 0xc22   :  { %6848 = vmatprep.subr.mxu0 %v6793_v51  ;;  %v7035_v51 = vld [vmem:[#allocation10 + $0x4c0] sm:$0xff] }
 0xc23   :  { %6849 = vmatpush2.msra.mxu0 %v6792_v53  ;;  %v7037_v53 = vld [vmem:[#allocation10 + $0x4d0] sm:$0xff]  ;;  %7164 = vmatpush1.msra.mxu1 %v7035_v51  ;;  %v7099_v51 = vld [vmem:[#allocation10 + $0x6c0] sm:$0xff] }
 0xc24   :  { %6850 = vmatprep.subr.mxu0 %v6791_v16  ;;  %v7032_v16 = vld [vmem:[#allocation10 + $0x4a8] sm:$0xff] }
 0xc25   :  { %6851 = vmatpush2.msra.mxu0 %v6790_v10  ;;  %v7034_v10 = vld [vmem:[#allocation10 + $0x4b8] sm:$0xff]  ;;  %7165 = vmatprep.subr.mxu1 %v7032_v16  ;;  %v7096_v16 = vld [vmem:[#allocation10 + $0x6a8] sm:$0xff] }
 0xc26   :  { %6852 = vmatprep.subr.mxu0 %v6789_v18  ;;  %v7031_v18 = vld [vmem:[#allocation10 + $0x4a0] sm:$0xff] }
 0xc27   :  { %6853 = vmatpush2.msra.mxu0 %v6788_v32  ;;  %v7033_v32 = vld [vmem:[#allocation10 + $0x4b0] sm:$0xff]  ;;  %7166 = vmatpush1.msra.mxu1 %v7031_v18  ;;  %v7095_v18 = vld [vmem:[#allocation10 + $0x6a0] sm:$0xff] }
 0xc28   :  { %6854 = vmatprep.subr.mxu0 %v6787_v28  ;;  %v7028_v28 = vld [vmem:[#allocation10 + $0x488] sm:$0xff] }
 0xc29   :  { %6855 = vmatpush2.msra.mxu0 %v6786_v29  ;;  %v7030_v29 = vld [vmem:[#allocation10 + $0x498] sm:$0xff]  ;;  %7167 = vmatprep.subr.mxu1 %v7028_v28  ;;  %v7092_v28 = vld [vmem:[#allocation10 + $0x688] sm:$0xff] }
 0xc2a   :  { %6856 = vmatprep.subr.mxu0 %v6785_v7  ;;  %v7027_v7 = vld [vmem:[#allocation10 + $0x480] sm:$0xff] }
 0xc2b   :  { %6857 = vmatpush2.msra.mxu0 %v6784_v26  ;;  %v7029_v26 = vld [vmem:[#allocation10 + $0x490] sm:$0xff]  ;;  %7168 = vmatpush1.msra.mxu1 %v7027_v7  ;;  %v7091_v7 = vld [vmem:[#allocation10 + $0x680] sm:$0xff] }
 0xc2c   :  { %6858 = vmatprep.subr.mxu0 %v6783_v27  ;;  %v7024_v27 = vld [vmem:[#allocation10 + $0x468] sm:$0xff] }
 0xc2d   :  { %6859 = vmatpush2.msra.mxu0 %v6782_v38  ;;  %v7026_v38 = vld [vmem:[#allocation10 + $0x478] sm:$0xff]  ;;  %7169 = vmatprep.subr.mxu1 %v7024_v27  ;;  %v7088_v27 = vld [vmem:[#allocation10 + $0x668] sm:$0xff] }
 0xc2e   :  { %6860 = vmatprep.subr.mxu0 %v6781_v40  ;;  %v7023_v40 = vld [vmem:[#allocation10 + $0x460] sm:$0xff] }
 0xc2f   :  { %6861 = vmatpush2.msra.mxu0 %v6780_v23  ;;  %v7025_v23 = vld [vmem:[#allocation10 + $0x470] sm:$0xff]  ;;  %7170 = vmatpush1.msra.mxu1 %v7023_v40  ;;  %v7087_v40 = vld [vmem:[#allocation10 + $0x660] sm:$0xff] }
 0xc30   :  { %6862 = vmatprep.subr.mxu0 %v6779_v41  ;;  %v7020_v41 = vld [vmem:[#allocation10 + $0x448] sm:$0xff] }
 0xc31   :  { %6863 = vmatpush2.msra.mxu0 %v6778_v13  ;;  %v7022_v13 = vld [vmem:[#allocation10 + $0x458] sm:$0xff]  ;;  %7171 = vmatprep.subr.mxu1 %v7020_v41  ;;  %v7084_v41 = vld [vmem:[#allocation10 + $0x648] sm:$0xff] }
 0xc32   :  { %6864 = vmatprep.subr.mxu0 %v6777_v20  ;;  %v7019_v20 = vld [vmem:[#allocation10 + $0x440] sm:$0xff] }
 0xc33   :  { %6865 = vmatpush2.msra.mxu0 %v6776_v0  ;;  %v7021_v0 = vld [vmem:[#allocation10 + $0x450] sm:$0xff]  ;;  %7172 = vmatpush1.msra.mxu1 %v7019_v20  ;;  %v7083_v20 = vld [vmem:[#allocation10 + $0x640] sm:$0xff] }
 0xc34   :  { %6866 = vmatprep.subr.mxu0 %v6775_v19  ;;  %v7016_v19 = vld [vmem:[#allocation10 + $0x428] sm:$0xff] }
 0xc35   :  { %6867 = vmatpush2.msra.mxu0 %v6774_v33  ;;  %v7018_v33 = vld [vmem:[#allocation10 + $0x438] sm:$0xff]  ;;  %7173 = vmatprep.subr.mxu1 %v7016_v19  ;;  %v7080_v19 = vld [vmem:[#allocation10 + $0x628] sm:$0xff] }
 0xc36   :  { %6868 = vmatprep.subr.mxu0 %v6773_v35  ;;  %v7015_v35 = vld [vmem:[#allocation10 + $0x420] sm:$0xff] }
 0xc37   :  { %6869 = vmatpush2.msra.mxu0 %v6772_v5  ;;  %v7017_v5 = vld [vmem:[#allocation10 + $0x430] sm:$0xff]  ;;  %7174 = vmatpush1.msra.mxu1 %v7015_v35  ;;  %v7079_v35 = vld [vmem:[#allocation10 + $0x620] sm:$0xff] }
 0xc38   :  { %6870 = vmatprep.subr.mxu0 %v6771_v22  ;;  %v7012_v22 = vld [vmem:[#allocation10 + $0x408] sm:$0xff] }
 0xc39   :  { %6871 = vmatpush2.msra.mxu0 %v6770_v14  ;;  %v7011_v14 = vld [vmem:[#allocation10 + $0x400] sm:$0xff]  ;;  %7175 = vmatprep.subr.mxu1 %v7012_v22  ;;  %v7076_v22 = vld [vmem:[#allocation10 + $0x608] sm:$0xff] }
 0xc3a   :  { %6873 = vmatmul.mubr.f32.vlgmr.msra.gmra.mxu0 %v6804_v50  ;;  %7216 = vmatprep.subr.mxu0 %v7074_v43  ;;  %v7013_v50 = vld [vmem:[#allocation10 + $0x410] sm:$0xff]  ;;  %v7138_v43 = vld [vmem:[#allocation10 + $0x7f8] sm:$0xff] }
 0xc3b   :  { %7217 = vmatpush1.msra.mxu0 %v7073_v17  ;;  %v7137_v17 = vld [vmem:[#allocation10 + $0x7f0] sm:$0xff]  ;;  %7176 = vmatpush1.msra.mxu1 %v7011_v14  ;;  %v7075_v14 = vld [vmem:[#allocation10 + $0x600] sm:$0xff] }
 0xc3c   :  { %7218 = vmatprep.subr.mxu0 %v7070_v34  ;;  %v7134_v34 = vld [vmem:[#allocation10 + $0x7d8] sm:$0xff]  ;;  %7177 = vmatprep.subr.mxu1 %v7136_v39  ;;  %v6944_v39 = vld [vmem:[#allocation10 + $0x1e8] sm:$0xff] }
 0xc3d   :  { %7219 = vmatpush1.msra.mxu0 %v7069_v59  ;;  %v7133_v59 = vld [vmem:[#allocation10 + $0x7d0] sm:$0xff]  ;;  %7178 = vmatpush2.msra.mxu1 %v7135_v44 }
 0xc3e   :  { %7220 = vmatprep.subr.mxu0 %v7066_v57  ;;  %v7130_v57 = vld [vmem:[#allocation10 + $0x7b8] sm:$0xff]  ;;  %7179 = vmatprep.subr.mxu1 %v7132_v30 }
 0xc3f   :  { %7221 = vmatpush1.msra.mxu0 %v7065_v2  ;;  %v7129_v2 = vld [vmem:[#allocation10 + $0x7b0] sm:$0xff]  ;;  %7180 = vmatpush2.msra.mxu1 %v7131_v42 }
 0xc40   :  { %7222 = vmatprep.subr.mxu0 %v7062_v49  ;;  %v7126_v49 = vld [vmem:[#allocation10 + $0x798] sm:$0xff]  ;;  %7181 = vmatprep.subr.mxu1 %v7128_v24 }
 0xc41   :  { %7223 = vmatpush1.msra.mxu0 %v7061_v62  ;;  %v7125_v62 = vld [vmem:[#allocation10 + $0x790] sm:$0xff]  ;;  %7182 = vmatpush2.msra.mxu1 %v7127_v36 }
 0xc42   :  { %7224 = vmatprep.subr.mxu0 %v7058_v25  ;;  %v7122_v25 = vld [vmem:[#allocation10 + $0x778] sm:$0xff]  ;;  %7183 = vmatprep.subr.mxu1 %v7124_v9 }
 0xc43   :  { %7225 = vmatpush1.msra.mxu0 %v7057_v61  ;;  %v7121_v61 = vld [vmem:[#allocation10 + $0x770] sm:$0xff]  ;;  %7184 = vmatpush2.msra.mxu1 %v7123_v31 }
 0xc44   :  { %7226 = vmatprep.subr.mxu0 %v7054_v4  ;;  %v7118_v4 = vld [vmem:[#allocation10 + $0x758] sm:$0xff]  ;;  %7185 = vmatprep.subr.mxu1 %v7120_v63  ;;  %v6943_v63 = vld [vmem:[#allocation10 + $0x1e0] sm:$0xff] }
 0xc45   :  { %7227 = vmatpush1.msra.mxu0 %v7053_v48  ;;  %v7117_v48 = vld [vmem:[#allocation10 + $0x750] sm:$0xff]  ;;  %7186 = vmatpush2.msra.mxu1 %v7119_v52  ;;  %v6940_v52 = vld [vmem:[#allocation10 + $0x1c8] sm:$0xff] }
 0xc46   :  { %7228 = vmatprep.subr.mxu0 %v7050_v45  ;;  %v7114_v45 = vld [vmem:[#allocation10 + $0x738] sm:$0xff]  ;;  %7187 = vmatprep.subr.mxu1 %v7116_v3  ;;  %v6939_v3 = vld [vmem:[#allocation10 + $0x1c0] sm:$0xff] }
 0xc47   :  { %7229 = vmatpush1.msra.mxu0 %v7049_v55  ;;  %v7113_v55 = vld [vmem:[#allocation10 + $0x730] sm:$0xff]  ;;  %7188 = vmatpush2.msra.mxu1 %v7115_v56  ;;  %v6936_v56 = vld [vmem:[#allocation10 + $0x1a8] sm:$0xff] }
 0xc48   :  { %7230 = vmatprep.subr.mxu0 %v7046_v47  ;;  %v7110_v47 = vld [vmem:[#allocation10 + $0x718] sm:$0xff]  ;;  %7189 = vmatprep.subr.mxu1 %v7112_v58  ;;  %v6935_v58 = vld [vmem:[#allocation10 + $0x1a0] sm:$0xff] }
 0xc49   :  { %7231 = vmatpush1.msra.mxu0 %v7045_v21  ;;  %v7109_v21 = vld [vmem:[#allocation10 + $0x710] sm:$0xff]  ;;  %7190 = vmatpush2.msra.mxu1 %v7111_v46  ;;  %v6932_v46 = vld [vmem:[#allocation10 + $0x188] sm:$0xff] }
 0xc4a   :  { %7232 = vmatprep.subr.mxu0 %v7042_v6  ;;  %v7106_v6 = vld [vmem:[#allocation10 + $0x6f8] sm:$0xff]  ;;  %7191 = vmatprep.subr.mxu1 %v7108_v54  ;;  %v6931_v54 = vld [vmem:[#allocation10 + $0x180] sm:$0xff] }
 0xc4b   :  { %7233 = vmatpush1.msra.mxu0 %v7041_v11  ;;  %v7105_v11 = vld [vmem:[#allocation10 + $0x6f0] sm:$0xff]  ;;  %7192 = vmatpush2.msra.mxu1 %v7107_v60  ;;  %v6928_v60 = vld [vmem:[#allocation10 + $0x168] sm:$0xff] }
 0xc4c   :  { %7234 = vmatprep.subr.mxu0 %v7038_v15  ;;  %v7102_v15 = vld [vmem:[#allocation10 + $0x6d8] sm:$0xff]  ;;  %7193 = vmatprep.subr.mxu1 %v7104_v1  ;;  %v6927_v1 = vld [vmem:[#allocation10 + $0x160] sm:$0xff] }
 0xc4d   :  { %7235 = vmatpush1.msra.mxu0 %v7037_v53  ;;  %v7101_v53 = vld [vmem:[#allocation10 + $0x6d0] sm:$0xff]  ;;  %7194 = vmatpush2.msra.mxu1 %v7103_v8  ;;  %v6924_v8 = vld [vmem:[#allocation10 + $0x148] sm:$0xff] }
 0xc4e   :  { %7236 = vmatprep.subr.mxu0 %v7034_v10  ;;  %v7098_v10 = vld [vmem:[#allocation10 + $0x6b8] sm:$0xff]  ;;  %7195 = vmatprep.subr.mxu1 %v7100_v12  ;;  %v6923_v12 = vld [vmem:[#allocation10 + $0x140] sm:$0xff] }
 0xc4f   :  { %7237 = vmatpush1.msra.mxu0 %v7033_v32  ;;  %v7097_v32 = vld [vmem:[#allocation10 + $0x6b0] sm:$0xff]  ;;  %7196 = vmatpush2.msra.mxu1 %v7099_v51  ;;  %v6920_v51 = vld [vmem:[#allocation10 + $0x128] sm:$0xff] }
 0xc50   :  { %7238 = vmatprep.subr.mxu0 %v7030_v29  ;;  %v7094_v29 = vld [vmem:[#allocation10 + $0x698] sm:$0xff]  ;;  %7197 = vmatprep.subr.mxu1 %v7096_v16  ;;  %v6919_v16 = vld [vmem:[#allocation10 + $0x120] sm:$0xff] }
 0xc51   :  { %7239 = vmatpush1.msra.mxu0 %v7029_v26  ;;  %7198 = vmatpush2.msra.mxu1 %v7095_v18  ;;  %v7093_v26 = vld [vmem:[#allocation10 + $0x690] sm:$0xff]  ;;  %v6916_v18 = vld [vmem:[#allocation10 + $0x108] sm:$0xff] }
 0xc52   :  { %7240 = vmatprep.subr.mxu0 %v7026_v38  ;;  %7199 = vmatprep.subr.mxu1 %v7092_v28  ;;  %v7090_v38 = vld [vmem:[#allocation10 + $0x678] sm:$0xff]  ;;  %v6915_v28 = vld [vmem:[#allocation10 + $0x100] sm:$0xff] }
 0xc53   :  { %7241 = vmatpush1.msra.mxu0 %v7025_v23  ;;  %7200 = vmatpush2.msra.mxu1 %v7091_v7  ;;  %v7089_v23 = vld [vmem:[#allocation10 + $0x670] sm:$0xff]  ;;  %v6912_v7 = vld [vmem:[#allocation10 + $0xe8] sm:$0xff] }
 0xc54   :  { %7242 = vmatprep.subr.mxu0 %v7022_v13  ;;  %7201 = vmatprep.subr.mxu1 %v7088_v27  ;;  %v7086_v13 = vld [vmem:[#allocation10 + $0x658] sm:$0xff]  ;;  %v6911_v27 = vld [vmem:[#allocation10 + $0xe0] sm:$0xff] }
 0xc55   :  { %7243 = vmatpush1.msra.mxu0 %v7021_v0  ;;  %7202 = vmatpush2.msra.mxu1 %v7087_v40  ;;  %v7085_v0 = vld [vmem:[#allocation10 + $0x650] sm:$0xff]  ;;  %v6908_v40 = vld [vmem:[#allocation10 + $0xc8] sm:$0xff] }
 0xc56   :  { %7244 = vmatprep.subr.mxu0 %v7018_v33  ;;  %7203 = vmatprep.subr.mxu1 %v7084_v41  ;;  %v7082_v33 = vld [vmem:[#allocation10 + $0x638] sm:$0xff]  ;;  %v6907_v41 = vld [vmem:[#allocation10 + $0xc0] sm:$0xff] }
 0xc57   :  { %7245 = vmatpush1.msra.mxu0 %v7017_v5  ;;  %7204 = vmatpush2.msra.mxu1 %v7083_v20  ;;  %v7081_v5 = vld [vmem:[#allocation10 + $0x630] sm:$0xff]  ;;  %v6904_v20 = vld [vmem:[#allocation10 + $0xa8] sm:$0xff] }
 0xc58   :  { %7246 = vmatprep.subr.mxu0 %v7014_v37  ;;  %7205 = vmatprep.subr.mxu1 %v7080_v19  ;;  %v7078_v37 = vld [vmem:[#allocation10 + $0x618] sm:$0xff]  ;;  %v6903_v19 = vld [vmem:[#allocation10 + $0xa0] sm:$0xff] }
 0xc59   :  { %7247 = vmatpush1.msra.mxu0 %v7013_v50  ;;  %7206 = vmatpush2.msra.mxu1 %v7079_v35  ;;  %v7077_v50 = vld [vmem:[#allocation10 + $0x610] sm:$0xff]  ;;  %v6900_v35 = vld [vmem:[#allocation10 + $0x88] sm:$0xff] }
 0xc5a   :  { %7248 = vmatprep.subr.mxu0 %v7138_v43  ;;  %7207 = vmatprep.subr.mxu1 %v7076_v22  ;;  %v6946_v43 = vld [vmem:[#allocation10 + $0x1f8] sm:$0xff]  ;;  %v6899_v22 = vld [vmem:[#allocation10 + $0x80] sm:$0xff] }
 0xc5b   :  { %7249 = vmatpush2.msra.mxu0 %v7137_v17  ;;  %7208 = vmatpush2.msra.mxu1 %v7075_v14  ;;  %v6896_v14 = vld [vmem:[#allocation10 + $0x68] sm:$0xff] }
 0xc5c   :  { %7250 = vmatprep.subr.mxu0 %v7134_v34  ;;  %7287 = vmatprep.subr.mxu1 %v6944_v39  ;;  %v6895_v39 = vld [vmem:[#allocation10 + $0x60] sm:$0xff] }
 0xc5d   :  { %7251 = vmatpush2.msra.mxu0 %v7133_v59 }
 0xc5e   :  { %7252 = vmatprep.subr.mxu0 %v7130_v57 }
 0xc5f   :  { %7253 = vmatpush2.msra.mxu0 %v7129_v2 }
 0xc60   :  { %7254 = vmatprep.subr.mxu0 %v7126_v49 }
 0xc61   :  { %7255 = vmatpush2.msra.mxu0 %v7125_v62 }
 0xc62   :  { %7256 = vmatprep.subr.mxu0 %v7122_v25  ;;  %v6945_v25 = vld [vmem:[#allocation10 + $0x1f0] sm:$0xff] }
 0xc63   :  { %7257 = vmatpush2.msra.mxu0 %v7121_v61  ;;  %v6942_v61 = vld [vmem:[#allocation10 + $0x1d8] sm:$0xff] }
 0xc64   :  { %7258 = vmatprep.subr.mxu0 %v7118_v4  ;;  %v6941_v4 = vld [vmem:[#allocation10 + $0x1d0] sm:$0xff] }
 0xc65   :  { %7259 = vmatpush2.msra.mxu0 %v7117_v48  ;;  %v6938_v48 = vld [vmem:[#allocation10 + $0x1b8] sm:$0xff] }
 0xc66   :  { %7260 = vmatprep.subr.mxu0 %v7114_v45  ;;  %v6937_v45 = vld [vmem:[#allocation10 + $0x1b0] sm:$0xff] }
 0xc67   :  { %7261 = vmatpush2.msra.mxu0 %v7113_v55  ;;  %v6934_v55 = vld [vmem:[#allocation10 + $0x198] sm:$0xff] }
 0xc68   :  { %7262 = vmatprep.subr.mxu0 %v7110_v47  ;;  %v6933_v47 = vld [vmem:[#allocation10 + $0x190] sm:$0xff] }
 0xc69   :  { %7263 = vmatpush2.msra.mxu0 %v7109_v21  ;;  %v6930_v21 = vld [vmem:[#allocation10 + $0x178] sm:$0xff] }
 0xc6a   :  { %7264 = vmatprep.subr.mxu0 %v7106_v6  ;;  %v6929_v6 = vld [vmem:[#allocation10 + $0x170] sm:$0xff] }
 0xc6b   :  { %7265 = vmatpush2.msra.mxu0 %v7105_v11  ;;  %v6926_v11 = vld [vmem:[#allocation10 + $0x158] sm:$0xff] }
 0xc6c   :  { %7266 = vmatprep.subr.mxu0 %v7102_v15  ;;  %v6925_v15 = vld [vmem:[#allocation10 + $0x150] sm:$0xff] }
 0xc6d   :  { %7267 = vmatpush2.msra.mxu0 %v7101_v53  ;;  %v6922_v53 = vld [vmem:[#allocation10 + $0x138] sm:$0xff] }
 0xc6e   :  { %7268 = vmatprep.subr.mxu0 %v7098_v10  ;;  %v6921_v10 = vld [vmem:[#allocation10 + $0x130] sm:$0xff] }
 0xc6f   :  { %7269 = vmatpush2.msra.mxu0 %v7097_v32  ;;  %v6918_v32 = vld [vmem:[#allocation10 + $0x118] sm:$0xff] }
 0xc70   :  { %7270 = vmatprep.subr.mxu0 %v7094_v29  ;;  %v6917_v29 = vld [vmem:[#allocation10 + $0x110] sm:$0xff] }
 0xc71   :  { %7271 = vmatpush2.msra.mxu0 %v7093_v26  ;;  %v6914_v26 = vld [vmem:[#allocation10 + $0xf8] sm:$0xff] }
 0xc72   :  { %7272 = vmatprep.subr.mxu0 %v7090_v38  ;;  %v6913_v38 = vld [vmem:[#allocation10 + $0xf0] sm:$0xff] }
 0xc73   :  { %7273 = vmatpush2.msra.mxu0 %v7089_v23  ;;  %v6910_v23 = vld [vmem:[#allocation10 + $0xd8] sm:$0xff] }
 0xc74   :  { %7274 = vmatprep.subr.mxu0 %v7086_v13  ;;  %v6909_v13 = vld [vmem:[#allocation10 + $0xd0] sm:$0xff] }
 0xc75   :  { %7275 = vmatpush2.msra.mxu0 %v7085_v0  ;;  %v6906_v0 = vld [vmem:[#allocation10 + $0xb8] sm:$0xff] }
 0xc76   :  { %7276 = vmatprep.subr.mxu0 %v7082_v33  ;;  %v6905_v33 = vld [vmem:[#allocation10 + $0xb0] sm:$0xff] }
 0xc77   :  { %7277 = vmatpush2.msra.mxu0 %v7081_v5  ;;  %v6902_v5 = vld [vmem:[#allocation10 + $0x98] sm:$0xff] }
 0xc78   :  { %7278 = vmatprep.subr.mxu0 %v7078_v37  ;;  %v6901_v37 = vld [vmem:[#allocation10 + $0x90] sm:$0xff] }
 0xc79   :  { %7279 = vmatpush2.msra.mxu0 %v7077_v50  ;;  %v6898_v50 = vld [vmem:[#allocation10 + $0x78] sm:$0xff] }
 0xc7a   :  { %7358 = vmatprep.subr.mxu0 %v6946_v43  ;;  %v6897_v43 = vld [vmem:[#allocation10 + $0x70] sm:$0xff] }
 0xcb9   :  { %v6731_v17 = vpop.f32.mrf.mxu1 }
 0xcba   :  { %v6660_v44 = vpop.f32.mrf.mxu0 }
 0xcbb   :  { %v6732_v34 = vadd.f32 %v6731_v17, %v6660_v44  ;;  %v6733_v42 = vpop.f32.mrf.mxu1  ;;  %v6892_v44 = vld [vmem:[#allocation10 + $0x48] sm:$0xff]  ;;  %v6894_v17 = vld [vmem:[#allocation10 + $0x58] sm:$0xff] }
 0xcbc   :  { %v6662_v30 = vpop.f32.mrf.mxu0 }
 0xcbd   :  { %v6734_v24 = vadd.f32 %v6733_v42, %v6662_v30  ;;  %v6891_v30 = vld [vmem:[#allocation10 + $0x40] sm:$0xff]  ;;  %v6888_v42 = vld [vmem:[#allocation10 + $0x28] sm:$0xff] }
 0xcfa   :  { %v6874_v59 = vpop.f32.mrf.mxu0 }
 0xcfb   :  { %v6879_v57 = vadd.f32 %v6874_v59, %v6732_v34  ;;  %v6893_v34 = vld [vmem:[#allocation10 + $0x50] sm:$0xff]  ;;  %v6890_v59 = vld [vmem:[#allocation10 + $0x38] sm:$0xff] }
 0xcfc   :  { %v6876_v36 = vpop.f32.mrf.mxu0 }
 0xcfd   :  { %v6880_v2 = vadd.f32 %v6876_v36, %v6734_v24  ;;  %v9103_v9 = vmax.f32 %v6879_v57, 0.0  ;;  %v6887_v24 = vld [vmem:[#allocation10 + $0x20] sm:$0xff]  ;;  %v6889_v57 = vld [vmem:[#allocation10 + $0x30] sm:$0xff]  ;;  %v6884_v36 = vld [vmem:[#allocation10 + $0x8] sm:$0xff] }
 0xcff   :  { %v9105_v49 = vmax.f32 %v6880_v2, 0.0  ;;  %v7141_v62 = vrot.slane %v9103_v9, 1  ;;  %v6886_v2 = vld [vmem:[#allocation10 + $0x18] sm:$0xff] }
 0xd01   :  { %v7142_v31 = vrot.slane %v9105_v49, 1 }
 0xd03   :  { %7209 = vmatprep.mubr.f32.mxu1 %v7142_v31  ;;  %7280 = vmatprep.mubr.f32.mxu0 %v7142_v31  ;;  %v6883_v31 = vld [vmem:[#allocation10] sm:$0xff] }
 0xd04   :  { %7210 = vmatmul.mubr.f32.vlgmr.msra.gmra.mxu1 %v7141_v62  ;;  %7281 = vmatmul.mubr.f32.vlgmr.msra.gmra.mxu0 %v7141_v62  ;;  %v6885_v62 = vld [vmem:[#allocation10 + $0x10] sm:$0xff] }
 0xd05   :  { %7288 = vmatpush1.msra.mxu1 %v6943_v63  ;;  %7359 = vmatpush1.msra.mxu0 %v6945_v25  ;;  %v7008_v63 = vld [vmem:[#allocation10 + $0x3e8] sm:$0xff]  ;;  %v7010_v25 = vld [vmem:[#allocation10 + $0x3f8] sm:$0xff] }
 0xd06   :  { %7289 = vmatprep.subr.mxu1 %v6940_v52  ;;  %7351 = vmatprep.mubr.f32.mxu1 %v9105_v49  ;;  %v7007_v52 = vld [vmem:[#allocation10 + $0x3e0] sm:$0xff] }
 0xd07   :  { %7360 = vmatprep.subr.mxu0 %v6942_v61  ;;  %7422 = vmatprep.mubr.f32.mxu0 %v9105_v49  ;;  %v7009_v61 = vld [vmem:[#allocation10 + $0x3f0] sm:$0xff] }
 0xd08   :  { %7290 = vmatpush1.msra.mxu1 %v6939_v3  ;;  %7361 = vmatpush1.msra.mxu0 %v6941_v4  ;;  %v7004_v3 = vld [vmem:[#allocation10 + $0x3c8] sm:$0xff]  ;;  %v7006_v4 = vld [vmem:[#allocation10 + $0x3d8] sm:$0xff] }
 0xd09   :  { %7291 = vmatprep.subr.mxu1 %v6936_v56  ;;  %7362 = vmatprep.subr.mxu0 %v6938_v48  ;;  %v7003_v56 = vld [vmem:[#allocation10 + $0x3c0] sm:$0xff]  ;;  %v7005_v48 = vld [vmem:[#allocation10 + $0x3d0] sm:$0xff] }
 0xd0a   :  { %7292 = vmatpush1.msra.mxu1 %v6935_v58  ;;  %7363 = vmatpush1.msra.mxu0 %v6937_v45  ;;  %v7000_v58 = vld [vmem:[#allocation10 + $0x3a8] sm:$0xff]  ;;  %v7002_v45 = vld [vmem:[#allocation10 + $0x3b8] sm:$0xff] }
 0xd0b   :  { %7293 = vmatprep.subr.mxu1 %v6932_v46  ;;  %7364 = vmatprep.subr.mxu0 %v6934_v55  ;;  %v6999_v46 = vld [vmem:[#allocation10 + $0x3a0] sm:$0xff]  ;;  %v7001_v55 = vld [vmem:[#allocation10 + $0x3b0] sm:$0xff] }
 0xd0c   :  { %7294 = vmatpush1.msra.mxu1 %v6931_v54  ;;  %7365 = vmatpush1.msra.mxu0 %v6933_v47  ;;  %v6996_v54 = vld [vmem:[#allocation10 + $0x388] sm:$0xff]  ;;  %v6998_v47 = vld [vmem:[#allocation10 + $0x398] sm:$0xff] }
 0xd0d   :  { %7295 = vmatprep.subr.mxu1 %v6928_v60  ;;  %7366 = vmatprep.subr.mxu0 %v6930_v21  ;;  %v6995_v60 = vld [vmem:[#allocation10 + $0x380] sm:$0xff]  ;;  %v6997_v21 = vld [vmem:[#allocation10 + $0x390] sm:$0xff] }
 0xd0e   :  { %7296 = vmatpush1.msra.mxu1 %v6927_v1  ;;  %7367 = vmatpush1.msra.mxu0 %v6929_v6  ;;  %v6992_v1 = vld [vmem:[#allocation10 + $0x368] sm:$0xff]  ;;  %v6994_v6 = vld [vmem:[#allocation10 + $0x378] sm:$0xff] }
 0xd0f   :  { %7297 = vmatprep.subr.mxu1 %v6924_v8  ;;  %7368 = vmatprep.subr.mxu0 %v6926_v11  ;;  %v6991_v8 = vld [vmem:[#allocation10 + $0x360] sm:$0xff]  ;;  %v6993_v11 = vld [vmem:[#allocation10 + $0x370] sm:$0xff] }
 0xd10   :  { %7298 = vmatpush1.msra.mxu1 %v6923_v12  ;;  %7369 = vmatpush1.msra.mxu0 %v6925_v15  ;;  %v6988_v12 = vld [vmem:[#allocation10 + $0x348] sm:$0xff]  ;;  %v6990_v15 = vld [vmem:[#allocation10 + $0x358] sm:$0xff] }
 0xd11   :  { %7299 = vmatprep.subr.mxu1 %v6920_v51  ;;  %7370 = vmatprep.subr.mxu0 %v6922_v53  ;;  %v6987_v51 = vld [vmem:[#allocation10 + $0x340] sm:$0xff]  ;;  %v6989_v53 = vld [vmem:[#allocation10 + $0x350] sm:$0xff] }
 0xd12   :  { %7300 = vmatpush1.msra.mxu1 %v6919_v16  ;;  %7371 = vmatpush1.msra.mxu0 %v6921_v10  ;;  %v6984_v16 = vld [vmem:[#allocation10 + $0x328] sm:$0xff]  ;;  %v6986_v10 = vld [vmem:[#allocation10 + $0x338] sm:$0xff] }
 0xd13   :  { %7301 = vmatprep.subr.mxu1 %v6916_v18  ;;  %7372 = vmatprep.subr.mxu0 %v6918_v32  ;;  %v6983_v18 = vld [vmem:[#allocation10 + $0x320] sm:$0xff]  ;;  %v6985_v32 = vld [vmem:[#allocation10 + $0x330] sm:$0xff] }
 0xd14   :  { %7302 = vmatpush1.msra.mxu1 %v6915_v28  ;;  %7373 = vmatpush1.msra.mxu0 %v6917_v29  ;;  %v6980_v28 = vld [vmem:[#allocation10 + $0x308] sm:$0xff]  ;;  %v6982_v29 = vld [vmem:[#allocation10 + $0x318] sm:$0xff] }
 0xd15   :  { %7303 = vmatprep.subr.mxu1 %v6912_v7  ;;  %7374 = vmatprep.subr.mxu0 %v6914_v26  ;;  %v6979_v7 = vld [vmem:[#allocation10 + $0x300] sm:$0xff]  ;;  %v6981_v26 = vld [vmem:[#allocation10 + $0x310] sm:$0xff] }
 0xd16   :  { %7304 = vmatpush1.msra.mxu1 %v6911_v27  ;;  %7375 = vmatpush1.msra.mxu0 %v6913_v38  ;;  %v6976_v27 = vld [vmem:[#allocation10 + $0x2e8] sm:$0xff]  ;;  %v6978_v38 = vld [vmem:[#allocation10 + $0x2f8] sm:$0xff] }
 0xd17   :  { %7305 = vmatprep.subr.mxu1 %v6908_v40  ;;  %7376 = vmatprep.subr.mxu0 %v6910_v23  ;;  %v6975_v40 = vld [vmem:[#allocation10 + $0x2e0] sm:$0xff]  ;;  %v6977_v23 = vld [vmem:[#allocation10 + $0x2f0] sm:$0xff] }
 0xd18   :  { %7306 = vmatpush1.msra.mxu1 %v6907_v41  ;;  %7377 = vmatpush1.msra.mxu0 %v6909_v13  ;;  %v6972_v41 = vld [vmem:[#allocation10 + $0x2c8] sm:$0xff]  ;;  %v6974_v13 = vld [vmem:[#allocation10 + $0x2d8] sm:$0xff] }
 0xd19   :  { %7307 = vmatprep.subr.mxu1 %v6904_v20  ;;  %7378 = vmatprep.subr.mxu0 %v6906_v0  ;;  %v6971_v20 = vld [vmem:[#allocation10 + $0x2c0] sm:$0xff]  ;;  %v6973_v0 = vld [vmem:[#allocation10 + $0x2d0] sm:$0xff] }
 0xd1a   :  { %7308 = vmatpush1.msra.mxu1 %v6903_v19  ;;  %7379 = vmatpush1.msra.mxu0 %v6905_v33  ;;  %v6968_v19 = vld [vmem:[#allocation10 + $0x2a8] sm:$0xff]  ;;  %v6970_v33 = vld [vmem:[#allocation10 + $0x2b8] sm:$0xff] }
 0xd1b   :  { %7309 = vmatprep.subr.mxu1 %v6900_v35  ;;  %7380 = vmatprep.subr.mxu0 %v6902_v5  ;;  %v6967_v35 = vld [vmem:[#allocation10 + $0x2a0] sm:$0xff]  ;;  %v6969_v5 = vld [vmem:[#allocation10 + $0x2b0] sm:$0xff] }
 0xd1c   :  { %7310 = vmatpush1.msra.mxu1 %v6899_v22  ;;  %7381 = vmatpush1.msra.mxu0 %v6901_v37  ;;  %v6964_v22 = vld [vmem:[#allocation10 + $0x288] sm:$0xff]  ;;  %v6966_v37 = vld [vmem:[#allocation10 + $0x298] sm:$0xff] }
 0xd1d   :  { %7311 = vmatprep.subr.mxu1 %v6896_v14  ;;  %7382 = vmatprep.subr.mxu0 %v6898_v50  ;;  %v6963_v14 = vld [vmem:[#allocation10 + $0x280] sm:$0xff]  ;;  %v6965_v50 = vld [vmem:[#allocation10 + $0x290] sm:$0xff] }
 0xd1e   :  { %7312 = vmatpush1.msra.mxu1 %v6895_v39  ;;  %7383 = vmatpush1.msra.mxu0 %v6897_v43  ;;  %v6960_v39 = vld [vmem:[#allocation10 + $0x268] sm:$0xff]  ;;  %v6962_v43 = vld [vmem:[#allocation10 + $0x278] sm:$0xff] }
 0xd1f   :  { %7313 = vmatprep.subr.mxu1 %v6892_v44  ;;  %7384 = vmatprep.subr.mxu0 %v6894_v17  ;;  %v6959_v44 = vld [vmem:[#allocation10 + $0x260] sm:$0xff]  ;;  %v6961_v17 = vld [vmem:[#allocation10 + $0x270] sm:$0xff] }
 0xd20   :  { %7314 = vmatpush1.msra.mxu1 %v6891_v30  ;;  %7385 = vmatpush1.msra.mxu0 %v6893_v34  ;;  %v6956_v30 = vld [vmem:[#allocation10 + $0x248] sm:$0xff]  ;;  %v6958_v34 = vld [vmem:[#allocation10 + $0x258] sm:$0xff] }
 0xd21   :  { %7315 = vmatprep.subr.mxu1 %v6888_v42  ;;  %7386 = vmatprep.subr.mxu0 %v6890_v59  ;;  %v6955_v42 = vld [vmem:[#allocation10 + $0x240] sm:$0xff]  ;;  %v6957_v59 = vld [vmem:[#allocation10 + $0x250] sm:$0xff] }
 0xd22   :  { %7316 = vmatpush1.msra.mxu1 %v6887_v24  ;;  %7387 = vmatpush1.msra.mxu0 %v6889_v57  ;;  %v6952_v24 = vld [vmem:[#allocation10 + $0x228] sm:$0xff]  ;;  %v6954_v57 = vld [vmem:[#allocation10 + $0x238] sm:$0xff] }
 0xd23   :  { %7317 = vmatprep.subr.mxu1 %v6884_v36  ;;  %7388 = vmatprep.subr.mxu0 %v6886_v2  ;;  %v6951_v36 = vld [vmem:[#allocation10 + $0x220] sm:$0xff]  ;;  %v6953_v2 = vld [vmem:[#allocation10 + $0x230] sm:$0xff] }
 0xd24   :  { %7318 = vmatpush1.msra.mxu1 %v6883_v31  ;;  %7389 = vmatpush1.msra.mxu0 %v6885_v62  ;;  %v6948_v31 = vld [vmem:[#allocation10 + $0x208] sm:$0xff]  ;;  %v6950_v62 = vld [vmem:[#allocation10 + $0x218] sm:$0xff] }
 0xd25   :  { %7319 = vmatprep.subr.mxu1 %v7008_v63  ;;  %7390 = vmatprep.subr.mxu0 %v7010_v25  ;;  %v6947_v63 = vld [vmem:[#allocation10 + $0x200] sm:$0xff]  ;;  %v6949_v25 = vld [vmem:[#allocation10 + $0x210] sm:$0xff] }
 0xd26   :  { %7320 = vmatpush2.msra.mxu1 %v7007_v52  ;;  %7391 = vmatpush2.msra.mxu0 %v7009_v61  ;;  %v7490_v52 = vld [vmem:[#allocation10 + $0x9e8] sm:$0xff]  ;;  %v7492_v61 = vld [vmem:[#allocation10 + $0x9f8] sm:$0xff] }
 0xd27   :  { %7321 = vmatprep.subr.mxu1 %v7004_v3  ;;  %7392 = vmatprep.subr.mxu0 %v7006_v4  ;;  %v7489_v3 = vld [vmem:[#allocation10 + $0x9e0] sm:$0xff]  ;;  %v7558_v4 = vrot.slane %v9105_v49, 2 }
 0xd28   :  { %7322 = vmatpush2.msra.mxu1 %v7003_v56  ;;  %7393 = vmatpush2.msra.mxu0 %v7005_v48  ;;  %v7491_v56 = vld [vmem:[#allocation10 + $0x9f0] sm:$0xff]  ;;  %v7486_v48 = vld [vmem:[#allocation10 + $0x9c8] sm:$0xff] }
 0xd29   :  { %7323 = vmatprep.subr.mxu1 %v7000_v58  ;;  %7394 = vmatprep.subr.mxu0 %v7002_v45  ;;  %v7488_v58 = vld [vmem:[#allocation10 + $0x9d8] sm:$0xff]  ;;  %v7485_v45 = vld [vmem:[#allocation10 + $0x9c0] sm:$0xff] }
 0xd2a   :  { %7324 = vmatpush2.msra.mxu1 %v6999_v46  ;;  %7395 = vmatpush2.msra.mxu0 %v7001_v55  ;;  %v7487_v46 = vld [vmem:[#allocation10 + $0x9d0] sm:$0xff]  ;;  %v7482_v55 = vld [vmem:[#allocation10 + $0x9a8] sm:$0xff] }
 0xd2b   :  { %7325 = vmatprep.subr.mxu1 %v6996_v54  ;;  %7396 = vmatprep.subr.mxu0 %v6998_v47  ;;  %v7484_v54 = vld [vmem:[#allocation10 + $0x9b8] sm:$0xff]  ;;  %v7481_v47 = vld [vmem:[#allocation10 + $0x9a0] sm:$0xff] }
 0xd2c   :  { %7326 = vmatpush2.msra.mxu1 %v6995_v60  ;;  %7397 = vmatpush2.msra.mxu0 %v6997_v21  ;;  %v7483_v60 = vld [vmem:[#allocation10 + $0x9b0] sm:$0xff]  ;;  %v7478_v21 = vld [vmem:[#allocation10 + $0x988] sm:$0xff] }
 0xd2d   :  { %7327 = vmatprep.subr.mxu1 %v6992_v1  ;;  %7398 = vmatprep.subr.mxu0 %v6994_v6  ;;  %v7480_v1 = vld [vmem:[#allocation10 + $0x998] sm:$0xff]  ;;  %v7477_v6 = vld [vmem:[#allocation10 + $0x980] sm:$0xff] }
 0xd2e   :  { %7328 = vmatpush2.msra.mxu1 %v6991_v8  ;;  %7399 = vmatpush2.msra.mxu0 %v6993_v11  ;;  %v7479_v8 = vld [vmem:[#allocation10 + $0x990] sm:$0xff]  ;;  %v7474_v11 = vld [vmem:[#allocation10 + $0x968] sm:$0xff] }
 0xd2f   :  { %7329 = vmatprep.subr.mxu1 %v6988_v12  ;;  %7400 = vmatprep.subr.mxu0 %v6990_v15  ;;  %v7476_v12 = vld [vmem:[#allocation10 + $0x978] sm:$0xff]  ;;  %v7473_v15 = vld [vmem:[#allocation10 + $0x960] sm:$0xff] }
 0xd30   :  { %7330 = vmatpush2.msra.mxu1 %v6987_v51  ;;  %7401 = vmatpush2.msra.mxu0 %v6989_v53  ;;  %v7475_v51 = vld [vmem:[#allocation10 + $0x970] sm:$0xff]  ;;  %v7470_v53 = vld [vmem:[#allocation10 + $0x948] sm:$0xff] }
 0xd31   :  { %7331 = vmatprep.subr.mxu1 %v6984_v16  ;;  %7402 = vmatprep.subr.mxu0 %v6986_v10  ;;  %v7472_v16 = vld [vmem:[#allocation10 + $0x958] sm:$0xff]  ;;  %v7469_v10 = vld [vmem:[#allocation10 + $0x940] sm:$0xff] }
 0xd32   :  { %7332 = vmatpush2.msra.mxu1 %v6983_v18  ;;  %7403 = vmatpush2.msra.mxu0 %v6985_v32  ;;  %v7471_v18 = vld [vmem:[#allocation10 + $0x950] sm:$0xff]  ;;  %v7466_v32 = vld [vmem:[#allocation10 + $0x928] sm:$0xff] }
 0xd33   :  { %7333 = vmatprep.subr.mxu1 %v6980_v28  ;;  %7404 = vmatprep.subr.mxu0 %v6982_v29  ;;  %v7468_v28 = vld [vmem:[#allocation10 + $0x938] sm:$0xff]  ;;  %v7465_v29 = vld [vmem:[#allocation10 + $0x920] sm:$0xff] }
 0xd34   :  { %7334 = vmatpush2.msra.mxu1 %v6979_v7  ;;  %7405 = vmatpush2.msra.mxu0 %v6981_v26  ;;  %v7467_v7 = vld [vmem:[#allocation10 + $0x930] sm:$0xff]  ;;  %v7462_v26 = vld [vmem:[#allocation10 + $0x908] sm:$0xff] }
 0xd35   :  { %7335 = vmatprep.subr.mxu1 %v6976_v27  ;;  %7406 = vmatprep.subr.mxu0 %v6978_v38  ;;  %v7464_v27 = vld [vmem:[#allocation10 + $0x918] sm:$0xff]  ;;  %v7461_v38 = vld [vmem:[#allocation10 + $0x900] sm:$0xff] }
 0xd36   :  { %7336 = vmatpush2.msra.mxu1 %v6975_v40  ;;  %7407 = vmatpush2.msra.mxu0 %v6977_v23  ;;  %v7463_v40 = vld [vmem:[#allocation10 + $0x910] sm:$0xff]  ;;  %v7458_v23 = vld [vmem:[#allocation10 + $0x8e8] sm:$0xff] }
 0xd37   :  { %7337 = vmatprep.subr.mxu1 %v6972_v41  ;;  %7408 = vmatprep.subr.mxu0 %v6974_v13  ;;  %v7460_v41 = vld [vmem:[#allocation10 + $0x8f8] sm:$0xff]  ;;  %v7457_v13 = vld [vmem:[#allocation10 + $0x8e0] sm:$0xff] }
 0xd38   :  { %7338 = vmatpush2.msra.mxu1 %v6971_v20  ;;  %7409 = vmatpush2.msra.mxu0 %v6973_v0  ;;  %v7459_v20 = vld [vmem:[#allocation10 + $0x8f0] sm:$0xff]  ;;  %v7454_v0 = vld [vmem:[#allocation10 + $0x8c8] sm:$0xff] }
 0xd39   :  { %7339 = vmatprep.subr.mxu1 %v6968_v19  ;;  %7410 = vmatprep.subr.mxu0 %v6970_v33  ;;  %v7456_v19 = vld [vmem:[#allocation10 + $0x8d8] sm:$0xff]  ;;  %v7453_v33 = vld [vmem:[#allocation10 + $0x8c0] sm:$0xff] }
 0xd3a   :  { %7340 = vmatpush2.msra.mxu1 %v6967_v35  ;;  %7411 = vmatpush2.msra.mxu0 %v6969_v5  ;;  %v7455_v35 = vld [vmem:[#allocation10 + $0x8d0] sm:$0xff]  ;;  %v7450_v5 = vld [vmem:[#allocation10 + $0x8a8] sm:$0xff] }
 0xd3b   :  { %7341 = vmatprep.subr.mxu1 %v6964_v22  ;;  %7412 = vmatprep.subr.mxu0 %v6966_v37  ;;  %v7452_v22 = vld [vmem:[#allocation10 + $0x8b8] sm:$0xff]  ;;  %v7449_v37 = vld [vmem:[#allocation10 + $0x8a0] sm:$0xff] }
 0xd3c   :  { %7342 = vmatpush2.msra.mxu1 %v6963_v14  ;;  %7413 = vmatpush2.msra.mxu0 %v6965_v50  ;;  %v7451_v14 = vld [vmem:[#allocation10 + $0x8b0] sm:$0xff]  ;;  %v7446_v50 = vld [vmem:[#allocation10 + $0x888] sm:$0xff] }
 0xd3d   :  { %7343 = vmatprep.subr.mxu1 %v6960_v39  ;;  %7414 = vmatprep.subr.mxu0 %v6962_v43  ;;  %v7448_v39 = vld [vmem:[#allocation10 + $0x898] sm:$0xff]  ;;  %v7445_v43 = vld [vmem:[#allocation10 + $0x880] sm:$0xff] }
 0xd3e   :  { %7344 = vmatpush2.msra.mxu1 %v6959_v44  ;;  %7415 = vmatpush2.msra.mxu0 %v6961_v17  ;;  %v7447_v44 = vld [vmem:[#allocation10 + $0x890] sm:$0xff]  ;;  %v7442_v17 = vld [vmem:[#allocation10 + $0x868] sm:$0xff] }
 0xd3f   :  { %7345 = vmatprep.subr.mxu1 %v6956_v30  ;;  %7416 = vmatprep.subr.mxu0 %v6958_v34  ;;  %v7444_v30 = vld [vmem:[#allocation10 + $0x878] sm:$0xff]  ;;  %v7441_v34 = vld [vmem:[#allocation10 + $0x860] sm:$0xff] }
 0xd40   :  { %7346 = vmatpush2.msra.mxu1 %v6955_v42  ;;  %7417 = vmatpush2.msra.mxu0 %v6957_v59  ;;  %v7443_v42 = vld [vmem:[#allocation10 + $0x870] sm:$0xff]  ;;  %v7438_v59 = vld [vmem:[#allocation10 + $0x848] sm:$0xff] }
 0xd41   :  { %7347 = vmatprep.subr.mxu1 %v6952_v24  ;;  %7418 = vmatprep.subr.mxu0 %v6954_v57  ;;  %v7440_v24 = vld [vmem:[#allocation10 + $0x858] sm:$0xff]  ;;  %v7437_v57 = vld [vmem:[#allocation10 + $0x840] sm:$0xff] }
 0xd42   :  { %7348 = vmatpush2.msra.mxu1 %v6951_v36  ;;  %7419 = vmatpush2.msra.mxu0 %v6953_v2  ;;  %v7439_v36 = vld [vmem:[#allocation10 + $0x850] sm:$0xff]  ;;  %v7434_v2 = vld [vmem:[#allocation10 + $0x828] sm:$0xff] }
 0xd43   :  { %7349 = vmatprep.subr.mxu1 %v6948_v31  ;;  %7420 = vmatprep.subr.mxu0 %v6950_v62  ;;  %v7436_v31 = vld [vmem:[#allocation10 + $0x838] sm:$0xff]  ;;  %v7433_v62 = vld [vmem:[#allocation10 + $0x820] sm:$0xff] }
 0xd44   :  { %7350 = vmatpush2.msra.mxu1 %v6947_v63  ;;  %7421 = vmatpush2.msra.mxu0 %v6949_v25  ;;  %v7435_v63 = vld [vmem:[#allocation10 + $0x830] sm:$0xff]  ;;  %v7430_v25 = vld [vmem:[#allocation10 + $0x808] sm:$0xff] }
 0xd45   :  { %7352 = vmatmul.mubr.f32.vlgmr.msra.gmra.mxu1 %v9103_v9  ;;  %7423 = vmatmul.mubr.f32.vlgmr.msra.gmra.mxu0 %v9103_v9 }
 0xd46   :  { %7561 = vmatprep.subr.mxu1 %v7490_v52  ;;  %7632 = vmatprep.subr.mxu0 %v7492_v61  ;;  %v7432_v52 = vld [vmem:[#allocation10 + $0x818] sm:$0xff]  ;;  %v7429_v61 = vld [vmem:[#allocation10 + $0x800] sm:$0xff] }
 0xd47   :  { %7562 = vmatpush1.msra.mxu1 %v7489_v3  ;;  %7625 = vmatprep.mubr.f32.mxu1 %v7558_v4  ;;  %v7431_v3 = vld [vmem:[#allocation10 + $0x810] sm:$0xff] }
 0xd48   :  { %7633 = vmatpush1.msra.mxu0 %v7491_v56  ;;  %7696 = vmatprep.mubr.f32.mxu0 %v7558_v4  ;;  %v7554_v4 = vld [vmem:[#allocation10 + $0xbe8] sm:$0xff]  ;;  %v7556_v56 = vld [vmem:[#allocation10 + $0xbf8] sm:$0xff] }
 0xd49   :  { %7563 = vmatprep.subr.mxu1 %v7486_v48  ;;  %7634 = vmatprep.subr.mxu0 %v7488_v58  ;;  %v7553_v48 = vld [vmem:[#allocation10 + $0xbe0] sm:$0xff]  ;;  %v7555_v58 = vld [vmem:[#allocation10 + $0xbf0] sm:$0xff] }
 0xd4a   :  { %7564 = vmatpush1.msra.mxu1 %v7485_v45  ;;  %7635 = vmatpush1.msra.mxu0 %v7487_v46  ;;  %v7550_v45 = vld [vmem:[#allocation10 + $0xbc8] sm:$0xff]  ;;  %v7552_v46 = vld [vmem:[#allocation10 + $0xbd8] sm:$0xff] }
 0xd4b   :  { %7565 = vmatprep.subr.mxu1 %v7482_v55  ;;  %7636 = vmatprep.subr.mxu0 %v7484_v54  ;;  %v7549_v55 = vld [vmem:[#allocation10 + $0xbc0] sm:$0xff]  ;;  %v7551_v54 = vld [vmem:[#allocation10 + $0xbd0] sm:$0xff] }
 0xd4c   :  { %7566 = vmatpush1.msra.mxu1 %v7481_v47  ;;  %7637 = vmatpush1.msra.mxu0 %v7483_v60  ;;  %v7546_v47 = vld [vmem:[#allocation10 + $0xba8] sm:$0xff]  ;;  %v7548_v60 = vld [vmem:[#allocation10 + $0xbb8] sm:$0xff] }
 0xd4d   :  { %7567 = vmatprep.subr.mxu1 %v7478_v21  ;;  %7638 = vmatprep.subr.mxu0 %v7480_v1  ;;  %v7545_v21 = vld [vmem:[#allocation10 + $0xba0] sm:$0xff]  ;;  %v7547_v1 = vld [vmem:[#allocation10 + $0xbb0] sm:$0xff] }
 0xd4e   :  { %7568 = vmatpush1.msra.mxu1 %v7477_v6  ;;  %7639 = vmatpush1.msra.mxu0 %v7479_v8  ;;  %v7542_v6 = vld [vmem:[#allocation10 + $0xb88] sm:$0xff]  ;;  %v7544_v8 = vld [vmem:[#allocation10 + $0xb98] sm:$0xff] }
 0xd4f   :  { %7569 = vmatprep.subr.mxu1 %v7474_v11  ;;  %7640 = vmatprep.subr.mxu0 %v7476_v12  ;;  %v7541_v11 = vld [vmem:[#allocation10 + $0xb80] sm:$0xff]  ;;  %v7543_v12 = vld [vmem:[#allocation10 + $0xb90] sm:$0xff] }
 0xd50   :  { %7570 = vmatpush1.msra.mxu1 %v7473_v15  ;;  %7641 = vmatpush1.msra.mxu0 %v7475_v51  ;;  %v7538_v15 = vld [vmem:[#allocation10 + $0xb68] sm:$0xff]  ;;  %v7540_v51 = vld [vmem:[#allocation10 + $0xb78] sm:$0xff] }
 0xd51   :  { %7571 = vmatprep.subr.mxu1 %v7470_v53  ;;  %7642 = vmatprep.subr.mxu0 %v7472_v16  ;;  %v7537_v53 = vld [vmem:[#allocation10 + $0xb60] sm:$0xff]  ;;  %v7539_v16 = vld [vmem:[#allocation10 + $0xb70] sm:$0xff] }
 0xd52   :  { %7572 = vmatpush1.msra.mxu1 %v7469_v10  ;;  %7643 = vmatpush1.msra.mxu0 %v7471_v18  ;;  %v7534_v10 = vld [vmem:[#allocation10 + $0xb48] sm:$0xff]  ;;  %v7536_v18 = vld [vmem:[#allocation10 + $0xb58] sm:$0xff] }
 0xd53   :  { %7573 = vmatprep.subr.mxu1 %v7466_v32  ;;  %7644 = vmatprep.subr.mxu0 %v7468_v28  ;;  %v7533_v32 = vld [vmem:[#allocation10 + $0xb40] sm:$0xff]  ;;  %v7535_v28 = vld [vmem:[#allocation10 + $0xb50] sm:$0xff] }
 0xd54   :  { %7574 = vmatpush1.msra.mxu1 %v7465_v29  ;;  %7645 = vmatpush1.msra.mxu0 %v7467_v7  ;;  %v7530_v29 = vld [vmem:[#allocation10 + $0xb28] sm:$0xff]  ;;  %v7532_v7 = vld [vmem:[#allocation10 + $0xb38] sm:$0xff] }
 0xd55   :  { %7575 = vmatprep.subr.mxu1 %v7462_v26  ;;  %7646 = vmatprep.subr.mxu0 %v7464_v27  ;;  %v7529_v26 = vld [vmem:[#allocation10 + $0xb20] sm:$0xff]  ;;  %v7531_v27 = vld [vmem:[#allocation10 + $0xb30] sm:$0xff] }
 0xd56   :  { %7576 = vmatpush1.msra.mxu1 %v7461_v38  ;;  %7647 = vmatpush1.msra.mxu0 %v7463_v40  ;;  %v7526_v38 = vld [vmem:[#allocation10 + $0xb08] sm:$0xff]  ;;  %v7528_v40 = vld [vmem:[#allocation10 + $0xb18] sm:$0xff] }
 0xd57   :  { %7577 = vmatprep.subr.mxu1 %v7458_v23  ;;  %7648 = vmatprep.subr.mxu0 %v7460_v41  ;;  %v7525_v23 = vld [vmem:[#allocation10 + $0xb00] sm:$0xff]  ;;  %v7527_v41 = vld [vmem:[#allocation10 + $0xb10] sm:$0xff] }
 0xd58   :  { %7578 = vmatpush1.msra.mxu1 %v7457_v13  ;;  %7649 = vmatpush1.msra.mxu0 %v7459_v20  ;;  %v7522_v13 = vld [vmem:[#allocation10 + $0xae8] sm:$0xff]  ;;  %v7524_v20 = vld [vmem:[#allocation10 + $0xaf8] sm:$0xff] }
 0xd59   :  { %7579 = vmatprep.subr.mxu1 %v7454_v0  ;;  %7650 = vmatprep.subr.mxu0 %v7456_v19  ;;  %v7521_v0 = vld [vmem:[#allocation10 + $0xae0] sm:$0xff]  ;;  %v7523_v19 = vld [vmem:[#allocation10 + $0xaf0] sm:$0xff] }
 0xd5a   :  { %7580 = vmatpush1.msra.mxu1 %v7453_v33  ;;  %7651 = vmatpush1.msra.mxu0 %v7455_v35  ;;  %v7518_v33 = vld [vmem:[#allocation10 + $0xac8] sm:$0xff]  ;;  %v7520_v35 = vld [vmem:[#allocation10 + $0xad8] sm:$0xff] }
 0xd5b   :  { %7581 = vmatprep.subr.mxu1 %v7450_v5  ;;  %7652 = vmatprep.subr.mxu0 %v7452_v22  ;;  %v7517_v5 = vld [vmem:[#allocation10 + $0xac0] sm:$0xff]  ;;  %v7519_v22 = vld [vmem:[#allocation10 + $0xad0] sm:$0xff] }
 0xd5c   :  { %7582 = vmatpush1.msra.mxu1 %v7449_v37  ;;  %7653 = vmatpush1.msra.mxu0 %v7451_v14  ;;  %v7514_v37 = vld [vmem:[#allocation10 + $0xaa8] sm:$0xff]  ;;  %v7516_v14 = vld [vmem:[#allocation10 + $0xab8] sm:$0xff] }
 0xd5d   :  { %7583 = vmatprep.subr.mxu1 %v7446_v50  ;;  %7654 = vmatprep.subr.mxu0 %v7448_v39  ;;  %v7513_v50 = vld [vmem:[#allocation10 + $0xaa0] sm:$0xff]  ;;  %v7515_v39 = vld [vmem:[#allocation10 + $0xab0] sm:$0xff] }
 0xd5e   :  { %7584 = vmatpush1.msra.mxu1 %v7445_v43  ;;  %7655 = vmatpush1.msra.mxu0 %v7447_v44  ;;  %v7510_v43 = vld [vmem:[#allocation10 + $0xa88] sm:$0xff]  ;;  %v7512_v44 = vld [vmem:[#allocation10 + $0xa98] sm:$0xff] }
 0xd5f   :  { %7585 = vmatprep.subr.mxu1 %v7442_v17  ;;  %7656 = vmatprep.subr.mxu0 %v7444_v30  ;;  %v7509_v17 = vld [vmem:[#allocation10 + $0xa80] sm:$0xff]  ;;  %v7511_v30 = vld [vmem:[#allocation10 + $0xa90] sm:$0xff] }
 0xd60   :  { %7586 = vmatpush1.msra.mxu1 %v7441_v34  ;;  %7657 = vmatpush1.msra.mxu0 %v7443_v42  ;;  %v7506_v34 = vld [vmem:[#allocation10 + $0xa68] sm:$0xff]  ;;  %v7508_v42 = vld [vmem:[#allocation10 + $0xa78] sm:$0xff] }
 0xd61   :  { %7587 = vmatprep.subr.mxu1 %v7438_v59  ;;  %7658 = vmatprep.subr.mxu0 %v7440_v24  ;;  %v7505_v59 = vld [vmem:[#allocation10 + $0xa60] sm:$0xff]  ;;  %v7507_v24 = vld [vmem:[#allocation10 + $0xa70] sm:$0xff] }
 0xd62   :  { %7588 = vmatpush1.msra.mxu1 %v7437_v57  ;;  %7659 = vmatpush1.msra.mxu0 %v7439_v36  ;;  %v7502_v57 = vld [vmem:[#allocation10 + $0xa48] sm:$0xff]  ;;  %v7504_v36 = vld [vmem:[#allocation10 + $0xa58] sm:$0xff] }
 0xd63   :  { %7589 = vmatprep.subr.mxu1 %v7434_v2  ;;  %7660 = vmatprep.subr.mxu0 %v7436_v31  ;;  %v7501_v2 = vld [vmem:[#allocation10 + $0xa40] sm:$0xff]  ;;  %v7503_v31 = vld [vmem:[#allocation10 + $0xa50] sm:$0xff] }
 0xd64   :  { %7590 = vmatpush1.msra.mxu1 %v7433_v62  ;;  %7661 = vmatpush1.msra.mxu0 %v7435_v63  ;;  %v7498_v62 = vld [vmem:[#allocation10 + $0xa28] sm:$0xff]  ;;  %v7500_v63 = vld [vmem:[#allocation10 + $0xa38] sm:$0xff] }
 0xd65   :  { %7591 = vmatprep.subr.mxu1 %v7430_v25  ;;  %7662 = vmatprep.subr.mxu0 %v7432_v52  ;;  %v7497_v25 = vld [vmem:[#allocation10 + $0xa20] sm:$0xff]  ;;  %v7499_v52 = vld [vmem:[#allocation10 + $0xa30] sm:$0xff] }
 0xd66   :  { %7592 = vmatpush1.msra.mxu1 %v7429_v61  ;;  %7663 = vmatpush1.msra.mxu0 %v7431_v3  ;;  %v7494_v61 = vld [vmem:[#allocation10 + $0xa08] sm:$0xff]  ;;  %v7496_v3 = vld [vmem:[#allocation10 + $0xa18] sm:$0xff] }
 0xd67   :  { %7593 = vmatprep.subr.mxu1 %v7554_v4  ;;  %7664 = vmatprep.subr.mxu0 %v7556_v56  ;;  %v7493_v4 = vld [vmem:[#allocation10 + $0xa00] sm:$0xff]  ;;  %v7495_v56 = vld [vmem:[#allocation10 + $0xa10] sm:$0xff] }
 0xd68   :  { %7594 = vmatpush2.msra.mxu1 %v7553_v48  ;;  %7665 = vmatpush2.msra.mxu0 %v7555_v58  ;;  %v7557_v48 = vrot.slane %v9103_v9, 2  ;;  %v7768_v58 = vld [vmem:[#allocation10 + $0xde8] sm:$0xff] }
 0xd69   :  { %7595 = vmatprep.subr.mxu1 %v7550_v45  ;;  %7666 = vmatprep.subr.mxu0 %v7552_v46  ;;  %v7770_v45 = vld [vmem:[#allocation10 + $0xdf8] sm:$0xff]  ;;  %v7767_v46 = vld [vmem:[#allocation10 + $0xde0] sm:$0xff] }
 0xd6a   :  { %7596 = vmatpush2.msra.mxu1 %v7549_v55  ;;  %7667 = vmatpush2.msra.mxu0 %v7551_v54  ;;  %v7836_v55 = vrot.slane %v9105_v49, 3  ;;  %v7769_v54 = vld [vmem:[#allocation10 + $0xdf0] sm:$0xff]  ;;  %v7756_v49 = vld [vmem:[#allocation10 + $0xd88] sm:$0xff] }
 0xd6b   :  { %7597 = vmatprep.subr.mxu1 %v7546_v47  ;;  %7668 = vmatprep.subr.mxu0 %v7548_v60  ;;  %v7764_v47 = vld [vmem:[#allocation10 + $0xdc8] sm:$0xff]  ;;  %v7766_v60 = vld [vmem:[#allocation10 + $0xdd8] sm:$0xff] }
 0xd6c   :  { %7598 = vmatpush2.msra.mxu1 %v7545_v21  ;;  %7669 = vmatpush2.msra.mxu0 %v7547_v1  ;;  %v7763_v21 = vld [vmem:[#allocation10 + $0xdc0] sm:$0xff]  ;;  %v7765_v1 = vld [vmem:[#allocation10 + $0xdd0] sm:$0xff] }
 0xd6d   :  { %7599 = vmatprep.subr.mxu1 %v7542_v6  ;;  %7670 = vmatprep.subr.mxu0 %v7544_v8  ;;  %v7760_v6 = vld [vmem:[#allocation10 + $0xda8] sm:$0xff]  ;;  %v7762_v8 = vld [vmem:[#allocation10 + $0xdb8] sm:$0xff] }
 0xd6e   :  { %7600 = vmatpush2.msra.mxu1 %v7541_v11  ;;  %7671 = vmatpush2.msra.mxu0 %v7543_v12  ;;  %v7759_v11 = vld [vmem:[#allocation10 + $0xda0] sm:$0xff]  ;;  %v7761_v12 = vld [vmem:[#allocation10 + $0xdb0] sm:$0xff] }
 0xd6f   :  { %7601 = vmatprep.subr.mxu1 %v7538_v15  ;;  %7672 = vmatprep.subr.mxu0 %v7540_v51  ;;  %v7758_v15 = vld [vmem:[#allocation10 + $0xd98] sm:$0xff]  ;;  %v7755_v51 = vld [vmem:[#allocation10 + $0xd80] sm:$0xff] }
 0xd70   :  { %7602 = vmatpush2.msra.mxu1 %v7537_v53  ;;  %7673 = vmatpush2.msra.mxu0 %v7539_v16  ;;  %v7757_v53 = vld [vmem:[#allocation10 + $0xd90] sm:$0xff]  ;;  %v7752_v16 = vld [vmem:[#allocation10 + $0xd68] sm:$0xff] }
 0xd71   :  { %7603 = vmatprep.subr.mxu1 %v7534_v10  ;;  %7674 = vmatprep.subr.mxu0 %v7536_v18  ;;  %v7754_v10 = vld [vmem:[#allocation10 + $0xd78] sm:$0xff]  ;;  %v7751_v18 = vld [vmem:[#allocation10 + $0xd60] sm:$0xff] }
 0xd72   :  { %7604 = vmatpush2.msra.mxu1 %v7533_v32  ;;  %7675 = vmatpush2.msra.mxu0 %v7535_v28  ;;  %v7753_v32 = vld [vmem:[#allocation10 + $0xd70] sm:$0xff]  ;;  %v7748_v28 = vld [vmem:[#allocation10 + $0xd48] sm:$0xff] }
 0xd73   :  { %7605 = vmatprep.subr.mxu1 %v7530_v29  ;;  %7676 = vmatprep.subr.mxu0 %v7532_v7  ;;  %v7750_v29 = vld [vmem:[#allocation10 + $0xd58] sm:$0xff]  ;;  %v7747_v7 = vld [vmem:[#allocation10 + $0xd40] sm:$0xff] }
 0xd74   :  { %7606 = vmatpush2.msra.mxu1 %v7529_v26  ;;  %7677 = vmatpush2.msra.mxu0 %v7531_v27  ;;  %v7749_v26 = vld [vmem:[#allocation10 + $0xd50] sm:$0xff]  ;;  %v7744_v27 = vld [vmem:[#allocation10 + $0xd28] sm:$0xff] }
 0xd75   :  { %7607 = vmatprep.subr.mxu1 %v7526_v38  ;;  %7678 = vmatprep.subr.mxu0 %v7528_v40  ;;  %v7746_v38 = vld [vmem:[#allocation10 + $0xd38] sm:$0xff]  ;;  %v7743_v40 = vld [vmem:[#allocation10 + $0xd20] sm:$0xff] }
 0xd76   :  { %7608 = vmatpush2.msra.mxu1 %v7525_v23  ;;  %7679 = vmatpush2.msra.mxu0 %v7527_v41  ;;  %v7745_v23 = vld [vmem:[#allocation10 + $0xd30] sm:$0xff]  ;;  %v7740_v41 = vld [vmem:[#allocation10 + $0xd08] sm:$0xff] }
 0xd77   :  { %7609 = vmatprep.subr.mxu1 %v7522_v13  ;;  %7680 = vmatprep.subr.mxu0 %v7524_v20  ;;  %v7742_v13 = vld [vmem:[#allocation10 + $0xd18] sm:$0xff]  ;;  %v7739_v20 = vld [vmem:[#allocation10 + $0xd00] sm:$0xff] }
 0xd78   :  { %7610 = vmatpush2.msra.mxu1 %v7521_v0  ;;  %7681 = vmatpush2.msra.mxu0 %v7523_v19  ;;  %v7741_v0 = vld [vmem:[#allocation10 + $0xd10] sm:$0xff]  ;;  %v7736_v19 = vld [vmem:[#allocation10 + $0xce8] sm:$0xff] }
 0xd79   :  { %7611 = vmatprep.subr.mxu1 %v7518_v33  ;;  %7682 = vmatprep.subr.mxu0 %v7520_v35  ;;  %v7738_v33 = vld [vmem:[#allocation10 + $0xcf8] sm:$0xff]  ;;  %v7735_v35 = vld [vmem:[#allocation10 + $0xce0] sm:$0xff] }
 0xd7a   :  { %7612 = vmatpush2.msra.mxu1 %v7517_v5  ;;  %7683 = vmatpush2.msra.mxu0 %v7519_v22  ;;  %v7737_v5 = vld [vmem:[#allocation10 + $0xcf0] sm:$0xff]  ;;  %v7732_v22 = vld [vmem:[#allocation10 + $0xcc8] sm:$0xff] }
 0xd7b   :  { %7613 = vmatprep.subr.mxu1 %v7514_v37  ;;  %7684 = vmatprep.subr.mxu0 %v7516_v14  ;;  %v7734_v37 = vld [vmem:[#allocation10 + $0xcd8] sm:$0xff]  ;;  %v7731_v14 = vld [vmem:[#allocation10 + $0xcc0] sm:$0xff] }
 0xd7c   :  { %7614 = vmatpush2.msra.mxu1 %v7513_v50  ;;  %7685 = vmatpush2.msra.mxu0 %v7515_v39  ;;  %v7733_v50 = vld [vmem:[#allocation10 + $0xcd0] sm:$0xff]  ;;  %v7728_v39 = vld [vmem:[#allocation10 + $0xca8] sm:$0xff] }
 0xd7d   :  { %7615 = vmatprep.subr.mxu1 %v7510_v43  ;;  %7686 = vmatprep.subr.mxu0 %v7512_v44  ;;  %v7730_v43 = vld [vmem:[#allocation10 + $0xcb8] sm:$0xff]  ;;  %v7727_v44 = vld [vmem:[#allocation10 + $0xca0] sm:$0xff] }
 0xd7e   :  { %7616 = vmatpush2.msra.mxu1 %v7509_v17  ;;  %7687 = vmatpush2.msra.mxu0 %v7511_v30  ;;  %v7729_v17 = vld [vmem:[#allocation10 + $0xcb0] sm:$0xff]  ;;  %v7724_v30 = vld [vmem:[#allocation10 + $0xc88] sm:$0xff] }
 0xd7f   :  { %7617 = vmatprep.subr.mxu1 %v7506_v34  ;;  %7688 = vmatprep.subr.mxu0 %v7508_v42  ;;  %v7726_v34 = vld [vmem:[#allocation10 + $0xc98] sm:$0xff]  ;;  %v7723_v42 = vld [vmem:[#allocation10 + $0xc80] sm:$0xff] }
 0xd80   :  { %7618 = vmatpush2.msra.mxu1 %v7505_v59  ;;  %7689 = vmatpush2.msra.mxu0 %v7507_v24  ;;  %v7725_v59 = vld [vmem:[#allocation10 + $0xc90] sm:$0xff]  ;;  %v7720_v24 = vld [vmem:[#allocation10 + $0xc68] sm:$0xff] }
 0xd81   :  { %7619 = vmatprep.subr.mxu1 %v7502_v57  ;;  %7690 = vmatprep.subr.mxu0 %v7504_v36  ;;  %v7722_v57 = vld [vmem:[#allocation10 + $0xc78] sm:$0xff]  ;;  %v7719_v36 = vld [vmem:[#allocation10 + $0xc60] sm:$0xff] }
 0xd82   :  { %7620 = vmatpush2.msra.mxu1 %v7501_v2  ;;  %7691 = vmatpush2.msra.mxu0 %v7503_v31  ;;  %v7721_v2 = vld [vmem:[#allocation10 + $0xc70] sm:$0xff]  ;;  %v7716_v31 = vld [vmem:[#allocation10 + $0xc48] sm:$0xff] }
 0xd83   :  { %7621 = vmatprep.subr.mxu1 %v7498_v62  ;;  %7692 = vmatprep.subr.mxu0 %v7500_v63  ;;  %v7718_v62 = vld [vmem:[#allocation10 + $0xc58] sm:$0xff]  ;;  %v7715_v63 = vld [vmem:[#allocation10 + $0xc40] sm:$0xff] }
 0xd84   :  { %7622 = vmatpush2.msra.mxu1 %v7497_v25  ;;  %7693 = vmatpush2.msra.mxu0 %v7499_v52  ;;  %v7717_v25 = vld [vmem:[#allocation10 + $0xc50] sm:$0xff]  ;;  %v7712_v52 = vld [vmem:[#allocation10 + $0xc28] sm:$0xff] }
 0xd85   :  { %7623 = vmatprep.subr.mxu1 %v7494_v61  ;;  %7694 = vmatprep.subr.mxu0 %v7496_v3  ;;  %v7714_v61 = vld [vmem:[#allocation10 + $0xc38] sm:$0xff]  ;;  %v7711_v3 = vld [vmem:[#allocation10 + $0xc20] sm:$0xff] }
 0xd86   :  { %7624 = vmatpush2.msra.mxu1 %v7493_v4  ;;  %7695 = vmatpush2.msra.mxu0 %v7495_v56  ;;  %v7713_v4 = vld [vmem:[#allocation10 + $0xc30] sm:$0xff]  ;;  %v7708_v56 = vld [vmem:[#allocation10 + $0xc08] sm:$0xff] }
 0xd87   :  { %7626 = vmatmul.mubr.f32.vlgmr.msra.gmra.mxu1 %v7557_v48  ;;  %7697 = vmatmul.mubr.f32.vlgmr.msra.gmra.mxu0 %v7557_v48  ;;  %v7710_v48 = vld [vmem:[#allocation10 + $0xc18] sm:$0xff] }
 0xd88   :  { %7839 = vmatprep.subr.mxu1 %v7768_v58  ;;  %7910 = vmatprep.subr.mxu0 %v7770_v45  ;;  %v7707_v58 = vld [vmem:[#allocation10 + $0xc00] sm:$0xff]  ;;  %v7709_v45 = vld [vmem:[#allocation10 + $0xc10] sm:$0xff] }
 0xd89   :  { %7840 = vmatpush1.msra.mxu1 %v7767_v46  ;;  %7903 = vmatprep.mubr.f32.mxu1 %v7836_v55  ;;  %v7832_v46 = vld [vmem:[#allocation10 + $0xfe8] sm:$0xff] }
 0xd8a   :  { %7911 = vmatpush1.msra.mxu0 %v7769_v54  ;;  %7974 = vmatprep.mubr.f32.mxu0 %v7836_v55  ;;  %v7834_v55 = vld [vmem:[#allocation10 + $0xff8] sm:$0xff]  ;;  %v7831_v54 = vld [vmem:[#allocation10 + $0xfe0] sm:$0xff] }
 0xd8b   :  { %7841 = vmatprep.subr.mxu1 %v7764_v47  ;;  %7912 = vmatprep.subr.mxu0 %v7766_v60  ;;  %v7833_v47 = vld [vmem:[#allocation10 + $0xff0] sm:$0xff]  ;;  %v7828_v60 = vld [vmem:[#allocation10 + $0xfc8] sm:$0xff] }
 0xd8c   :  { %7842 = vmatpush1.msra.mxu1 %v7763_v21  ;;  %7913 = vmatpush1.msra.mxu0 %v7765_v1  ;;  %v7830_v21 = vld [vmem:[#allocation10 + $0xfd8] sm:$0xff]  ;;  %v7827_v1 = vld [vmem:[#allocation10 + $0xfc0] sm:$0xff] }
 0xd8d   :  { %7843 = vmatprep.subr.mxu1 %v7760_v6  ;;  %7914 = vmatprep.subr.mxu0 %v7762_v8  ;;  %v7829_v6 = vld [vmem:[#allocation10 + $0xfd0] sm:$0xff]  ;;  %v7824_v8 = vld [vmem:[#allocation10 + $0xfa8] sm:$0xff] }
 0xd8e   :  { %7844 = vmatpush1.msra.mxu1 %v7759_v11  ;;  %7915 = vmatpush1.msra.mxu0 %v7761_v12  ;;  %v7826_v11 = vld [vmem:[#allocation10 + $0xfb8] sm:$0xff]  ;;  %v7823_v12 = vld [vmem:[#allocation10 + $0xfa0] sm:$0xff] }
 0xd8f   :  { %7845 = vmatprep.subr.mxu1 %v7756_v49  ;;  %7916 = vmatprep.subr.mxu0 %v7758_v15  ;;  %v7825_v49 = vld [vmem:[#allocation10 + $0xfb0] sm:$0xff]  ;;  %v7820_v15 = vld [vmem:[#allocation10 + $0xf88] sm:$0xff] }
 0xd90   :  { %7846 = vmatpush1.msra.mxu1 %v7755_v51  ;;  %7917 = vmatpush1.msra.mxu0 %v7757_v53  ;;  %v7822_v51 = vld [vmem:[#allocation10 + $0xf98] sm:$0xff]  ;;  %v7819_v53 = vld [vmem:[#allocation10 + $0xf80] sm:$0xff] }
 0xd91   :  { %7847 = vmatprep.subr.mxu1 %v7752_v16  ;;  %7918 = vmatprep.subr.mxu0 %v7754_v10  ;;  %v7821_v16 = vld [vmem:[#allocation10 + $0xf90] sm:$0xff]  ;;  %v7816_v10 = vld [vmem:[#allocation10 + $0xf68] sm:$0xff] }
 0xd92   :  { %7848 = vmatpush1.msra.mxu1 %v7751_v18  ;;  %7919 = vmatpush1.msra.mxu0 %v7753_v32  ;;  %v7818_v18 = vld [vmem:[#allocation10 + $0xf78] sm:$0xff]  ;;  %v7815_v32 = vld [vmem:[#allocation10 + $0xf60] sm:$0xff] }
 0xd93   :  { %7849 = vmatprep.subr.mxu1 %v7748_v28  ;;  %7920 = vmatprep.subr.mxu0 %v7750_v29  ;;  %v7817_v28 = vld [vmem:[#allocation10 + $0xf70] sm:$0xff]  ;;  %v7812_v29 = vld [vmem:[#allocation10 + $0xf48] sm:$0xff] }
 0xd94   :  { %7850 = vmatpush1.msra.mxu1 %v7747_v7  ;;  %7921 = vmatpush1.msra.mxu0 %v7749_v26  ;;  %v7814_v7 = vld [vmem:[#allocation10 + $0xf58] sm:$0xff]  ;;  %v7811_v26 = vld [vmem:[#allocation10 + $0xf40] sm:$0xff] }
 0xd95   :  { %7851 = vmatprep.subr.mxu1 %v7744_v27  ;;  %7922 = vmatprep.subr.mxu0 %v7746_v38  ;;  %v7813_v27 = vld [vmem:[#allocation10 + $0xf50] sm:$0xff]  ;;  %v7808_v38 = vld [vmem:[#allocation10 + $0xf28] sm:$0xff] }
 0xd96   :  { %7852 = vmatpush1.msra.mxu1 %v7743_v40  ;;  %7923 = vmatpush1.msra.mxu0 %v7745_v23  ;;  %v7810_v40 = vld [vmem:[#allocation10 + $0xf38] sm:$0xff]  ;;  %v7807_v23 = vld [vmem:[#allocation10 + $0xf20] sm:$0xff] }
 0xd97   :  { %7853 = vmatprep.subr.mxu1 %v7740_v41  ;;  %7924 = vmatprep.subr.mxu0 %v7742_v13  ;;  %v7809_v41 = vld [vmem:[#allocation10 + $0xf30] sm:$0xff]  ;;  %v7804_v13 = vld [vmem:[#allocation10 + $0xf08] sm:$0xff] }
 0xd98   :  { %7854 = vmatpush1.msra.mxu1 %v7739_v20  ;;  %7925 = vmatpush1.msra.mxu0 %v7741_v0  ;;  %v7806_v20 = vld [vmem:[#allocation10 + $0xf18] sm:$0xff]  ;;  %v7803_v0 = vld [vmem:[#allocation10 + $0xf00] sm:$0xff] }
 0xd99   :  { %7855 = vmatprep.subr.mxu1 %v7736_v19  ;;  %7926 = vmatprep.subr.mxu0 %v7738_v33  ;;  %v7805_v19 = vld [vmem:[#allocation10 + $0xf10] sm:$0xff]  ;;  %v7800_v33 = vld [vmem:[#allocation10 + $0xee8] sm:$0xff] }
 0xd9a   :  { %7856 = vmatpush1.msra.mxu1 %v7735_v35  ;;  %7927 = vmatpush1.msra.mxu0 %v7737_v5  ;;  %v7802_v35 = vld [vmem:[#allocation10 + $0xef8] sm:$0xff]  ;;  %v7799_v5 = vld [vmem:[#allocation10 + $0xee0] sm:$0xff] }
 0xd9b   :  { %7857 = vmatprep.subr.mxu1 %v7732_v22  ;;  %7928 = vmatprep.subr.mxu0 %v7734_v37  ;;  %v7801_v22 = vld [vmem:[#allocation10 + $0xef0] sm:$0xff]  ;;  %v7796_v37 = vld [vmem:[#allocation10 + $0xec8] sm:$0xff] }
 0xd9c   :  { %7858 = vmatpush1.msra.mxu1 %v7731_v14  ;;  %7929 = vmatpush1.msra.mxu0 %v7733_v50  ;;  %v7798_v14 = vld [vmem:[#allocation10 + $0xed8] sm:$0xff]  ;;  %v7795_v50 = vld [vmem:[#allocation10 + $0xec0] sm:$0xff] }
 0xd9d   :  { %7859 = vmatprep.subr.mxu1 %v7728_v39  ;;  %7930 = vmatprep.subr.mxu0 %v7730_v43  ;;  %v7797_v39 = vld [vmem:[#allocation10 + $0xed0] sm:$0xff]  ;;  %v7792_v43 = vld [vmem:[#allocation10 + $0xea8] sm:$0xff] }
 0xd9e   :  { %7860 = vmatpush1.msra.mxu1 %v7727_v44  ;;  %7931 = vmatpush1.msra.mxu0 %v7729_v17  ;;  %v7794_v44 = vld [vmem:[#allocation10 + $0xeb8] sm:$0xff]  ;;  %v7791_v17 = vld [vmem:[#allocation10 + $0xea0] sm:$0xff] }
 0xd9f   :  { %7861 = vmatprep.subr.mxu1 %v7724_v30  ;;  %7932 = vmatprep.subr.mxu0 %v7726_v34  ;;  %v7793_v30 = vld [vmem:[#allocation10 + $0xeb0] sm:$0xff]  ;;  %v7788_v34 = vld [vmem:[#allocation10 + $0xe88] sm:$0xff] }
 0xda0   :  { %7862 = vmatpush1.msra.mxu1 %v7723_v42  ;;  %7933 = vmatpush1.msra.mxu0 %v7725_v59  ;;  %v7790_v42 = vld [vmem:[#allocation10 + $0xe98] sm:$0xff]  ;;  %v7787_v59 = vld [vmem:[#allocation10 + $0xe80] sm:$0xff] }
 0xda1   :  { %7863 = vmatprep.subr.mxu1 %v7720_v24  ;;  %7934 = vmatprep.subr.mxu0 %v7722_v57  ;;  %v7789_v24 = vld [vmem:[#allocation10 + $0xe90] sm:$0xff]  ;;  %v7784_v57 = vld [vmem:[#allocation10 + $0xe68] sm:$0xff] }
 0xda2   :  { %7864 = vmatpush1.msra.mxu1 %v7719_v36  ;;  %7935 = vmatpush1.msra.mxu0 %v7721_v2  ;;  %v7786_v36 = vld [vmem:[#allocation10 + $0xe78] sm:$0xff]  ;;  %v7783_v2 = vld [vmem:[#allocation10 + $0xe60] sm:$0xff] }
 0xda3   :  { %7865 = vmatprep.subr.mxu1 %v7716_v31  ;;  %7936 = vmatprep.subr.mxu0 %v7718_v62  ;;  %v7785_v31 = vld [vmem:[#allocation10 + $0xe70] sm:$0xff]  ;;  %v7780_v62 = vld [vmem:[#allocation10 + $0xe48] sm:$0xff] }
 0xda4   :  { %7866 = vmatpush1.msra.mxu1 %v7715_v63  ;;  %7937 = vmatpush1.msra.mxu0 %v7717_v25  ;;  %v7782_v63 = vld [vmem:[#allocation10 + $0xe58] sm:$0xff]  ;;  %v7779_v25 = vld [vmem:[#allocation10 + $0xe40] sm:$0xff] }
 0xda5   :  { %7867 = vmatprep.subr.mxu1 %v7712_v52  ;;  %7938 = vmatprep.subr.mxu0 %v7714_v61  ;;  %v7781_v52 = vld [vmem:[#allocation10 + $0xe50] sm:$0xff]  ;;  %v7776_v61 = vld [vmem:[#allocation10 + $0xe28] sm:$0xff] }
 0xda6   :  { %7868 = vmatpush1.msra.mxu1 %v7711_v3  ;;  %7939 = vmatpush1.msra.mxu0 %v7713_v4  ;;  %v7778_v3 = vld [vmem:[#allocation10 + $0xe38] sm:$0xff]  ;;  %v7775_v4 = vld [vmem:[#allocation10 + $0xe20] sm:$0xff] }
 0xda7   :  { %7869 = vmatprep.subr.mxu1 %v7708_v56  ;;  %7940 = vmatprep.subr.mxu0 %v7710_v48  ;;  %v7777_v56 = vld [vmem:[#allocation10 + $0xe30] sm:$0xff]  ;;  %v7772_v48 = vld [vmem:[#allocation10 + $0xe08] sm:$0xff] }
 0xda8   :  { %7870 = vmatpush1.msra.mxu1 %v7707_v58  ;;  %7941 = vmatpush1.msra.mxu0 %v7709_v45  ;;  %v7774_v58 = vld [vmem:[#allocation10 + $0xe18] sm:$0xff]  ;;  %v7771_v45 = vld [vmem:[#allocation10 + $0xe00] sm:$0xff] }
 0xda9   :  { %7871 = vmatprep.subr.mxu1 %v7832_v46  ;;  %7942 = vmatprep.subr.mxu0 %v7834_v55  ;;  %v7773_v46 = vld [vmem:[#allocation10 + $0xe10] sm:$0xff]  ;;  %v7835_v55 = vrot.slane %v9103_v9, 3  ;;  %v8003_v9 = vld [vmem:[%s9330_s5 + $0x70] sm:$0xff] }
 0xdaa   :  { %7872 = vmatpush2.msra.mxu1 %v7831_v54  ;;  %7943 = vmatpush2.msra.mxu0 %v7833_v47  ;;  %v8020_v54 = vld [vmem:[%s9330_s5 + $0xf8] sm:$0xff] }
 0xdab   :  { %7873 = vmatprep.subr.mxu1 %v7828_v60  ;;  %7944 = vmatprep.subr.mxu0 %v7830_v21  ;;  %v8004_v47 = vld [vmem:[%s9330_s5 + $0x78] sm:$0xff]  ;;  %v8019_v60 = vld [vmem:[%s9330_s5 + $0xf0] sm:$0xff]  ;;  %v8018_v21 = vld [vmem:[%s9330_s5 + $0xe8] sm:$0xff] }
 0xdac   :  { %7874 = vmatpush2.msra.mxu1 %v7827_v1  ;;  %7945 = vmatpush2.msra.mxu0 %v7829_v6  ;;  %v8002_v1 = vld [vmem:[%s9330_s5 + $0x68] sm:$0xff]  ;;  %v8017_v6 = vld [vmem:[%s9330_s5 + $0xe0] sm:$0xff] }
 0xdad   :  { %7875 = vmatprep.subr.mxu1 %v7824_v8  ;;  %7946 = vmatprep.subr.mxu0 %v7826_v11  ;;  %v8001_v8 = vld [vmem:[%s9330_s5 + $0x60] sm:$0xff]  ;;  %v8016_v11 = vld [vmem:[%s9330_s5 + $0xd8] sm:$0xff] }
 0xdae   :  { %7876 = vmatpush2.msra.mxu1 %v7823_v12  ;;  %7947 = vmatpush2.msra.mxu0 %v7825_v49  ;;  %v8000_v12 = vld [vmem:[%s9330_s5 + $0x58] sm:$0xff]  ;;  %v8015_v49 = vld [vmem:[%s9330_s5 + $0xd0] sm:$0xff] }
 0xdaf   :  { %7877 = vmatprep.subr.mxu1 %v7820_v15  ;;  %7948 = vmatprep.subr.mxu0 %v7822_v51  ;;  %v7999_v15 = vld [vmem:[%s9330_s5 + $0x50] sm:$0xff]  ;;  %v8014_v51 = vld [vmem:[%s9330_s5 + $0xc8] sm:$0xff] }
 0xdb0   :  { %7878 = vmatpush2.msra.mxu1 %v7819_v53  ;;  %7949 = vmatpush2.msra.mxu0 %v7821_v16  ;;  %v7998_v53 = vld [vmem:[%s9330_s5 + $0x48] sm:$0xff]  ;;  %v8013_v16 = vld [vmem:[%s9330_s5 + $0xc0] sm:$0xff] }
 0xdb1   :  { %7879 = vmatprep.subr.mxu1 %v7816_v10  ;;  %7950 = vmatprep.subr.mxu0 %v7818_v18  ;;  %v7997_v10 = vld [vmem:[%s9330_s5 + $0x40] sm:$0xff]  ;;  %v8012_v18 = vld [vmem:[%s9330_s5 + $0xb8] sm:$0xff] }
 0xdb2   :  { %7880 = vmatpush2.msra.mxu1 %v7815_v32  ;;  %7951 = vmatpush2.msra.mxu0 %v7817_v28  ;;  %v7996_v32 = vld [vmem:[%s9330_s5 + $0x38] sm:$0xff]  ;;  %v8011_v28 = vld [vmem:[%s9330_s5 + $0xb0] sm:$0xff] }
 0xdb3   :  { %7881 = vmatprep.subr.mxu1 %v7812_v29  ;;  %7952 = vmatprep.subr.mxu0 %v7814_v7  ;;  %v7995_v29 = vld [vmem:[%s9330_s5 + $0x30] sm:$0xff]  ;;  %v8010_v7 = vld [vmem:[%s9330_s5 + $0xa8] sm:$0xff] }
 0xdb4   :  { %7882 = vmatpush2.msra.mxu1 %v7811_v26  ;;  %7953 = vmatpush2.msra.mxu0 %v7813_v27  ;;  %v7994_v26 = vld [vmem:[%s9330_s5 + $0x28] sm:$0xff]  ;;  %v8009_v27 = vld [vmem:[%s9330_s5 + $0xa0] sm:$0xff] }
 0xdb5   :  { %7883 = vmatprep.subr.mxu1 %v7808_v38  ;;  %7954 = vmatprep.subr.mxu0 %v7810_v40  ;;  %v7993_v38 = vld [vmem:[%s9330_s5 + $0x20] sm:$0xff]  ;;  %v8008_v40 = vld [vmem:[%s9330_s5 + $0x98] sm:$0xff] }
 0xdb6   :  { %7884 = vmatpush2.msra.mxu1 %v7807_v23  ;;  %7955 = vmatpush2.msra.mxu0 %v7809_v41  ;;  %v7992_v23 = vld [vmem:[%s9330_s5 + $0x18] sm:$0xff]  ;;  %v8007_v41 = vld [vmem:[%s9330_s5 + $0x90] sm:$0xff] }
 0xdb7   :  { %7885 = vmatprep.subr.mxu1 %v7804_v13  ;;  %7956 = vmatprep.subr.mxu0 %v7806_v20  ;;  %v7991_v13 = vld [vmem:[%s9330_s5 + $0x10] sm:$0xff]  ;;  %v8006_v20 = vld [vmem:[%s9330_s5 + $0x88] sm:$0xff] }
 0xdb8   :  { %7886 = vmatpush2.msra.mxu1 %v7803_v0  ;;  %7957 = vmatpush2.msra.mxu0 %v7805_v19  ;;  %v7990_v0 = vld [vmem:[%s9330_s5 + $0x8] sm:$0xff]  ;;  %v8005_v19 = vld [vmem:[%s9330_s5 + $0x80] sm:$0xff] }
 0xdb9   :  { %7887 = vmatprep.subr.mxu1 %v7800_v33  ;;  %7958 = vmatprep.subr.mxu0 %v7802_v35  ;;  %v7989_v33 = vld [vmem:[%s9330_s5] sm:$0xff]  ;;  %v8052_v35 = vld [vmem:[%s9330_s5 + $0x1f8] sm:$0xff] }
 0xdba   :  { %7888 = vmatpush2.msra.mxu1 %v7799_v5  ;;  %7959 = vmatpush2.msra.mxu0 %v7801_v22 }
 0xdbb   :  { %7889 = vmatprep.subr.mxu1 %v7796_v37  ;;  %7960 = vmatprep.subr.mxu0 %v7798_v14 }
 0xdbc   :  { %7890 = vmatpush2.msra.mxu1 %v7795_v50  ;;  %7961 = vmatpush2.msra.mxu0 %v7797_v39 }
 0xdbd   :  { %7891 = vmatprep.subr.mxu1 %v7792_v43  ;;  %7962 = vmatprep.subr.mxu0 %v7794_v44 }
 0xdbe   :  { %7892 = vmatpush2.msra.mxu1 %v7791_v17  ;;  %7963 = vmatpush2.msra.mxu0 %v7793_v30 }
 0xdbf   :  { %7893 = vmatprep.subr.mxu1 %v7788_v34  ;;  %7964 = vmatprep.subr.mxu0 %v7790_v42 }
 0xdc0   :  { %7894 = vmatpush2.msra.mxu1 %v7787_v59  ;;  %7965 = vmatpush2.msra.mxu0 %v7789_v24 }
 0xdc1   :  { %7895 = vmatprep.subr.mxu1 %v7784_v57  ;;  %7966 = vmatprep.subr.mxu0 %v7786_v36 }
 0xdc2   :  { %7896 = vmatpush2.msra.mxu1 %v7783_v2  ;;  %7967 = vmatpush2.msra.mxu0 %v7785_v31 }
 0xdc3   :  { %7897 = vmatprep.subr.mxu1 %v7780_v62  ;;  %7968 = vmatprep.subr.mxu0 %v7782_v63 }
 0xdc4   :  { %7898 = vmatpush2.msra.mxu1 %v7779_v25  ;;  %7969 = vmatpush2.msra.mxu0 %v7781_v52  ;;  %v7211_v5 = vpop.f32.mrf.mxu1  ;;  %v9216_v22 = vpop.f32.mrf.mxu0 }
 0xdc5   :  { %7899 = vmatprep.subr.mxu1 %v7776_v61  ;;  %7970 = vmatprep.subr.mxu0 %v7778_v3 }
 0xdc6   :  { %7900 = vmatpush2.msra.mxu1 %v7775_v4  ;;  %7971 = vmatpush2.msra.mxu0 %v7777_v56  ;;  %v7213_v37 = vpop.f32.mrf.mxu1  ;;  %v7284_v14 = vpop.f32.mrf.mxu0 }
 0xdc7   :  { %7901 = vmatprep.subr.mxu1 %v7772_v48  ;;  %7972 = vmatprep.subr.mxu0 %v7774_v58  ;;  %v8036_v58 = vld [vmem:[%s9330_s5 + $0x178] sm:$0xff] }
 0xdc8   :  { %7902 = vmatpush2.msra.mxu1 %v7771_v45  ;;  %7973 = vmatpush2.msra.mxu0 %v7773_v46  ;;  %v8051_v46 = vld [vmem:[%s9330_s5 + $0x1f0] sm:$0xff] }
 0xdc9   :  { %7904 = vmatmul.mubr.f32.vlgmr.msra.gmra.mxu1 %v7835_v55  ;;  %7975 = vmatmul.mubr.f32.vlgmr.msra.gmra.mxu0 %v7835_v55  ;;  %v8035_v55 = vld [vmem:[%s9330_s5 + $0x170] sm:$0xff] }
 0xdca   :  { %8321 = vmatprep.subr.mxu1 %v8020_v54  ;;  %v8050_v54 = vld [vmem:[%s9330_s5 + $0x1e8] sm:$0xff] }
 0xdcb   :  { %8322 = vmatpush3.msra.mxu1 %v8004_v47  ;;  %v8034_v47 = vld [vmem:[%s9330_s5 + $0x168] sm:$0xff] }
 0xdcc   :  { %8323 = vmatprep.subr.mxu1 %v8019_v60  ;;  %v8049_v60 = vld [vmem:[%s9330_s5 + $0x1e0] sm:$0xff] }
 0xdcd   :  { %8324 = vmatpush3.msra.mxu1 %v8003_v9  ;;  %v8033_v9 = vld [vmem:[%s9330_s5 + $0x160] sm:$0xff] }
 0xdce   :  { %8325 = vmatprep.subr.mxu1 %v8018_v21  ;;  %v8048_v21 = vld [vmem:[%s9330_s5 + $0x1d8] sm:$0xff] }
 0xdcf   :  { %8326 = vmatpush3.msra.mxu1 %v8002_v1  ;;  %v8032_v1 = vld [vmem:[%s9330_s5 + $0x158] sm:$0xff] }
 0xdd0   :  { %8327 = vmatprep.subr.mxu1 %v8017_v6  ;;  %v8047_v6 = vld [vmem:[%s9330_s5 + $0x1d0] sm:$0xff] }
 0xdd1   :  { %8328 = vmatpush3.msra.mxu1 %v8001_v8  ;;  %v8031_v8 = vld [vmem:[%s9330_s5 + $0x150] sm:$0xff] }
 0xdd2   :  { %8329 = vmatprep.subr.mxu1 %v8016_v11  ;;  %v8046_v11 = vld [vmem:[%s9330_s5 + $0x1c8] sm:$0xff] }
 0xdd3   :  { %8330 = vmatpush3.msra.mxu1 %v8000_v12  ;;  %v8030_v12 = vld [vmem:[%s9330_s5 + $0x148] sm:$0xff] }
 0xdd4   :  { %8331 = vmatprep.subr.mxu1 %v8015_v49  ;;  %v8045_v49 = vld [vmem:[%s9330_s5 + $0x1c0] sm:$0xff] }
 0xdd5   :  { %8332 = vmatpush3.msra.mxu1 %v7999_v15  ;;  %v8029_v15 = vld [vmem:[%s9330_s5 + $0x140] sm:$0xff] }
 0xdd6   :  { %8333 = vmatprep.subr.mxu1 %v8014_v51  ;;  %v8044_v51 = vld [vmem:[%s9330_s5 + $0x1b8] sm:$0xff] }
 0xdd7   :  { %8334 = vmatpush3.msra.mxu1 %v7998_v53  ;;  %v8028_v53 = vld [vmem:[%s9330_s5 + $0x138] sm:$0xff] }
 0xdd8   :  { %8335 = vmatprep.subr.mxu1 %v8013_v16  ;;  %v8043_v16 = vld [vmem:[%s9330_s5 + $0x1b0] sm:$0xff] }
 0xdd9   :  { %8336 = vmatpush3.msra.mxu1 %v7997_v10  ;;  %v8027_v10 = vld [vmem:[%s9330_s5 + $0x130] sm:$0xff] }
 0xdda   :  { %8337 = vmatprep.subr.mxu1 %v8012_v18  ;;  %v8042_v18 = vld [vmem:[%s9330_s5 + $0x1a8] sm:$0xff] }
 0xddb   :  { %8338 = vmatpush3.msra.mxu1 %v7996_v32  ;;  %v8026_v32 = vld [vmem:[%s9330_s5 + $0x128] sm:$0xff] }
 0xddc   :  { %8339 = vmatprep.subr.mxu1 %v8011_v28  ;;  %v8041_v28 = vld [vmem:[%s9330_s5 + $0x1a0] sm:$0xff] }
 0xddd   :  { %8340 = vmatpush3.msra.mxu1 %v7995_v29  ;;  %v8025_v29 = vld [vmem:[%s9330_s5 + $0x120] sm:$0xff] }
 0xdde   :  { %8341 = vmatprep.subr.mxu1 %v8010_v7  ;;  %v8040_v7 = vld [vmem:[%s9330_s5 + $0x198] sm:$0xff] }
 0xddf   :  { %8342 = vmatpush3.msra.mxu1 %v7994_v26 }
 0xde0   :  { %8343 = vmatprep.subr.mxu1 %v8009_v27  ;;  %v8024_v27 = vld [vmem:[%s9330_s5 + $0x118] sm:$0xff] }
 0xde1   :  { %8344 = vmatpush3.msra.mxu1 %v7993_v38  ;;  %v8039_v38 = vld [vmem:[%s9330_s5 + $0x190] sm:$0xff] }
 0xde2   :  { %8345 = vmatprep.subr.mxu1 %v8008_v40 }
 0xde3   :  { %8346 = vmatpush3.msra.mxu1 %v7992_v23  ;;  %v8023_v23 = vld [vmem:[%s9330_s5 + $0x110] sm:$0xff] }
 0xde4   :  { %8347 = vmatprep.subr.mxu1 %v8007_v41  ;;  %v8038_v41 = vld [vmem:[%s9330_s5 + $0x188] sm:$0xff] }
 0xde5   :  { %8348 = vmatpush3.msra.mxu1 %v7991_v13 }
 0xde6   :  { %8349 = vmatprep.subr.mxu1 %v8006_v20  ;;  %v8022_v20 = vld [vmem:[%s9330_s5 + $0x108] sm:$0xff] }
 0xde7   :  { %8350 = vmatpush3.msra.mxu1 %v7990_v0  ;;  %v8037_v0 = vld [vmem:[%s9330_s5 + $0x180] sm:$0xff] }
 0xde8   :  { %8351 = vmatprep.subr.mxu1 %v8005_v19  ;;  %v8021_v19 = vld [vmem:[%s9330_s5 + $0x100] sm:$0xff] }
 0xde9   :  { %8352 = vmatpush3.msra.mxu1 %v7989_v33 }
 0xdea   :  { %8356 = vmatprep.subr.mxu1 %v8052_v35 }
 0xe05   :  { %v7353_v50 = vpop.f32.mrf.mxu1  ;;  %v9218_v39 = vpop.f32.mrf.mxu0 }
 0xe06   :  { %v7354_v34 = vadd.f32 %v7353_v50, %v7211_v5  ;;  %v7425_v26 = vadd.f32 %v9218_v39, %v9216_v22 }
 0xe07   :  { %v7355_v43 = vpop.f32.mrf.mxu1  ;;  %v7426_v44 = vpop.f32.mrf.mxu0 }
 0xe08   :  { %v7356_v24 = vadd.f32 %v7355_v43, %v7213_v37  ;;  %v7427_v57 = vadd.f32 %v7426_v44, %v7284_v14 }
 0xe47   :  { %v7627_v17 = vpop.f32.mrf.mxu1  ;;  %v9220_v30 = vpop.f32.mrf.mxu0 }
 0xe48   :  { %v7703_v36 = vadd.f32 %v7627_v17, %v7354_v34  ;;  %v7705_v40 = vadd.f32 %v9220_v30, %v7425_v26 }
 0xe49   :  { %v7629_v42 = vpop.f32.mrf.mxu1  ;;  %v7700_v59 = vpop.f32.mrf.mxu0 }
 0xe4a   :  { %v7704_v62 = vadd.f32 %v7629_v42, %v7356_v24  ;;  %v7706_v63 = vadd.f32 %v7700_v59, %v7427_v57 }
 0xe89   :  { %v7905_v2 = vpop.f32.mrf.mxu1  ;;  %v9222_v31 = vpop.f32.mrf.mxu0 }
 0xe8a   :  { %v7981_v25 = vadd.f32 %v7905_v2, %v7703_v36  ;;  %v7983_v13 = vadd.f32 %v9222_v31, %v7705_v40 }
 0xe8b   :  { %v7907_v52 = vpop.f32.mrf.mxu1  ;;  %v7978_v61 = vpop.f32.mrf.mxu0 }
 0xe8c   :  { %v7982_v3 = vadd.f32 %v7907_v52, %v7704_v62  ;;  %v7984_v4 = vadd.f32 %v7978_v61, %v7706_v63  ;;  %v7985_v48 = vmax.f32 %v7981_v25, 0.0  ;;  %v7987_v33 = vmax.f32 %v7983_v13, 0.0 }
 0xe8e   :  { %v7986_v56 = vmax.f32 %v7982_v3, 0.0  ;;  %v7988_v45 = vmax.f32 %v7984_v4, 0.0 }
 0xe90   :  { %8117 = vmatprep.mubr.f32.mxu1 %v7986_v56 }
 0xe91   :  { %8118 = vmatmul.mubr.f32.vlgmr.msra.gmra.mxu1 %v7985_v48 }
 0xe92   :  { %8357 = vmatpush3.msra.mxu1 %v8036_v58  ;;  %8187 = vmatprep.mubr.f32.mxu1 %v7988_v45 }
 0xe93   :  { %8358 = vmatprep.subr.mxu1 %v8051_v46 }
 0xe94   :  { %8359 = vmatpush3.msra.mxu1 %v8035_v55 }
 0xe95   :  { %8360 = vmatprep.subr.mxu1 %v8050_v54 }
 0xe96   :  { %8361 = vmatpush3.msra.mxu1 %v8034_v47 }
 0xe97   :  { %8362 = vmatprep.subr.mxu1 %v8049_v60 }
 0xe98   :  { %8363 = vmatpush3.msra.mxu1 %v8033_v9 }
 0xe99   :  { %8364 = vmatprep.subr.mxu1 %v8048_v21 }
 0xe9a   :  { %8365 = vmatpush3.msra.mxu1 %v8032_v1 }
 0xe9b   :  { %8366 = vmatprep.subr.mxu1 %v8047_v6 }
 0xe9c   :  { %8367 = vmatpush3.msra.mxu1 %v8031_v8 }
 0xe9d   :  { %8368 = vmatprep.subr.mxu1 %v8046_v11 }
 0xe9e   :  { %8369 = vmatpush3.msra.mxu1 %v8030_v12 }
 0xe9f   :  { %8370 = vmatprep.subr.mxu1 %v8045_v49 }
 0xea0   :  { %8371 = vmatpush3.msra.mxu1 %v8029_v15 }
 0xea1   :  { %8372 = vmatprep.subr.mxu1 %v8044_v51 }
 0xea2   :  { %8373 = vmatpush3.msra.mxu1 %v8028_v53 }
 0xea3   :  { %8374 = vmatprep.subr.mxu1 %v8043_v16 }
 0xea4   :  { %8375 = vmatpush3.msra.mxu1 %v8027_v10 }
 0xea5   :  { %8376 = vmatprep.subr.mxu1 %v8042_v18 }
 0xea6   :  { %8377 = vmatpush3.msra.mxu1 %v8026_v32 }
 0xea7   :  { %8378 = vmatprep.subr.mxu1 %v8041_v28 }
 0xea8   :  { %8379 = vmatpush3.msra.mxu1 %v8025_v29 }
 0xea9   :  { %8380 = vmatprep.subr.mxu1 %v8040_v7 }
 0xeaa   :  { %8381 = vmatpush3.msra.mxu1 %v8024_v27 }
 0xeab   :  { %8382 = vmatprep.subr.mxu1 %v8039_v38 }
 0xeac   :  { %8383 = vmatpush3.msra.mxu1 %v8023_v23 }
 0xead   :  { %8384 = vmatprep.subr.mxu1 %v8038_v41 }
 0xeae   :  { %8385 = vmatpush3.msra.mxu1 %v8022_v20 }
 0xeaf   :  { %8386 = vmatprep.subr.mxu1 %v8037_v0 }
 0xeb0   :  { %8387 = vmatpush3.msra.mxu1 %v8021_v19 }
 0xeb1   :  { %8188 = vmatmul.mubr.f32.vlgmr.msra.gmra.mxu1 %v7987_v33 }
 0xf51   :  { %v8353_v35 = vpop.f32.mrf.mxu1 }
 0xf53   :  { %v8354_v5 = vpop.f32.mrf.mxu1 }
 0xf54   :  { %v8355_v14 = vadd.f32 %v8354_v5, %v8353_v35 }
 0xf71   :  { %v8388_v22 = vpop.f32.mrf.mxu1 }
 0xf73   :  { %v8389_v37 = vpop.f32.mrf.mxu1 }
 0xf74   :  { %v8390_v50 = vadd.f32 %v8389_v37, %v8388_v22 }
 0xf76   :  { %v8190_v39 = vadd.f32 %v8390_v50, %v8355_v14 }
 0xf78   :  { %8193 = vst.msk [vmem:[#allocation12 + $0x1] sm:$0x1] %vm4159_vm10, %v8190_v39 }
 0xf79   :  { %8492 = shalt.err (!%p8489_p10)
}
 0xf7a   :  { %8203 = dma.vmem_to_hbm [thread:$0]  %s8201_s11, 32, %s9331_s6, [#allocation6]  }
 0xf7b   :  { %8507 = dma.done.wait [#allocation6], 32  }
 0xf7c   :  { %8508 = vsyncadd [#allocation6], 4294967264 }
 0xf7d   :  { %8207 = vsyncpa [#allocation5], 1 }
 0xf7e   :  { %8208 = vsyncpa [#allocation8], 1 }
 0xf7f   :  { %8209 = vsyncpa [#allocation11], 1 }
 0xf80   :  { %8210 = vsyncpa [#allocation6], 1 }

</bundles_post_ra>
